<compile_context>
chip_gen: v7x
topology: tpu7x:2x2x1
jax: 0.10.0
libtpu: 0.0.40
codegen_flags: <defaults>
</compile_context>

<pallas_src>
from functools import partial

import numpy as np
import jax
import jax.numpy as jnp
from jax.experimental import pallas as pl
from jax.experimental.pallas import tpu as pltpu

TILE = 32
PIX = TILE * TILE          # 1024 pixels per tile
LATENT_DIM = 256
_SLOPE = 0.2


def _leaky(v, slope):
    return jnp.where(v >= 0, v, slope * v)


# ----------------------------------------------------------------------------
# Fused encoder kernel: conv1 -> conv2 -> conv3 -> linear, all in VMEM.
# Six MXU dots total per block of `tb` tiles.
# ----------------------------------------------------------------------------
def _encoder_kernel(x_ref, g1_ref, l1_ref, g2_ref, l2_ref, w3_ref, w4_ref,
                    out_ref, *, tb, slope):
    f32, bf16 = jnp.float32, jnp.bfloat16
    ones_row = lambda n: jnp.ones((1, n), f32)

    # ---- Conv1 (1->16, k3, s2, p1): in-kernel im2col (one gather dot) + one
    #      shared-weight block dot.  Gather values are exact bf16 copies.
    x = x_ref[...].astype(bf16)                                     # (tb, 1024)
    p1 = jnp.dot(x, g1_ref[...], preferred_element_type=f32)        # (tb, 9*256)
    p1aug = jnp.concatenate(
        [p1[:, 256 * t:256 * (t + 1)] for t in range(9)] + [ones_row(256)],
        axis=0).astype(bf16)                                         # (9*tb+1, 256)
    y1 = _leaky(jnp.dot(l1_ref[...], p1aug, preferred_element_type=f32),
                slope)                                               # (tb*16, 256)

    # ---- Conv2 (16->32, k3, s2, p1): ONE gather dot over all 9 taps, then
    #      ONE weight dot with K = 9*tb*16 (+1 bias row).
    p2 = jnp.dot(y1.astype(bf16), g2_ref[...],
                 preferred_element_type=f32)                         # (tb*16, 9*64)
    p2aug = jnp.concatenate(
        [p2[:, 64 * t:64 * (t + 1)] for t in range(9)] + [ones_row(64)],
        axis=0).astype(bf16)                                         # (9*tb*16+1, 64)
    y2 = _leaky(jnp.dot(l2_ref[...], p2aug, preferred_element_type=f32),
                slope)                                               # (32*tb, 64), rows=(chan, tile)

    # ---- Conv3 (32->64, k8, valid): single (tb, 2049)@(2049, 64) dot;
    #      channel-major rows of y2 are re-packed onto lanes with static slices.
    y2flat = jnp.concatenate(
        [y2[tb * c:tb * (c + 1), :] for c in range(32)] + [jnp.ones((tb, 1), f32)],
        axis=1).astype(bf16)                                         # (tb, 2049)
    y3 = _leaky(jnp.dot(y2flat, w3_ref[...], preferred_element_type=f32),
                slope)                                               # (tb, 64)

    # ---- Flatten + Linear(64 -> 256), bias folded; lane-dense (tb, 256) store.
    y3aug = jnp.concatenate([y3, jnp.ones((tb, 1), f32)], axis=1).astype(bf16)
    out = jnp.dot(y3aug, w4_ref[...], preferred_element_type=f32)
    out_ref[...] = out.astype(out_ref.dtype)


# ----------------------------------------------------------------------------
# One-time weight layout (hoisted out of the forward path).
# ----------------------------------------------------------------------------
def _conv_gather(in_hw, out_hw, k, stride, pad):
    """0/1 gather matrix: rows = in_hw*in_hw input positions,
    cols = (tap, out position); all-zero columns realize the zero padding."""
    g = np.zeros((in_hw * in_hw, k * k * out_hw * out_hw), np.float32)
    for kh in range(k):
        for kw in range(k):
            t = kh * k + kw
            for oh in range(out_hw):
                for ow in range(out_hw):
                    ih = stride * oh - pad + kh
                    iw = stride * ow - pad + kw
                    if 0 <= ih < in_hw and 0 <= iw < in_hw:
                        g[ih * in_hw + iw,
                          t * out_hw * out_hw + oh * out_hw + ow] = 1.0
    return g


def prepare_encoder(params, tiles_per_block=8):
    tb = int(tiles_per_block)
    assert tb % 8 == 0, "tiles_per_block must be a multiple of 8 (sublane tiling)"
    eye = np.eye(tb, dtype=np.float32)
    bf16 = jnp.bfloat16

    w1 = np.asarray(params["w1"], np.float32)     # (16, 1, 3, 3)
    b1 = np.asarray(params["b1"], np.float32)
    w2 = np.asarray(params["w2"], np.float32)     # (32, 16, 3, 3)
    b2 = np.asarray(params["b2"], np.float32)
    w3 = np.asarray(params["w3"], np.float32)     # (64, 32, 8, 8)
    b3 = np.asarray(params["b3"], np.float32)
    w4 = np.asarray(params["w4"], np.float32)     # (256, 64)
    b4 = np.asarray(params["b4"], np.float32)

    # conv1: rows = (tile, chan), cols = (tap, tile) + bias column.
    a1 = w1.reshape(16, 9)                                           # [c, t]
    l1 = np.einsum("ct,nm->nctm", a1, eye).reshape(tb * 16, 9 * tb)
    l1 = np.concatenate([l1, np.tile(b1, tb).reshape(tb * 16, 1)], axis=1)

    # conv2: rows = (chan_out, tile), cols = (tap, tile, chan_in) + bias column.
    w2r = w2.reshape(32, 16, 9)                                      # [co, ci, t]
    l2 = np.einsum("oct,mn->omtnc", w2r, eye).reshape(32 * tb, 9 * tb * 16)
    l2 = np.concatenate([l2, np.repeat(b2, tb).reshape(32 * tb, 1)], axis=1)

    # conv3: rows = (chan_in, 8x8 spatial) + bias row, cols = chan_out.
    w3r = np.transpose(w3, (1, 2, 3, 0)).reshape(32 * 64, 64)
    w3r = np.concatenate([w3r, b3.reshape(1, 64)], axis=0)

    # linear: rows = 64 features + bias row, cols = latent.
    w4r = np.concatenate([w4.T, b4.reshape(1, LATENT_DIM)], axis=0)

    return {
        "tb": tb,
        "g1": jnp.asarray(_conv_gather(32, 16, 3, 2, 1), bf16),      # (1024, 2304)
        "l1": jnp.asarray(l1, bf16),                                 # (tb*16, 9*tb+1)
        "g2": jnp.asarray(_conv_gather(16, 8, 3, 2, 1), bf16),       # (256, 576)
        "l2": jnp.asarray(l2, bf16),                                 # (32*tb, 9*tb*16+1)
        "w3": jnp.asarray(w3r, bf16),                                # (2049, 64)
        "w4": jnp.asarray(w4r, bf16),                                # (65, 256)
    }


def _resident_spec(shape):
    """Constant (grid-invariant) weight input; single-buffered when supported."""
    if hasattr(pl, "Buffered"):
        try:
            return pl.BlockSpec(shape, lambda i: (0, 0),
                                pipeline_mode=pl.Buffered(1))
        except TypeError:
            pass
    return pl.BlockSpec(shape, lambda i: (0, 0))


# ----------------------------------------------------------------------------
# Forward pass.
# ----------------------------------------------------------------------------
def custom_encoder_forward(x, prep):
    """x: any shape whose elements factor into 32x32 tiles (same as the torch
    `x.view(-1, 1, tile_size, tile_size)`).  Returns (Ntiles, 256) float32."""
    tb = prep["tb"]
    xt = x.reshape(-1, PIX).astype(jnp.float32)      # raw tiles, lane-dense
    n = xt.shape[0]
    n_pad = ((n + tb - 1) // tb) * tb
    if n_pad != n:
        xt = jnp.pad(xt, ((0, n_pad - n), (0, 0)))

    grid = (n_pad // tb,)
    kernel = partial(_encoder_kernel, tb=tb, slope=_SLOPE)
    out = pl.pallas_call(
        kernel,
        out_shape=jax.ShapeDtypeStruct((n_pad, LATENT_DIM), jnp.float32),
        grid_spec=pltpu.PrefetchScalarGridSpec(
            num_scalar_prefetch=0,
            grid=grid,
            in_specs=[
                pl.BlockSpec((tb, PIX), lambda i: (i, 0)),           # raw tiles
                _resident_spec((PIX, 9 * 256)),                      # conv1 gather
                _resident_spec((tb * 16, 9 * tb + 1)),               # conv1 weights
                _resident_spec((256, 9 * 64)),                       # conv2 gather
                _resident_spec((32 * tb, 9 * tb * 16 + 1)),          # conv2 weights
                _resident_spec((32 * 64 + 1, 64)),                   # conv3 weights
                _resident_spec((65, LATENT_DIM)),                    # linear weights
            ],
            out_specs=pl.BlockSpec((tb, LATENT_DIM), lambda i: (i, 0)),
        ),
        compiler_params=pltpu.CompilerParams(
            dimension_semantics=("parallel",),
            vmem_limit_bytes=32 * 1024 * 1024),
    )(xt, prep["g1"], prep["l1"], prep["g2"], prep["l2"], prep["w3"], prep["w4"])
    return out[:n]


# ----------------------------------------------------------------------------
# Deterministic synthetic parameters (shapes match the nn modules).
# ----------------------------------------------------------------------------
def init_params(key):
    keys = jax.random.split(key, 8)

    def unif(k, shape, fan_in):
        bound = 1.0 / jnp.sqrt(float(fan_in))
        return jax.random.uniform(k, shape, jnp.float32, -bound, bound)

    return {
        "w1": unif(keys[0], (16, 1, 3, 3), 1 * 3 * 3),
        "b1": unif(keys[1], (16,), 1 * 3 * 3),
        "w2": unif(keys[2], (32, 16, 3, 3), 16 * 3 * 3),
        "b2": unif(keys[3], (32,), 16 * 3 * 3),
        "w3": unif(keys[4], (64, 32, 8, 8), 32 * 8 * 8),
        "b3": unif(keys[5], (64,), 32 * 8 * 8),
        "w4": unif(keys[6], (LATENT_DIM, 64), 64),
        "b4": unif(keys[7], (LATENT_DIM,), 64),
    }


# ----------------------------------------------------------------------------
# Plain-JAX reference (for a self-check against the kernel).
# ----------------------------------------------------------------------------
def reference_encoder(x, params, slope=_SLOPE):
    xt = x.reshape(-1, 1, TILE, TILE).astype(jnp.float32)
    hp = jax.lax.Precision.HIGHEST

    def conv(v, w, b, stride, pad):
        y = jax.lax.conv_general_dilated(
            v, w, (stride, stride), [(pad, pad), (pad, pad)],
            dimension_numbers=("NCHW", "OIHW", "NCHW"), precision=hp)
        return y + b[None, :, None, None]

    y = _leaky(conv(xt, params["w1"], params["b1"], 2, 1), slope)
    y = _leaky(conv(y, params["w2"], params["b2"], 2, 1), slope)
    y = _leaky(conv(y, params["w3"], params["b3"], 1, 0), slope)
    y = y.reshape(y.shape[0], -1)                                    # (N, 64)
    return jnp.dot(y, params["w4"].T, precision=hp) + params["b4"]


# ----------------------------------------------------------------------------
if __name__ == "__main__":
    key_in, key_params = jax.random.split(jax.random.PRNGKey(0))

    # 2 x 256 x 256 input -> view(-1, 1, 32, 32) = 128 tiles -> 16 grid steps
    # (>=8 steps per TensorCore even on megacore parts).
    x = jax.random.normal(key_in, (2, 256, 256), dtype=jnp.float32)
    params = init_params(key_params)
    prep = prepare_encoder(params, tiles_per_block=8)

    fwd = jax.jit(lambda v: custom_encoder_forward(v, prep))
    out = jax.block_until_ready(fwd(x))

    n_tiles = x.size // PIX
    assert out.shape == (n_tiles, LATENT_DIM), out.shape
    assert out.dtype == jnp.float32
    assert bool(jnp.all(jnp.isfinite(out)))

    ref = reference_encoder(x, params)
    max_err = float(jnp.max(jnp.abs(out - ref)))
    # bf16 MXU operands vs an f32 HIGHEST-precision reference: expect ~1e-2-level
    # absolute error; a real indexing bug produces O(0.1-1) errors.
    assert max_err < 5e-2, f"kernel/reference mismatch: {max_err}"

    print("KERNEL_OK")
</pallas_src>

<mosaic_0001>
module attributes {stable_mosaic.version = 11 : i64} {
  func.func @_encoder_kernel(%arg0: i32, %arg1: memref<8x1024xf32, #tpu.memory_space<vmem>>, %arg2: memref<1024x2304xbf16, #tpu.memory_space<vmem>>, %arg3: memref<128x73xbf16, #tpu.memory_space<vmem>>, %arg4: memref<256x576xbf16, #tpu.memory_space<vmem>>, %arg5: memref<256x1153xbf16, #tpu.memory_space<vmem>>, %arg6: memref<2049x64xbf16, #tpu.memory_space<vmem>>, %arg7: memref<65x256xbf16, #tpu.memory_space<vmem>>, %arg8: memref<8x256xf32, #tpu.memory_space<vmem>>) attributes {dimension_semantics = [#tpu.dimension_semantics<parallel>], iteration_bounds = array<i64: 16>, scalar_prefetch = 0 : i64, scratch_operands = 0 : i64, tpu.core_type = #tpu.core_type<tc>, window_params = [{transform_indices = @transform_0, window_bounds = array<i64: 8, 1024>}, {pipeline_mode = #tpu.pipeline_mode<synchronous>, transform_indices = @transform_1, window_bounds = array<i64: 1024, 2304>}, {pipeline_mode = #tpu.pipeline_mode<synchronous>, transform_indices = @transform_2, window_bounds = array<i64: 128, 73>}, {pipeline_mode = #tpu.pipeline_mode<synchronous>, transform_indices = @transform_3, window_bounds = array<i64: 256, 576>}, {pipeline_mode = #tpu.pipeline_mode<synchronous>, transform_indices = @transform_4, window_bounds = array<i64: 256, 1153>}, {pipeline_mode = #tpu.pipeline_mode<synchronous>, transform_indices = @transform_5, window_bounds = array<i64: 2049, 64>}, {pipeline_mode = #tpu.pipeline_mode<synchronous>, transform_indices = @transform_6, window_bounds = array<i64: 65, 256>}, {transform_indices = @transform_7, window_bounds = array<i64: 8, 256>}]} {
    %c0 = arith.constant 0 : index
    %c0_0 = arith.constant 0 : index
    %0 = vector.load %arg1[%c0, %c0_0] : memref<8x1024xf32, #tpu.memory_space<vmem>>, vector<8x1024xf32>
    %1 = arith.truncf %0 : vector<8x1024xf32> to vector<8x1024xbf16>
    %c0_1 = arith.constant 0 : index
    %c0_2 = arith.constant 0 : index
    %2 = vector.load %arg2[%c0_1, %c0_2] : memref<1024x2304xbf16, #tpu.memory_space<vmem>>, vector<1024x2304xbf16>
    %cst = arith.constant dense<0.000000e+00> : vector<8x2304xf32>
    %3 = tpu.matmul %1, %2, %cst {dimension_numbers = #tpu.dot_dimension_numbers<[1], [0], [0], [1], [0, 0, 1, 1], [], []>} : vector<8x1024xbf16>, vector<1024x2304xbf16>, vector<8x2304xf32> -> vector<8x2304xf32>
    %4 = vector.extract_strided_slice %3 {offsets = [0, 0], sizes = [8, 256], strides = [1, 1]} : vector<8x2304xf32> to vector<8x256xf32>
    %5 = vector.extract_strided_slice %3 {offsets = [0, 256], sizes = [8, 256], strides = [1, 1]} : vector<8x2304xf32> to vector<8x256xf32>
    %6 = vector.extract_strided_slice %3 {offsets = [0, 512], sizes = [8, 256], strides = [1, 1]} : vector<8x2304xf32> to vector<8x256xf32>
    %7 = vector.extract_strided_slice %3 {offsets = [0, 768], sizes = [8, 256], strides = [1, 1]} : vector<8x2304xf32> to vector<8x256xf32>
    %8 = vector.extract_strided_slice %3 {offsets = [0, 1024], sizes = [8, 256], strides = [1, 1]} : vector<8x2304xf32> to vector<8x256xf32>
    %9 = vector.extract_strided_slice %3 {offsets = [0, 1280], sizes = [8, 256], strides = [1, 1]} : vector<8x2304xf32> to vector<8x256xf32>
    %10 = vector.extract_strided_slice %3 {offsets = [0, 1536], sizes = [8, 256], strides = [1, 1]} : vector<8x2304xf32> to vector<8x256xf32>
    %11 = vector.extract_strided_slice %3 {offsets = [0, 1792], sizes = [8, 256], strides = [1, 1]} : vector<8x2304xf32> to vector<8x256xf32>
    %12 = vector.extract_strided_slice %3 {offsets = [0, 2048], sizes = [8, 256], strides = [1, 1]} : vector<8x2304xf32> to vector<8x256xf32>
    %cst_3 = arith.constant 1.000000e+00 : f32
    %13 = vector.broadcast %cst_3 : f32 to vector<1x256xf32>
    %14 = tpu.concatenate %4, %5, %6, %7, %8, %9, %10, %11, %12, %13 in 0 : vector<8x256xf32>, vector<8x256xf32>, vector<8x256xf32>, vector<8x256xf32>, vector<8x256xf32>, vector<8x256xf32>, vector<8x256xf32>, vector<8x256xf32>, vector<8x256xf32>, vector<1x256xf32> -> vector<73x256xf32>
    %15 = arith.truncf %14 : vector<73x256xf32> to vector<73x256xbf16>
    %c0_4 = arith.constant 0 : index
    %c0_5 = arith.constant 0 : index
    %16 = vector.load %arg3[%c0_4, %c0_5] : memref<128x73xbf16, #tpu.memory_space<vmem>>, vector<128x73xbf16>
    %cst_6 = arith.constant dense<0.000000e+00> : vector<128x256xf32>
    %17 = tpu.matmul %16, %15, %cst_6 {dimension_numbers = #tpu.dot_dimension_numbers<[1], [0], [0], [1], [0, 0, 1, 1], [], []>} : vector<128x73xbf16>, vector<73x256xbf16>, vector<128x256xf32> -> vector<128x256xf32>
    %cst_7 = arith.constant 0.000000e+00 : f32
    %18 = vector.broadcast %cst_7 : f32 to vector<128x256xf32>
    %19 = arith.cmpf oge, %17, %18 : vector<128x256xf32>
    %cst_8 = arith.constant 2.000000e-01 : f32
    %20 = vector.broadcast %cst_8 : f32 to vector<128x256xf32>
    %21 = arith.mulf %20, %17 : vector<128x256xf32>
    %22 = arith.select %19, %17, %21 : vector<128x256xi1>, vector<128x256xf32>
    %23 = arith.truncf %22 : vector<128x256xf32> to vector<128x256xbf16>
    %c0_9 = arith.constant 0 : index
    %c0_10 = arith.constant 0 : index
    %24 = vector.load %arg4[%c0_9, %c0_10] : memref<256x576xbf16, #tpu.memory_space<vmem>>, vector<256x576xbf16>
    %cst_11 = arith.constant dense<0.000000e+00> : vector<128x576xf32>
    %25 = tpu.matmul %23, %24, %cst_11 {dimension_numbers = #tpu.dot_dimension_numbers<[1], [0], [0], [1], [0, 0, 1, 1], [], []>} : vector<128x256xbf16>, vector<256x576xbf16>, vector<128x576xf32> -> vector<128x576xf32>
    %26 = vector.extract_strided_slice %25 {offsets = [0, 0], sizes = [128, 64], strides = [1, 1]} : vector<128x576xf32> to vector<128x64xf32>
    %27 = vector.extract_strided_slice %25 {offsets = [0, 64], sizes = [128, 64], strides = [1, 1]} : vector<128x576xf32> to vector<128x64xf32>
    %28 = vector.extract_strided_slice %25 {offsets = [0, 128], sizes = [128, 64], strides = [1, 1]} : vector<128x576xf32> to vector<128x64xf32>
    %29 = vector.extract_strided_slice %25 {offsets = [0, 192], sizes = [128, 64], strides = [1, 1]} : vector<128x576xf32> to vector<128x64xf32>
    %30 = vector.extract_strided_slice %25 {offsets = [0, 256], sizes = [128, 64], strides = [1, 1]} : vector<128x576xf32> to vector<128x64xf32>
    %31 = vector.extract_strided_slice %25 {offsets = [0, 320], sizes = [128, 64], strides = [1, 1]} : vector<128x576xf32> to vector<128x64xf32>
    %32 = vector.extract_strided_slice %25 {offsets = [0, 384], sizes = [128, 64], strides = [1, 1]} : vector<128x576xf32> to vector<128x64xf32>
    %33 = vector.extract_strided_slice %25 {offsets = [0, 448], sizes = [128, 64], strides = [1, 1]} : vector<128x576xf32> to vector<128x64xf32>
    %34 = vector.extract_strided_slice %25 {offsets = [0, 512], sizes = [128, 64], strides = [1, 1]} : vector<128x576xf32> to vector<128x64xf32>
    %cst_12 = arith.constant 1.000000e+00 : f32
    %35 = vector.broadcast %cst_12 : f32 to vector<1x64xf32>
    %36 = tpu.concatenate %26, %27, %28, %29, %30, %31, %32, %33, %34, %35 in 0 : vector<128x64xf32>, vector<128x64xf32>, vector<128x64xf32>, vector<128x64xf32>, vector<128x64xf32>, vector<128x64xf32>, vector<128x64xf32>, vector<128x64xf32>, vector<128x64xf32>, vector<1x64xf32> -> vector<1153x64xf32>
    %37 = arith.truncf %36 : vector<1153x64xf32> to vector<1153x64xbf16>
    %c0_13 = arith.constant 0 : index
    %c0_14 = arith.constant 0 : index
    %38 = vector.load %arg5[%c0_13, %c0_14] : memref<256x1153xbf16, #tpu.memory_space<vmem>>, vector<256x1153xbf16>
    %cst_15 = arith.constant dense<0.000000e+00> : vector<256x64xf32>
    %39 = tpu.matmul %38, %37, %cst_15 {dimension_numbers = #tpu.dot_dimension_numbers<[1], [0], [0], [1], [0, 0, 1, 1], [], []>} : vector<256x1153xbf16>, vector<1153x64xbf16>, vector<256x64xf32> -> vector<256x64xf32>
    %cst_16 = arith.constant 0.000000e+00 : f32
    %40 = vector.broadcast %cst_16 : f32 to vector<256x64xf32>
    %41 = arith.cmpf oge, %39, %40 : vector<256x64xf32>
    %cst_17 = arith.constant 2.000000e-01 : f32
    %42 = vector.broadcast %cst_17 : f32 to vector<256x64xf32>
    %43 = arith.mulf %42, %39 : vector<256x64xf32>
    %44 = arith.select %41, %39, %43 : vector<256x64xi1>, vector<256x64xf32>
    %45 = vector.extract_strided_slice %44 {offsets = [0, 0], sizes = [8, 64], strides = [1, 1]} : vector<256x64xf32> to vector<8x64xf32>
    %46 = vector.extract_strided_slice %44 {offsets = [8, 0], sizes = [8, 64], strides = [1, 1]} : vector<256x64xf32> to vector<8x64xf32>
    %47 = vector.extract_strided_slice %44 {offsets = [16, 0], sizes = [8, 64], strides = [1, 1]} : vector<256x64xf32> to vector<8x64xf32>
    %48 = vector.extract_strided_slice %44 {offsets = [24, 0], sizes = [8, 64], strides = [1, 1]} : vector<256x64xf32> to vector<8x64xf32>
    %49 = vector.extract_strided_slice %44 {offsets = [32, 0], sizes = [8, 64], strides = [1, 1]} : vector<256x64xf32> to vector<8x64xf32>
    %50 = vector.extract_strided_slice %44 {offsets = [40, 0], sizes = [8, 64], strides = [1, 1]} : vector<256x64xf32> to vector<8x64xf32>
    %51 = vector.extract_strided_slice %44 {offsets = [48, 0], sizes = [8, 64], strides = [1, 1]} : vector<256x64xf32> to vector<8x64xf32>
    %52 = vector.extract_strided_slice %44 {offsets = [56, 0], sizes = [8, 64], strides = [1, 1]} : vector<256x64xf32> to vector<8x64xf32>
    %53 = vector.extract_strided_slice %44 {offsets = [64, 0], sizes = [8, 64], strides = [1, 1]} : vector<256x64xf32> to vector<8x64xf32>
    %54 = vector.extract_strided_slice %44 {offsets = [72, 0], sizes = [8, 64], strides = [1, 1]} : vector<256x64xf32> to vector<8x64xf32>
    %55 = vector.extract_strided_slice %44 {offsets = [80, 0], sizes = [8, 64], strides = [1, 1]} : vector<256x64xf32> to vector<8x64xf32>
    %56 = vector.extract_strided_slice %44 {offsets = [88, 0], sizes = [8, 64], strides = [1, 1]} : vector<256x64xf32> to vector<8x64xf32>
    %57 = vector.extract_strided_slice %44 {offsets = [96, 0], sizes = [8, 64], strides = [1, 1]} : vector<256x64xf32> to vector<8x64xf32>
    %58 = vector.extract_strided_slice %44 {offsets = [104, 0], sizes = [8, 64], strides = [1, 1]} : vector<256x64xf32> to vector<8x64xf32>
    %59 = vector.extract_strided_slice %44 {offsets = [112, 0], sizes = [8, 64], strides = [1, 1]} : vector<256x64xf32> to vector<8x64xf32>
    %60 = vector.extract_strided_slice %44 {offsets = [120, 0], sizes = [8, 64], strides = [1, 1]} : vector<256x64xf32> to vector<8x64xf32>
    %61 = vector.extract_strided_slice %44 {offsets = [128, 0], sizes = [8, 64], strides = [1, 1]} : vector<256x64xf32> to vector<8x64xf32>
    %62 = vector.extract_strided_slice %44 {offsets = [136, 0], sizes = [8, 64], strides = [1, 1]} : vector<256x64xf32> to vector<8x64xf32>
    %63 = vector.extract_strided_slice %44 {offsets = [144, 0], sizes = [8, 64], strides = [1, 1]} : vector<256x64xf32> to vector<8x64xf32>
    %64 = vector.extract_strided_slice %44 {offsets = [152, 0], sizes = [8, 64], strides = [1, 1]} : vector<256x64xf32> to vector<8x64xf32>
    %65 = vector.extract_strided_slice %44 {offsets = [160, 0], sizes = [8, 64], strides = [1, 1]} : vector<256x64xf32> to vector<8x64xf32>
    %66 = vector.extract_strided_slice %44 {offsets = [168, 0], sizes = [8, 64], strides = [1, 1]} : vector<256x64xf32> to vector<8x64xf32>
    %67 = vector.extract_strided_slice %44 {offsets = [176, 0], sizes = [8, 64], strides = [1, 1]} : vector<256x64xf32> to vector<8x64xf32>
    %68 = vector.extract_strided_slice %44 {offsets = [184, 0], sizes = [8, 64], strides = [1, 1]} : vector<256x64xf32> to vector<8x64xf32>
    %69 = vector.extract_strided_slice %44 {offsets = [192, 0], sizes = [8, 64], strides = [1, 1]} : vector<256x64xf32> to vector<8x64xf32>
    %70 = vector.extract_strided_slice %44 {offsets = [200, 0], sizes = [8, 64], strides = [1, 1]} : vector<256x64xf32> to vector<8x64xf32>
    %71 = vector.extract_strided_slice %44 {offsets = [208, 0], sizes = [8, 64], strides = [1, 1]} : vector<256x64xf32> to vector<8x64xf32>
    %72 = vector.extract_strided_slice %44 {offsets = [216, 0], sizes = [8, 64], strides = [1, 1]} : vector<256x64xf32> to vector<8x64xf32>
    %73 = vector.extract_strided_slice %44 {offsets = [224, 0], sizes = [8, 64], strides = [1, 1]} : vector<256x64xf32> to vector<8x64xf32>
    %74 = vector.extract_strided_slice %44 {offsets = [232, 0], sizes = [8, 64], strides = [1, 1]} : vector<256x64xf32> to vector<8x64xf32>
    %75 = vector.extract_strided_slice %44 {offsets = [240, 0], sizes = [8, 64], strides = [1, 1]} : vector<256x64xf32> to vector<8x64xf32>
    %76 = vector.extract_strided_slice %44 {offsets = [248, 0], sizes = [8, 64], strides = [1, 1]} : vector<256x64xf32> to vector<8x64xf32>
    %cst_18 = arith.constant 1.000000e+00 : f32
    %77 = vector.broadcast %cst_18 : f32 to vector<8x1xf32>
    %78 = tpu.concatenate %45, %46, %47, %48, %49, %50, %51, %52, %53, %54, %55, %56, %57, %58, %59, %60 in 1 : vector<8x64xf32>, vector<8x64xf32>, vector<8x64xf32>, vector<8x64xf32>, vector<8x64xf32>, vector<8x64xf32>, vector<8x64xf32>, vector<8x64xf32>, vector<8x64xf32>, vector<8x64xf32>, vector<8x64xf32>, vector<8x64xf32>, vector<8x64xf32>, vector<8x64xf32>, vector<8x64xf32>, vector<8x64xf32> -> vector<8x1024xf32>
    %79 = tpu.concatenate %61, %62, %63, %64, %65, %66, %67, %68, %69, %70, %71, %72, %73, %74, %75, %76 in 1 : vector<8x64xf32>, vector<8x64xf32>, vector<8x64xf32>, vector<8x64xf32>, vector<8x64xf32>, vector<8x64xf32>, vector<8x64xf32>, vector<8x64xf32>, vector<8x64xf32>, vector<8x64xf32>, vector<8x64xf32>, vector<8x64xf32>, vector<8x64xf32>, vector<8x64xf32>, vector<8x64xf32>, vector<8x64xf32> -> vector<8x1024xf32>
    %80 = tpu.concatenate %78, %79, %77 in 1 : vector<8x1024xf32>, vector<8x1024xf32>, vector<8x1xf32> -> vector<8x2049xf32>
    %81 = arith.truncf %80 : vector<8x2049xf32> to vector<8x2049xbf16>
    %c0_19 = arith.constant 0 : index
    %c0_20 = arith.constant 0 : index
    %82 = vector.load %arg6[%c0_19, %c0_20] : memref<2049x64xbf16, #tpu.memory_space<vmem>>, vector<2049x64xbf16>
    %cst_21 = arith.constant dense<0.000000e+00> : vector<8x64xf32>
    %83 = tpu.matmul %81, %82, %cst_21 {dimension_numbers = #tpu.dot_dimension_numbers<[1], [0], [0], [1], [0, 0, 1, 1], [], []>} : vector<8x2049xbf16>, vector<2049x64xbf16>, vector<8x64xf32> -> vector<8x64xf32>
    %cst_22 = arith.constant 0.000000e+00 : f32
    %84 = vector.broadcast %cst_22 : f32 to vector<8x64xf32>
    %85 = arith.cmpf oge, %83, %84 : vector<8x64xf32>
    %cst_23 = arith.constant 2.000000e-01 : f32
    %86 = vector.broadcast %cst_23 : f32 to vector<8x64xf32>
    %87 = arith.mulf %86, %83 : vector<8x64xf32>
    %88 = arith.select %85, %83, %87 : vector<8x64xi1>, vector<8x64xf32>
    %cst_24 = arith.constant 1.000000e+00 : f32
    %89 = vector.broadcast %cst_24 : f32 to vector<8x1xf32>
    %90 = tpu.concatenate %88, %89 in 1 : vector<8x64xf32>, vector<8x1xf32> -> vector<8x65xf32>
    %91 = arith.truncf %90 : vector<8x65xf32> to vector<8x65xbf16>
    %c0_25 = arith.constant 0 : index
    %c0_26 = arith.constant 0 : index
    %92 = vector.load %arg7[%c0_25, %c0_26] : memref<65x256xbf16, #tpu.memory_space<vmem>>, vector<65x256xbf16>
    %cst_27 = arith.constant dense<0.000000e+00> : vector<8x256xf32>
    %93 = tpu.matmul %91, %92, %cst_27 {dimension_numbers = #tpu.dot_dimension_numbers<[1], [0], [0], [1], [0, 0, 1, 1], [], []>} : vector<8x65xbf16>, vector<65x256xbf16>, vector<8x256xf32> -> vector<8x256xf32>
    %c0_28 = arith.constant 0 : index
    %c0_29 = arith.constant 0 : index
    %94 = vector.load %arg8[%c0_28, %c0_29] : memref<8x256xf32, #tpu.memory_space<vmem>>, vector<8x256xf32>
    tpu.vector_store %arg8[%c0_28, %c0_29], %93 {strides = array<i32>} : memref<8x256xf32, #tpu.memory_space<vmem>>, vector<8x256xf32>,
    return
  }
  func.func @transform_0(%arg0: i32) -> (i32, i32) {
    %c0_i32 = arith.constant 0 : i32
    %c0_i32_0 = arith.constant 0 : i32
    return %arg0, %c0_i32 : i32, i32
  }
  func.func @transform_1(%arg0: i32) -> (i32, i32) {
    %c0_i32 = arith.constant 0 : i32
    %c0_i32_0 = arith.constant 0 : i32
    %c0_i32_1 = arith.constant 0 : i32
    return %c0_i32, %c0_i32_0 : i32, i32
  }
  func.func @transform_2(%arg0: i32) -> (i32, i32) {
    %c0_i32 = arith.constant 0 : i32
    %c0_i32_0 = arith.constant 0 : i32
    %c0_i32_1 = arith.constant 0 : i32
    return %c0_i32, %c0_i32_0 : i32, i32
  }
  func.func @transform_3(%arg0: i32) -> (i32, i32) {
    %c0_i32 = arith.constant 0 : i32
    %c0_i32_0 = arith.constant 0 : i32
    %c0_i32_1 = arith.constant 0 : i32
    return %c0_i32, %c0_i32_0 : i32, i32
  }
  func.func @transform_4(%arg0: i32) -> (i32, i32) {
    %c0_i32 = arith.constant 0 : i32
    %c0_i32_0 = arith.constant 0 : i32
    %c0_i32_1 = arith.constant 0 : i32
    return %c0_i32, %c0_i32_0 : i32, i32
  }
  func.func @transform_5(%arg0: i32) -> (i32, i32) {
    %c0_i32 = arith.constant 0 : i32
    %c0_i32_0 = arith.constant 0 : i32
    %c0_i32_1 = arith.constant 0 : i32
    return %c0_i32, %c0_i32_0 : i32, i32
  }
  func.func @transform_6(%arg0: i32) -> (i32, i32) {
    %c0_i32 = arith.constant 0 : i32
    %c0_i32_0 = arith.constant 0 : i32
    %c0_i32_1 = arith.constant 0 : i32
    return %c0_i32, %c0_i32_0 : i32, i32
  }
  func.func @transform_7(%arg0: i32) -> (i32, i32) {
    %c0_i32 = arith.constant 0 : i32
    %c0_i32_0 = arith.constant 0 : i32
    return %arg0, %c0_i32 : i32, i32
  }
}

</mosaic_0001>

<bundles_post_ra>
// kernel: _lambda_.1
= control target key start
LH: loop header
LB: loop body
LE: loop exit
PB: predicated region body
PF: predicated region fallthrough
CT: control target
= control target key end

     0   :  { %12 = vsyncpa [#allocation3], 0  ;;  %s24676_s0 = inlined_call_operand.vmem [shape: f32[128,1024], index: 0, kind: input, shape index: {}]   ;;  %s24677_s1 = inlined_call_operand.vmem [shape: bf16[1024,2304], index: 1, kind: input, shape index: {}]   ;;  %s24678_s2 = inlined_call_operand.vmem [shape: bf16[128,73], index: 2, kind: input, shape index: {}]   ;;  %s24679_s3 = inlined_call_operand.vmem [shape: bf16[256,576], index: 3, kind: input, shape index: {}]   ;;  %s24680_s4 = inlined_call_operand.vmem [shape: bf16[256,1153], index: 4, kind: input, shape index: {}]   ;;  %s24681_s5 = inlined_call_operand.vmem [shape: bf16[2049,64], index: 5, kind: input, shape index: {}]   ;;  %s24682_s6 = inlined_call_operand.vmem [shape: bf16[65,256], index: 6, kind: input, shape index: {}]   ;;  %s24683_s7 = inlined_call_operand.hbm [shape: f32[128,256], index: 7, kind: output, shape index: {}]  }
   0x1   :  { %14 = vsyncpa [#allocation3 + $0x1], 0  ;;  %s18720_s24 = smov 0   ;;  %s18722_s25 = smov 0  }
   0x2   :  { %s18724_s26 = smov 0   ;;  %s18726_s27 = smov 0  }
   0x3 LB: > { %s18741_s28 = sadd.s32 4294967295, %s18670_s27   ;;  %s13748_s29 = sadd.s32 4294967294, %s18670_s27   ;;  %s18670_s27 = sphi %s18726_s27, %s24782_s27   ;;  %s18666_s26 = sphi %s18724_s26, %s24781_s26   ;;  %s18662_s25 = sphi %s18722_s25, %s24780_s25   ;;  %s18658_s24 = sphi %s18720_s24, %s24779_s24  }
   0x4   : > { %s18745_s30 = sadd.s32 1, %s18670_s27   ;;  %s179_s8 = sadd.s32 1, %s18666_s26 }
   0x5   : > { %s176_s9 = ssub.s32 %s18670_s27, %s18745_s30  ;;  %p189_p0 = scmp.ne.s32.totalorder %s18666_s26, %s18662_s25 }
   0x6   : > { %p177_p1 = scmp.eq.s32.totalorder %s176_s9, 0  ;;  %p190_p2 = scmp.eq.s32.totalorder %s18741_s28, 15 }
   0x7   : > { %p195_p3 = scmp.ne.s32.totalorder %s18662_s25, %s18658_s24  ;;  %p196_p4 = scmp.eq.s32.totalorder %s13748_s29, 15 }
   0x8   : > { %s18756_s10 = scalar_select %p177_p1, %s18666_s26, %s179_s8  }
   0x9   : > { %p18758_p5 = por %p190_p2, %p189_p0  ;;  %p18762_p6 = por %p196_p4, %p195_p3 }
   0xa   : > { %p13751_p7 = scmp.ge.s32.totalorder %s18670_s27, 1  ;;  %p240_p8 = scmp.lt.s32.totalorder %s18670_s27, 17 }
   0xc   : > { %p241_p9 = pnand %p13751_p7, %p240_p8 }
   0xe   : > { %244 = sbr.rel (%p241_p9) target bundleno = 3361 (0xd21), region = 48 }
  0x15   : > { %v16377_v0 = vld [vmem:[%s24677_s1 + $0x4] ss:$72 sps:$4 sm:$0xff]   ;;  %v16381_v2 = vld [vmem:[%s24677_s1] ss:$72 sps:$4 sm:$0xff]   ;;  %v16383_v4 = vld [vmem:[%s24677_s1 + $0x94] ss:$72 sps:$4 sm:$0xff]  }
  0x16   : > { %v16379_v1 = vld [vmem:[%s24677_s1 + $0xc] ss:$72 sps:$4 sm:$0xff]   ;;  %7206 = vmatprep.subr.bf16.mxu0 %v16377_v0  ;;  %v16382_v3 = vld [vmem:[%s24677_s1 + $0x8] ss:$72 sps:$4 sm:$0xff]   ;;  %v16385_v5 = vld [vmem:[%s24677_s1 + $0x9c] ss:$72 sps:$4 sm:$0xff]  }
  0x17   : > { %7370 = vmatprep.subr.bf16.mxu1 %v16379_v1  ;;  %7207 = vmatpush1.bf16.msra.mxu0 %v16381_v2  ;;  %v16387_v6 = vld [vmem:[%s24677_s1 + $0x90] ss:$72 sps:$4 sm:$0xff]   ;;  %v16389_v8 = vld [vmem:[%s24677_s1 + $0x124] ss:$72 sps:$4 sm:$0xff]   ;;  %v16393_v10 = vld [vmem:[%s24677_s1 + $0x120] ss:$72 sps:$4 sm:$0xff]  }
  0x18   : > { %7371 = vmatpush1.bf16.msra.mxu1 %v16382_v3  ;;  %7208 = vmatprep.subr.bf16.mxu0 %v16383_v4  ;;  %v16388_v7 = vld [vmem:[%s24677_s1 + $0x98] ss:$72 sps:$4 sm:$0xff]   ;;  %v16391_v9 = vld [vmem:[%s24677_s1 + $0x12c] ss:$72 sps:$4 sm:$0xff]   ;;  %v16394_v11 = vld [vmem:[%s24677_s1 + $0x128] ss:$72 sps:$4 sm:$0xff]  }
  0x19   : > { %7372 = vmatprep.subr.bf16.mxu1 %v16385_v5  ;;  %v16395_v12 = vld [vmem:[%s24677_s1 + $0x1b4] ss:$72 sps:$4 sm:$0xff]   ;;  %v16399_v14 = vld [vmem:[%s24677_s1 + $0x1b0] ss:$72 sps:$4 sm:$0xff]   ;;  %v16401_v16 = vld [vmem:[%s24677_s1 + $0x244] ss:$72 sps:$4 sm:$0xff]  }
  0x1a   : > { %v16397_v13 = vld [vmem:[%s24677_s1 + $0x1bc] ss:$72 sps:$4 sm:$0xff]   ;;  %v16400_v15 = vld [vmem:[%s24677_s1 + $0x1b8] ss:$72 sps:$4 sm:$0xff]   ;;  %v16403_v17 = vld [vmem:[%s24677_s1 + $0x24c] ss:$72 sps:$4 sm:$0xff]  }
  0x1b   : > { %7209 = vmatpush1.bf16.msra.mxu0 %v16387_v6  ;;  %v16405_v18 = vld [vmem:[%s24677_s1 + $0x240] ss:$72 sps:$4 sm:$0xff]   ;;  %v16407_v20 = vld [vmem:[%s24677_s1 + $0x2d4] ss:$72 sps:$4 sm:$0xff]   ;;  %v16411_v22 = vld [vmem:[%s24677_s1 + $0x2d0] ss:$72 sps:$4 sm:$0xff]  }
  0x1c   : > { %7373 = vmatpush1.bf16.msra.mxu1 %v16388_v7  ;;  %7210 = vmatprep.subr.bf16.mxu0 %v16389_v8  ;;  %v16406_v19 = vld [vmem:[%s24677_s1 + $0x248] ss:$72 sps:$4 sm:$0xff]   ;;  %v16409_v21 = vld [vmem:[%s24677_s1 + $0x2dc] ss:$72 sps:$4 sm:$0xff]   ;;  %v16412_v23 = vld [vmem:[%s24677_s1 + $0x2d8] ss:$72 sps:$4 sm:$0xff]  }
  0x1d   : > { %7374 = vmatprep.subr.bf16.mxu1 %v16391_v9  ;;  %v16413_v24 = vld [vmem:[%s24677_s1 + $0x364] ss:$72 sps:$4 sm:$0xff]   ;;  %v16417_v26 = vld [vmem:[%s24677_s1 + $0x360] ss:$72 sps:$4 sm:$0xff]   ;;  %v16419_v28 = vld [vmem:[%s24677_s1 + $0x3f4] ss:$72 sps:$4 sm:$0xff]  }
  0x1e   : > { %v16415_v25 = vld [vmem:[%s24677_s1 + $0x36c] ss:$72 sps:$4 sm:$0xff]   ;;  %v16418_v27 = vld [vmem:[%s24677_s1 + $0x368] ss:$72 sps:$4 sm:$0xff]   ;;  %v16421_v29 = vld [vmem:[%s24677_s1 + $0x3fc] ss:$72 sps:$4 sm:$0xff]  }
  0x1f   : > { %7211 = vmatpush1.bf16.msra.mxu0 %v16393_v10  ;;  %v16423_v30 = vld [vmem:[%s24677_s1 + $0x3f0] ss:$72 sps:$4 sm:$0xff]   ;;  %v16425_v32 = vld [vmem:[%s24677_s1 + $0x484] ss:$72 sps:$4 sm:$0xff]   ;;  %p272_p10 = scmp.lt.s32.totalorder %s18741_s28, 15  ;;  %vm8773_vm0 = vcmask 1043456  }
  0x20   : > { %7375 = vmatpush1.bf16.msra.mxu1 %v16394_v11  ;;  %7212 = vmatprep.subr.bf16.mxu0 %v16395_v12  ;;  %v16424_v31 = vld [vmem:[%s24677_s1 + $0x3f8] ss:$72 sps:$4 sm:$0xff]   ;;  %v16427_v33 = vld [vmem:[%s24677_s1 + $0x48c] ss:$72 sps:$4 sm:$0xff]   ;;  %v16430_v35 = vld [vmem:[%s24677_s1 + $0x488] ss:$72 sps:$4 sm:$0xff]  }
  0x21   : > { %7376 = vmatprep.subr.bf16.mxu1 %v16397_v13  ;;  %v16429_v34 = vld [vmem:[%s24677_s1 + $0x480] ss:$72 sps:$4 sm:$0xff]   ;;  %v16431_v36 = vld [vmem:[%s24677_s1 + $0x514] ss:$72 sps:$4 sm:$0xff]   ;;  %s273_s17 = scalar_select %p272_p10, %s18741_s28, 15  ;;  %vm8774_vm1 = vcmask 1044480  }
  0x22   : > { %v16433_v37 = vld [vmem:[%s24677_s1 + $0x51c] ss:$72 sps:$4 sm:$0xff]   ;;  %v16435_v38 = vld [vmem:[%s24677_s1 + $0x510] ss:$72 sps:$4 sm:$0xff]   ;;  %v16439_v41 = vld [vmem:[%s24677_s1 + $0x5ac] ss:$72 sps:$4 sm:$0xff]  }
  0x23   : > { %7213 = vmatpush1.bf16.msra.mxu0 %v16399_v14  ;;  %v16436_v39 = vld [vmem:[%s24677_s1 + $0x518] ss:$72 sps:$4 sm:$0xff]   ;;  %v16437_v40 = vld [vmem:[%s24677_s1 + $0x5a4] ss:$72 sps:$4 sm:$0xff]   ;;  %s15325_s9 = sshll.u32 %s273_s17, 6  ;;  %vm8748_vm2 = vcmask 596992  }
  0x24   : > { %7377 = vmatpush1.bf16.msra.mxu1 %v16400_v15  ;;  %7214 = vmatprep.subr.bf16.mxu0 %v16401_v16  ;;  %v16441_v42 = vld [vmem:[%s24677_s1 + $0x5a0] ss:$72 sps:$4 sm:$0xff]   ;;  %s18905_s22 = scalar_lea.vmem %s24676_s0, %s15325_s9  ;;  %v16443_v44 = vld [vmem:[%s24677_s1 + $0x634] ss:$72 sps:$4 sm:$0xff]   ;;  %v16447_v47 = vld [vmem:[%s24677_s1 + $0x630] ss:$72 sps:$4 sm:$0xff]  }
  0x25   : > { %7378 = vmatprep.subr.bf16.mxu1 %v16403_v17  ;;  %v16442_v43 = vld [vmem:[%s24677_s1 + $0x5a8] ss:$72 sps:$4 sm:$0xff]   ;;  %v16445_v45 = vld [vmem:[%s24677_s1 + $0x63c] ss:$72 sps:$4 sm:$0xff]   ;;  %v16448_v49 = vld [vmem:[%s24677_s1 + $0x638] ss:$72 sps:$4 sm:$0xff]  }
  0x26   : > { %v279_v46 = vld [vmem:[%s18905_s22 + $0x8] sm:$0xff]  ;;  %v16455_v54 = vld [vmem:[%s24677_s1 + $0x754] ss:$72 sps:$4 sm:$0xff]   ;;  %v16459_v56 = vld [vmem:[%s24677_s1 + $0x750] ss:$72 sps:$4 sm:$0xff]   ;;  %s18675_s29 = smov 64  }
  0x27   : > { %7215 = vmatpush1.bf16.msra.mxu0 %v16405_v18  ;;  %v18917_v48 = vpack.c.bf16 %v279_v46, %v279_v46  ;;  %v16449_v50 = vld [vmem:[%s24677_s1 + $0x6c4] ss:$72 sps:$4 sm:$0xff]   ;;  %v16453_v52 = vld [vmem:[%s24677_s1 + $0x6c0] ss:$72 sps:$4 sm:$0xff]   ;;  %v16467_v62 = vld [vmem:[%s24677_s1 + $0x874] ss:$72 sps:$4 sm:$0xff]  }
  0x28   : > { %7379 = vmatpush1.bf16.msra.mxu1 %v16406_v19  ;;  %7216 = vmatprep.subr.bf16.mxu0 %v16407_v20  ;;  %v16451_v51 = vld [vmem:[%s24677_s1 + $0x6cc] ss:$72 sps:$4 sm:$0xff]   ;;  %v16454_v53 = vld [vmem:[%s24677_s1 + $0x6c8] ss:$72 sps:$4 sm:$0xff]   ;;  %v16457_v55 = vld [vmem:[%s24677_s1 + $0x75c] ss:$72 sps:$4 sm:$0xff]  }
  0x29   : > { %7380 = vmatprep.subr.bf16.mxu1 %v16409_v21  ;;  %7238 = vmatprep.mubr.bf16.mxu0 %v18917_v48  ;;  %v16460_v57 = vld [vmem:[%s24677_s1 + $0x758] ss:$72 sps:$4 sm:$0xff]   ;;  %v16461_v58 = vld [vmem:[%s24677_s1 + $0x7e4] ss:$72 sps:$4 sm:$0xff]   ;;  %v16466_v61 = vld [vmem:[%s24677_s1 + $0x7e8] ss:$72 sps:$4 sm:$0xff]  }
  0x2a   : > { %7402 = vmatprep.mubr.bf16.mxu1 %v18917_v48  ;;  %v16463_v59 = vld [vmem:[%s24677_s1 + $0x7ec] ss:$72 sps:$4 sm:$0xff]   ;;  %v16465_v60 = vld [vmem:[%s24677_s1 + $0x7e0] ss:$72 sps:$4 sm:$0xff]   ;;  %v16469_v63 = vld [vmem:[%s24677_s1 + $0x87c] ss:$72 sps:$4 sm:$0xff]  }
  0x2b   : > { %7217 = vmatpush1.bf16.msra.mxu0 %v16411_v22  ;;  %v16471_v0 = vld [vmem:[%s24677_s1 + $0x870] ss:$72 sps:$4 sm:$0xff]   ;;  %v278_v2 = vld [vmem:[%s18905_s22] sm:$0xff]  ;;  %v16478_v4 = vld [vmem:[%s24677_s1 + $0x90c] ss:$72 sps:$4 sm:$0xff]   ;;  %s269_s21 = sand.u32 1, %s18662_s25  }
  0x2c   : > { %7381 = vmatpush1.bf16.msra.mxu1 %v16412_v23  ;;  %7218 = vmatprep.subr.bf16.mxu0 %v16413_v24  ;;  %v16472_v1 = vld [vmem:[%s24677_s1 + $0x878] ss:$72 sps:$4 sm:$0xff]   ;;  %v16475_v3 = vld [vmem:[%s24677_s1 + $0x904] ss:$72 sps:$4 sm:$0xff]   ;;  %v18979_v5 = vpack.c.bf16 %v278_v2, %v278_v2  ;;  %v16476_v7 = vld [vmem:[%s24677_s1 + $0x908] ss:$72 sps:$4 sm:$0xff]  }
  0x2d   : > { %7382 = vmatprep.subr.bf16.mxu1 %v16415_v25  ;;  %v16473_v6 = vld [vmem:[%s24677_s1 + $0x900] ss:$72 sps:$4 sm:$0xff]   ;;  %v16481_v8 = vld [vmem:[%s24677_s1 + $0x994] ss:$72 sps:$4 sm:$0xff]   ;;  %v16479_v10 = vld [vmem:[%s24677_s1 + $0x990] ss:$72 sps:$4 sm:$0xff]  }
  0x2e   : > { %v16484_v9 = vld [vmem:[%s24677_s1 + $0x99c] ss:$72 sps:$4 sm:$0xff]   ;;  %v16482_v11 = vld [vmem:[%s24677_s1 + $0x998] ss:$72 sps:$4 sm:$0xff]   ;;  %v16490_v13 = vld [vmem:[%s24677_s1 + $0xa2c] ss:$72 sps:$4 sm:$0xff]  }
  0x2f   : > { %7219 = vmatpush1.bf16.msra.mxu0 %v16417_v26  ;;  %v16487_v12 = vld [vmem:[%s24677_s1 + $0xa24] ss:$72 sps:$4 sm:$0xff]   ;;  %v16485_v14 = vld [vmem:[%s24677_s1 + $0xa20] ss:$72 sps:$4 sm:$0xff]   ;;  %v16493_v16 = vld [vmem:[%s24677_s1 + $0xab4] ss:$72 sps:$4 sm:$0xff]  }
  0x30   : > { %7383 = vmatpush1.bf16.msra.mxu1 %v16418_v27  ;;  %7220 = vmatprep.subr.bf16.mxu0 %v16419_v28  ;;  %v16488_v15 = vld [vmem:[%s24677_s1 + $0xa28] ss:$72 sps:$4 sm:$0xff]   ;;  %v16496_v17 = vld [vmem:[%s24677_s1 + $0xabc] ss:$72 sps:$4 sm:$0xff]   ;;  %v16494_v19 = vld [vmem:[%s24677_s1 + $0xab8] ss:$72 sps:$4 sm:$0xff]  }
  0x31   : > { %7384 = vmatprep.subr.bf16.mxu1 %v16421_v29  ;;  %v16491_v18 = vld [vmem:[%s24677_s1 + $0xab0] ss:$72 sps:$4 sm:$0xff]   ;;  %v16499_v20 = vld [vmem:[%s24677_s1 + $0xb44] ss:$72 sps:$4 sm:$0xff]   ;;  %v16497_v22 = vld [vmem:[%s24677_s1 + $0xb40] ss:$72 sps:$4 sm:$0xff]  }
  0x32   : > { %v16502_v21 = vld [vmem:[%s24677_s1 + $0xb4c] ss:$72 sps:$4 sm:$0xff]   ;;  %v16500_v23 = vld [vmem:[%s24677_s1 + $0xb48] ss:$72 sps:$4 sm:$0xff]   ;;  %v16508_v25 = vld [vmem:[%s24677_s1 + $0xbdc] ss:$72 sps:$4 sm:$0xff]  }
  0x33   : > { %7221 = vmatpush1.bf16.msra.mxu0 %v16423_v30  ;;  %v16505_v24 = vld [vmem:[%s24677_s1 + $0xbd4] ss:$72 sps:$4 sm:$0xff]   ;;  %v16503_v26 = vld [vmem:[%s24677_s1 + $0xbd0] ss:$72 sps:$4 sm:$0xff]   ;;  %v16511_v28 = vld [vmem:[%s24677_s1 + $0xc64] ss:$72 sps:$4 sm:$0xff]  }
  0x34   : > { %7385 = vmatpush1.bf16.msra.mxu1 %v16424_v31  ;;  %7222 = vmatprep.subr.bf16.mxu0 %v16425_v32  ;;  %v16506_v27 = vld [vmem:[%s24677_s1 + $0xbd8] ss:$72 sps:$4 sm:$0xff]   ;;  %v16514_v29 = vld [vmem:[%s24677_s1 + $0xc6c] ss:$72 sps:$4 sm:$0xff]   ;;  %v16560_v2 = vld [vmem:[%s24677_s1 + $0x10e8] ss:$72 sps:$4 sm:$0xff]  }
  0x35   : > { %7386 = vmatprep.subr.bf16.mxu1 %v16427_v33  ;;  %v281_v30 = vld [vmem:[%s18905_s22 + $0x18] sm:$0xff]  ;;  %v16509_v31 = vld [vmem:[%s24677_s1 + $0xc60] ss:$72 sps:$4 sm:$0xff]   ;;  %v16535_v46 = vld [vmem:[%s24677_s1 + $0xea4] ss:$72 sps:$4 sm:$0xff]   ;;  %s13752_s17 = sshll.u32 %s269_s21, 4 }
  0x36   : > { %v19059_v32 = vpack.c.bf16 %v281_v30, %v281_v30  ;;  %v16512_v33 = vld [vmem:[%s24677_s1 + $0xc68] ss:$72 sps:$4 sm:$0xff]   ;;  %s271_s23 = scalar_lea.vmem [#allocation2], %s13752_s17  ;;  %s13675_s9 = scalar_lea.sflag [#allocation3], %s269_s21 }
  0x37   : > { %7223 = vmatpush1.bf16.msra.mxu0 %v16429_v34  ;;  %v16517_v34 = vld [vmem:[%s24677_s1 + $0xcf4] ss:$72 sps:$4 sm:$0xff]   ;;  %v16593_v30 = vld [vmem:[%s24677_s1 + $0x1440] ss:$72 sps:$4 sm:$0xff]  }
  0x38   : > { %7387 = vmatpush1.bf16.msra.mxu1 %v16430_v35  ;;  %7224 = vmatprep.subr.bf16.mxu0 %v16431_v36  ;;  %v16520_v35 = vld [vmem:[%s24677_s1 + $0xcfc] ss:$72 sps:$4 sm:$0xff]   ;;  %v16515_v36 = vld [vmem:[%s24677_s1 + $0xcf0] ss:$72 sps:$4 sm:$0xff]  }
  0x39   : > { %7388 = vmatprep.subr.bf16.mxu1 %v16433_v37  ;;  %v16518_v37 = vld [vmem:[%s24677_s1 + $0xcf8] ss:$72 sps:$4 sm:$0xff]  }
  0x3b   : > { %7225 = vmatpush1.bf16.msra.mxu0 %v16435_v38  ;;  %v16523_v38 = vld [vmem:[%s24677_s1 + $0xd84] ss:$72 sps:$4 sm:$0xff]  }
  0x3c   : > { %7389 = vmatpush1.bf16.msra.mxu1 %v16436_v39  ;;  %7226 = vmatprep.subr.bf16.mxu0 %v16437_v40  ;;  %v16526_v39 = vld [vmem:[%s24677_s1 + $0xd8c] ss:$72 sps:$4 sm:$0xff]   ;;  %v16521_v40 = vld [vmem:[%s24677_s1 + $0xd80] ss:$72 sps:$4 sm:$0xff]  }
  0x3d   : > { %7390 = vmatprep.subr.bf16.mxu1 %v16439_v41  ;;  %v16524_v41 = vld [vmem:[%s24677_s1 + $0xd88] ss:$72 sps:$4 sm:$0xff]  }
  0x3f   : > { %7227 = vmatpush1.bf16.msra.mxu0 %v16441_v42  ;;  %v16529_v42 = vld [vmem:[%s24677_s1 + $0xe14] ss:$72 sps:$4 sm:$0xff]  }
  0x40   : > { %7391 = vmatpush1.bf16.msra.mxu1 %v16442_v43  ;;  %7228 = vmatprep.subr.bf16.mxu0 %v16443_v44  ;;  %v16532_v43 = vld [vmem:[%s24677_s1 + $0xe1c] ss:$72 sps:$4 sm:$0xff]   ;;  %v16527_v44 = vld [vmem:[%s24677_s1 + $0xe10] ss:$72 sps:$4 sm:$0xff]  }
  0x41   : > { %7392 = vmatprep.subr.bf16.mxu1 %v16445_v45  ;;  %v16530_v45 = vld [vmem:[%s24677_s1 + $0xe18] ss:$72 sps:$4 sm:$0xff]  }
  0x43   : > { %7229 = vmatpush1.bf16.msra.mxu0 %v16447_v47  ;;  %v16538_v47 = vld [vmem:[%s24677_s1 + $0xeac] ss:$72 sps:$4 sm:$0xff]  }
  0x44   : > { %7393 = vmatpush1.bf16.msra.mxu1 %v16448_v49  ;;  %7230 = vmatprep.subr.bf16.mxu0 %v16449_v50  ;;  %v16533_v49 = vld [vmem:[%s24677_s1 + $0xea0] ss:$72 sps:$4 sm:$0xff]  }
  0x45   : > { %7394 = vmatprep.subr.bf16.mxu1 %v16451_v51  ;;  %v16536_v50 = vld [vmem:[%s24677_s1 + $0xea8] ss:$72 sps:$4 sm:$0xff]   ;;  %v16541_v51 = vld [vmem:[%s24677_s1 + $0xf34] ss:$72 sps:$4 sm:$0xff]  }
  0x47   : > { %7231 = vmatpush1.bf16.msra.mxu0 %v16453_v52  ;;  %v16544_v52 = vld [vmem:[%s24677_s1 + $0xf3c] ss:$72 sps:$4 sm:$0xff]  }
  0x48   : > { %7395 = vmatpush1.bf16.msra.mxu1 %v16454_v53  ;;  %7232 = vmatprep.subr.bf16.mxu0 %v16455_v54  ;;  %v16539_v53 = vld [vmem:[%s24677_s1 + $0xf30] ss:$72 sps:$4 sm:$0xff]  }
  0x49   : > { %7396 = vmatprep.subr.bf16.mxu1 %v16457_v55  ;;  %v16542_v54 = vld [vmem:[%s24677_s1 + $0xf38] ss:$72 sps:$4 sm:$0xff]   ;;  %v16547_v55 = vld [vmem:[%s24677_s1 + $0xfc4] ss:$72 sps:$4 sm:$0xff]  }
  0x4b   : > { %7233 = vmatpush1.bf16.msra.mxu0 %v16459_v56  ;;  %v16550_v56 = vld [vmem:[%s24677_s1 + $0xfcc] ss:$72 sps:$4 sm:$0xff]  }
  0x4c   : > { %7397 = vmatpush1.bf16.msra.mxu1 %v16460_v57  ;;  %7234 = vmatprep.subr.bf16.mxu0 %v16461_v58  ;;  %v16545_v57 = vld [vmem:[%s24677_s1 + $0xfc0] ss:$72 sps:$4 sm:$0xff]  }
  0x4d   : > { %7398 = vmatprep.subr.bf16.mxu1 %v16463_v59  ;;  %v16548_v58 = vld [vmem:[%s24677_s1 + $0xfc8] ss:$72 sps:$4 sm:$0xff]   ;;  %v16553_v59 = vld [vmem:[%s24677_s1 + $0x1054] ss:$72 sps:$4 sm:$0xff]  }
  0x4f   : > { %7235 = vmatpush1.bf16.msra.mxu0 %v16465_v60  ;;  %v16556_v60 = vld [vmem:[%s24677_s1 + $0x105c] ss:$72 sps:$4 sm:$0xff]  }
  0x50   : > { %7399 = vmatpush1.bf16.msra.mxu1 %v16466_v61  ;;  %7236 = vmatprep.subr.bf16.mxu0 %v16467_v62  ;;  %v16551_v61 = vld [vmem:[%s24677_s1 + $0x1050] ss:$72 sps:$4 sm:$0xff]  }
  0x51   : > { %7400 = vmatprep.subr.bf16.mxu1 %v16469_v63  ;;  %v16554_v62 = vld [vmem:[%s24677_s1 + $0x1058] ss:$72 sps:$4 sm:$0xff]   ;;  %v16559_v63 = vld [vmem:[%s24677_s1 + $0x10e4] ss:$72 sps:$4 sm:$0xff]  }
  0x53   : > { %7237 = vmatpush1.bf16.msra.mxu0 %v16471_v0  ;;  %v16562_v0 = vld [vmem:[%s24677_s1 + $0x10ec] ss:$72 sps:$4 sm:$0xff]  }
  0x54   : > { %7401 = vmatpush1.bf16.msra.mxu1 %v16472_v1  ;;  %7247 = vmatprep.subr.bf16.mxu0 %v16475_v3  ;;  %v16557_v1 = vld [vmem:[%s24677_s1 + $0x10e0] ss:$72 sps:$4 sm:$0xff]   ;;  %v16565_v3 = vld [vmem:[%s24677_s1 + $0x1174] ss:$72 sps:$4 sm:$0xff]  }
  0x55   : > { %7411 = vmatprep.subr.bf16.mxu1 %v16478_v4  ;;  %v16568_v4 = vld [vmem:[%s24677_s1 + $0x117c] ss:$72 sps:$4 sm:$0xff]  }
  0x56   : > { %7239 = vmatmul.mubr.bf16.vlgmr.msra.gmra.mrb[0].mxu0 %v18979_v5 }
  0x57   : > { %7403 = vmatmul.mubr.bf16.vlgmr.msra.gmra.mrb[0].mxu1 %v18979_v5  ;;  %7248 = vmatpush1.bf16.msra.mxu0 %v16473_v6  ;;  %v16563_v6 = vld [vmem:[%s24677_s1 + $0x1170] ss:$72 sps:$4 sm:$0xff]  }
  0x58   : > { %7412 = vmatpush1.bf16.msra.mxu1 %v16476_v7  ;;  %7249 = vmatprep.subr.bf16.mxu0 %v16481_v8  ;;  %v16566_v7 = vld [vmem:[%s24677_s1 + $0x1178] ss:$72 sps:$4 sm:$0xff]   ;;  %v16571_v8 = vld [vmem:[%s24677_s1 + $0x1204] ss:$72 sps:$4 sm:$0xff]  }
  0x59   : > { %7413 = vmatprep.subr.bf16.mxu1 %v16484_v9  ;;  %7279 = vmatprep.mubr.bf16.mxu0 %v19059_v32  ;;  %v280_v9 = vld [vmem:[%s18905_s22 + $0x10] sm:$0xff] }
  0x5a   : > { %7443 = vmatprep.mubr.bf16.mxu1 %v19059_v32 }
  0x5b   : > { %7250 = vmatpush1.bf16.msra.mxu0 %v16479_v10  ;;  %v16574_v10 = vld [vmem:[%s24677_s1 + $0x120c] ss:$72 sps:$4 sm:$0xff]  }
  0x5c   : > { %7414 = vmatpush1.bf16.msra.mxu1 %v16482_v11  ;;  %7251 = vmatprep.subr.bf16.mxu0 %v16487_v12  ;;  %v16569_v11 = vld [vmem:[%s24677_s1 + $0x1200] ss:$72 sps:$4 sm:$0xff]  }
  0x5d   : > { %7415 = vmatprep.subr.bf16.mxu1 %v16490_v13  ;;  %v16572_v12 = vld [vmem:[%s24677_s1 + $0x1208] ss:$72 sps:$4 sm:$0xff]   ;;  %v19187_v13 = vpack.c.bf16 %v280_v9, %v280_v9 }
  0x5e   : > { %v16653_v9 = vld [vmem:[%s24677_s1 + $0x19e0] ss:$72 sps:$4 sm:$0xff]  }
  0x5f   : > { %7252 = vmatpush1.bf16.msra.mxu0 %v16485_v14  ;;  %v16577_v14 = vld [vmem:[%s24677_s1 + $0x1294] ss:$72 sps:$4 sm:$0xff]  }
  0x60   : > { %7416 = vmatpush1.bf16.msra.mxu1 %v16488_v15  ;;  %7253 = vmatprep.subr.bf16.mxu0 %v16493_v16  ;;  %v16580_v15 = vld [vmem:[%s24677_s1 + $0x129c] ss:$72 sps:$4 sm:$0xff]   ;;  %v283_v16 = vld [vmem:[%s18905_s22 + $0x28] sm:$0xff] }
  0x61   : > { %7417 = vmatprep.subr.bf16.mxu1 %v16496_v17  ;;  %v19196_v17 = vpack.c.bf16 %v283_v16, %v283_v16  ;;  %v16667_v16 = vld [vmem:[%s24677_s1 + $0x1b04] ss:$72 sps:$4 sm:$0xff]  }
  0x63   : > { %7254 = vmatpush1.bf16.msra.mxu0 %v16491_v18  ;;  %v16575_v18 = vld [vmem:[%s24677_s1 + $0x1290] ss:$72 sps:$4 sm:$0xff]  }
  0x64   : > { %7418 = vmatpush1.bf16.msra.mxu1 %v16494_v19  ;;  %7255 = vmatprep.subr.bf16.mxu0 %v16499_v20  ;;  %v16578_v19 = vld [vmem:[%s24677_s1 + $0x1298] ss:$72 sps:$4 sm:$0xff]   ;;  %v16583_v20 = vld [vmem:[%s24677_s1 + $0x1324] ss:$72 sps:$4 sm:$0xff]  }
  0x65   : > { %7419 = vmatprep.subr.bf16.mxu1 %v16502_v21  ;;  %v16586_v21 = vld [vmem:[%s24677_s1 + $0x132c] ss:$72 sps:$4 sm:$0xff]  }
  0x67   : > { %7256 = vmatpush1.bf16.msra.mxu0 %v16497_v22  ;;  %v16581_v22 = vld [vmem:[%s24677_s1 + $0x1320] ss:$72 sps:$4 sm:$0xff]  }
  0x68   : > { %7420 = vmatpush1.bf16.msra.mxu1 %v16500_v23  ;;  %7257 = vmatprep.subr.bf16.mxu0 %v16505_v24  ;;  %v16584_v23 = vld [vmem:[%s24677_s1 + $0x1328] ss:$72 sps:$4 sm:$0xff]   ;;  %v16589_v24 = vld [vmem:[%s24677_s1 + $0x13b4] ss:$72 sps:$4 sm:$0xff]  }
  0x69   : > { %7421 = vmatprep.subr.bf16.mxu1 %v16508_v25  ;;  %v16592_v25 = vld [vmem:[%s24677_s1 + $0x13bc] ss:$72 sps:$4 sm:$0xff]  }
  0x6b   : > { %7258 = vmatpush1.bf16.msra.mxu0 %v16503_v26  ;;  %v16587_v26 = vld [vmem:[%s24677_s1 + $0x13b0] ss:$72 sps:$4 sm:$0xff]  }
  0x6c   : > { %7422 = vmatpush1.bf16.msra.mxu1 %v16506_v27  ;;  %7259 = vmatprep.subr.bf16.mxu0 %v16511_v28  ;;  %v16590_v27 = vld [vmem:[%s24677_s1 + $0x13b8] ss:$72 sps:$4 sm:$0xff]   ;;  %v16595_v28 = vld [vmem:[%s24677_s1 + $0x1444] ss:$72 sps:$4 sm:$0xff]  }
  0x6d   : > { %7423 = vmatprep.subr.bf16.mxu1 %v16514_v29  ;;  %v16598_v29 = vld [vmem:[%s24677_s1 + $0x144c] ss:$72 sps:$4 sm:$0xff]  }
  0x6f   : > { %7260 = vmatpush1.bf16.msra.mxu0 %v16509_v31  ;;  %v16596_v31 = vld [vmem:[%s24677_s1 + $0x1448] ss:$72 sps:$4 sm:$0xff]  }
  0x70   : > { %7424 = vmatpush1.bf16.msra.mxu1 %v16512_v33  ;;  %7261 = vmatprep.subr.bf16.mxu0 %v16517_v34  ;;  %v16601_v33 = vld [vmem:[%s24677_s1 + $0x14d4] ss:$72 sps:$4 sm:$0xff]  }
  0x71   : > { %7425 = vmatprep.subr.bf16.mxu1 %v16520_v35  ;;  %v16604_v34 = vld [vmem:[%s24677_s1 + $0x14dc] ss:$72 sps:$4 sm:$0xff]   ;;  %v16599_v35 = vld [vmem:[%s24677_s1 + $0x14d0] ss:$72 sps:$4 sm:$0xff]  }
  0x73   : > { %7262 = vmatpush1.bf16.msra.mxu0 %v16515_v36  ;;  %v16602_v36 = vld [vmem:[%s24677_s1 + $0x14d8] ss:$72 sps:$4 sm:$0xff]  }
  0x74   : > { %7426 = vmatpush1.bf16.msra.mxu1 %v16518_v37  ;;  %7263 = vmatprep.subr.bf16.mxu0 %v16523_v38  ;;  %v16607_v37 = vld [vmem:[%s24677_s1 + $0x1564] ss:$72 sps:$4 sm:$0xff]  }
  0x75   : > { %7427 = vmatprep.subr.bf16.mxu1 %v16526_v39  ;;  %v16610_v38 = vld [vmem:[%s24677_s1 + $0x156c] ss:$72 sps:$4 sm:$0xff]   ;;  %v16605_v39 = vld [vmem:[%s24677_s1 + $0x1560] ss:$72 sps:$4 sm:$0xff]  }
  0x77   : > { %7264 = vmatpush1.bf16.msra.mxu0 %v16521_v40  ;;  %v16608_v40 = vld [vmem:[%s24677_s1 + $0x1568] ss:$72 sps:$4 sm:$0xff]  }
  0x78   : > { %7428 = vmatpush1.bf16.msra.mxu1 %v16524_v41  ;;  %7265 = vmatprep.subr.bf16.mxu0 %v16529_v42  ;;  %v16613_v41 = vld [vmem:[%s24677_s1 + $0x15f4] ss:$72 sps:$4 sm:$0xff]  }
  0x79   : > { %7429 = vmatprep.subr.bf16.mxu1 %v16532_v43  ;;  %v16616_v42 = vld [vmem:[%s24677_s1 + $0x15fc] ss:$72 sps:$4 sm:$0xff]   ;;  %v16611_v43 = vld [vmem:[%s24677_s1 + $0x15f0] ss:$72 sps:$4 sm:$0xff]  }
  0x7b   : > { %7266 = vmatpush1.bf16.msra.mxu0 %v16527_v44  ;;  %v16614_v44 = vld [vmem:[%s24677_s1 + $0x15f8] ss:$72 sps:$4 sm:$0xff]  }
  0x7c   : > { %7430 = vmatpush1.bf16.msra.mxu1 %v16530_v45  ;;  %7267 = vmatprep.subr.bf16.mxu0 %v16535_v46  ;;  %v16619_v45 = vld [vmem:[%s24677_s1 + $0x1684] ss:$72 sps:$4 sm:$0xff]  }
  0x7d   : > { %7431 = vmatprep.subr.bf16.mxu1 %v16538_v47  ;;  %v16622_v46 = vld [vmem:[%s24677_s1 + $0x168c] ss:$72 sps:$4 sm:$0xff]   ;;  %v16617_v47 = vld [vmem:[%s24677_s1 + $0x1680] ss:$72 sps:$4 sm:$0xff]  }
  0x7f   : > { %7268 = vmatpush1.bf16.msra.mxu0 %v16533_v49  ;;  %v16620_v49 = vld [vmem:[%s24677_s1 + $0x1688] ss:$72 sps:$4 sm:$0xff]  }
  0x80   : > { %7432 = vmatpush1.bf16.msra.mxu1 %v16536_v50  ;;  %7269 = vmatprep.subr.bf16.mxu0 %v16541_v51  ;;  %v16625_v50 = vld [vmem:[%s24677_s1 + $0x1714] ss:$72 sps:$4 sm:$0xff]  }
  0x81   : > { %7433 = vmatprep.subr.bf16.mxu1 %v16544_v52  ;;  %v16628_v51 = vld [vmem:[%s24677_s1 + $0x171c] ss:$72 sps:$4 sm:$0xff]   ;;  %v16623_v52 = vld [vmem:[%s24677_s1 + $0x1710] ss:$72 sps:$4 sm:$0xff]  }
  0x83   : > { %7270 = vmatpush1.bf16.msra.mxu0 %v16539_v53  ;;  %v16626_v53 = vld [vmem:[%s24677_s1 + $0x1718] ss:$72 sps:$4 sm:$0xff]  }
  0x84   : > { %7434 = vmatpush1.bf16.msra.mxu1 %v16542_v54  ;;  %7271 = vmatprep.subr.bf16.mxu0 %v16547_v55  ;;  %v16631_v54 = vld [vmem:[%s24677_s1 + $0x17a4] ss:$72 sps:$4 sm:$0xff]  }
  0x85   : > { %7435 = vmatprep.subr.bf16.mxu1 %v16550_v56  ;;  %v16634_v55 = vld [vmem:[%s24677_s1 + $0x17ac] ss:$72 sps:$4 sm:$0xff]   ;;  %v16629_v56 = vld [vmem:[%s24677_s1 + $0x17a0] ss:$72 sps:$4 sm:$0xff]  }
  0x87   : > { %7272 = vmatpush1.bf16.msra.mxu0 %v16545_v57  ;;  %v16632_v57 = vld [vmem:[%s24677_s1 + $0x17a8] ss:$72 sps:$4 sm:$0xff]  }
  0x88   : > { %7436 = vmatpush1.bf16.msra.mxu1 %v16548_v58  ;;  %7273 = vmatprep.subr.bf16.mxu0 %v16553_v59  ;;  %v16637_v58 = vld [vmem:[%s24677_s1 + $0x1834] ss:$72 sps:$4 sm:$0xff]  }
  0x89   : > { %7437 = vmatprep.subr.bf16.mxu1 %v16556_v60  ;;  %v16640_v59 = vld [vmem:[%s24677_s1 + $0x183c] ss:$72 sps:$4 sm:$0xff]   ;;  %v16635_v60 = vld [vmem:[%s24677_s1 + $0x1830] ss:$72 sps:$4 sm:$0xff]  }
  0x8b   : > { %7274 = vmatpush1.bf16.msra.mxu0 %v16551_v61  ;;  %v16638_v61 = vld [vmem:[%s24677_s1 + $0x1838] ss:$72 sps:$4 sm:$0xff]  }
  0x8c   : > { %7438 = vmatpush1.bf16.msra.mxu1 %v16554_v62  ;;  %7275 = vmatprep.subr.bf16.mxu0 %v16559_v63  ;;  %v16643_v62 = vld [vmem:[%s24677_s1 + $0x18c4] ss:$72 sps:$4 sm:$0xff]  }
  0x8d   : > { %7439 = vmatprep.subr.bf16.mxu1 %v16562_v0  ;;  %v16646_v63 = vld [vmem:[%s24677_s1 + $0x18cc] ss:$72 sps:$4 sm:$0xff]   ;;  %v16641_v0 = vld [vmem:[%s24677_s1 + $0x18c0] ss:$72 sps:$4 sm:$0xff]  }
  0x8f   : > { %7276 = vmatpush1.bf16.msra.mxu0 %v16557_v1  ;;  %v16644_v1 = vld [vmem:[%s24677_s1 + $0x18c8] ss:$72 sps:$4 sm:$0xff]  }
  0x90   : > { %7440 = vmatpush1.bf16.msra.mxu1 %v16560_v2  ;;  %7277 = vmatprep.subr.bf16.mxu0 %v16565_v3  ;;  %v16649_v2 = vld [vmem:[%s24677_s1 + $0x1954] ss:$72 sps:$4 sm:$0xff]  }
  0x91   : > { %7441 = vmatprep.subr.bf16.mxu1 %v16568_v4  ;;  %v16652_v3 = vld [vmem:[%s24677_s1 + $0x195c] ss:$72 sps:$4 sm:$0xff]   ;;  %v16647_v4 = vld [vmem:[%s24677_s1 + $0x1950] ss:$72 sps:$4 sm:$0xff]  }
  0x93   : > { %7278 = vmatpush1.bf16.msra.mxu0 %v16563_v6  ;;  %v16650_v6 = vld [vmem:[%s24677_s1 + $0x1958] ss:$72 sps:$4 sm:$0xff]  }
  0x94   : > { %7442 = vmatpush1.bf16.msra.mxu1 %v16566_v7  ;;  %7288 = vmatprep.subr.bf16.mxu0 %v16571_v8  ;;  %v16655_v7 = vld [vmem:[%s24677_s1 + $0x19e4] ss:$72 sps:$4 sm:$0xff]  }
  0x95   : > { %7452 = vmatprep.subr.bf16.mxu1 %v16574_v10  ;;  %v16658_v8 = vld [vmem:[%s24677_s1 + $0x19ec] ss:$72 sps:$4 sm:$0xff]   ;;  %v16656_v10 = vld [vmem:[%s24677_s1 + $0x19e8] ss:$72 sps:$4 sm:$0xff]  }
  0x96   : > { %7280 = vmatmul.mubr.bf16.vlgmr.msra.gmra.mrb[0].mxu0 %v19187_v13 }
  0x97   : > { %7444 = vmatmul.mubr.bf16.vlgmr.msra.gmra.mrb[0].mxu1 %v19187_v13  ;;  %7289 = vmatpush1.bf16.msra.mxu0 %v16569_v11  ;;  %v16661_v11 = vld [vmem:[%s24677_s1 + $0x1a74] ss:$72 sps:$4 sm:$0xff]  }
  0x98   : > { %7453 = vmatpush1.bf16.msra.mxu1 %v16572_v12  ;;  %7290 = vmatprep.subr.bf16.mxu0 %v16577_v14  ;;  %v16664_v12 = vld [vmem:[%s24677_s1 + $0x1a7c] ss:$72 sps:$4 sm:$0xff]   ;;  %v16659_v14 = vld [vmem:[%s24677_s1 + $0x1a70] ss:$72 sps:$4 sm:$0xff]  }
  0x99   : > { %7454 = vmatprep.subr.bf16.mxu1 %v16580_v15  ;;  %7320 = vmatprep.mubr.bf16.mxu0 %v19196_v17  ;;  %v16662_v15 = vld [vmem:[%s24677_s1 + $0x1a78] ss:$72 sps:$4 sm:$0xff]  }
  0x9a   : > { %7484 = vmatprep.mubr.bf16.mxu1 %v19196_v17 }
  0x9b   : > { %7291 = vmatpush1.bf16.msra.mxu0 %v16575_v18  ;;  %v282_v18 = vld [vmem:[%s18905_s22 + $0x20] sm:$0xff] }
  0x9c   : > { %7455 = vmatpush1.bf16.msra.mxu1 %v16578_v19  ;;  %7292 = vmatprep.subr.bf16.mxu0 %v16583_v20  ;;  %v16670_v19 = vld [vmem:[%s24677_s1 + $0x1b0c] ss:$72 sps:$4 sm:$0xff]   ;;  %v16665_v20 = vld [vmem:[%s24677_s1 + $0x1b00] ss:$72 sps:$4 sm:$0xff]  }
  0x9d   : > { %7456 = vmatprep.subr.bf16.mxu1 %v16586_v21  ;;  %v16668_v21 = vld [vmem:[%s24677_s1 + $0x1b08] ss:$72 sps:$4 sm:$0xff]  }
  0x9f   : > { %7293 = vmatpush1.bf16.msra.mxu0 %v16581_v22  ;;  %v19389_v22 = vpack.c.bf16 %v282_v18, %v282_v18  ;;  %v16751_v18 = vld [vmem:[%s24677_s1 + $0x22e4] ss:$72 sps:$4 sm:$0xff]  }
  0xa0   : > { %7457 = vmatpush1.bf16.msra.mxu1 %v16584_v23  ;;  %7294 = vmatprep.subr.bf16.mxu0 %v16589_v24  ;;  %v285_v23 = vld [vmem:[%s18905_s22 + $0x38] sm:$0xff] }
  0xa1   : > { %7458 = vmatprep.subr.bf16.mxu1 %v16592_v25  ;;  %v16673_v24 = vld [vmem:[%s24677_s1 + $0x1b94] ss:$72 sps:$4 sm:$0xff]  }
  0xa2   : > { %v16676_v25 = vld [vmem:[%s24677_s1 + $0x1b9c] ss:$72 sps:$4 sm:$0xff]  }
  0xa3   : > { %7295 = vmatpush1.bf16.msra.mxu0 %v16587_v26  ;;  %v19398_v26 = vpack.c.bf16 %v285_v23, %v285_v23  ;;  %v16757_v23 = vld [vmem:[%s24677_s1 + $0x2374] ss:$72 sps:$4 sm:$0xff]  }
  0xa4   : > { %7459 = vmatpush1.bf16.msra.mxu1 %v16590_v27  ;;  %7296 = vmatprep.subr.bf16.mxu0 %v16595_v28  ;;  %v16671_v27 = vld [vmem:[%s24677_s1 + $0x1b90] ss:$72 sps:$4 sm:$0xff]  }
  0xa5   : > { %7460 = vmatprep.subr.bf16.mxu1 %v16598_v29  ;;  %v16674_v28 = vld [vmem:[%s24677_s1 + $0x1b98] ss:$72 sps:$4 sm:$0xff]   ;;  %v16679_v29 = vld [vmem:[%s24677_s1 + $0x1c24] ss:$72 sps:$4 sm:$0xff]  }
  0xa7   : > { %7297 = vmatpush1.bf16.msra.mxu0 %v16593_v30  ;;  %v16682_v30 = vld [vmem:[%s24677_s1 + $0x1c2c] ss:$72 sps:$4 sm:$0xff]  }
  0xa8   : > { %7461 = vmatpush1.bf16.msra.mxu1 %v16596_v31  ;;  %7298 = vmatprep.subr.bf16.mxu0 %v16601_v33  ;;  %v16677_v31 = vld [vmem:[%s24677_s1 + $0x1c20] ss:$72 sps:$4 sm:$0xff]  }
  0xa9   : > { %7462 = vmatprep.subr.bf16.mxu1 %v16604_v34  ;;  %v16680_v33 = vld [vmem:[%s24677_s1 + $0x1c28] ss:$72 sps:$4 sm:$0xff]   ;;  %v16685_v34 = vld [vmem:[%s24677_s1 + $0x1cb4] ss:$72 sps:$4 sm:$0xff]  }
  0xab   : > { %7299 = vmatpush1.bf16.msra.mxu0 %v16599_v35  ;;  %v16688_v35 = vld [vmem:[%s24677_s1 + $0x1cbc] ss:$72 sps:$4 sm:$0xff]  }
  0xac   : > { %7463 = vmatpush1.bf16.msra.mxu1 %v16602_v36  ;;  %7300 = vmatprep.subr.bf16.mxu0 %v16607_v37  ;;  %v16683_v36 = vld [vmem:[%s24677_s1 + $0x1cb0] ss:$72 sps:$4 sm:$0xff]  }
  0xad   : > { %7464 = vmatprep.subr.bf16.mxu1 %v16610_v38  ;;  %v16686_v37 = vld [vmem:[%s24677_s1 + $0x1cb8] ss:$72 sps:$4 sm:$0xff]   ;;  %v16691_v38 = vld [vmem:[%s24677_s1 + $0x1d44] ss:$72 sps:$4 sm:$0xff]  }
  0xaf   : > { %7301 = vmatpush1.bf16.msra.mxu0 %v16605_v39  ;;  %v16694_v39 = vld [vmem:[%s24677_s1 + $0x1d4c] ss:$72 sps:$4 sm:$0xff]  }
  0xb0   : > { %7465 = vmatpush1.bf16.msra.mxu1 %v16608_v40  ;;  %7302 = vmatprep.subr.bf16.mxu0 %v16613_v41  ;;  %v16689_v40 = vld [vmem:[%s24677_s1 + $0x1d40] ss:$72 sps:$4 sm:$0xff]  }
  0xb1   : > { %7466 = vmatprep.subr.bf16.mxu1 %v16616_v42  ;;  %v16692_v41 = vld [vmem:[%s24677_s1 + $0x1d48] ss:$72 sps:$4 sm:$0xff]   ;;  %v16697_v42 = vld [vmem:[%s24677_s1 + $0x1dd4] ss:$72 sps:$4 sm:$0xff]  }
  0xb3   : > { %7303 = vmatpush1.bf16.msra.mxu0 %v16611_v43  ;;  %v16700_v43 = vld [vmem:[%s24677_s1 + $0x1ddc] ss:$72 sps:$4 sm:$0xff]  }
  0xb4   : > { %7467 = vmatpush1.bf16.msra.mxu1 %v16614_v44  ;;  %7304 = vmatprep.subr.bf16.mxu0 %v16619_v45  ;;  %v16695_v44 = vld [vmem:[%s24677_s1 + $0x1dd0] ss:$72 sps:$4 sm:$0xff]  }
  0xb5   : > { %7468 = vmatprep.subr.bf16.mxu1 %v16622_v46  ;;  %v16698_v45 = vld [vmem:[%s24677_s1 + $0x1dd8] ss:$72 sps:$4 sm:$0xff]   ;;  %v16703_v46 = vld [vmem:[%s24677_s1 + $0x1e64] ss:$72 sps:$4 sm:$0xff]  }
  0xb7   : > { %7305 = vmatpush1.bf16.msra.mxu0 %v16617_v47  ;;  %v16706_v47 = vld [vmem:[%s24677_s1 + $0x1e6c] ss:$72 sps:$4 sm:$0xff]  }
  0xb8   : > { %7469 = vmatpush1.bf16.msra.mxu1 %v16620_v49  ;;  %7306 = vmatprep.subr.bf16.mxu0 %v16625_v50  ;;  %v16701_v49 = vld [vmem:[%s24677_s1 + $0x1e60] ss:$72 sps:$4 sm:$0xff]  }
  0xb9   : > { %7470 = vmatprep.subr.bf16.mxu1 %v16628_v51  ;;  %v16704_v50 = vld [vmem:[%s24677_s1 + $0x1e68] ss:$72 sps:$4 sm:$0xff]   ;;  %v16709_v51 = vld [vmem:[%s24677_s1 + $0x1ef4] ss:$72 sps:$4 sm:$0xff]  }
  0xbb   : > { %7307 = vmatpush1.bf16.msra.mxu0 %v16623_v52  ;;  %v16712_v52 = vld [vmem:[%s24677_s1 + $0x1efc] ss:$72 sps:$4 sm:$0xff]  }
  0xbc   : > { %7471 = vmatpush1.bf16.msra.mxu1 %v16626_v53  ;;  %7308 = vmatprep.subr.bf16.mxu0 %v16631_v54  ;;  %v16707_v53 = vld [vmem:[%s24677_s1 + $0x1ef0] ss:$72 sps:$4 sm:$0xff]  }
  0xbd   : > { %7472 = vmatprep.subr.bf16.mxu1 %v16634_v55  ;;  %v16710_v54 = vld [vmem:[%s24677_s1 + $0x1ef8] ss:$72 sps:$4 sm:$0xff]   ;;  %v16715_v55 = vld [vmem:[%s24677_s1 + $0x1f84] ss:$72 sps:$4 sm:$0xff]  }
  0xbf   : > { %7309 = vmatpush1.bf16.msra.mxu0 %v16629_v56  ;;  %v16718_v56 = vld [vmem:[%s24677_s1 + $0x1f8c] ss:$72 sps:$4 sm:$0xff]  }
  0xc0   : > { %7473 = vmatpush1.bf16.msra.mxu1 %v16632_v57  ;;  %7310 = vmatprep.subr.bf16.mxu0 %v16637_v58  ;;  %v16713_v57 = vld [vmem:[%s24677_s1 + $0x1f80] ss:$72 sps:$4 sm:$0xff]  }
  0xc1   : > { %7474 = vmatprep.subr.bf16.mxu1 %v16640_v59  ;;  %v16716_v58 = vld [vmem:[%s24677_s1 + $0x1f88] ss:$72 sps:$4 sm:$0xff]   ;;  %v16721_v59 = vld [vmem:[%s24677_s1 + $0x2014] ss:$72 sps:$4 sm:$0xff]  }
  0xc3   : > { %7311 = vmatpush1.bf16.msra.mxu0 %v16635_v60  ;;  %v16724_v60 = vld [vmem:[%s24677_s1 + $0x201c] ss:$72 sps:$4 sm:$0xff]  }
  0xc4   : > { %7475 = vmatpush1.bf16.msra.mxu1 %v16638_v61  ;;  %7312 = vmatprep.subr.bf16.mxu0 %v16643_v62  ;;  %v16719_v61 = vld [vmem:[%s24677_s1 + $0x2010] ss:$72 sps:$4 sm:$0xff]  }
  0xc5   : > { %7476 = vmatprep.subr.bf16.mxu1 %v16646_v63  ;;  %v16722_v62 = vld [vmem:[%s24677_s1 + $0x2018] ss:$72 sps:$4 sm:$0xff]   ;;  %v16727_v63 = vld [vmem:[%s24677_s1 + $0x20a4] ss:$72 sps:$4 sm:$0xff]  }
  0xc7   : > { %7313 = vmatpush1.bf16.msra.mxu0 %v16641_v0  ;;  %v16730_v0 = vld [vmem:[%s24677_s1 + $0x20ac] ss:$72 sps:$4 sm:$0xff]  }
  0xc8   : > { %7477 = vmatpush1.bf16.msra.mxu1 %v16644_v1  ;;  %7314 = vmatprep.subr.bf16.mxu0 %v16649_v2  ;;  %v16725_v1 = vld [vmem:[%s24677_s1 + $0x20a0] ss:$72 sps:$4 sm:$0xff]  }
  0xc9   : > { %7478 = vmatprep.subr.bf16.mxu1 %v16652_v3  ;;  %v16728_v2 = vld [vmem:[%s24677_s1 + $0x20a8] ss:$72 sps:$4 sm:$0xff]   ;;  %v16733_v3 = vld [vmem:[%s24677_s1 + $0x2134] ss:$72 sps:$4 sm:$0xff]  }
  0xcb   : > { %7315 = vmatpush1.bf16.msra.mxu0 %v16647_v4  ;;  %v16736_v4 = vld [vmem:[%s24677_s1 + $0x213c] ss:$72 sps:$4 sm:$0xff]  }
  0xcc   : > { %7479 = vmatpush1.bf16.msra.mxu1 %v16650_v6  ;;  %7316 = vmatprep.subr.bf16.mxu0 %v16655_v7  ;;  %v16731_v6 = vld [vmem:[%s24677_s1 + $0x2130] ss:$72 sps:$4 sm:$0xff]  }
  0xcd   : > { %7480 = vmatprep.subr.bf16.mxu1 %v16658_v8  ;;  %v16734_v7 = vld [vmem:[%s24677_s1 + $0x2138] ss:$72 sps:$4 sm:$0xff]   ;;  %v16739_v8 = vld [vmem:[%s24677_s1 + $0x21c4] ss:$72 sps:$4 sm:$0xff]  }
  0xcf   : > { %7317 = vmatpush1.bf16.msra.mxu0 %v16653_v9  ;;  %v16742_v9 = vld [vmem:[%s24677_s1 + $0x21cc] ss:$72 sps:$4 sm:$0xff]  }
  0xd0   : > { %7481 = vmatpush1.bf16.msra.mxu1 %v16656_v10  ;;  %7318 = vmatprep.subr.bf16.mxu0 %v16661_v11  ;;  %v16737_v10 = vld [vmem:[%s24677_s1 + $0x21c0] ss:$72 sps:$4 sm:$0xff]  }
  0xd1   : > { %7482 = vmatprep.subr.bf16.mxu1 %v16664_v12  ;;  %v16740_v11 = vld [vmem:[%s24677_s1 + $0x21c8] ss:$72 sps:$4 sm:$0xff]   ;;  %v16745_v12 = vld [vmem:[%s24677_s1 + $0x2254] ss:$72 sps:$4 sm:$0xff]  }
  0xd3   : > { %7319 = vmatpush1.bf16.msra.mxu0 %v16659_v14  ;;  %v16748_v14 = vld [vmem:[%s24677_s1 + $0x225c] ss:$72 sps:$4 sm:$0xff]  }
  0xd4   : > { %7483 = vmatpush1.bf16.msra.mxu1 %v16662_v15  ;;  %7329 = vmatprep.subr.bf16.mxu0 %v16667_v16  ;;  %v16743_v15 = vld [vmem:[%s24677_s1 + $0x2250] ss:$72 sps:$4 sm:$0xff]  }
  0xd5   : > { %7493 = vmatprep.subr.bf16.mxu1 %v16670_v19  ;;  %v16746_v16 = vld [vmem:[%s24677_s1 + $0x2258] ss:$72 sps:$4 sm:$0xff]   ;;  %v16754_v19 = vld [vmem:[%s24677_s1 + $0x22ec] ss:$72 sps:$4 sm:$0xff]  }
  0xd6   : > { %7321 = vmatmul.mubr.bf16.vlgmr.msra.gmra.mrb[0].mxu0 %v19389_v22 }
  0xd7   : > { %7485 = vmatmul.mubr.bf16.vlgmr.msra.gmra.mrb[0].mxu1 %v19389_v22  ;;  %7330 = vmatpush1.bf16.msra.mxu0 %v16665_v20  ;;  %v16749_v20 = vld [vmem:[%s24677_s1 + $0x22e0] ss:$72 sps:$4 sm:$0xff]  }
  0xd8   : > { %7494 = vmatpush1.bf16.msra.mxu1 %v16668_v21  ;;  %7331 = vmatprep.subr.bf16.mxu0 %v16673_v24  ;;  %v16752_v21 = vld [vmem:[%s24677_s1 + $0x22e8] ss:$72 sps:$4 sm:$0xff]   ;;  %v16760_v24 = vld [vmem:[%s24677_s1 + $0x237c] ss:$72 sps:$4 sm:$0xff]  }
  0xd9   : > { %7495 = vmatprep.subr.bf16.mxu1 %v16676_v25  ;;  %7361 = vmatprep.mubr.bf16.mxu0 %v19398_v26  ;;  %v16755_v25 = vld [vmem:[%s24677_s1 + $0x2370] ss:$72 sps:$4 sm:$0xff]  }
  0xda   : > { %7525 = vmatprep.mubr.bf16.mxu1 %v19398_v26 }
  0xdb   : > { %7332 = vmatpush1.bf16.msra.mxu0 %v16671_v27  ;;  %v16758_v27 = vld [vmem:[%s24677_s1 + $0x2378] ss:$72 sps:$4 sm:$0xff]  }
  0xdc   : > { %7496 = vmatpush1.bf16.msra.mxu1 %v16674_v28  ;;  %7333 = vmatprep.subr.bf16.mxu0 %v16679_v29  ;;  %v284_v28 = vld [vmem:[%s18905_s22 + $0x30] sm:$0xff]  ;;  %s15326_s22 = sshll.u32 %s18741_s28, 8  ;;  %s18679_s28 = smov [#allocation2]  }
  0xdd   : > { %7497 = vmatprep.subr.bf16.mxu1 %v16682_v30  ;;  %v16763_v29 = vld [vmem:[%s24677_s1 + $0x14] ss:$72 sps:$4 sm:$0xff]   ;;  %s24636_s14 = scalar_lea.hbm %s24683_s7, %s15326_s22  ;;  %s18612_s16 = sshll.u32 %s18679_s28, 4  ;;  %s18613_s16 = int_to_ptr.vmem [resolvable:$false] %s18612_s16 }
  0xde   : > { %v16766_v30 = vld [vmem:[%s24677_s1 + $0x1c] ss:$72 sps:$4 sm:$0xff]   ;;  %s18614_s18 = scalar_lea.vmem %s18613_s16, 512 }
  0xdf   : > { %7334 = vmatpush1.bf16.msra.mxu0 %v16677_v31  ;;  %v19585_v31 = vpack.c.bf16 %v284_v28, %v284_v28  ;;  %v16842_v28 = vld [vmem:[%s24677_s1 + $0x768] ss:$72 sps:$4 sm:$0xff]  }
  0xe0   : > { %7498 = vmatpush1.bf16.msra.mxu1 %v16680_v33  ;;  %7335 = vmatprep.subr.bf16.mxu0 %v16685_v34  ;;  %v16761_v33 = vld [vmem:[%s24677_s1 + $0x10] ss:$72 sps:$4 sm:$0xff]  }
  0xe1   : > { %7499 = vmatprep.subr.bf16.mxu1 %v16688_v35  ;;  %v16764_v34 = vld [vmem:[%s24677_s1 + $0x18] ss:$72 sps:$4 sm:$0xff]   ;;  %v16769_v35 = vld [vmem:[%s24677_s1 + $0xa4] ss:$72 sps:$4 sm:$0xff]  }
  0xe3   : > { %7336 = vmatpush1.bf16.msra.mxu0 %v16683_v36  ;;  %v16772_v36 = vld [vmem:[%s24677_s1 + $0xac] ss:$72 sps:$4 sm:$0xff]  }
  0xe4   : > { %7500 = vmatpush1.bf16.msra.mxu1 %v16686_v37  ;;  %7337 = vmatprep.subr.bf16.mxu0 %v16691_v38  ;;  %v16767_v37 = vld [vmem:[%s24677_s1 + $0xa0] ss:$72 sps:$4 sm:$0xff]  }
  0xe5   : > { %7501 = vmatprep.subr.bf16.mxu1 %v16694_v39  ;;  %v16770_v38 = vld [vmem:[%s24677_s1 + $0xa8] ss:$72 sps:$4 sm:$0xff]   ;;  %v16775_v39 = vld [vmem:[%s24677_s1 + $0x134] ss:$72 sps:$4 sm:$0xff]  }
  0xe7   : > { %7338 = vmatpush1.bf16.msra.mxu0 %v16689_v40  ;;  %v16778_v40 = vld [vmem:[%s24677_s1 + $0x13c] ss:$72 sps:$4 sm:$0xff]  }
  0xe8   : > { %7502 = vmatpush1.bf16.msra.mxu1 %v16692_v41  ;;  %7339 = vmatprep.subr.bf16.mxu0 %v16697_v42  ;;  %v16773_v41 = vld [vmem:[%s24677_s1 + $0x130] ss:$72 sps:$4 sm:$0xff]  }
  0xe9   : > { %7503 = vmatprep.subr.bf16.mxu1 %v16700_v43  ;;  %v16776_v42 = vld [vmem:[%s24677_s1 + $0x138] ss:$72 sps:$4 sm:$0xff]   ;;  %v16781_v43 = vld [vmem:[%s24677_s1 + $0x1c4] ss:$72 sps:$4 sm:$0xff]  }
  0xeb   : > { %7340 = vmatpush1.bf16.msra.mxu0 %v16695_v44  ;;  %v16784_v44 = vld [vmem:[%s24677_s1 + $0x1cc] ss:$72 sps:$4 sm:$0xff]  }
  0xec   : > { %7504 = vmatpush1.bf16.msra.mxu1 %v16698_v45  ;;  %7341 = vmatprep.subr.bf16.mxu0 %v16703_v46  ;;  %v16779_v45 = vld [vmem:[%s24677_s1 + $0x1c0] ss:$72 sps:$4 sm:$0xff]  }
  0xed   : > { %7505 = vmatprep.subr.bf16.mxu1 %v16706_v47  ;;  %v16782_v46 = vld [vmem:[%s24677_s1 + $0x1c8] ss:$72 sps:$4 sm:$0xff]   ;;  %v16787_v47 = vld [vmem:[%s24677_s1 + $0x254] ss:$72 sps:$4 sm:$0xff]  }
  0xef   : > { %7342 = vmatpush1.bf16.msra.mxu0 %v16701_v49  ;;  %v16790_v49 = vld [vmem:[%s24677_s1 + $0x25c] ss:$72 sps:$4 sm:$0xff]  }
  0xf0   : > { %7506 = vmatpush1.bf16.msra.mxu1 %v16704_v50  ;;  %7343 = vmatprep.subr.bf16.mxu0 %v16709_v51  ;;  %v16785_v50 = vld [vmem:[%s24677_s1 + $0x250] ss:$72 sps:$4 sm:$0xff]  }
  0xf1   : > { %7507 = vmatprep.subr.bf16.mxu1 %v16712_v52  ;;  %v16788_v51 = vld [vmem:[%s24677_s1 + $0x258] ss:$72 sps:$4 sm:$0xff]   ;;  %v16793_v52 = vld [vmem:[%s24677_s1 + $0x2e4] ss:$72 sps:$4 sm:$0xff]  }
  0xf3   : > { %7344 = vmatpush1.bf16.msra.mxu0 %v16707_v53  ;;  %v16796_v53 = vld [vmem:[%s24677_s1 + $0x2ec] ss:$72 sps:$4 sm:$0xff]  }
  0xf4   : > { %7508 = vmatpush1.bf16.msra.mxu1 %v16710_v54  ;;  %7345 = vmatprep.subr.bf16.mxu0 %v16715_v55  ;;  %v16791_v54 = vld [vmem:[%s24677_s1 + $0x2e0] ss:$72 sps:$4 sm:$0xff]  }
  0xf5   : > { %7509 = vmatprep.subr.bf16.mxu1 %v16718_v56  ;;  %v16794_v55 = vld [vmem:[%s24677_s1 + $0x2e8] ss:$72 sps:$4 sm:$0xff]   ;;  %v16799_v56 = vld [vmem:[%s24677_s1 + $0x374] ss:$72 sps:$4 sm:$0xff]  }
  0xf7   : > { %7346 = vmatpush1.bf16.msra.mxu0 %v16713_v57  ;;  %v16802_v57 = vld [vmem:[%s24677_s1 + $0x37c] ss:$72 sps:$4 sm:$0xff]  }
  0xf8   : > { %7510 = vmatpush1.bf16.msra.mxu1 %v16716_v58  ;;  %7347 = vmatprep.subr.bf16.mxu0 %v16721_v59  ;;  %v16797_v58 = vld [vmem:[%s24677_s1 + $0x370] ss:$72 sps:$4 sm:$0xff]  }
  0xf9   : > { %7511 = vmatprep.subr.bf16.mxu1 %v16724_v60  ;;  %v16800_v59 = vld [vmem:[%s24677_s1 + $0x378] ss:$72 sps:$4 sm:$0xff]   ;;  %v16805_v60 = vld [vmem:[%s24677_s1 + $0x404] ss:$72 sps:$4 sm:$0xff]  }
  0xfb   : > { %7348 = vmatpush1.bf16.msra.mxu0 %v16719_v61  ;;  %v16808_v61 = vld [vmem:[%s24677_s1 + $0x40c] ss:$72 sps:$4 sm:$0xff]  }
  0xfc   : > { %7512 = vmatpush1.bf16.msra.mxu1 %v16722_v62  ;;  %7349 = vmatprep.subr.bf16.mxu0 %v16727_v63  ;;  %v16803_v62 = vld [vmem:[%s24677_s1 + $0x400] ss:$72 sps:$4 sm:$0xff]  }
  0xfd   : > { %7513 = vmatprep.subr.bf16.mxu1 %v16730_v0  ;;  %v16806_v63 = vld [vmem:[%s24677_s1 + $0x408] ss:$72 sps:$4 sm:$0xff]   ;;  %v16811_v0 = vld [vmem:[%s24677_s1 + $0x494] ss:$72 sps:$4 sm:$0xff]  }
  0xff   : > { %7350 = vmatpush1.bf16.msra.mxu0 %v16725_v1  ;;  %v16814_v1 = vld [vmem:[%s24677_s1 + $0x49c] ss:$72 sps:$4 sm:$0xff]  }
 0x100   : > { %7514 = vmatpush1.bf16.msra.mxu1 %v16728_v2  ;;  %7351 = vmatprep.subr.bf16.mxu0 %v16733_v3  ;;  %v16809_v2 = vld [vmem:[%s24677_s1 + $0x490] ss:$72 sps:$4 sm:$0xff]  }
 0x101   : > { %7515 = vmatprep.subr.bf16.mxu1 %v16736_v4  ;;  %v16812_v3 = vld [vmem:[%s24677_s1 + $0x498] ss:$72 sps:$4 sm:$0xff]   ;;  %v16817_v4 = vld [vmem:[%s24677_s1 + $0x524] ss:$72 sps:$4 sm:$0xff]  }
 0x103   : > { %7352 = vmatpush1.bf16.msra.mxu0 %v16731_v6  ;;  %v16820_v6 = vld [vmem:[%s24677_s1 + $0x52c] ss:$72 sps:$4 sm:$0xff]  }
 0x104   : > { %7516 = vmatpush1.bf16.msra.mxu1 %v16734_v7  ;;  %7353 = vmatprep.subr.bf16.mxu0 %v16739_v8  ;;  %v16815_v7 = vld [vmem:[%s24677_s1 + $0x520] ss:$72 sps:$4 sm:$0xff]  }
 0x105   : > { %7517 = vmatprep.subr.bf16.mxu1 %v16742_v9  ;;  %v16818_v8 = vld [vmem:[%s24677_s1 + $0x528] ss:$72 sps:$4 sm:$0xff]   ;;  %v16823_v9 = vld [vmem:[%s24677_s1 + $0x5b4] ss:$72 sps:$4 sm:$0xff]  }
 0x107   : > { %7354 = vmatpush1.bf16.msra.mxu0 %v16737_v10  ;;  %v16826_v10 = vld [vmem:[%s24677_s1 + $0x5bc] ss:$72 sps:$4 sm:$0xff]  }
 0x108   : > { %7518 = vmatpush1.bf16.msra.mxu1 %v16740_v11  ;;  %7355 = vmatprep.subr.bf16.mxu0 %v16745_v12  ;;  %v16821_v11 = vld [vmem:[%s24677_s1 + $0x5b0] ss:$72 sps:$4 sm:$0xff]  }
 0x109   : > { %7519 = vmatprep.subr.bf16.mxu1 %v16748_v14  ;;  %v16824_v12 = vld [vmem:[%s24677_s1 + $0x5b8] ss:$72 sps:$4 sm:$0xff]   ;;  %v16829_v14 = vld [vmem:[%s24677_s1 + $0x644] ss:$72 sps:$4 sm:$0xff]  }
 0x10b   : > { %7356 = vmatpush1.bf16.msra.mxu0 %v16743_v15  ;;  %v16832_v15 = vld [vmem:[%s24677_s1 + $0x64c] ss:$72 sps:$4 sm:$0xff]  }
 0x10c   : > { %7520 = vmatpush1.bf16.msra.mxu1 %v16746_v16  ;;  %7357 = vmatprep.subr.bf16.mxu0 %v16751_v18  ;;  %v16827_v16 = vld [vmem:[%s24677_s1 + $0x640] ss:$72 sps:$4 sm:$0xff]  }
 0x10d   : > { %7521 = vmatprep.subr.bf16.mxu1 %v16754_v19  ;;  %v16830_v18 = vld [vmem:[%s24677_s1 + $0x648] ss:$72 sps:$4 sm:$0xff]   ;;  %v16835_v19 = vld [vmem:[%s24677_s1 + $0x6d4] ss:$72 sps:$4 sm:$0xff]  }
 0x10f   : > { %7358 = vmatpush1.bf16.msra.mxu0 %v16749_v20  ;;  %v16838_v20 = vld [vmem:[%s24677_s1 + $0x6dc] ss:$72 sps:$4 sm:$0xff]  }
 0x110   : > { %7522 = vmatpush1.bf16.msra.mxu1 %v16752_v21  ;;  %7359 = vmatprep.subr.bf16.mxu0 %v16757_v23  ;;  %v16833_v21 = vld [vmem:[%s24677_s1 + $0x6d0] ss:$72 sps:$4 sm:$0xff]  }
 0x111   : > { %7523 = vmatprep.subr.bf16.mxu1 %v16760_v24  ;;  %v16836_v23 = vld [vmem:[%s24677_s1 + $0x6d8] ss:$72 sps:$4 sm:$0xff]   ;;  %v16841_v24 = vld [vmem:[%s24677_s1 + $0x764] ss:$72 sps:$4 sm:$0xff]  }
 0x113   : > { %7360 = vmatpush1.bf16.msra.mxu0 %v16755_v25  ;;  %v16844_v25 = vld [vmem:[%s24677_s1 + $0x76c] ss:$72 sps:$4 sm:$0xff]  }
 0x114   : > { %7524 = vmatpush1.bf16.msra.mxu1 %v16758_v27  ;;  %7534 = vmatprep.subr.bf16.mxu0 %v16763_v29  ;;  %v16839_v27 = vld [vmem:[%s24677_s1 + $0x760] ss:$72 sps:$4 sm:$0xff]   ;;  %v16847_v29 = vld [vmem:[%s24677_s1 + $0x7f4] ss:$72 sps:$4 sm:$0xff]  }
 0x115   : > { %7698 = vmatprep.subr.bf16.mxu1 %v16766_v30  ;;  %v16850_v30 = vld [vmem:[%s24677_s1 + $0x7fc] ss:$72 sps:$4 sm:$0xff]  }
 0x116   : > { %7362 = vmatmul.mubr.bf16.vlgmr.msra.gmra.mrb[0].mxu0 %v19585_v31 }
 0x117   : > { %7526 = vmatmul.mubr.bf16.vlgmr.msra.gmra.mrb[0].mxu1 %v19585_v31  ;;  %7535 = vmatpush1.bf16.msra.mxu0 %v16761_v33  ;;  %v16845_v33 = vld [vmem:[%s24677_s1 + $0x7f0] ss:$72 sps:$4 sm:$0xff]  }
 0x118   : > { %7699 = vmatpush1.bf16.msra.mxu1 %v16764_v34  ;;  %7536 = vmatprep.subr.bf16.mxu0 %v16769_v35  ;;  %v16848_v34 = vld [vmem:[%s24677_s1 + $0x7f8] ss:$72 sps:$4 sm:$0xff]   ;;  %v16853_v35 = vld [vmem:[%s24677_s1 + $0x884] ss:$72 sps:$4 sm:$0xff]  }
 0x119   : > { %7700 = vmatprep.subr.bf16.mxu1 %v16772_v36  ;;  %7566 = vmatprep.mubr.bf16.mxu0 %v18917_v48  ;;  %v16856_v36 = vld [vmem:[%s24677_s1 + $0x88c] ss:$72 sps:$4 sm:$0xff]  }
 0x11a   : > { %7730 = vmatprep.mubr.bf16.mxu1 %v18917_v48 }
 0x11b   : > { %7537 = vmatpush1.bf16.msra.mxu0 %v16767_v37  ;;  %v16851_v37 = vld [vmem:[%s24677_s1 + $0x880] ss:$72 sps:$4 sm:$0xff]  }
 0x11c   : > { %7701 = vmatpush1.bf16.msra.mxu1 %v16770_v38  ;;  %7538 = vmatprep.subr.bf16.mxu0 %v16775_v39  ;;  %v16854_v38 = vld [vmem:[%s24677_s1 + $0x888] ss:$72 sps:$4 sm:$0xff]   ;;  %v16859_v39 = vld [vmem:[%s24677_s1 + $0x914] ss:$72 sps:$4 sm:$0xff]  }
 0x11d   : > { %7702 = vmatprep.subr.bf16.mxu1 %v16778_v40  ;;  %v16862_v40 = vld [vmem:[%s24677_s1 + $0x91c] ss:$72 sps:$4 sm:$0xff]  }
 0x11f   : > { %7539 = vmatpush1.bf16.msra.mxu0 %v16773_v41  ;;  %v16857_v41 = vld [vmem:[%s24677_s1 + $0x910] ss:$72 sps:$4 sm:$0xff]  }
 0x120   : > { %7703 = vmatpush1.bf16.msra.mxu1 %v16776_v42  ;;  %7540 = vmatprep.subr.bf16.mxu0 %v16781_v43  ;;  %v16860_v42 = vld [vmem:[%s24677_s1 + $0x918] ss:$72 sps:$4 sm:$0xff]   ;;  %v16865_v43 = vld [vmem:[%s24677_s1 + $0x9a4] ss:$72 sps:$4 sm:$0xff]  }
 0x121   : > { %7704 = vmatprep.subr.bf16.mxu1 %v16784_v44  ;;  %v16868_v44 = vld [vmem:[%s24677_s1 + $0x9ac] ss:$72 sps:$4 sm:$0xff]  }
 0x123   : > { %7541 = vmatpush1.bf16.msra.mxu0 %v16779_v45  ;;  %v16863_v45 = vld [vmem:[%s24677_s1 + $0x9a0] ss:$72 sps:$4 sm:$0xff]  }
 0x124   : > { %7705 = vmatpush1.bf16.msra.mxu1 %v16782_v46  ;;  %7542 = vmatprep.subr.bf16.mxu0 %v16787_v47  ;;  %v16866_v46 = vld [vmem:[%s24677_s1 + $0x9a8] ss:$72 sps:$4 sm:$0xff]   ;;  %v16871_v47 = vld [vmem:[%s24677_s1 + $0xa34] ss:$72 sps:$4 sm:$0xff]  }
 0x125   : > { %7706 = vmatprep.subr.bf16.mxu1 %v16790_v49  ;;  %v16874_v49 = vld [vmem:[%s24677_s1 + $0xa3c] ss:$72 sps:$4 sm:$0xff]  }
 0x127   : > { %7543 = vmatpush1.bf16.msra.mxu0 %v16785_v50  ;;  %v16869_v50 = vld [vmem:[%s24677_s1 + $0xa30] ss:$72 sps:$4 sm:$0xff]  }
 0x128   : > { %7707 = vmatpush1.bf16.msra.mxu1 %v16788_v51  ;;  %7544 = vmatprep.subr.bf16.mxu0 %v16793_v52  ;;  %v16872_v51 = vld [vmem:[%s24677_s1 + $0xa38] ss:$72 sps:$4 sm:$0xff]   ;;  %v16877_v52 = vld [vmem:[%s24677_s1 + $0xac4] ss:$72 sps:$4 sm:$0xff]  }
 0x129   : > { %7708 = vmatprep.subr.bf16.mxu1 %v16796_v53  ;;  %v16880_v53 = vld [vmem:[%s24677_s1 + $0xacc] ss:$72 sps:$4 sm:$0xff]  }
 0x12b   : > { %7545 = vmatpush1.bf16.msra.mxu0 %v16791_v54  ;;  %v16875_v54 = vld [vmem:[%s24677_s1 + $0xac0] ss:$72 sps:$4 sm:$0xff]  }
 0x12c   : > { %7709 = vmatpush1.bf16.msra.mxu1 %v16794_v55  ;;  %7546 = vmatprep.subr.bf16.mxu0 %v16799_v56  ;;  %v16878_v55 = vld [vmem:[%s24677_s1 + $0xac8] ss:$72 sps:$4 sm:$0xff]   ;;  %v16883_v56 = vld [vmem:[%s24677_s1 + $0xb54] ss:$72 sps:$4 sm:$0xff]  }
 0x12d   : > { %7710 = vmatprep.subr.bf16.mxu1 %v16802_v57  ;;  %v16886_v57 = vld [vmem:[%s24677_s1 + $0xb5c] ss:$72 sps:$4 sm:$0xff]  }
 0x12f   : > { %7547 = vmatpush1.bf16.msra.mxu0 %v16797_v58  ;;  %v16881_v58 = vld [vmem:[%s24677_s1 + $0xb50] ss:$72 sps:$4 sm:$0xff]  }
 0x130   : > { %7711 = vmatpush1.bf16.msra.mxu1 %v16800_v59  ;;  %7548 = vmatprep.subr.bf16.mxu0 %v16805_v60  ;;  %v16884_v59 = vld [vmem:[%s24677_s1 + $0xb58] ss:$72 sps:$4 sm:$0xff]   ;;  %v16889_v60 = vld [vmem:[%s24677_s1 + $0xbe4] ss:$72 sps:$4 sm:$0xff]  }
 0x131   : > { %7712 = vmatprep.subr.bf16.mxu1 %v16808_v61  ;;  %v16892_v61 = vld [vmem:[%s24677_s1 + $0xbec] ss:$72 sps:$4 sm:$0xff]  }
 0x133   : > { %7549 = vmatpush1.bf16.msra.mxu0 %v16803_v62  ;;  %v16887_v62 = vld [vmem:[%s24677_s1 + $0xbe0] ss:$72 sps:$4 sm:$0xff]  }
 0x134   : > { %7713 = vmatpush1.bf16.msra.mxu1 %v16806_v63  ;;  %7550 = vmatprep.subr.bf16.mxu0 %v16811_v0  ;;  %v16890_v63 = vld [vmem:[%s24677_s1 + $0xbe8] ss:$72 sps:$4 sm:$0xff]   ;;  %v16895_v0 = vld [vmem:[%s24677_s1 + $0xc74] ss:$72 sps:$4 sm:$0xff]  }
 0x135   : > { %7714 = vmatprep.subr.bf16.mxu1 %v16814_v1  ;;  %v16898_v1 = vld [vmem:[%s24677_s1 + $0xc7c] ss:$72 sps:$4 sm:$0xff]  }
 0x137   : > { %7551 = vmatpush1.bf16.msra.mxu0 %v16809_v2  ;;  %v16893_v2 = vld [vmem:[%s24677_s1 + $0xc70] ss:$72 sps:$4 sm:$0xff]  }
 0x138   : > { %7715 = vmatpush1.bf16.msra.mxu1 %v16812_v3  ;;  %7552 = vmatprep.subr.bf16.mxu0 %v16817_v4  ;;  %v16896_v3 = vld [vmem:[%s24677_s1 + $0xc78] ss:$72 sps:$4 sm:$0xff]   ;;  %v16901_v4 = vld [vmem:[%s24677_s1 + $0xd04] ss:$72 sps:$4 sm:$0xff]  }
 0x139   : > { %7716 = vmatprep.subr.bf16.mxu1 %v16820_v6  ;;  %v16904_v6 = vld [vmem:[%s24677_s1 + $0xd0c] ss:$72 sps:$4 sm:$0xff]  }
 0x13b   : > { %7553 = vmatpush1.bf16.msra.mxu0 %v16815_v7  ;;  %v16899_v7 = vld [vmem:[%s24677_s1 + $0xd00] ss:$72 sps:$4 sm:$0xff]  }
 0x13c   : > { %7717 = vmatpush1.bf16.msra.mxu1 %v16818_v8  ;;  %7554 = vmatprep.subr.bf16.mxu0 %v16823_v9  ;;  %v16902_v8 = vld [vmem:[%s24677_s1 + $0xd08] ss:$72 sps:$4 sm:$0xff]   ;;  %v16907_v9 = vld [vmem:[%s24677_s1 + $0xd94] ss:$72 sps:$4 sm:$0xff]  }
 0x13d   : > { %7718 = vmatprep.subr.bf16.mxu1 %v16826_v10  ;;  %v16910_v10 = vld [vmem:[%s24677_s1 + $0xd9c] ss:$72 sps:$4 sm:$0xff]  }
 0x13f   : > { %7555 = vmatpush1.bf16.msra.mxu0 %v16821_v11  ;;  %v16905_v11 = vld [vmem:[%s24677_s1 + $0xd90] ss:$72 sps:$4 sm:$0xff]  }
 0x140   : > { %7719 = vmatpush1.bf16.msra.mxu1 %v16824_v12  ;;  %7556 = vmatprep.subr.bf16.mxu0 %v16829_v14  ;;  %v16908_v12 = vld [vmem:[%s24677_s1 + $0xd98] ss:$72 sps:$4 sm:$0xff]   ;;  %v16913_v14 = vld [vmem:[%s24677_s1 + $0xe24] ss:$72 sps:$4 sm:$0xff]  }
 0x141   : > { %7720 = vmatprep.subr.bf16.mxu1 %v16832_v15  ;;  %v16916_v15 = vld [vmem:[%s24677_s1 + $0xe2c] ss:$72 sps:$4 sm:$0xff]  }
 0x143   : > { %7557 = vmatpush1.bf16.msra.mxu0 %v16827_v16  ;;  %v16911_v16 = vld [vmem:[%s24677_s1 + $0xe20] ss:$72 sps:$4 sm:$0xff]  }
 0x144   : > { %7721 = vmatpush1.bf16.msra.mxu1 %v16830_v18  ;;  %7558 = vmatprep.subr.bf16.mxu0 %v16835_v19  ;;  %v16914_v18 = vld [vmem:[%s24677_s1 + $0xe28] ss:$72 sps:$4 sm:$0xff]   ;;  %v16919_v19 = vld [vmem:[%s24677_s1 + $0xeb4] ss:$72 sps:$4 sm:$0xff]  }
 0x145   : > { %7722 = vmatprep.subr.bf16.mxu1 %v16838_v20  ;;  %v16922_v20 = vld [vmem:[%s24677_s1 + $0xebc] ss:$72 sps:$4 sm:$0xff]  }
 0x147   : > { %7559 = vmatpush1.bf16.msra.mxu0 %v16833_v21  ;;  %v16917_v21 = vld [vmem:[%s24677_s1 + $0xeb0] ss:$72 sps:$4 sm:$0xff]  }
 0x148   : > { %7723 = vmatpush1.bf16.msra.mxu1 %v16836_v23  ;;  %7560 = vmatprep.subr.bf16.mxu0 %v16841_v24  ;;  %v16920_v23 = vld [vmem:[%s24677_s1 + $0xeb8] ss:$72 sps:$4 sm:$0xff]   ;;  %v16925_v24 = vld [vmem:[%s24677_s1 + $0xf44] ss:$72 sps:$4 sm:$0xff]  }
 0x149   : > { %7724 = vmatprep.subr.bf16.mxu1 %v16844_v25  ;;  %v16928_v25 = vld [vmem:[%s24677_s1 + $0xf4c] ss:$72 sps:$4 sm:$0xff]  }
 0x14b   : > { %7561 = vmatpush1.bf16.msra.mxu0 %v16839_v27  ;;  %v16923_v27 = vld [vmem:[%s24677_s1 + $0xf40] ss:$72 sps:$4 sm:$0xff]  }
 0x14c   : > { %7725 = vmatpush1.bf16.msra.mxu1 %v16842_v28  ;;  %7562 = vmatprep.subr.bf16.mxu0 %v16847_v29  ;;  %v16926_v28 = vld [vmem:[%s24677_s1 + $0xf48] ss:$72 sps:$4 sm:$0xff]   ;;  %v16931_v29 = vld [vmem:[%s24677_s1 + $0xfd4] ss:$72 sps:$4 sm:$0xff]  }
 0x14d   : > { %7726 = vmatprep.subr.bf16.mxu1 %v16850_v30  ;;  %v16934_v30 = vld [vmem:[%s24677_s1 + $0xfdc] ss:$72 sps:$4 sm:$0xff]  }
 0x14f   : > { %7563 = vmatpush1.bf16.msra.mxu0 %v16845_v33  ;;  %v16929_v33 = vld [vmem:[%s24677_s1 + $0xfd0] ss:$72 sps:$4 sm:$0xff]  }
 0x150   : > { %7727 = vmatpush1.bf16.msra.mxu1 %v16848_v34  ;;  %7564 = vmatprep.subr.bf16.mxu0 %v16853_v35  ;;  %v16932_v34 = vld [vmem:[%s24677_s1 + $0xfd8] ss:$72 sps:$4 sm:$0xff]   ;;  %v16937_v35 = vld [vmem:[%s24677_s1 + $0x1064] ss:$72 sps:$4 sm:$0xff]  }
 0x151   : > { %7728 = vmatprep.subr.bf16.mxu1 %v16856_v36  ;;  %v16940_v36 = vld [vmem:[%s24677_s1 + $0x106c] ss:$72 sps:$4 sm:$0xff]  }
 0x153   : > { %7565 = vmatpush1.bf16.msra.mxu0 %v16851_v37  ;;  %v16935_v37 = vld [vmem:[%s24677_s1 + $0x1060] ss:$72 sps:$4 sm:$0xff]  }
 0x154   : > { %7729 = vmatpush1.bf16.msra.mxu1 %v16854_v38  ;;  %7575 = vmatprep.subr.bf16.mxu0 %v16859_v39  ;;  %v16938_v38 = vld [vmem:[%s24677_s1 + $0x1068] ss:$72 sps:$4 sm:$0xff]   ;;  %v16943_v39 = vld [vmem:[%s24677_s1 + $0x10f4] ss:$72 sps:$4 sm:$0xff]  }
 0x155   : > { %7739 = vmatprep.subr.bf16.mxu1 %v16862_v40  ;;  %v16946_v40 = vld [vmem:[%s24677_s1 + $0x10fc] ss:$72 sps:$4 sm:$0xff]  }
 0x156   : > { %7567 = vmatmul.mubr.bf16.vlgmr.msra.gmra.mrb[4].mxu0 %v18979_v5 }
 0x157   : > { %7731 = vmatmul.mubr.bf16.vlgmr.msra.gmra.mrb[4].mxu1 %v18979_v5  ;;  %7576 = vmatpush1.bf16.msra.mxu0 %v16857_v41  ;;  %v16941_v41 = vld [vmem:[%s24677_s1 + $0x10f0] ss:$72 sps:$4 sm:$0xff]  }
 0x158   : > { %7740 = vmatpush1.bf16.msra.mxu1 %v16860_v42  ;;  %7577 = vmatprep.subr.bf16.mxu0 %v16865_v43  ;;  %v16944_v42 = vld [vmem:[%s24677_s1 + $0x10f8] ss:$72 sps:$4 sm:$0xff]   ;;  %v16949_v43 = vld [vmem:[%s24677_s1 + $0x1184] ss:$72 sps:$4 sm:$0xff]  }
 0x159   : > { %7741 = vmatprep.subr.bf16.mxu1 %v16868_v44  ;;  %7607 = vmatprep.mubr.bf16.mxu0 %v19059_v32  ;;  %v16952_v44 = vld [vmem:[%s24677_s1 + $0x118c] ss:$72 sps:$4 sm:$0xff]  }
 0x15a   : > { %7771 = vmatprep.mubr.bf16.mxu1 %v19059_v32 }
 0x15b   : > { %7578 = vmatpush1.bf16.msra.mxu0 %v16863_v45  ;;  %v16947_v45 = vld [vmem:[%s24677_s1 + $0x1180] ss:$72 sps:$4 sm:$0xff]  }
 0x15c   : > { %7742 = vmatpush1.bf16.msra.mxu1 %v16866_v46  ;;  %7579 = vmatprep.subr.bf16.mxu0 %v16871_v47  ;;  %v16950_v46 = vld [vmem:[%s24677_s1 + $0x1188] ss:$72 sps:$4 sm:$0xff]   ;;  %v16955_v47 = vld [vmem:[%s24677_s1 + $0x1214] ss:$72 sps:$4 sm:$0xff]  }
 0x15d   : > { %7743 = vmatprep.subr.bf16.mxu1 %v16874_v49  ;;  %v16958_v49 = vld [vmem:[%s24677_s1 + $0x121c] ss:$72 sps:$4 sm:$0xff]  }
 0x15f   : > { %7580 = vmatpush1.bf16.msra.mxu0 %v16869_v50  ;;  %v16953_v50 = vld [vmem:[%s24677_s1 + $0x1210] ss:$72 sps:$4 sm:$0xff]  }
 0x160   : > { %7744 = vmatpush1.bf16.msra.mxu1 %v16872_v51  ;;  %7581 = vmatprep.subr.bf16.mxu0 %v16877_v52  ;;  %v16956_v51 = vld [vmem:[%s24677_s1 + $0x1218] ss:$72 sps:$4 sm:$0xff]   ;;  %v16961_v52 = vld [vmem:[%s24677_s1 + $0x12a4] ss:$72 sps:$4 sm:$0xff]  }
 0x161   : > { %7745 = vmatprep.subr.bf16.mxu1 %v16880_v53  ;;  %v16964_v53 = vld [vmem:[%s24677_s1 + $0x12ac] ss:$72 sps:$4 sm:$0xff]  }
 0x163   : > { %7582 = vmatpush1.bf16.msra.mxu0 %v16875_v54  ;;  %v16959_v54 = vld [vmem:[%s24677_s1 + $0x12a0] ss:$72 sps:$4 sm:$0xff]  }
 0x164   : > { %7746 = vmatpush1.bf16.msra.mxu1 %v16878_v55  ;;  %7583 = vmatprep.subr.bf16.mxu0 %v16883_v56  ;;  %v16962_v55 = vld [vmem:[%s24677_s1 + $0x12a8] ss:$72 sps:$4 sm:$0xff]   ;;  %v16967_v56 = vld [vmem:[%s24677_s1 + $0x1334] ss:$72 sps:$4 sm:$0xff]  }
 0x165   : > { %7747 = vmatprep.subr.bf16.mxu1 %v16886_v57  ;;  %v16970_v57 = vld [vmem:[%s24677_s1 + $0x133c] ss:$72 sps:$4 sm:$0xff]  }
 0x167   : > { %7584 = vmatpush1.bf16.msra.mxu0 %v16881_v58  ;;  %v16965_v58 = vld [vmem:[%s24677_s1 + $0x1330] ss:$72 sps:$4 sm:$0xff]  }
 0x168   : > { %7748 = vmatpush1.bf16.msra.mxu1 %v16884_v59  ;;  %7585 = vmatprep.subr.bf16.mxu0 %v16889_v60  ;;  %v16968_v59 = vld [vmem:[%s24677_s1 + $0x1338] ss:$72 sps:$4 sm:$0xff]   ;;  %v16973_v60 = vld [vmem:[%s24677_s1 + $0x13c4] ss:$72 sps:$4 sm:$0xff]  }
 0x169   : > { %7749 = vmatprep.subr.bf16.mxu1 %v16892_v61  ;;  %v16976_v61 = vld [vmem:[%s24677_s1 + $0x13cc] ss:$72 sps:$4 sm:$0xff]  }
 0x16b   : > { %7586 = vmatpush1.bf16.msra.mxu0 %v16887_v62  ;;  %v16971_v62 = vld [vmem:[%s24677_s1 + $0x13c0] ss:$72 sps:$4 sm:$0xff]  }
 0x16c   : > { %7750 = vmatpush1.bf16.msra.mxu1 %v16890_v63  ;;  %7587 = vmatprep.subr.bf16.mxu0 %v16895_v0  ;;  %v16974_v63 = vld [vmem:[%s24677_s1 + $0x13c8] ss:$72 sps:$4 sm:$0xff]   ;;  %v16979_v0 = vld [vmem:[%s24677_s1 + $0x1454] ss:$72 sps:$4 sm:$0xff]  }
 0x16d   : > { %7751 = vmatprep.subr.bf16.mxu1 %v16898_v1  ;;  %v16982_v1 = vld [vmem:[%s24677_s1 + $0x145c] ss:$72 sps:$4 sm:$0xff]  }
 0x16f   : > { %7588 = vmatpush1.bf16.msra.mxu0 %v16893_v2  ;;  %v16977_v2 = vld [vmem:[%s24677_s1 + $0x1450] ss:$72 sps:$4 sm:$0xff]  }
 0x170   : > { %7752 = vmatpush1.bf16.msra.mxu1 %v16896_v3  ;;  %7589 = vmatprep.subr.bf16.mxu0 %v16901_v4  ;;  %v16980_v3 = vld [vmem:[%s24677_s1 + $0x1458] ss:$72 sps:$4 sm:$0xff]   ;;  %v16985_v4 = vld [vmem:[%s24677_s1 + $0x14e4] ss:$72 sps:$4 sm:$0xff]  }
 0x171   : > { %7753 = vmatprep.subr.bf16.mxu1 %v16904_v6  ;;  %v16988_v6 = vld [vmem:[%s24677_s1 + $0x14ec] ss:$72 sps:$4 sm:$0xff]  }
 0x173   : > { %7590 = vmatpush1.bf16.msra.mxu0 %v16899_v7  ;;  %v16983_v7 = vld [vmem:[%s24677_s1 + $0x14e0] ss:$72 sps:$4 sm:$0xff]  }
 0x174   : > { %7754 = vmatpush1.bf16.msra.mxu1 %v16902_v8  ;;  %7591 = vmatprep.subr.bf16.mxu0 %v16907_v9  ;;  %v16986_v8 = vld [vmem:[%s24677_s1 + $0x14e8] ss:$72 sps:$4 sm:$0xff]   ;;  %v16991_v9 = vld [vmem:[%s24677_s1 + $0x1574] ss:$72 sps:$4 sm:$0xff]  }
 0x175   : > { %7755 = vmatprep.subr.bf16.mxu1 %v16910_v10  ;;  %v16994_v10 = vld [vmem:[%s24677_s1 + $0x157c] ss:$72 sps:$4 sm:$0xff]  }
 0x177   : > { %7592 = vmatpush1.bf16.msra.mxu0 %v16905_v11  ;;  %v16989_v11 = vld [vmem:[%s24677_s1 + $0x1570] ss:$72 sps:$4 sm:$0xff]  }
 0x178   : > { %7756 = vmatpush1.bf16.msra.mxu1 %v16908_v12  ;;  %7593 = vmatprep.subr.bf16.mxu0 %v16913_v14  ;;  %v16992_v12 = vld [vmem:[%s24677_s1 + $0x1578] ss:$72 sps:$4 sm:$0xff]   ;;  %v16997_v14 = vld [vmem:[%s24677_s1 + $0x1604] ss:$72 sps:$4 sm:$0xff]  }
 0x179   : > { %7757 = vmatprep.subr.bf16.mxu1 %v16916_v15  ;;  %v17000_v15 = vld [vmem:[%s24677_s1 + $0x160c] ss:$72 sps:$4 sm:$0xff]  }
 0x17b   : > { %7594 = vmatpush1.bf16.msra.mxu0 %v16911_v16  ;;  %v16995_v16 = vld [vmem:[%s24677_s1 + $0x1600] ss:$72 sps:$4 sm:$0xff]  }
 0x17c   : > { %7758 = vmatpush1.bf16.msra.mxu1 %v16914_v18  ;;  %7595 = vmatprep.subr.bf16.mxu0 %v16919_v19  ;;  %v16998_v18 = vld [vmem:[%s24677_s1 + $0x1608] ss:$72 sps:$4 sm:$0xff]   ;;  %v17003_v19 = vld [vmem:[%s24677_s1 + $0x1694] ss:$72 sps:$4 sm:$0xff]  }
 0x17d   : > { %7759 = vmatprep.subr.bf16.mxu1 %v16922_v20  ;;  %v17006_v20 = vld [vmem:[%s24677_s1 + $0x169c] ss:$72 sps:$4 sm:$0xff]  }
 0x17f   : > { %7596 = vmatpush1.bf16.msra.mxu0 %v16917_v21  ;;  %v17001_v21 = vld [vmem:[%s24677_s1 + $0x1690] ss:$72 sps:$4 sm:$0xff]  }
 0x180   : > { %7760 = vmatpush1.bf16.msra.mxu1 %v16920_v23  ;;  %7597 = vmatprep.subr.bf16.mxu0 %v16925_v24  ;;  %v17004_v23 = vld [vmem:[%s24677_s1 + $0x1698] ss:$72 sps:$4 sm:$0xff]   ;;  %v17009_v24 = vld [vmem:[%s24677_s1 + $0x1724] ss:$72 sps:$4 sm:$0xff]  }
 0x181   : > { %7761 = vmatprep.subr.bf16.mxu1 %v16928_v25  ;;  %v17012_v25 = vld [vmem:[%s24677_s1 + $0x172c] ss:$72 sps:$4 sm:$0xff]  }
 0x183   : > { %7598 = vmatpush1.bf16.msra.mxu0 %v16923_v27  ;;  %v17007_v27 = vld [vmem:[%s24677_s1 + $0x1720] ss:$72 sps:$4 sm:$0xff]  }
 0x184   : > { %7762 = vmatpush1.bf16.msra.mxu1 %v16926_v28  ;;  %7599 = vmatprep.subr.bf16.mxu0 %v16931_v29  ;;  %v17010_v28 = vld [vmem:[%s24677_s1 + $0x1728] ss:$72 sps:$4 sm:$0xff]   ;;  %v17015_v29 = vld [vmem:[%s24677_s1 + $0x17b4] ss:$72 sps:$4 sm:$0xff]  }
 0x185   : > { %7763 = vmatprep.subr.bf16.mxu1 %v16934_v30  ;;  %v17018_v30 = vld [vmem:[%s24677_s1 + $0x17bc] ss:$72 sps:$4 sm:$0xff]  }
 0x187   : > { %7600 = vmatpush1.bf16.msra.mxu0 %v16929_v33  ;;  %v17013_v33 = vld [vmem:[%s24677_s1 + $0x17b0] ss:$72 sps:$4 sm:$0xff]  }
 0x188   : > { %7764 = vmatpush1.bf16.msra.mxu1 %v16932_v34  ;;  %7601 = vmatprep.subr.bf16.mxu0 %v16937_v35  ;;  %v17016_v34 = vld [vmem:[%s24677_s1 + $0x17b8] ss:$72 sps:$4 sm:$0xff]   ;;  %v17021_v35 = vld [vmem:[%s24677_s1 + $0x1844] ss:$72 sps:$4 sm:$0xff]  }
 0x189   : > { %7765 = vmatprep.subr.bf16.mxu1 %v16940_v36  ;;  %v17024_v36 = vld [vmem:[%s24677_s1 + $0x184c] ss:$72 sps:$4 sm:$0xff]  }
 0x18b   : > { %7602 = vmatpush1.bf16.msra.mxu0 %v16935_v37  ;;  %v17019_v37 = vld [vmem:[%s24677_s1 + $0x1840] ss:$72 sps:$4 sm:$0xff]  }
 0x18c   : > { %7766 = vmatpush1.bf16.msra.mxu1 %v16938_v38  ;;  %7603 = vmatprep.subr.bf16.mxu0 %v16943_v39  ;;  %v17022_v38 = vld [vmem:[%s24677_s1 + $0x1848] ss:$72 sps:$4 sm:$0xff]   ;;  %v17027_v39 = vld [vmem:[%s24677_s1 + $0x18d4] ss:$72 sps:$4 sm:$0xff]  }
 0x18d   : > { %7767 = vmatprep.subr.bf16.mxu1 %v16946_v40  ;;  %v17030_v40 = vld [vmem:[%s24677_s1 + $0x18dc] ss:$72 sps:$4 sm:$0xff]  }
 0x18f   : > { %7604 = vmatpush1.bf16.msra.mxu0 %v16941_v41  ;;  %v17025_v41 = vld [vmem:[%s24677_s1 + $0x18d0] ss:$72 sps:$4 sm:$0xff]  }
 0x190   : > { %7768 = vmatpush1.bf16.msra.mxu1 %v16944_v42  ;;  %7605 = vmatprep.subr.bf16.mxu0 %v16949_v43  ;;  %v17028_v42 = vld [vmem:[%s24677_s1 + $0x18d8] ss:$72 sps:$4 sm:$0xff]   ;;  %v17033_v43 = vld [vmem:[%s24677_s1 + $0x1964] ss:$72 sps:$4 sm:$0xff]  }
 0x191   : > { %7769 = vmatprep.subr.bf16.mxu1 %v16952_v44  ;;  %v17036_v44 = vld [vmem:[%s24677_s1 + $0x196c] ss:$72 sps:$4 sm:$0xff]  }
 0x193   : > { %7606 = vmatpush1.bf16.msra.mxu0 %v16947_v45  ;;  %v17031_v45 = vld [vmem:[%s24677_s1 + $0x1960] ss:$72 sps:$4 sm:$0xff]  }
 0x194   : > { %7770 = vmatpush1.bf16.msra.mxu1 %v16950_v46  ;;  %7616 = vmatprep.subr.bf16.mxu0 %v16955_v47  ;;  %v17034_v46 = vld [vmem:[%s24677_s1 + $0x1968] ss:$72 sps:$4 sm:$0xff]   ;;  %v17039_v47 = vld [vmem:[%s24677_s1 + $0x19f4] ss:$72 sps:$4 sm:$0xff]  }
 0x195   : > { %7780 = vmatprep.subr.bf16.mxu1 %v16958_v49  ;;  %v17042_v49 = vld [vmem:[%s24677_s1 + $0x19fc] ss:$72 sps:$4 sm:$0xff]  }
 0x196   : > { %7608 = vmatmul.mubr.bf16.vlgmr.msra.gmra.mrb[4].mxu0 %v19187_v13 }
 0x197   : > { %7772 = vmatmul.mubr.bf16.vlgmr.msra.gmra.mrb[4].mxu1 %v19187_v13  ;;  %7617 = vmatpush1.bf16.msra.mxu0 %v16953_v50  ;;  %v17037_v50 = vld [vmem:[%s24677_s1 + $0x19f0] ss:$72 sps:$4 sm:$0xff]  }
 0x198   : > { %7781 = vmatpush1.bf16.msra.mxu1 %v16956_v51  ;;  %7618 = vmatprep.subr.bf16.mxu0 %v16961_v52  ;;  %v17040_v51 = vld [vmem:[%s24677_s1 + $0x19f8] ss:$72 sps:$4 sm:$0xff]   ;;  %v17045_v52 = vld [vmem:[%s24677_s1 + $0x1a84] ss:$72 sps:$4 sm:$0xff]  }
 0x199   : > { %7782 = vmatprep.subr.bf16.mxu1 %v16964_v53  ;;  %7648 = vmatprep.mubr.bf16.mxu0 %v19196_v17  ;;  %v17048_v53 = vld [vmem:[%s24677_s1 + $0x1a8c] ss:$72 sps:$4 sm:$0xff]  }
 0x19a   : > { %7812 = vmatprep.mubr.bf16.mxu1 %v19196_v17 }
 0x19b   : > { %7619 = vmatpush1.bf16.msra.mxu0 %v16959_v54  ;;  %v17043_v54 = vld [vmem:[%s24677_s1 + $0x1a80] ss:$72 sps:$4 sm:$0xff]  }
 0x19c   : > { %7783 = vmatpush1.bf16.msra.mxu1 %v16962_v55  ;;  %7620 = vmatprep.subr.bf16.mxu0 %v16967_v56  ;;  %v17046_v55 = vld [vmem:[%s24677_s1 + $0x1a88] ss:$72 sps:$4 sm:$0xff]   ;;  %v17051_v56 = vld [vmem:[%s24677_s1 + $0x1b14] ss:$72 sps:$4 sm:$0xff]  }
 0x19d   : > { %7784 = vmatprep.subr.bf16.mxu1 %v16970_v57  ;;  %v17054_v57 = vld [vmem:[%s24677_s1 + $0x1b1c] ss:$72 sps:$4 sm:$0xff]  }
 0x19f   : > { %7621 = vmatpush1.bf16.msra.mxu0 %v16965_v58  ;;  %v17049_v58 = vld [vmem:[%s24677_s1 + $0x1b10] ss:$72 sps:$4 sm:$0xff]  }
 0x1a0   : > { %7785 = vmatpush1.bf16.msra.mxu1 %v16968_v59  ;;  %7622 = vmatprep.subr.bf16.mxu0 %v16973_v60  ;;  %v17052_v59 = vld [vmem:[%s24677_s1 + $0x1b18] ss:$72 sps:$4 sm:$0xff]   ;;  %v17057_v60 = vld [vmem:[%s24677_s1 + $0x1ba4] ss:$72 sps:$4 sm:$0xff]  }
 0x1a1   : > { %7786 = vmatprep.subr.bf16.mxu1 %v16976_v61  ;;  %v17060_v61 = vld [vmem:[%s24677_s1 + $0x1bac] ss:$72 sps:$4 sm:$0xff]  }
 0x1a3   : > { %7623 = vmatpush1.bf16.msra.mxu0 %v16971_v62  ;;  %v17055_v62 = vld [vmem:[%s24677_s1 + $0x1ba0] ss:$72 sps:$4 sm:$0xff]  }
 0x1a4   : > { %7787 = vmatpush1.bf16.msra.mxu1 %v16974_v63  ;;  %7624 = vmatprep.subr.bf16.mxu0 %v16979_v0  ;;  %v17058_v63 = vld [vmem:[%s24677_s1 + $0x1ba8] ss:$72 sps:$4 sm:$0xff]   ;;  %v17063_v0 = vld [vmem:[%s24677_s1 + $0x1c34] ss:$72 sps:$4 sm:$0xff]  }
 0x1a5   : > { %7788 = vmatprep.subr.bf16.mxu1 %v16982_v1  ;;  %v17066_v1 = vld [vmem:[%s24677_s1 + $0x1c3c] ss:$72 sps:$4 sm:$0xff]  }
 0x1a7   : > { %7625 = vmatpush1.bf16.msra.mxu0 %v16977_v2  ;;  %v17061_v2 = vld [vmem:[%s24677_s1 + $0x1c30] ss:$72 sps:$4 sm:$0xff]  }
 0x1a8   : > { %7789 = vmatpush1.bf16.msra.mxu1 %v16980_v3  ;;  %7626 = vmatprep.subr.bf16.mxu0 %v16985_v4  ;;  %v17064_v3 = vld [vmem:[%s24677_s1 + $0x1c38] ss:$72 sps:$4 sm:$0xff]   ;;  %v17069_v4 = vld [vmem:[%s24677_s1 + $0x1cc4] ss:$72 sps:$4 sm:$0xff]  }
 0x1a9   : > { %7790 = vmatprep.subr.bf16.mxu1 %v16988_v6  ;;  %v17072_v6 = vld [vmem:[%s24677_s1 + $0x1ccc] ss:$72 sps:$4 sm:$0xff]  }
 0x1ab   : > { %7627 = vmatpush1.bf16.msra.mxu0 %v16983_v7  ;;  %v17067_v7 = vld [vmem:[%s24677_s1 + $0x1cc0] ss:$72 sps:$4 sm:$0xff]  }
 0x1ac   : > { %7791 = vmatpush1.bf16.msra.mxu1 %v16986_v8  ;;  %7628 = vmatprep.subr.bf16.mxu0 %v16991_v9  ;;  %v17070_v8 = vld [vmem:[%s24677_s1 + $0x1cc8] ss:$72 sps:$4 sm:$0xff]   ;;  %v17075_v9 = vld [vmem:[%s24677_s1 + $0x1d54] ss:$72 sps:$4 sm:$0xff]  }
 0x1ad   : > { %7792 = vmatprep.subr.bf16.mxu1 %v16994_v10  ;;  %v17078_v10 = vld [vmem:[%s24677_s1 + $0x1d5c] ss:$72 sps:$4 sm:$0xff]  }
 0x1af   : > { %7629 = vmatpush1.bf16.msra.mxu0 %v16989_v11  ;;  %v17073_v11 = vld [vmem:[%s24677_s1 + $0x1d50] ss:$72 sps:$4 sm:$0xff]  }
 0x1b0   : > { %7793 = vmatpush1.bf16.msra.mxu1 %v16992_v12  ;;  %7630 = vmatprep.subr.bf16.mxu0 %v16997_v14  ;;  %v17076_v12 = vld [vmem:[%s24677_s1 + $0x1d58] ss:$72 sps:$4 sm:$0xff]   ;;  %v17081_v14 = vld [vmem:[%s24677_s1 + $0x1de4] ss:$72 sps:$4 sm:$0xff]  }
 0x1b1   : > { %7794 = vmatprep.subr.bf16.mxu1 %v17000_v15  ;;  %v17084_v15 = vld [vmem:[%s24677_s1 + $0x1dec] ss:$72 sps:$4 sm:$0xff]  }
 0x1b3   : > { %7631 = vmatpush1.bf16.msra.mxu0 %v16995_v16  ;;  %v17079_v16 = vld [vmem:[%s24677_s1 + $0x1de0] ss:$72 sps:$4 sm:$0xff]  }
 0x1b4   : > { %7795 = vmatpush1.bf16.msra.mxu1 %v16998_v18  ;;  %7632 = vmatprep.subr.bf16.mxu0 %v17003_v19  ;;  %v17082_v18 = vld [vmem:[%s24677_s1 + $0x1de8] ss:$72 sps:$4 sm:$0xff]   ;;  %v17087_v19 = vld [vmem:[%s24677_s1 + $0x1e74] ss:$72 sps:$4 sm:$0xff]  }
 0x1b5   : > { %7796 = vmatprep.subr.bf16.mxu1 %v17006_v20  ;;  %v17090_v20 = vld [vmem:[%s24677_s1 + $0x1e7c] ss:$72 sps:$4 sm:$0xff]  }
 0x1b7   : > { %7633 = vmatpush1.bf16.msra.mxu0 %v17001_v21 }
 0x1b8   : > { %7797 = vmatpush1.bf16.msra.mxu1 %v17004_v23  ;;  %7634 = vmatprep.subr.bf16.mxu0 %v17009_v24 }
 0x1b9   : > { %7798 = vmatprep.subr.bf16.mxu1 %v17012_v25 }
 0x1bb   : > { %7635 = vmatpush1.bf16.msra.mxu0 %v17007_v27 }
 0x1bc   : > { %7799 = vmatpush1.bf16.msra.mxu1 %v17010_v28  ;;  %7636 = vmatprep.subr.bf16.mxu0 %v17015_v29 }
 0x1bd   : > { %7800 = vmatprep.subr.bf16.mxu1 %v17018_v30  ;;  %v17085_v30 = vld [vmem:[%s24677_s1 + $0x1e70] ss:$72 sps:$4 sm:$0xff]  }
 0x1bf   : > { %7637 = vmatpush1.bf16.msra.mxu0 %v17013_v33  ;;  %v17088_v33 = vld [vmem:[%s24677_s1 + $0x1e78] ss:$72 sps:$4 sm:$0xff]  }
 0x1c0   : > { %7801 = vmatpush1.bf16.msra.mxu1 %v17016_v34  ;;  %7638 = vmatprep.subr.bf16.mxu0 %v17021_v35 }
 0x1c1   : > { %7802 = vmatprep.subr.bf16.mxu1 %v17024_v36  ;;  %v17093_v36 = vld [vmem:[%s24677_s1 + $0x1f04] ss:$72 sps:$4 sm:$0xff]  }
 0x1c3   : > { %7639 = vmatpush1.bf16.msra.mxu0 %v17019_v37  ;;  %v17096_v37 = vld [vmem:[%s24677_s1 + $0x1f0c] ss:$72 sps:$4 sm:$0xff]  }
 0x1c4   : > { %7803 = vmatpush1.bf16.msra.mxu1 %v17022_v38  ;;  %7640 = vmatprep.subr.bf16.mxu0 %v17027_v39  ;;  %v17091_v39 = vld [vmem:[%s24677_s1 + $0x1f00] ss:$72 sps:$4 sm:$0xff]  }
 0x1c5   : > { %7804 = vmatprep.subr.bf16.mxu1 %v17030_v40  ;;  %v17094_v40 = vld [vmem:[%s24677_s1 + $0x1f08] ss:$72 sps:$4 sm:$0xff]  }
 0x1c7   : > { %7641 = vmatpush1.bf16.msra.mxu0 %v17025_v41  ;;  %v17099_v41 = vld [vmem:[%s24677_s1 + $0x1f94] ss:$72 sps:$4 sm:$0xff]  }
 0x1c8   : > { %7805 = vmatpush1.bf16.msra.mxu1 %v17028_v42  ;;  %7642 = vmatprep.subr.bf16.mxu0 %v17033_v43  ;;  %v17102_v42 = vld [vmem:[%s24677_s1 + $0x1f9c] ss:$72 sps:$4 sm:$0xff]   ;;  %v17097_v43 = vld [vmem:[%s24677_s1 + $0x1f90] ss:$72 sps:$4 sm:$0xff]  }
 0x1c9   : > { %7806 = vmatprep.subr.bf16.mxu1 %v17036_v44  ;;  %v17100_v44 = vld [vmem:[%s24677_s1 + $0x1f98] ss:$72 sps:$4 sm:$0xff]  }
 0x1cb   : > { %7643 = vmatpush1.bf16.msra.mxu0 %v17031_v45  ;;  %v17105_v45 = vld [vmem:[%s24677_s1 + $0x2024] ss:$72 sps:$4 sm:$0xff]  }
 0x1cc   : > { %7807 = vmatpush1.bf16.msra.mxu1 %v17034_v46  ;;  %7644 = vmatprep.subr.bf16.mxu0 %v17039_v47  ;;  %v17108_v46 = vld [vmem:[%s24677_s1 + $0x202c] ss:$72 sps:$4 sm:$0xff]   ;;  %v17103_v47 = vld [vmem:[%s24677_s1 + $0x2020] ss:$72 sps:$4 sm:$0xff]  }
 0x1cd   : > { %7808 = vmatprep.subr.bf16.mxu1 %v17042_v49  ;;  %v17106_v49 = vld [vmem:[%s24677_s1 + $0x2028] ss:$72 sps:$4 sm:$0xff]  }
 0x1cf   : > { %7645 = vmatpush1.bf16.msra.mxu0 %v17037_v50  ;;  %v17111_v50 = vld [vmem:[%s24677_s1 + $0x20b4] ss:$72 sps:$4 sm:$0xff]  }
 0x1d0   : > { %7809 = vmatpush1.bf16.msra.mxu1 %v17040_v51  ;;  %7646 = vmatprep.subr.bf16.mxu0 %v17045_v52  ;;  %v17114_v51 = vld [vmem:[%s24677_s1 + $0x20bc] ss:$72 sps:$4 sm:$0xff]   ;;  %v17109_v52 = vld [vmem:[%s24677_s1 + $0x20b0] ss:$72 sps:$4 sm:$0xff]  }
 0x1d1   : > { %7810 = vmatprep.subr.bf16.mxu1 %v17048_v53  ;;  %v17112_v53 = vld [vmem:[%s24677_s1 + $0x20b8] ss:$72 sps:$4 sm:$0xff]  }
 0x1d3   : > { %7647 = vmatpush1.bf16.msra.mxu0 %v17043_v54  ;;  %v17117_v54 = vld [vmem:[%s24677_s1 + $0x2144] ss:$72 sps:$4 sm:$0xff]  }
 0x1d4   : > { %7811 = vmatpush1.bf16.msra.mxu1 %v17046_v55  ;;  %7657 = vmatprep.subr.bf16.mxu0 %v17051_v56  ;;  %v17120_v55 = vld [vmem:[%s24677_s1 + $0x214c] ss:$72 sps:$4 sm:$0xff]   ;;  %v17115_v56 = vld [vmem:[%s24677_s1 + $0x2140] ss:$72 sps:$4 sm:$0xff]  }
 0x1d5   : > { %7821 = vmatprep.subr.bf16.mxu1 %v17054_v57  ;;  %v17118_v57 = vld [vmem:[%s24677_s1 + $0x2148] ss:$72 sps:$4 sm:$0xff]  }
 0x1d6   : > { %7649 = vmatmul.mubr.bf16.vlgmr.msra.gmra.mrb[4].mxu0 %v19389_v22 }
 0x1d7   : > { %7813 = vmatmul.mubr.bf16.vlgmr.msra.gmra.mrb[4].mxu1 %v19389_v22  ;;  %7658 = vmatpush1.bf16.msra.mxu0 %v17049_v58  ;;  %v17123_v58 = vld [vmem:[%s24677_s1 + $0x21d4] ss:$72 sps:$4 sm:$0xff]  }
 0x1d8   : > { %7822 = vmatpush1.bf16.msra.mxu1 %v17052_v59  ;;  %7659 = vmatprep.subr.bf16.mxu0 %v17057_v60  ;;  %v17126_v59 = vld [vmem:[%s24677_s1 + $0x21dc] ss:$72 sps:$4 sm:$0xff]   ;;  %v17121_v60 = vld [vmem:[%s24677_s1 + $0x21d0] ss:$72 sps:$4 sm:$0xff]  }
 0x1d9   : > { %7823 = vmatprep.subr.bf16.mxu1 %v17060_v61  ;;  %7689 = vmatprep.mubr.bf16.mxu0 %v19398_v26  ;;  %v17124_v61 = vld [vmem:[%s24677_s1 + $0x21d8] ss:$72 sps:$4 sm:$0xff]  }
 0x1da   : > { %7853 = vmatprep.mubr.bf16.mxu1 %v19398_v26 }
 0x1db   : > { %7660 = vmatpush1.bf16.msra.mxu0 %v17055_v62  ;;  %v17129_v62 = vld [vmem:[%s24677_s1 + $0x2264] ss:$72 sps:$4 sm:$0xff]  }
 0x1dc   : > { %7824 = vmatpush1.bf16.msra.mxu1 %v17058_v63  ;;  %7661 = vmatprep.subr.bf16.mxu0 %v17063_v0  ;;  %v17132_v63 = vld [vmem:[%s24677_s1 + $0x226c] ss:$72 sps:$4 sm:$0xff]   ;;  %v17127_v0 = vld [vmem:[%s24677_s1 + $0x2260] ss:$72 sps:$4 sm:$0xff]  }
 0x1dd   : > { %7825 = vmatprep.subr.bf16.mxu1 %v17066_v1  ;;  %v17130_v1 = vld [vmem:[%s24677_s1 + $0x2268] ss:$72 sps:$4 sm:$0xff]  }
 0x1df   : > { %7662 = vmatpush1.bf16.msra.mxu0 %v17061_v2  ;;  %v17135_v2 = vld [vmem:[%s24677_s1 + $0x22f4] ss:$72 sps:$4 sm:$0xff]  }
 0x1e0   : > { %7826 = vmatpush1.bf16.msra.mxu1 %v17064_v3  ;;  %7663 = vmatprep.subr.bf16.mxu0 %v17069_v4  ;;  %v17138_v3 = vld [vmem:[%s24677_s1 + $0x22fc] ss:$72 sps:$4 sm:$0xff]   ;;  %v17133_v4 = vld [vmem:[%s24677_s1 + $0x22f0] ss:$72 sps:$4 sm:$0xff]  }
 0x1e1   : > { %7827 = vmatprep.subr.bf16.mxu1 %v17072_v6  ;;  %v17136_v6 = vld [vmem:[%s24677_s1 + $0x22f8] ss:$72 sps:$4 sm:$0xff]  }
 0x1e3   : > { %7664 = vmatpush1.bf16.msra.mxu0 %v17067_v7  ;;  %v17141_v7 = vld [vmem:[%s24677_s1 + $0x2384] ss:$72 sps:$4 sm:$0xff]  }
 0x1e4   : > { %7828 = vmatpush1.bf16.msra.mxu1 %v17070_v8  ;;  %7665 = vmatprep.subr.bf16.mxu0 %v17075_v9  ;;  %v17144_v8 = vld [vmem:[%s24677_s1 + $0x238c] ss:$72 sps:$4 sm:$0xff]   ;;  %v17139_v9 = vld [vmem:[%s24677_s1 + $0x2380] ss:$72 sps:$4 sm:$0xff]  }
 0x1e5   : > { %7829 = vmatprep.subr.bf16.mxu1 %v17078_v10  ;;  %v17142_v10 = vld [vmem:[%s24677_s1 + $0x2388] ss:$72 sps:$4 sm:$0xff]  }
 0x1e7   : > { %7666 = vmatpush1.bf16.msra.mxu0 %v17073_v11  ;;  %v17147_v11 = vld [vmem:[%s24677_s1 + $0x24] ss:$72 sps:$4 sm:$0xff]  }
 0x1e8   : > { %7830 = vmatpush1.bf16.msra.mxu1 %v17076_v12  ;;  %7667 = vmatprep.subr.bf16.mxu0 %v17081_v14  ;;  %v17150_v12 = vld [vmem:[%s24677_s1 + $0x2c] ss:$72 sps:$4 sm:$0xff]   ;;  %v17145_v14 = vld [vmem:[%s24677_s1 + $0x20] ss:$72 sps:$4 sm:$0xff]  }
 0x1e9   : > { %7831 = vmatprep.subr.bf16.mxu1 %v17084_v15  ;;  %v20251_v21 = vpop.f32.mrb[0].mxu0  ;;  %v17148_v15 = vld [vmem:[%s24677_s1 + $0x28] ss:$72 sps:$4 sm:$0xff]  }
 0x1ea   : > { %v20253_v23 = vpop.f32.mrb[0].mxu1  ;;  %v20257_v25 = vpop.f32.mrb[1].mxu0 }
 0x1eb   : > { %v8682_v24 = vpack.c.bf16 %v20253_v23, %v20251_v21  ;;  %v20259_v27 = vpop.f32.mrb[1].mxu1  ;;  %v7367_v29 = vpop.f32.mrb[2].mxu0  ;;  %7668 = vmatpush1.bf16.msra.mxu0 %v17079_v16  ;;  %v17153_v16 = vld [vmem:[%s24677_s1 + $0xb4] ss:$72 sps:$4 sm:$0xff]   ;;  %v17919_v21 = vld [vmem:[%s24677_s1 + $0x160] ss:$72 sps:$4 sm:$0xff]  }
 0x1ec   : > { %v8683_v28 = vpack.c.bf16 %v20259_v27, %v20257_v25  ;;  %7832 = vmatpush1.bf16.msra.mxu1 %v17082_v18  ;;  %v7531_v34 = vpop.f32.mrb[2].mxu1  ;;  %v7368_v35 = vpop.f32.mrb[3].mxu0  ;;  %7669 = vmatprep.subr.bf16.mxu0 %v17087_v19  ;;  %v17156_v18 = vld [vmem:[%s24677_s1 + $0xbc] ss:$72 sps:$4 sm:$0xff]   ;;  %v17151_v19 = vld [vmem:[%s24677_s1 + $0xb0] ss:$72 sps:$4 sm:$0xff]  }
 0x1ed   : > { %7833 = vmatprep.subr.bf16.mxu1 %v17090_v20  ;;  %v7532_v38 = vpop.f32.mrb[3].mxu1  ;;  %v17154_v20 = vld [vmem:[%s24677_s1 + $0xb8] ss:$72 sps:$4 sm:$0xff]   ;;  %v17159_v29 = vld [vmem:[%s24677_s1 + $0x144] ss:$72 sps:$4 sm:$0xff]  }
 0x1ee   : > { %v17160_v34 = vld [vmem:[%s24677_s1 + $0x148] ss:$72 sps:$4 sm:$0xff]   ;;  %v17165_v35 = vld [vmem:[%s24677_s1 + $0x1d4] ss:$72 sps:$4 sm:$0xff]   ;;  %v17166_v38 = vld [vmem:[%s24677_s1 + $0x1d8] ss:$72 sps:$4 sm:$0xff]  }
 0x1ef   : > { %7670 = vmatpush1.bf16.msra.mxu0 %v17085_v30  ;;  %v17162_v30 = vld [vmem:[%s24677_s1 + $0x14c] ss:$72 sps:$4 sm:$0xff]   ;;  %v17925_v27 = vld [vmem:[%s24677_s1 + $0x280] ss:$72 sps:$4 sm:$0xff]  }
 0x1f0   : > { %7834 = vmatpush1.bf16.msra.mxu1 %v17088_v33  ;;  %7671 = vmatprep.subr.bf16.mxu0 %v17093_v36  ;;  %v17157_v33 = vld [vmem:[%s24677_s1 + $0x140] ss:$72 sps:$4 sm:$0xff]   ;;  %v17168_v36 = vld [vmem:[%s24677_s1 + $0x1dc] ss:$72 sps:$4 sm:$0xff]  }
 0x1f1   : > { %7835 = vmatprep.subr.bf16.mxu1 %v17096_v37  ;;  %v17163_v37 = vld [vmem:[%s24677_s1 + $0x1d0] ss:$72 sps:$4 sm:$0xff]   ;;  %v17921_v25 = vld [vmem:[%s24677_s1 + $0x164] ss:$72 sps:$4 sm:$0xff]   ;;  %v17924_v23 = vld [vmem:[%s24677_s1 + $0x1f4] ss:$72 sps:$4 sm:$0xff]  }
 0x1f3   : > { %7672 = vmatpush1.bf16.msra.mxu0 %v17091_v39  ;;  %v17171_v39 = vld [vmem:[%s24677_s1 + $0x264] ss:$72 sps:$4 sm:$0xff]  }
 0x1f4   : > { %7836 = vmatpush1.bf16.msra.mxu1 %v17094_v40  ;;  %7673 = vmatprep.subr.bf16.mxu0 %v17099_v41  ;;  %v17174_v40 = vld [vmem:[%s24677_s1 + $0x26c] ss:$72 sps:$4 sm:$0xff]   ;;  %v17169_v41 = vld [vmem:[%s24677_s1 + $0x260] ss:$72 sps:$4 sm:$0xff]  }
 0x1f5   : > { %7837 = vmatprep.subr.bf16.mxu1 %v17102_v42  ;;  %v17172_v42 = vld [vmem:[%s24677_s1 + $0x268] ss:$72 sps:$4 sm:$0xff]  }
 0x1f7   : > { %7674 = vmatpush1.bf16.msra.mxu0 %v17097_v43  ;;  %v17177_v43 = vld [vmem:[%s24677_s1 + $0x2f4] ss:$72 sps:$4 sm:$0xff]  }
 0x1f8   : > { %7838 = vmatpush1.bf16.msra.mxu1 %v17100_v44  ;;  %7675 = vmatprep.subr.bf16.mxu0 %v17105_v45  ;;  %v17180_v44 = vld [vmem:[%s24677_s1 + $0x2fc] ss:$72 sps:$4 sm:$0xff]   ;;  %v17175_v45 = vld [vmem:[%s24677_s1 + $0x2f0] ss:$72 sps:$4 sm:$0xff]  }
 0x1f9   : > { %7839 = vmatprep.subr.bf16.mxu1 %v17108_v46  ;;  %v17178_v46 = vld [vmem:[%s24677_s1 + $0x2f8] ss:$72 sps:$4 sm:$0xff]  }
 0x1fb   : > { %7676 = vmatpush1.bf16.msra.mxu0 %v17103_v47  ;;  %v17183_v47 = vld [vmem:[%s24677_s1 + $0x384] ss:$72 sps:$4 sm:$0xff]  }
 0x1fc   : > { %7840 = vmatpush1.bf16.msra.mxu1 %v17106_v49  ;;  %7677 = vmatprep.subr.bf16.mxu0 %v17111_v50  ;;  %v17186_v49 = vld [vmem:[%s24677_s1 + $0x38c] ss:$72 sps:$4 sm:$0xff]   ;;  %v17181_v50 = vld [vmem:[%s24677_s1 + $0x380] ss:$72 sps:$4 sm:$0xff]  }
 0x1fd   : > { %7841 = vmatprep.subr.bf16.mxu1 %v17114_v51  ;;  %v17184_v51 = vld [vmem:[%s24677_s1 + $0x388] ss:$72 sps:$4 sm:$0xff]  }
 0x1ff   : > { %7678 = vmatpush1.bf16.msra.mxu0 %v17109_v52  ;;  %v17189_v52 = vld [vmem:[%s24677_s1 + $0x414] ss:$72 sps:$4 sm:$0xff]  }
 0x200   : > { %7842 = vmatpush1.bf16.msra.mxu1 %v17112_v53  ;;  %7679 = vmatprep.subr.bf16.mxu0 %v17117_v54  ;;  %v17192_v53 = vld [vmem:[%s24677_s1 + $0x41c] ss:$72 sps:$4 sm:$0xff]   ;;  %v17187_v54 = vld [vmem:[%s24677_s1 + $0x410] ss:$72 sps:$4 sm:$0xff]  }
 0x201   : > { %7843 = vmatprep.subr.bf16.mxu1 %v17120_v55  ;;  %v17190_v55 = vld [vmem:[%s24677_s1 + $0x418] ss:$72 sps:$4 sm:$0xff]  }
 0x203   : > { %7680 = vmatpush1.bf16.msra.mxu0 %v17115_v56  ;;  %v17195_v56 = vld [vmem:[%s24677_s1 + $0x4a4] ss:$72 sps:$4 sm:$0xff]  }
 0x204   : > { %7844 = vmatpush1.bf16.msra.mxu1 %v17118_v57  ;;  %7681 = vmatprep.subr.bf16.mxu0 %v17123_v58  ;;  %v17198_v57 = vld [vmem:[%s24677_s1 + $0x4ac] ss:$72 sps:$4 sm:$0xff]   ;;  %v17193_v58 = vld [vmem:[%s24677_s1 + $0x4a0] ss:$72 sps:$4 sm:$0xff]  }
 0x205   : > { %7845 = vmatprep.subr.bf16.mxu1 %v17126_v59  ;;  %v17196_v59 = vld [vmem:[%s24677_s1 + $0x4a8] ss:$72 sps:$4 sm:$0xff]  }
 0x207   : > { %7682 = vmatpush1.bf16.msra.mxu0 %v17121_v60  ;;  %v17201_v60 = vld [vmem:[%s24677_s1 + $0x534] ss:$72 sps:$4 sm:$0xff]  }
 0x208   : > { %7846 = vmatpush1.bf16.msra.mxu1 %v17124_v61  ;;  %7683 = vmatprep.subr.bf16.mxu0 %v17129_v62  ;;  %v17204_v61 = vld [vmem:[%s24677_s1 + $0x53c] ss:$72 sps:$4 sm:$0xff]   ;;  %v17199_v62 = vld [vmem:[%s24677_s1 + $0x530] ss:$72 sps:$4 sm:$0xff]  }
 0x209   : > { %7847 = vmatprep.subr.bf16.mxu1 %v17132_v63  ;;  %v17202_v63 = vld [vmem:[%s24677_s1 + $0x538] ss:$72 sps:$4 sm:$0xff]  }
 0x20b   : > { %7684 = vmatpush1.bf16.msra.mxu0 %v17127_v0  ;;  %v17207_v0 = vld [vmem:[%s24677_s1 + $0x5c4] ss:$72 sps:$4 sm:$0xff]  }
 0x20c   : > { %7848 = vmatpush1.bf16.msra.mxu1 %v17130_v1  ;;  %7685 = vmatprep.subr.bf16.mxu0 %v17135_v2  ;;  %v17210_v1 = vld [vmem:[%s24677_s1 + $0x5cc] ss:$72 sps:$4 sm:$0xff]   ;;  %v17205_v2 = vld [vmem:[%s24677_s1 + $0x5c0] ss:$72 sps:$4 sm:$0xff]  }
 0x20d   : > { %7849 = vmatprep.subr.bf16.mxu1 %v17138_v3  ;;  %v17208_v3 = vld [vmem:[%s24677_s1 + $0x5c8] ss:$72 sps:$4 sm:$0xff]  }
 0x20f   : > { %7686 = vmatpush1.bf16.msra.mxu0 %v17133_v4  ;;  %v17213_v4 = vld [vmem:[%s24677_s1 + $0x654] ss:$72 sps:$4 sm:$0xff]  }
 0x210   : > { %7850 = vmatpush1.bf16.msra.mxu1 %v17136_v6  ;;  %7687 = vmatprep.subr.bf16.mxu0 %v17141_v7  ;;  %v17216_v6 = vld [vmem:[%s24677_s1 + $0x65c] ss:$72 sps:$4 sm:$0xff]   ;;  %v17211_v7 = vld [vmem:[%s24677_s1 + $0x650] ss:$72 sps:$4 sm:$0xff]  }
 0x211   : > { %7851 = vmatprep.subr.bf16.mxu1 %v17144_v8  ;;  %v17214_v8 = vld [vmem:[%s24677_s1 + $0x658] ss:$72 sps:$4 sm:$0xff]  }
 0x213   : > { %7688 = vmatpush1.bf16.msra.mxu0 %v17139_v9  ;;  %v17219_v9 = vld [vmem:[%s24677_s1 + $0x6e4] ss:$72 sps:$4 sm:$0xff]  }
 0x214   : > { %7852 = vmatpush1.bf16.msra.mxu1 %v17142_v10  ;;  %7862 = vmatprep.subr.bf16.mxu0 %v17147_v11  ;;  %v17222_v10 = vld [vmem:[%s24677_s1 + $0x6ec] ss:$72 sps:$4 sm:$0xff]   ;;  %v17217_v11 = vld [vmem:[%s24677_s1 + $0x6e0] ss:$72 sps:$4 sm:$0xff]  }
 0x215   : > { %8026 = vmatprep.subr.bf16.mxu1 %v17150_v12  ;;  %v17220_v12 = vld [vmem:[%s24677_s1 + $0x6e8] ss:$72 sps:$4 sm:$0xff]  }
 0x216   : > { %7690 = vmatmul.mubr.bf16.vlgmr.msra.gmra.mrb[4].mxu0 %v19585_v31 }
 0x217   : > { %7854 = vmatmul.mubr.bf16.vlgmr.msra.gmra.mrb[4].mxu1 %v19585_v31  ;;  %7863 = vmatpush1.bf16.msra.mxu0 %v17145_v14  ;;  %v17225_v14 = vld [vmem:[%s24677_s1 + $0x774] ss:$72 sps:$4 sm:$0xff]  }
 0x218   : > { %8027 = vmatpush1.bf16.msra.mxu1 %v17148_v15  ;;  %7864 = vmatprep.subr.bf16.mxu0 %v17153_v16  ;;  %v17228_v15 = vld [vmem:[%s24677_s1 + $0x77c] ss:$72 sps:$4 sm:$0xff]   ;;  %v17223_v16 = vld [vmem:[%s24677_s1 + $0x770] ss:$72 sps:$4 sm:$0xff]  }
 0x219   : > { %8028 = vmatprep.subr.bf16.mxu1 %v17156_v18  ;;  %7894 = vmatprep.mubr.bf16.mxu0 %v18917_v48  ;;  %v17226_v18 = vld [vmem:[%s24677_s1 + $0x778] ss:$72 sps:$4 sm:$0xff]  }
 0x21a   : > { %8058 = vmatprep.mubr.bf16.mxu1 %v18917_v48 }
 0x21b   : > { %7865 = vmatpush1.bf16.msra.mxu0 %v17151_v19  ;;  %v17231_v19 = vld [vmem:[%s24677_s1 + $0x804] ss:$72 sps:$4 sm:$0xff]  }
 0x21c   : > { %8029 = vmatpush1.bf16.msra.mxu1 %v17154_v20  ;;  %7866 = vmatprep.subr.bf16.mxu0 %v17159_v29  ;;  %v17234_v20 = vld [vmem:[%s24677_s1 + $0x80c] ss:$72 sps:$4 sm:$0xff]   ;;  %v17229_v29 = vld [vmem:[%s24677_s1 + $0x800] ss:$72 sps:$4 sm:$0xff]  }
 0x21d   : > { %8030 = vmatprep.subr.bf16.mxu1 %v17162_v30  ;;  %v17232_v30 = vld [vmem:[%s24677_s1 + $0x808] ss:$72 sps:$4 sm:$0xff]  }
 0x21f   : > { %7867 = vmatpush1.bf16.msra.mxu0 %v17157_v33  ;;  %v17237_v33 = vld [vmem:[%s24677_s1 + $0x894] ss:$72 sps:$4 sm:$0xff]  }
 0x220   : > { %8031 = vmatpush1.bf16.msra.mxu1 %v17160_v34  ;;  %7868 = vmatprep.subr.bf16.mxu0 %v17165_v35  ;;  %v17240_v34 = vld [vmem:[%s24677_s1 + $0x89c] ss:$72 sps:$4 sm:$0xff]   ;;  %v17235_v35 = vld [vmem:[%s24677_s1 + $0x890] ss:$72 sps:$4 sm:$0xff]  }
 0x221   : > { %8032 = vmatprep.subr.bf16.mxu1 %v17168_v36  ;;  %v17238_v36 = vld [vmem:[%s24677_s1 + $0x898] ss:$72 sps:$4 sm:$0xff]  }
 0x223   : > { %7869 = vmatpush1.bf16.msra.mxu0 %v17163_v37  ;;  %v17243_v37 = vld [vmem:[%s24677_s1 + $0x924] ss:$72 sps:$4 sm:$0xff]  }
 0x224   : > { %8033 = vmatpush1.bf16.msra.mxu1 %v17166_v38  ;;  %7870 = vmatprep.subr.bf16.mxu0 %v17171_v39  ;;  %v17246_v38 = vld [vmem:[%s24677_s1 + $0x92c] ss:$72 sps:$4 sm:$0xff]   ;;  %v17241_v39 = vld [vmem:[%s24677_s1 + $0x920] ss:$72 sps:$4 sm:$0xff]  }
 0x225   : > { %8034 = vmatprep.subr.bf16.mxu1 %v17174_v40  ;;  %v17244_v40 = vld [vmem:[%s24677_s1 + $0x928] ss:$72 sps:$4 sm:$0xff]  }
 0x227   : > { %7871 = vmatpush1.bf16.msra.mxu0 %v17169_v41  ;;  %v17249_v41 = vld [vmem:[%s24677_s1 + $0x9b4] ss:$72 sps:$4 sm:$0xff]  }
 0x228   : > { %8035 = vmatpush1.bf16.msra.mxu1 %v17172_v42  ;;  %7872 = vmatprep.subr.bf16.mxu0 %v17177_v43  ;;  %v17252_v42 = vld [vmem:[%s24677_s1 + $0x9bc] ss:$72 sps:$4 sm:$0xff]   ;;  %v17247_v43 = vld [vmem:[%s24677_s1 + $0x9b0] ss:$72 sps:$4 sm:$0xff]  }
 0x229   : > { %8036 = vmatprep.subr.bf16.mxu1 %v17180_v44  ;;  %v17250_v44 = vld [vmem:[%s24677_s1 + $0x9b8] ss:$72 sps:$4 sm:$0xff]  }
 0x22b   : > { %7873 = vmatpush1.bf16.msra.mxu0 %v17175_v45  ;;  %v17255_v45 = vld [vmem:[%s24677_s1 + $0xa44] ss:$72 sps:$4 sm:$0xff]  }
 0x22c   : > { %8037 = vmatpush1.bf16.msra.mxu1 %v17178_v46  ;;  %7874 = vmatprep.subr.bf16.mxu0 %v17183_v47  ;;  %v17258_v46 = vld [vmem:[%s24677_s1 + $0xa4c] ss:$72 sps:$4 sm:$0xff]   ;;  %v17253_v47 = vld [vmem:[%s24677_s1 + $0xa40] ss:$72 sps:$4 sm:$0xff]  }
 0x22d   : > { %8038 = vmatprep.subr.bf16.mxu1 %v17186_v49  ;;  %v17256_v49 = vld [vmem:[%s24677_s1 + $0xa48] ss:$72 sps:$4 sm:$0xff]  }
 0x22f   : > { %7875 = vmatpush1.bf16.msra.mxu0 %v17181_v50  ;;  %v17261_v50 = vld [vmem:[%s24677_s1 + $0xad4] ss:$72 sps:$4 sm:$0xff]  }
 0x230   : > { %8039 = vmatpush1.bf16.msra.mxu1 %v17184_v51  ;;  %7876 = vmatprep.subr.bf16.mxu0 %v17189_v52  ;;  %v17264_v51 = vld [vmem:[%s24677_s1 + $0xadc] ss:$72 sps:$4 sm:$0xff]   ;;  %v17259_v52 = vld [vmem:[%s24677_s1 + $0xad0] ss:$72 sps:$4 sm:$0xff]  }
 0x231   : > { %8040 = vmatprep.subr.bf16.mxu1 %v17192_v53  ;;  %v17262_v53 = vld [vmem:[%s24677_s1 + $0xad8] ss:$72 sps:$4 sm:$0xff]  }
 0x233   : > { %7877 = vmatpush1.bf16.msra.mxu0 %v17187_v54  ;;  %v17267_v54 = vld [vmem:[%s24677_s1 + $0xb64] ss:$72 sps:$4 sm:$0xff]  }
 0x234   : > { %8041 = vmatpush1.bf16.msra.mxu1 %v17190_v55  ;;  %7878 = vmatprep.subr.bf16.mxu0 %v17195_v56  ;;  %v17270_v55 = vld [vmem:[%s24677_s1 + $0xb6c] ss:$72 sps:$4 sm:$0xff]   ;;  %v17265_v56 = vld [vmem:[%s24677_s1 + $0xb60] ss:$72 sps:$4 sm:$0xff]  }
 0x235   : > { %8042 = vmatprep.subr.bf16.mxu1 %v17198_v57  ;;  %v17268_v57 = vld [vmem:[%s24677_s1 + $0xb68] ss:$72 sps:$4 sm:$0xff]  }
 0x237   : > { %7879 = vmatpush1.bf16.msra.mxu0 %v17193_v58  ;;  %v17273_v58 = vld [vmem:[%s24677_s1 + $0xbf4] ss:$72 sps:$4 sm:$0xff]  }
 0x238   : > { %8043 = vmatpush1.bf16.msra.mxu1 %v17196_v59  ;;  %7880 = vmatprep.subr.bf16.mxu0 %v17201_v60  ;;  %v17276_v59 = vld [vmem:[%s24677_s1 + $0xbfc] ss:$72 sps:$4 sm:$0xff]   ;;  %v17271_v60 = vld [vmem:[%s24677_s1 + $0xbf0] ss:$72 sps:$4 sm:$0xff]  }
 0x239   : > { %8044 = vmatprep.subr.bf16.mxu1 %v17204_v61  ;;  %v17274_v61 = vld [vmem:[%s24677_s1 + $0xbf8] ss:$72 sps:$4 sm:$0xff]  }
 0x23b   : > { %7881 = vmatpush1.bf16.msra.mxu0 %v17199_v62  ;;  %v17279_v62 = vld [vmem:[%s24677_s1 + $0xc84] ss:$72 sps:$4 sm:$0xff]  }
 0x23c   : > { %8045 = vmatpush1.bf16.msra.mxu1 %v17202_v63  ;;  %7882 = vmatprep.subr.bf16.mxu0 %v17207_v0  ;;  %v17282_v63 = vld [vmem:[%s24677_s1 + $0xc8c] ss:$72 sps:$4 sm:$0xff]   ;;  %v17277_v0 = vld [vmem:[%s24677_s1 + $0xc80] ss:$72 sps:$4 sm:$0xff]  }
 0x23d   : > { %8046 = vmatprep.subr.bf16.mxu1 %v17210_v1  ;;  %v17280_v1 = vld [vmem:[%s24677_s1 + $0xc88] ss:$72 sps:$4 sm:$0xff]  }
 0x23f   : > { %7883 = vmatpush1.bf16.msra.mxu0 %v17205_v2  ;;  %v17285_v2 = vld [vmem:[%s24677_s1 + $0xd14] ss:$72 sps:$4 sm:$0xff]  }
 0x240   : > { %8047 = vmatpush1.bf16.msra.mxu1 %v17208_v3  ;;  %7884 = vmatprep.subr.bf16.mxu0 %v17213_v4  ;;  %v17288_v3 = vld [vmem:[%s24677_s1 + $0xd1c] ss:$72 sps:$4 sm:$0xff]   ;;  %v17283_v4 = vld [vmem:[%s24677_s1 + $0xd10] ss:$72 sps:$4 sm:$0xff]  }
 0x241   : > { %8048 = vmatprep.subr.bf16.mxu1 %v17216_v6  ;;  %v17286_v6 = vld [vmem:[%s24677_s1 + $0xd18] ss:$72 sps:$4 sm:$0xff]  }
 0x243   : > { %7885 = vmatpush1.bf16.msra.mxu0 %v17211_v7  ;;  %v17291_v7 = vld [vmem:[%s24677_s1 + $0xda4] ss:$72 sps:$4 sm:$0xff]  }
 0x244   : > { %8049 = vmatpush1.bf16.msra.mxu1 %v17214_v8  ;;  %7886 = vmatprep.subr.bf16.mxu0 %v17219_v9  ;;  %v17294_v8 = vld [vmem:[%s24677_s1 + $0xdac] ss:$72 sps:$4 sm:$0xff]   ;;  %v17289_v9 = vld [vmem:[%s24677_s1 + $0xda0] ss:$72 sps:$4 sm:$0xff]  }
 0x245   : > { %8050 = vmatprep.subr.bf16.mxu1 %v17222_v10  ;;  %v17292_v10 = vld [vmem:[%s24677_s1 + $0xda8] ss:$72 sps:$4 sm:$0xff]  }
 0x247   : > { %7887 = vmatpush1.bf16.msra.mxu0 %v17217_v11  ;;  %v17297_v11 = vld [vmem:[%s24677_s1 + $0xe34] ss:$72 sps:$4 sm:$0xff]  }
 0x248   : > { %8051 = vmatpush1.bf16.msra.mxu1 %v17220_v12  ;;  %7888 = vmatprep.subr.bf16.mxu0 %v17225_v14  ;;  %v17300_v12 = vld [vmem:[%s24677_s1 + $0xe3c] ss:$72 sps:$4 sm:$0xff]   ;;  %v17295_v14 = vld [vmem:[%s24677_s1 + $0xe30] ss:$72 sps:$4 sm:$0xff]  }
 0x249   : > { %8052 = vmatprep.subr.bf16.mxu1 %v17228_v15  ;;  %v17298_v15 = vld [vmem:[%s24677_s1 + $0xe38] ss:$72 sps:$4 sm:$0xff]  }
 0x24b   : > { %7889 = vmatpush1.bf16.msra.mxu0 %v17223_v16  ;;  %v17303_v16 = vld [vmem:[%s24677_s1 + $0xec4] ss:$72 sps:$4 sm:$0xff]  }
 0x24c   : > { %8053 = vmatpush1.bf16.msra.mxu1 %v17226_v18  ;;  %7890 = vmatprep.subr.bf16.mxu0 %v17231_v19  ;;  %v17306_v18 = vld [vmem:[%s24677_s1 + $0xecc] ss:$72 sps:$4 sm:$0xff]   ;;  %v17301_v19 = vld [vmem:[%s24677_s1 + $0xec0] ss:$72 sps:$4 sm:$0xff]  }
 0x24d   : > { %8054 = vmatprep.subr.bf16.mxu1 %v17234_v20  ;;  %v17304_v20 = vld [vmem:[%s24677_s1 + $0xec8] ss:$72 sps:$4 sm:$0xff]  }
 0x24f   : > { %7891 = vmatpush1.bf16.msra.mxu0 %v17229_v29  ;;  %v17309_v29 = vld [vmem:[%s24677_s1 + $0xf54] ss:$72 sps:$4 sm:$0xff]  }
 0x250   : > { %8055 = vmatpush1.bf16.msra.mxu1 %v17232_v30  ;;  %7892 = vmatprep.subr.bf16.mxu0 %v17237_v33  ;;  %v17312_v30 = vld [vmem:[%s24677_s1 + $0xf5c] ss:$72 sps:$4 sm:$0xff]   ;;  %v17307_v33 = vld [vmem:[%s24677_s1 + $0xf50] ss:$72 sps:$4 sm:$0xff]  }
 0x251   : > { %8056 = vmatprep.subr.bf16.mxu1 %v17240_v34  ;;  %v17310_v34 = vld [vmem:[%s24677_s1 + $0xf58] ss:$72 sps:$4 sm:$0xff]  }
 0x253   : > { %7893 = vmatpush1.bf16.msra.mxu0 %v17235_v35  ;;  %v17315_v35 = vld [vmem:[%s24677_s1 + $0xfe4] ss:$72 sps:$4 sm:$0xff]  }
 0x254   : > { %8057 = vmatpush1.bf16.msra.mxu1 %v17238_v36  ;;  %7903 = vmatprep.subr.bf16.mxu0 %v17243_v37  ;;  %v17318_v36 = vld [vmem:[%s24677_s1 + $0xfec] ss:$72 sps:$4 sm:$0xff]   ;;  %v17313_v37 = vld [vmem:[%s24677_s1 + $0xfe0] ss:$72 sps:$4 sm:$0xff]  }
 0x255   : > { %8067 = vmatprep.subr.bf16.mxu1 %v17246_v38  ;;  %v17316_v38 = vld [vmem:[%s24677_s1 + $0xfe8] ss:$72 sps:$4 sm:$0xff]  }
 0x256   : > { %7895 = vmatmul.mubr.bf16.vlgmr.msra.gmra.mrb[8].mxu0 %v18979_v5 }
 0x257   : > { %8059 = vmatmul.mubr.bf16.vlgmr.msra.gmra.mrb[8].mxu1 %v18979_v5  ;;  %7904 = vmatpush1.bf16.msra.mxu0 %v17241_v39  ;;  %v17321_v39 = vld [vmem:[%s24677_s1 + $0x1074] ss:$72 sps:$4 sm:$0xff]  }
 0x258   : > { %8068 = vmatpush1.bf16.msra.mxu1 %v17244_v40  ;;  %7905 = vmatprep.subr.bf16.mxu0 %v17249_v41  ;;  %v17324_v40 = vld [vmem:[%s24677_s1 + $0x107c] ss:$72 sps:$4 sm:$0xff]   ;;  %v17319_v41 = vld [vmem:[%s24677_s1 + $0x1070] ss:$72 sps:$4 sm:$0xff]  }
 0x259   : > { %8069 = vmatprep.subr.bf16.mxu1 %v17252_v42  ;;  %7935 = vmatprep.mubr.bf16.mxu0 %v19059_v32  ;;  %v17322_v42 = vld [vmem:[%s24677_s1 + $0x1078] ss:$72 sps:$4 sm:$0xff]  }
 0x25a   : > { %8099 = vmatprep.mubr.bf16.mxu1 %v19059_v32 }
 0x25b   : > { %7906 = vmatpush1.bf16.msra.mxu0 %v17247_v43  ;;  %v17327_v43 = vld [vmem:[%s24677_s1 + $0x1104] ss:$72 sps:$4 sm:$0xff]  }
 0x25c   : > { %8070 = vmatpush1.bf16.msra.mxu1 %v17250_v44  ;;  %7907 = vmatprep.subr.bf16.mxu0 %v17255_v45  ;;  %v17330_v44 = vld [vmem:[%s24677_s1 + $0x110c] ss:$72 sps:$4 sm:$0xff]   ;;  %v17325_v45 = vld [vmem:[%s24677_s1 + $0x1100] ss:$72 sps:$4 sm:$0xff]  }
 0x25d   : > { %8071 = vmatprep.subr.bf16.mxu1 %v17258_v46  ;;  %v17328_v46 = vld [vmem:[%s24677_s1 + $0x1108] ss:$72 sps:$4 sm:$0xff]  }
 0x25f   : > { %7908 = vmatpush1.bf16.msra.mxu0 %v17253_v47  ;;  %v17333_v47 = vld [vmem:[%s24677_s1 + $0x1194] ss:$72 sps:$4 sm:$0xff]  }
 0x260   : > { %8072 = vmatpush1.bf16.msra.mxu1 %v17256_v49  ;;  %7909 = vmatprep.subr.bf16.mxu0 %v17261_v50  ;;  %v17336_v49 = vld [vmem:[%s24677_s1 + $0x119c] ss:$72 sps:$4 sm:$0xff]   ;;  %v17331_v50 = vld [vmem:[%s24677_s1 + $0x1190] ss:$72 sps:$4 sm:$0xff]  }
 0x261   : > { %8073 = vmatprep.subr.bf16.mxu1 %v17264_v51  ;;  %v17334_v51 = vld [vmem:[%s24677_s1 + $0x1198] ss:$72 sps:$4 sm:$0xff]  }
 0x263   : > { %7910 = vmatpush1.bf16.msra.mxu0 %v17259_v52  ;;  %v17339_v52 = vld [vmem:[%s24677_s1 + $0x1224] ss:$72 sps:$4 sm:$0xff]  }
 0x264   : > { %8074 = vmatpush1.bf16.msra.mxu1 %v17262_v53  ;;  %7911 = vmatprep.subr.bf16.mxu0 %v17267_v54  ;;  %v17342_v53 = vld [vmem:[%s24677_s1 + $0x122c] ss:$72 sps:$4 sm:$0xff]   ;;  %v17337_v54 = vld [vmem:[%s24677_s1 + $0x1220] ss:$72 sps:$4 sm:$0xff]  }
 0x265   : > { %8075 = vmatprep.subr.bf16.mxu1 %v17270_v55  ;;  %v17340_v55 = vld [vmem:[%s24677_s1 + $0x1228] ss:$72 sps:$4 sm:$0xff]  }
 0x267   : > { %7912 = vmatpush1.bf16.msra.mxu0 %v17265_v56  ;;  %v17345_v56 = vld [vmem:[%s24677_s1 + $0x12b4] ss:$72 sps:$4 sm:$0xff]  }
 0x268   : > { %8076 = vmatpush1.bf16.msra.mxu1 %v17268_v57  ;;  %7913 = vmatprep.subr.bf16.mxu0 %v17273_v58  ;;  %v17348_v57 = vld [vmem:[%s24677_s1 + $0x12bc] ss:$72 sps:$4 sm:$0xff]   ;;  %v17343_v58 = vld [vmem:[%s24677_s1 + $0x12b0] ss:$72 sps:$4 sm:$0xff]  }
 0x269   : > { %8077 = vmatprep.subr.bf16.mxu1 %v17276_v59  ;;  %v17346_v59 = vld [vmem:[%s24677_s1 + $0x12b8] ss:$72 sps:$4 sm:$0xff]  }
 0x26b   : > { %7914 = vmatpush1.bf16.msra.mxu0 %v17271_v60  ;;  %v17351_v60 = vld [vmem:[%s24677_s1 + $0x1344] ss:$72 sps:$4 sm:$0xff]  }
 0x26c   : > { %8078 = vmatpush1.bf16.msra.mxu1 %v17274_v61  ;;  %7915 = vmatprep.subr.bf16.mxu0 %v17279_v62  ;;  %v17354_v61 = vld [vmem:[%s24677_s1 + $0x134c] ss:$72 sps:$4 sm:$0xff]   ;;  %v17349_v62 = vld [vmem:[%s24677_s1 + $0x1340] ss:$72 sps:$4 sm:$0xff]  }
 0x26d   : > { %8079 = vmatprep.subr.bf16.mxu1 %v17282_v63  ;;  %v17352_v63 = vld [vmem:[%s24677_s1 + $0x1348] ss:$72 sps:$4 sm:$0xff]  }
 0x26f   : > { %7916 = vmatpush1.bf16.msra.mxu0 %v17277_v0  ;;  %v17357_v0 = vld [vmem:[%s24677_s1 + $0x13d4] ss:$72 sps:$4 sm:$0xff]  }
 0x270   : > { %8080 = vmatpush1.bf16.msra.mxu1 %v17280_v1  ;;  %7917 = vmatprep.subr.bf16.mxu0 %v17285_v2  ;;  %v17360_v1 = vld [vmem:[%s24677_s1 + $0x13dc] ss:$72 sps:$4 sm:$0xff]   ;;  %v17355_v2 = vld [vmem:[%s24677_s1 + $0x13d0] ss:$72 sps:$4 sm:$0xff]  }
 0x271   : > { %8081 = vmatprep.subr.bf16.mxu1 %v17288_v3  ;;  %v17358_v3 = vld [vmem:[%s24677_s1 + $0x13d8] ss:$72 sps:$4 sm:$0xff]  }
 0x273   : > { %7918 = vmatpush1.bf16.msra.mxu0 %v17283_v4  ;;  %v17363_v4 = vld [vmem:[%s24677_s1 + $0x1464] ss:$72 sps:$4 sm:$0xff]  }
 0x274   : > { %8082 = vmatpush1.bf16.msra.mxu1 %v17286_v6  ;;  %7919 = vmatprep.subr.bf16.mxu0 %v17291_v7  ;;  %v17366_v6 = vld [vmem:[%s24677_s1 + $0x146c] ss:$72 sps:$4 sm:$0xff]   ;;  %v17361_v7 = vld [vmem:[%s24677_s1 + $0x1460] ss:$72 sps:$4 sm:$0xff]  }
 0x275   : > { %8083 = vmatprep.subr.bf16.mxu1 %v17294_v8  ;;  %v17364_v8 = vld [vmem:[%s24677_s1 + $0x1468] ss:$72 sps:$4 sm:$0xff]  }
 0x277   : > { %7920 = vmatpush1.bf16.msra.mxu0 %v17289_v9  ;;  %v17369_v9 = vld [vmem:[%s24677_s1 + $0x14f4] ss:$72 sps:$4 sm:$0xff]  }
 0x278   : > { %8084 = vmatpush1.bf16.msra.mxu1 %v17292_v10  ;;  %7921 = vmatprep.subr.bf16.mxu0 %v17297_v11  ;;  %v17372_v10 = vld [vmem:[%s24677_s1 + $0x14fc] ss:$72 sps:$4 sm:$0xff]   ;;  %v17367_v11 = vld [vmem:[%s24677_s1 + $0x14f0] ss:$72 sps:$4 sm:$0xff]  }
 0x279   : > { %8085 = vmatprep.subr.bf16.mxu1 %v17300_v12  ;;  %v17370_v12 = vld [vmem:[%s24677_s1 + $0x14f8] ss:$72 sps:$4 sm:$0xff]  }
 0x27b   : > { %7922 = vmatpush1.bf16.msra.mxu0 %v17295_v14  ;;  %v17375_v14 = vld [vmem:[%s24677_s1 + $0x1584] ss:$72 sps:$4 sm:$0xff]  }
 0x27c   : > { %8086 = vmatpush1.bf16.msra.mxu1 %v17298_v15  ;;  %7923 = vmatprep.subr.bf16.mxu0 %v17303_v16  ;;  %v17378_v15 = vld [vmem:[%s24677_s1 + $0x158c] ss:$72 sps:$4 sm:$0xff]   ;;  %v17373_v16 = vld [vmem:[%s24677_s1 + $0x1580] ss:$72 sps:$4 sm:$0xff]  }
 0x27d   : > { %8087 = vmatprep.subr.bf16.mxu1 %v17306_v18  ;;  %v17376_v18 = vld [vmem:[%s24677_s1 + $0x1588] ss:$72 sps:$4 sm:$0xff]  }
 0x27f   : > { %7924 = vmatpush1.bf16.msra.mxu0 %v17301_v19  ;;  %v17381_v19 = vld [vmem:[%s24677_s1 + $0x1614] ss:$72 sps:$4 sm:$0xff]  }
 0x280   : > { %8088 = vmatpush1.bf16.msra.mxu1 %v17304_v20  ;;  %7925 = vmatprep.subr.bf16.mxu0 %v17309_v29  ;;  %v17384_v20 = vld [vmem:[%s24677_s1 + $0x161c] ss:$72 sps:$4 sm:$0xff]   ;;  %v17379_v29 = vld [vmem:[%s24677_s1 + $0x1610] ss:$72 sps:$4 sm:$0xff]  }
 0x281   : > { %8089 = vmatprep.subr.bf16.mxu1 %v17312_v30  ;;  %v17382_v30 = vld [vmem:[%s24677_s1 + $0x1618] ss:$72 sps:$4 sm:$0xff]  }
 0x283   : > { %7926 = vmatpush1.bf16.msra.mxu0 %v17307_v33  ;;  %v17387_v33 = vld [vmem:[%s24677_s1 + $0x16a4] ss:$72 sps:$4 sm:$0xff]  }
 0x284   : > { %8090 = vmatpush1.bf16.msra.mxu1 %v17310_v34  ;;  %7927 = vmatprep.subr.bf16.mxu0 %v17315_v35  ;;  %v17390_v34 = vld [vmem:[%s24677_s1 + $0x16ac] ss:$72 sps:$4 sm:$0xff]   ;;  %v17385_v35 = vld [vmem:[%s24677_s1 + $0x16a0] ss:$72 sps:$4 sm:$0xff]  }
 0x285   : > { %8091 = vmatprep.subr.bf16.mxu1 %v17318_v36  ;;  %v17388_v36 = vld [vmem:[%s24677_s1 + $0x16a8] ss:$72 sps:$4 sm:$0xff]  }
 0x287   : > { %7928 = vmatpush1.bf16.msra.mxu0 %v17313_v37  ;;  %v17393_v37 = vld [vmem:[%s24677_s1 + $0x1734] ss:$72 sps:$4 sm:$0xff]  }
 0x288   : > { %8092 = vmatpush1.bf16.msra.mxu1 %v17316_v38  ;;  %7929 = vmatprep.subr.bf16.mxu0 %v17321_v39  ;;  %v17396_v38 = vld [vmem:[%s24677_s1 + $0x173c] ss:$72 sps:$4 sm:$0xff]   ;;  %v17391_v39 = vld [vmem:[%s24677_s1 + $0x1730] ss:$72 sps:$4 sm:$0xff]  }
 0x289   : > { %8093 = vmatprep.subr.bf16.mxu1 %v17324_v40  ;;  %v17394_v40 = vld [vmem:[%s24677_s1 + $0x1738] ss:$72 sps:$4 sm:$0xff]  }
 0x28b   : > { %7930 = vmatpush1.bf16.msra.mxu0 %v17319_v41  ;;  %v17399_v41 = vld [vmem:[%s24677_s1 + $0x17c4] ss:$72 sps:$4 sm:$0xff]  }
 0x28c   : > { %8094 = vmatpush1.bf16.msra.mxu1 %v17322_v42  ;;  %7931 = vmatprep.subr.bf16.mxu0 %v17327_v43  ;;  %v17402_v42 = vld [vmem:[%s24677_s1 + $0x17cc] ss:$72 sps:$4 sm:$0xff]   ;;  %v17397_v43 = vld [vmem:[%s24677_s1 + $0x17c0] ss:$72 sps:$4 sm:$0xff]  }
 0x28d   : > { %8095 = vmatprep.subr.bf16.mxu1 %v17330_v44  ;;  %v17400_v44 = vld [vmem:[%s24677_s1 + $0x17c8] ss:$72 sps:$4 sm:$0xff]  }
 0x28f   : > { %7932 = vmatpush1.bf16.msra.mxu0 %v17325_v45  ;;  %v17405_v45 = vld [vmem:[%s24677_s1 + $0x1854] ss:$72 sps:$4 sm:$0xff]  }
 0x290   : > { %8096 = vmatpush1.bf16.msra.mxu1 %v17328_v46  ;;  %7933 = vmatprep.subr.bf16.mxu0 %v17333_v47  ;;  %v17408_v46 = vld [vmem:[%s24677_s1 + $0x185c] ss:$72 sps:$4 sm:$0xff]   ;;  %v17403_v47 = vld [vmem:[%s24677_s1 + $0x1850] ss:$72 sps:$4 sm:$0xff]  }
 0x291   : > { %8097 = vmatprep.subr.bf16.mxu1 %v17336_v49  ;;  %v17406_v49 = vld [vmem:[%s24677_s1 + $0x1858] ss:$72 sps:$4 sm:$0xff]  }
 0x293   : > { %7934 = vmatpush1.bf16.msra.mxu0 %v17331_v50  ;;  %v17411_v50 = vld [vmem:[%s24677_s1 + $0x18e4] ss:$72 sps:$4 sm:$0xff]  }
 0x294   : > { %8098 = vmatpush1.bf16.msra.mxu1 %v17334_v51  ;;  %7944 = vmatprep.subr.bf16.mxu0 %v17339_v52  ;;  %v17414_v51 = vld [vmem:[%s24677_s1 + $0x18ec] ss:$72 sps:$4 sm:$0xff]   ;;  %v17409_v52 = vld [vmem:[%s24677_s1 + $0x18e0] ss:$72 sps:$4 sm:$0xff]  }
 0x295   : > { %8108 = vmatprep.subr.bf16.mxu1 %v17342_v53  ;;  %v17412_v53 = vld [vmem:[%s24677_s1 + $0x18e8] ss:$72 sps:$4 sm:$0xff]  }
 0x296   : > { %7936 = vmatmul.mubr.bf16.vlgmr.msra.gmra.mrb[8].mxu0 %v19187_v13 }
 0x297   : > { %8100 = vmatmul.mubr.bf16.vlgmr.msra.gmra.mrb[8].mxu1 %v19187_v13  ;;  %7945 = vmatpush1.bf16.msra.mxu0 %v17337_v54  ;;  %v17417_v54 = vld [vmem:[%s24677_s1 + $0x1974] ss:$72 sps:$4 sm:$0xff]  }
 0x298   : > { %8109 = vmatpush1.bf16.msra.mxu1 %v17340_v55  ;;  %7946 = vmatprep.subr.bf16.mxu0 %v17345_v56  ;;  %v17420_v55 = vld [vmem:[%s24677_s1 + $0x197c] ss:$72 sps:$4 sm:$0xff]   ;;  %v17415_v56 = vld [vmem:[%s24677_s1 + $0x1970] ss:$72 sps:$4 sm:$0xff]  }
 0x299   : > { %8110 = vmatprep.subr.bf16.mxu1 %v17348_v57  ;;  %7976 = vmatprep.mubr.bf16.mxu0 %v19196_v17  ;;  %v17418_v57 = vld [vmem:[%s24677_s1 + $0x1978] ss:$72 sps:$4 sm:$0xff]  }
 0x29a   : > { %8140 = vmatprep.mubr.bf16.mxu1 %v19196_v17 }
 0x29b   : > { %7947 = vmatpush1.bf16.msra.mxu0 %v17343_v58  ;;  %v17423_v58 = vld [vmem:[%s24677_s1 + $0x1a04] ss:$72 sps:$4 sm:$0xff]  }
 0x29c   : > { %8111 = vmatpush1.bf16.msra.mxu1 %v17346_v59  ;;  %7948 = vmatprep.subr.bf16.mxu0 %v17351_v60  ;;  %v17426_v59 = vld [vmem:[%s24677_s1 + $0x1a0c] ss:$72 sps:$4 sm:$0xff]   ;;  %v17421_v60 = vld [vmem:[%s24677_s1 + $0x1a00] ss:$72 sps:$4 sm:$0xff]  }
 0x29d   : > { %8112 = vmatprep.subr.bf16.mxu1 %v17354_v61  ;;  %v17424_v61 = vld [vmem:[%s24677_s1 + $0x1a08] ss:$72 sps:$4 sm:$0xff]  }
 0x29f   : > { %7949 = vmatpush1.bf16.msra.mxu0 %v17349_v62  ;;  %v17429_v62 = vld [vmem:[%s24677_s1 + $0x1a94] ss:$72 sps:$4 sm:$0xff]  }
 0x2a0   : > { %8113 = vmatpush1.bf16.msra.mxu1 %v17352_v63  ;;  %7950 = vmatprep.subr.bf16.mxu0 %v17357_v0  ;;  %v17432_v63 = vld [vmem:[%s24677_s1 + $0x1a9c] ss:$72 sps:$4 sm:$0xff]   ;;  %v17427_v0 = vld [vmem:[%s24677_s1 + $0x1a90] ss:$72 sps:$4 sm:$0xff]  }
 0x2a1   : > { %8114 = vmatprep.subr.bf16.mxu1 %v17360_v1  ;;  %v17430_v1 = vld [vmem:[%s24677_s1 + $0x1a98] ss:$72 sps:$4 sm:$0xff]  }
 0x2a3   : > { %7951 = vmatpush1.bf16.msra.mxu0 %v17355_v2  ;;  %v17435_v2 = vld [vmem:[%s24677_s1 + $0x1b24] ss:$72 sps:$4 sm:$0xff]  }
 0x2a4   : > { %8115 = vmatpush1.bf16.msra.mxu1 %v17358_v3  ;;  %7952 = vmatprep.subr.bf16.mxu0 %v17363_v4  ;;  %v17438_v3 = vld [vmem:[%s24677_s1 + $0x1b2c] ss:$72 sps:$4 sm:$0xff]   ;;  %v17433_v4 = vld [vmem:[%s24677_s1 + $0x1b20] ss:$72 sps:$4 sm:$0xff]  }
 0x2a5   : > { %8116 = vmatprep.subr.bf16.mxu1 %v17366_v6  ;;  %v17436_v6 = vld [vmem:[%s24677_s1 + $0x1b28] ss:$72 sps:$4 sm:$0xff]  }
 0x2a7   : > { %7953 = vmatpush1.bf16.msra.mxu0 %v17361_v7  ;;  %v17441_v7 = vld [vmem:[%s24677_s1 + $0x1bb4] ss:$72 sps:$4 sm:$0xff]  }
 0x2a8   : > { %8117 = vmatpush1.bf16.msra.mxu1 %v17364_v8  ;;  %7954 = vmatprep.subr.bf16.mxu0 %v17369_v9  ;;  %v17444_v8 = vld [vmem:[%s24677_s1 + $0x1bbc] ss:$72 sps:$4 sm:$0xff]   ;;  %v17439_v9 = vld [vmem:[%s24677_s1 + $0x1bb0] ss:$72 sps:$4 sm:$0xff]  }
 0x2a9   : > { %8118 = vmatprep.subr.bf16.mxu1 %v17372_v10  ;;  %v17442_v10 = vld [vmem:[%s24677_s1 + $0x1bb8] ss:$72 sps:$4 sm:$0xff]  }
 0x2ab   : > { %7955 = vmatpush1.bf16.msra.mxu0 %v17367_v11  ;;  %v17447_v11 = vld [vmem:[%s24677_s1 + $0x1c44] ss:$72 sps:$4 sm:$0xff]  }
 0x2ac   : > { %8119 = vmatpush1.bf16.msra.mxu1 %v17370_v12  ;;  %7956 = vmatprep.subr.bf16.mxu0 %v17375_v14  ;;  %v17450_v12 = vld [vmem:[%s24677_s1 + $0x1c4c] ss:$72 sps:$4 sm:$0xff]   ;;  %v17445_v14 = vld [vmem:[%s24677_s1 + $0x1c40] ss:$72 sps:$4 sm:$0xff]  }
 0x2ad   : > { %8120 = vmatprep.subr.bf16.mxu1 %v17378_v15  ;;  %v17448_v15 = vld [vmem:[%s24677_s1 + $0x1c48] ss:$72 sps:$4 sm:$0xff]  }
 0x2af   : > { %7957 = vmatpush1.bf16.msra.mxu0 %v17373_v16  ;;  %v17453_v16 = vld [vmem:[%s24677_s1 + $0x1cd4] ss:$72 sps:$4 sm:$0xff]  }
 0x2b0   : > { %8121 = vmatpush1.bf16.msra.mxu1 %v17376_v18  ;;  %7958 = vmatprep.subr.bf16.mxu0 %v17381_v19  ;;  %v17456_v18 = vld [vmem:[%s24677_s1 + $0x1cdc] ss:$72 sps:$4 sm:$0xff]   ;;  %v17451_v19 = vld [vmem:[%s24677_s1 + $0x1cd0] ss:$72 sps:$4 sm:$0xff]  }
 0x2b1   : > { %8122 = vmatprep.subr.bf16.mxu1 %v17384_v20  ;;  %v17454_v20 = vld [vmem:[%s24677_s1 + $0x1cd8] ss:$72 sps:$4 sm:$0xff]  }
 0x2b3   : > { %7959 = vmatpush1.bf16.msra.mxu0 %v17379_v29  ;;  %v17459_v29 = vld [vmem:[%s24677_s1 + $0x1d64] ss:$72 sps:$4 sm:$0xff]  }
 0x2b4   : > { %8123 = vmatpush1.bf16.msra.mxu1 %v17382_v30  ;;  %7960 = vmatprep.subr.bf16.mxu0 %v17387_v33  ;;  %v17462_v30 = vld [vmem:[%s24677_s1 + $0x1d6c] ss:$72 sps:$4 sm:$0xff]   ;;  %v17457_v33 = vld [vmem:[%s24677_s1 + $0x1d60] ss:$72 sps:$4 sm:$0xff]  }
 0x2b5   : > { %8124 = vmatprep.subr.bf16.mxu1 %v17390_v34  ;;  %v17460_v34 = vld [vmem:[%s24677_s1 + $0x1d68] ss:$72 sps:$4 sm:$0xff]  }
 0x2b7   : > { %7961 = vmatpush1.bf16.msra.mxu0 %v17385_v35  ;;  %v17465_v35 = vld [vmem:[%s24677_s1 + $0x1df4] ss:$72 sps:$4 sm:$0xff]  }
 0x2b8   : > { %8125 = vmatpush1.bf16.msra.mxu1 %v17388_v36  ;;  %7962 = vmatprep.subr.bf16.mxu0 %v17393_v37  ;;  %v17468_v36 = vld [vmem:[%s24677_s1 + $0x1dfc] ss:$72 sps:$4 sm:$0xff]   ;;  %v17463_v37 = vld [vmem:[%s24677_s1 + $0x1df0] ss:$72 sps:$4 sm:$0xff]  }
 0x2b9   : > { %8126 = vmatprep.subr.bf16.mxu1 %v17396_v38  ;;  %v17466_v38 = vld [vmem:[%s24677_s1 + $0x1df8] ss:$72 sps:$4 sm:$0xff]  }
 0x2bb   : > { %7963 = vmatpush1.bf16.msra.mxu0 %v17391_v39  ;;  %v17471_v39 = vld [vmem:[%s24677_s1 + $0x1e84] ss:$72 sps:$4 sm:$0xff]  }
 0x2bc   : > { %8127 = vmatpush1.bf16.msra.mxu1 %v17394_v40  ;;  %7964 = vmatprep.subr.bf16.mxu0 %v17399_v41  ;;  %v17474_v40 = vld [vmem:[%s24677_s1 + $0x1e8c] ss:$72 sps:$4 sm:$0xff]  }
 0x2bd   : > { %8128 = vmatprep.subr.bf16.mxu1 %v17402_v42 }
 0x2bf   : > { %7965 = vmatpush1.bf16.msra.mxu0 %v17397_v43 }
 0x2c0   : > { %8129 = vmatpush1.bf16.msra.mxu1 %v17400_v44  ;;  %7966 = vmatprep.subr.bf16.mxu0 %v17405_v45 }
 0x2c1   : > { %8130 = vmatprep.subr.bf16.mxu1 %v17408_v46 }
 0x2c3   : > { %7967 = vmatpush1.bf16.msra.mxu0 %v17403_v47 }
 0x2c4   : > { %8131 = vmatpush1.bf16.msra.mxu1 %v17406_v49  ;;  %7968 = vmatprep.subr.bf16.mxu0 %v17411_v50  ;;  %v17469_v49 = vld [vmem:[%s24677_s1 + $0x1e80] ss:$72 sps:$4 sm:$0xff]  }
 0x2c5   : > { %8132 = vmatprep.subr.bf16.mxu1 %v17414_v51  ;;  %v17472_v50 = vld [vmem:[%s24677_s1 + $0x1e88] ss:$72 sps:$4 sm:$0xff]  }
 0x2c7   : > { %7969 = vmatpush1.bf16.msra.mxu0 %v17409_v52 }
 0x2c8   : > { %8133 = vmatpush1.bf16.msra.mxu1 %v17412_v53  ;;  %7970 = vmatprep.subr.bf16.mxu0 %v17417_v54  ;;  %v17477_v53 = vld [vmem:[%s24677_s1 + $0x1f14] ss:$72 sps:$4 sm:$0xff]  }
 0x2c9   : > { %8134 = vmatprep.subr.bf16.mxu1 %v17420_v55  ;;  %v17480_v54 = vld [vmem:[%s24677_s1 + $0x1f1c] ss:$72 sps:$4 sm:$0xff]  }
 0x2cb   : > { %7971 = vmatpush1.bf16.msra.mxu0 %v17415_v56  ;;  %v17475_v56 = vld [vmem:[%s24677_s1 + $0x1f10] ss:$72 sps:$4 sm:$0xff]  }
 0x2cc   : > { %8135 = vmatpush1.bf16.msra.mxu1 %v17418_v57  ;;  %7972 = vmatprep.subr.bf16.mxu0 %v17423_v58  ;;  %v17478_v57 = vld [vmem:[%s24677_s1 + $0x1f18] ss:$72 sps:$4 sm:$0xff]   ;;  %v17483_v58 = vld [vmem:[%s24677_s1 + $0x1fa4] ss:$72 sps:$4 sm:$0xff]  }
 0x2cd   : > { %8136 = vmatprep.subr.bf16.mxu1 %v17426_v59  ;;  %v17486_v59 = vld [vmem:[%s24677_s1 + $0x1fac] ss:$72 sps:$4 sm:$0xff]  }
 0x2cf   : > { %7973 = vmatpush1.bf16.msra.mxu0 %v17421_v60  ;;  %v17481_v60 = vld [vmem:[%s24677_s1 + $0x1fa0] ss:$72 sps:$4 sm:$0xff]  }
 0x2d0   : > { %8137 = vmatpush1.bf16.msra.mxu1 %v17424_v61  ;;  %7974 = vmatprep.subr.bf16.mxu0 %v17429_v62  ;;  %v17484_v61 = vld [vmem:[%s24677_s1 + $0x1fa8] ss:$72 sps:$4 sm:$0xff]   ;;  %v17489_v62 = vld [vmem:[%s24677_s1 + $0x2034] ss:$72 sps:$4 sm:$0xff]  }
 0x2d1   : > { %8138 = vmatprep.subr.bf16.mxu1 %v17432_v63  ;;  %v17492_v63 = vld [vmem:[%s24677_s1 + $0x203c] ss:$72 sps:$4 sm:$0xff]  }
 0x2d3   : > { %7975 = vmatpush1.bf16.msra.mxu0 %v17427_v0  ;;  %v17487_v0 = vld [vmem:[%s24677_s1 + $0x2030] ss:$72 sps:$4 sm:$0xff]  }
 0x2d4   : > { %8139 = vmatpush1.bf16.msra.mxu1 %v17430_v1  ;;  %7985 = vmatprep.subr.bf16.mxu0 %v17435_v2  ;;  %v17490_v1 = vld [vmem:[%s24677_s1 + $0x2038] ss:$72 sps:$4 sm:$0xff]   ;;  %v17495_v2 = vld [vmem:[%s24677_s1 + $0x20c4] ss:$72 sps:$4 sm:$0xff]  }
 0x2d5   : > { %8149 = vmatprep.subr.bf16.mxu1 %v17438_v3  ;;  %v17498_v3 = vld [vmem:[%s24677_s1 + $0x20cc] ss:$72 sps:$4 sm:$0xff]  }
 0x2d6   : > { %7977 = vmatmul.mubr.bf16.vlgmr.msra.gmra.mrb[8].mxu0 %v19389_v22 }
 0x2d7   : > { %8141 = vmatmul.mubr.bf16.vlgmr.msra.gmra.mrb[8].mxu1 %v19389_v22  ;;  %7986 = vmatpush1.bf16.msra.mxu0 %v17433_v4  ;;  %v17493_v4 = vld [vmem:[%s24677_s1 + $0x20c0] ss:$72 sps:$4 sm:$0xff]  }
 0x2d8   : > { %8150 = vmatpush1.bf16.msra.mxu1 %v17436_v6  ;;  %7987 = vmatprep.subr.bf16.mxu0 %v17441_v7  ;;  %v17496_v6 = vld [vmem:[%s24677_s1 + $0x20c8] ss:$72 sps:$4 sm:$0xff]   ;;  %v17501_v7 = vld [vmem:[%s24677_s1 + $0x2154] ss:$72 sps:$4 sm:$0xff]  }
 0x2d9   : > { %8151 = vmatprep.subr.bf16.mxu1 %v17444_v8  ;;  %8017 = vmatprep.mubr.bf16.mxu0 %v19398_v26  ;;  %v17504_v8 = vld [vmem:[%s24677_s1 + $0x215c] ss:$72 sps:$4 sm:$0xff]  }
 0x2da   : > { %8181 = vmatprep.mubr.bf16.mxu1 %v19398_v26 }
 0x2db   : > { %7988 = vmatpush1.bf16.msra.mxu0 %v17439_v9  ;;  %v17499_v9 = vld [vmem:[%s24677_s1 + $0x2150] ss:$72 sps:$4 sm:$0xff]  }
 0x2dc   : > { %8152 = vmatpush1.bf16.msra.mxu1 %v17442_v10  ;;  %7989 = vmatprep.subr.bf16.mxu0 %v17447_v11  ;;  %v17502_v10 = vld [vmem:[%s24677_s1 + $0x2158] ss:$72 sps:$4 sm:$0xff]   ;;  %v17507_v11 = vld [vmem:[%s24677_s1 + $0x21e4] ss:$72 sps:$4 sm:$0xff]  }
 0x2dd   : > { %8153 = vmatprep.subr.bf16.mxu1 %v17450_v12  ;;  %v17510_v12 = vld [vmem:[%s24677_s1 + $0x21ec] ss:$72 sps:$4 sm:$0xff]  }
 0x2df   : > { %7990 = vmatpush1.bf16.msra.mxu0 %v17445_v14  ;;  %v17505_v14 = vld [vmem:[%s24677_s1 + $0x21e0] ss:$72 sps:$4 sm:$0xff]  }
 0x2e0   : > { %8154 = vmatpush1.bf16.msra.mxu1 %v17448_v15  ;;  %7991 = vmatprep.subr.bf16.mxu0 %v17453_v16  ;;  %v17508_v15 = vld [vmem:[%s24677_s1 + $0x21e8] ss:$72 sps:$4 sm:$0xff]   ;;  %v17513_v16 = vld [vmem:[%s24677_s1 + $0x2274] ss:$72 sps:$4 sm:$0xff]  }
 0x2e1   : > { %8155 = vmatprep.subr.bf16.mxu1 %v17456_v18  ;;  %v17516_v18 = vld [vmem:[%s24677_s1 + $0x227c] ss:$72 sps:$4 sm:$0xff]  }
 0x2e3   : > { %7992 = vmatpush1.bf16.msra.mxu0 %v17451_v19  ;;  %v17511_v19 = vld [vmem:[%s24677_s1 + $0x2270] ss:$72 sps:$4 sm:$0xff]  }
 0x2e4   : > { %8156 = vmatpush1.bf16.msra.mxu1 %v17454_v20  ;;  %7993 = vmatprep.subr.bf16.mxu0 %v17459_v29  ;;  %v17514_v20 = vld [vmem:[%s24677_s1 + $0x2278] ss:$72 sps:$4 sm:$0xff]   ;;  %v17519_v29 = vld [vmem:[%s24677_s1 + $0x2304] ss:$72 sps:$4 sm:$0xff]  }
 0x2e5   : > { %8157 = vmatprep.subr.bf16.mxu1 %v17462_v30  ;;  %v17522_v30 = vld [vmem:[%s24677_s1 + $0x230c] ss:$72 sps:$4 sm:$0xff]  }
 0x2e7   : > { %7994 = vmatpush1.bf16.msra.mxu0 %v17457_v33  ;;  %v17517_v33 = vld [vmem:[%s24677_s1 + $0x2300] ss:$72 sps:$4 sm:$0xff]  }
 0x2e8   : > { %8158 = vmatpush1.bf16.msra.mxu1 %v17460_v34  ;;  %7995 = vmatprep.subr.bf16.mxu0 %v17465_v35  ;;  %v17520_v34 = vld [vmem:[%s24677_s1 + $0x2308] ss:$72 sps:$4 sm:$0xff]   ;;  %v17525_v35 = vld [vmem:[%s24677_s1 + $0x2394] ss:$72 sps:$4 sm:$0xff]  }
 0x2e9   : > { %8159 = vmatprep.subr.bf16.mxu1 %v17468_v36  ;;  %v21047_v41 = vpop.f32.mrb[4].mxu0  ;;  %v17528_v36 = vld [vmem:[%s24677_s1 + $0x239c] ss:$72 sps:$4 sm:$0xff]  }
 0x2ea   : > { %v21049_v42 = vpop.f32.mrb[4].mxu1  ;;  %v21053_v44 = vpop.f32.mrb[5].mxu0 }
 0x2eb   : > { %v8684_v43 = vpack.c.bf16 %v21049_v42, %v21047_v41  ;;  %v21055_v45 = vpop.f32.mrb[5].mxu1  ;;  %v7695_v47 = vpop.f32.mrb[6].mxu0  ;;  %7996 = vmatpush1.bf16.msra.mxu0 %v17463_v37  ;;  %v17523_v37 = vld [vmem:[%s24677_s1 + $0x2390] ss:$72 sps:$4 sm:$0xff]   ;;  %v17933_v42 = vld [vmem:[%s24677_s1 + $0x3a4] ss:$72 sps:$4 sm:$0xff]  }
 0x2ec   : > { %v8685_v46 = vpack.c.bf16 %v21055_v45, %v21053_v44  ;;  %8160 = vmatpush1.bf16.msra.mxu1 %v17466_v38  ;;  %v7859_v51 = vpop.f32.mrb[6].mxu1  ;;  %v7696_v52 = vpop.f32.mrb[7].mxu0  ;;  %7997 = vmatprep.subr.bf16.mxu0 %v17471_v39  ;;  %v17526_v38 = vld [vmem:[%s24677_s1 + $0x2398] ss:$72 sps:$4 sm:$0xff]   ;;  %v17531_v39 = vld [vmem:[%s24677_s1 + $0x34] ss:$72 sps:$4 sm:$0xff]  }
 0x2ed   : > { %8161 = vmatprep.subr.bf16.mxu1 %v17474_v40  ;;  %v7860_v55 = vpop.f32.mrb[7].mxu1  ;;  %v17534_v40 = vld [vmem:[%s24677_s1 + $0x3c] ss:$72 sps:$4 sm:$0xff]   ;;  %v17529_v47 = vld [vmem:[%s24677_s1 + $0x30] ss:$72 sps:$4 sm:$0xff]  }
 0x2ee   : > { %v17540_v51 = vld [vmem:[%s24677_s1 + $0xcc] ss:$72 sps:$4 sm:$0xff]   ;;  %v17535_v52 = vld [vmem:[%s24677_s1 + $0xc0] ss:$72 sps:$4 sm:$0xff]   ;;  %v17546_v55 = vld [vmem:[%s24677_s1 + $0x15c] ss:$72 sps:$4 sm:$0xff]  }
 0x2ef   : > { %7998 = vmatpush1.bf16.msra.mxu0 %v17469_v49  ;;  %v17532_v49 = vld [vmem:[%s24677_s1 + $0x38] ss:$72 sps:$4 sm:$0xff]   ;;  %v17936_v44 = vld [vmem:[%s24677_s1 + $0x434] ss:$72 sps:$4 sm:$0xff]  }
 0x2f0   : > { %8162 = vmatpush1.bf16.msra.mxu1 %v17472_v50  ;;  %7999 = vmatprep.subr.bf16.mxu0 %v17477_v53  ;;  %v17537_v50 = vld [vmem:[%s24677_s1 + $0xc4] ss:$72 sps:$4 sm:$0xff]   ;;  %v17538_v53 = vld [vmem:[%s24677_s1 + $0xc8] ss:$72 sps:$4 sm:$0xff]  }
 0x2f1   : > { %8163 = vmatprep.subr.bf16.mxu1 %v17480_v54  ;;  %v17543_v54 = vld [vmem:[%s24677_s1 + $0x154] ss:$72 sps:$4 sm:$0xff]   ;;  %v17928_v41 = vld [vmem:[%s24677_s1 + $0x310] ss:$72 sps:$4 sm:$0xff]  }
 0x2f2   : > { %v17934_v45 = vld [vmem:[%s24677_s1 + $0x430] ss:$72 sps:$4 sm:$0xff]  }
 0x2f3   : > { %8000 = vmatpush1.bf16.msra.mxu0 %v17475_v56  ;;  %v17541_v56 = vld [vmem:[%s24677_s1 + $0x150] ss:$72 sps:$4 sm:$0xff]  }
 0x2f4   : > { %8164 = vmatpush1.bf16.msra.mxu1 %v17478_v57  ;;  %8001 = vmatprep.subr.bf16.mxu0 %v17483_v58  ;;  %v17544_v57 = vld [vmem:[%s24677_s1 + $0x158] ss:$72 sps:$4 sm:$0xff]   ;;  %v17549_v58 = vld [vmem:[%s24677_s1 + $0x1e4] ss:$72 sps:$4 sm:$0xff]  }
 0x2f5   : > { %8165 = vmatprep.subr.bf16.mxu1 %v17486_v59  ;;  %v17552_v59 = vld [vmem:[%s24677_s1 + $0x1ec] ss:$72 sps:$4 sm:$0xff]  }
 0x2f7   : > { %8002 = vmatpush1.bf16.msra.mxu0 %v17481_v60  ;;  %v17547_v60 = vld [vmem:[%s24677_s1 + $0x1e0] ss:$72 sps:$4 sm:$0xff]  }
 0x2f8   : > { %8166 = vmatpush1.bf16.msra.mxu1 %v17484_v61  ;;  %8003 = vmatprep.subr.bf16.mxu0 %v17489_v62  ;;  %v17550_v61 = vld [vmem:[%s24677_s1 + $0x1e8] ss:$72 sps:$4 sm:$0xff]   ;;  %v17555_v62 = vld [vmem:[%s24677_s1 + $0x274] ss:$72 sps:$4 sm:$0xff]  }
 0x2f9   : > { %8167 = vmatprep.subr.bf16.mxu1 %v17492_v63  ;;  %v17558_v63 = vld [vmem:[%s24677_s1 + $0x27c] ss:$72 sps:$4 sm:$0xff]  }
 0x2fb   : > { %8004 = vmatpush1.bf16.msra.mxu0 %v17487_v0  ;;  %v17553_v0 = vld [vmem:[%s24677_s1 + $0x270] ss:$72 sps:$4 sm:$0xff]  }
 0x2fc   : > { %8168 = vmatpush1.bf16.msra.mxu1 %v17490_v1  ;;  %8005 = vmatprep.subr.bf16.mxu0 %v17495_v2  ;;  %v17556_v1 = vld [vmem:[%s24677_s1 + $0x278] ss:$72 sps:$4 sm:$0xff]   ;;  %v17561_v2 = vld [vmem:[%s24677_s1 + $0x304] ss:$72 sps:$4 sm:$0xff]  }
 0x2fd   : > { %8169 = vmatprep.subr.bf16.mxu1 %v17498_v3  ;;  %v17564_v3 = vld [vmem:[%s24677_s1 + $0x30c] ss:$72 sps:$4 sm:$0xff]  }
 0x2ff   : > { %8006 = vmatpush1.bf16.msra.mxu0 %v17493_v4  ;;  %v17559_v4 = vld [vmem:[%s24677_s1 + $0x300] ss:$72 sps:$4 sm:$0xff]  }
 0x300   : > { %8170 = vmatpush1.bf16.msra.mxu1 %v17496_v6  ;;  %8007 = vmatprep.subr.bf16.mxu0 %v17501_v7  ;;  %v17562_v6 = vld [vmem:[%s24677_s1 + $0x308] ss:$72 sps:$4 sm:$0xff]   ;;  %v17567_v7 = vld [vmem:[%s24677_s1 + $0x394] ss:$72 sps:$4 sm:$0xff]  }
 0x301   : > { %8171 = vmatprep.subr.bf16.mxu1 %v17504_v8  ;;  %v17570_v8 = vld [vmem:[%s24677_s1 + $0x39c] ss:$72 sps:$4 sm:$0xff]  }
 0x303   : > { %8008 = vmatpush1.bf16.msra.mxu0 %v17499_v9  ;;  %v17565_v9 = vld [vmem:[%s24677_s1 + $0x390] ss:$72 sps:$4 sm:$0xff]  }
 0x304   : > { %8172 = vmatpush1.bf16.msra.mxu1 %v17502_v10  ;;  %8009 = vmatprep.subr.bf16.mxu0 %v17507_v11  ;;  %v17568_v10 = vld [vmem:[%s24677_s1 + $0x398] ss:$72 sps:$4 sm:$0xff]   ;;  %v17573_v11 = vld [vmem:[%s24677_s1 + $0x424] ss:$72 sps:$4 sm:$0xff]  }
 0x305   : > { %8173 = vmatprep.subr.bf16.mxu1 %v17510_v12  ;;  %v17576_v12 = vld [vmem:[%s24677_s1 + $0x42c] ss:$72 sps:$4 sm:$0xff]  }
 0x307   : > { %8010 = vmatpush1.bf16.msra.mxu0 %v17505_v14  ;;  %v17571_v14 = vld [vmem:[%s24677_s1 + $0x420] ss:$72 sps:$4 sm:$0xff]  }
 0x308   : > { %8174 = vmatpush1.bf16.msra.mxu1 %v17508_v15  ;;  %8011 = vmatprep.subr.bf16.mxu0 %v17513_v16  ;;  %v17574_v15 = vld [vmem:[%s24677_s1 + $0x428] ss:$72 sps:$4 sm:$0xff]   ;;  %v17579_v16 = vld [vmem:[%s24677_s1 + $0x4b4] ss:$72 sps:$4 sm:$0xff]  }
 0x309   : > { %8175 = vmatprep.subr.bf16.mxu1 %v17516_v18  ;;  %v17582_v18 = vld [vmem:[%s24677_s1 + $0x4bc] ss:$72 sps:$4 sm:$0xff]  }
 0x30b   : > { %8012 = vmatpush1.bf16.msra.mxu0 %v17511_v19  ;;  %v17577_v19 = vld [vmem:[%s24677_s1 + $0x4b0] ss:$72 sps:$4 sm:$0xff]  }
 0x30c   : > { %8176 = vmatpush1.bf16.msra.mxu1 %v17514_v20  ;;  %8013 = vmatprep.subr.bf16.mxu0 %v17519_v29  ;;  %v17580_v20 = vld [vmem:[%s24677_s1 + $0x4b8] ss:$72 sps:$4 sm:$0xff]   ;;  %v17585_v29 = vld [vmem:[%s24677_s1 + $0x544] ss:$72 sps:$4 sm:$0xff]  }
 0x30d   : > { %8177 = vmatprep.subr.bf16.mxu1 %v17522_v30  ;;  %v17588_v30 = vld [vmem:[%s24677_s1 + $0x54c] ss:$72 sps:$4 sm:$0xff]  }
 0x30f   : > { %8014 = vmatpush1.bf16.msra.mxu0 %v17517_v33  ;;  %v17583_v33 = vld [vmem:[%s24677_s1 + $0x540] ss:$72 sps:$4 sm:$0xff]  }
 0x310   : > { %8178 = vmatpush1.bf16.msra.mxu1 %v17520_v34  ;;  %8015 = vmatprep.subr.bf16.mxu0 %v17525_v35  ;;  %v17586_v34 = vld [vmem:[%s24677_s1 + $0x548] ss:$72 sps:$4 sm:$0xff]   ;;  %v17591_v35 = vld [vmem:[%s24677_s1 + $0x5d4] ss:$72 sps:$4 sm:$0xff]  }
 0x311   : > { %8179 = vmatprep.subr.bf16.mxu1 %v17528_v36  ;;  %v17594_v36 = vld [vmem:[%s24677_s1 + $0x5dc] ss:$72 sps:$4 sm:$0xff]  }
 0x313   : > { %8016 = vmatpush1.bf16.msra.mxu0 %v17523_v37  ;;  %v17589_v37 = vld [vmem:[%s24677_s1 + $0x5d0] ss:$72 sps:$4 sm:$0xff]  }
 0x314   : > { %8180 = vmatpush1.bf16.msra.mxu1 %v17526_v38  ;;  %8190 = vmatprep.subr.bf16.mxu0 %v17531_v39  ;;  %v17592_v38 = vld [vmem:[%s24677_s1 + $0x5d8] ss:$72 sps:$4 sm:$0xff]   ;;  %v17597_v39 = vld [vmem:[%s24677_s1 + $0x664] ss:$72 sps:$4 sm:$0xff]  }
 0x315   : > { %8354 = vmatprep.subr.bf16.mxu1 %v17534_v40  ;;  %v17600_v40 = vld [vmem:[%s24677_s1 + $0x66c] ss:$72 sps:$4 sm:$0xff]  }
 0x316   : > { %8018 = vmatmul.mubr.bf16.vlgmr.msra.gmra.mrb[8].mxu0 %v19585_v31 }
 0x317   : > { %8182 = vmatmul.mubr.bf16.vlgmr.msra.gmra.mrb[8].mxu1 %v19585_v31  ;;  %8191 = vmatpush1.bf16.msra.mxu0 %v17529_v47  ;;  %v17595_v47 = vld [vmem:[%s24677_s1 + $0x660] ss:$72 sps:$4 sm:$0xff]  }
 0x318   : > { %8355 = vmatpush1.bf16.msra.mxu1 %v17532_v49  ;;  %8192 = vmatprep.subr.bf16.mxu0 %v17537_v50  ;;  %v17598_v49 = vld [vmem:[%s24677_s1 + $0x668] ss:$72 sps:$4 sm:$0xff]   ;;  %v17603_v50 = vld [vmem:[%s24677_s1 + $0x6f4] ss:$72 sps:$4 sm:$0xff]  }
 0x319   : > { %8356 = vmatprep.subr.bf16.mxu1 %v17540_v51  ;;  %8222 = vmatprep.mubr.bf16.mxu0 %v18917_v48  ;;  %v17606_v51 = vld [vmem:[%s24677_s1 + $0x6fc] ss:$72 sps:$4 sm:$0xff]  }
 0x31a   : > { %8386 = vmatprep.mubr.bf16.mxu1 %v18917_v48 }
 0x31b   : > { %8193 = vmatpush1.bf16.msra.mxu0 %v17535_v52  ;;  %v17601_v52 = vld [vmem:[%s24677_s1 + $0x6f0] ss:$72 sps:$4 sm:$0xff]  }
 0x31c   : > { %8357 = vmatpush1.bf16.msra.mxu1 %v17538_v53  ;;  %8194 = vmatprep.subr.bf16.mxu0 %v17543_v54  ;;  %v17604_v53 = vld [vmem:[%s24677_s1 + $0x6f8] ss:$72 sps:$4 sm:$0xff]   ;;  %v17609_v54 = vld [vmem:[%s24677_s1 + $0x784] ss:$72 sps:$4 sm:$0xff]  }
 0x31d   : > { %8358 = vmatprep.subr.bf16.mxu1 %v17546_v55  ;;  %v17612_v55 = vld [vmem:[%s24677_s1 + $0x78c] ss:$72 sps:$4 sm:$0xff]  }
 0x31f   : > { %8195 = vmatpush1.bf16.msra.mxu0 %v17541_v56  ;;  %v17607_v56 = vld [vmem:[%s24677_s1 + $0x780] ss:$72 sps:$4 sm:$0xff]  }
 0x320   : > { %8359 = vmatpush1.bf16.msra.mxu1 %v17544_v57  ;;  %8196 = vmatprep.subr.bf16.mxu0 %v17549_v58  ;;  %v17610_v57 = vld [vmem:[%s24677_s1 + $0x788] ss:$72 sps:$4 sm:$0xff]   ;;  %v17615_v58 = vld [vmem:[%s24677_s1 + $0x814] ss:$72 sps:$4 sm:$0xff]  }
 0x321   : > { %8360 = vmatprep.subr.bf16.mxu1 %v17552_v59  ;;  %v17618_v59 = vld [vmem:[%s24677_s1 + $0x81c] ss:$72 sps:$4 sm:$0xff]  }
 0x323   : > { %8197 = vmatpush1.bf16.msra.mxu0 %v17547_v60  ;;  %v17613_v60 = vld [vmem:[%s24677_s1 + $0x810] ss:$72 sps:$4 sm:$0xff]  }
 0x324   : > { %8361 = vmatpush1.bf16.msra.mxu1 %v17550_v61  ;;  %8198 = vmatprep.subr.bf16.mxu0 %v17555_v62  ;;  %v17616_v61 = vld [vmem:[%s24677_s1 + $0x818] ss:$72 sps:$4 sm:$0xff]   ;;  %v17621_v62 = vld [vmem:[%s24677_s1 + $0x8a4] ss:$72 sps:$4 sm:$0xff]  }
 0x325   : > { %8362 = vmatprep.subr.bf16.mxu1 %v17558_v63  ;;  %v17624_v63 = vld [vmem:[%s24677_s1 + $0x8ac] ss:$72 sps:$4 sm:$0xff]  }
 0x327   : > { %8199 = vmatpush1.bf16.msra.mxu0 %v17553_v0  ;;  %v17619_v0 = vld [vmem:[%s24677_s1 + $0x8a0] ss:$72 sps:$4 sm:$0xff]  }
 0x328   : > { %8363 = vmatpush1.bf16.msra.mxu1 %v17556_v1  ;;  %8200 = vmatprep.subr.bf16.mxu0 %v17561_v2  ;;  %v17622_v1 = vld [vmem:[%s24677_s1 + $0x8a8] ss:$72 sps:$4 sm:$0xff]   ;;  %v17627_v2 = vld [vmem:[%s24677_s1 + $0x934] ss:$72 sps:$4 sm:$0xff]  }
 0x329   : > { %8364 = vmatprep.subr.bf16.mxu1 %v17564_v3  ;;  %v17630_v3 = vld [vmem:[%s24677_s1 + $0x93c] ss:$72 sps:$4 sm:$0xff]  }
 0x32b   : > { %8201 = vmatpush1.bf16.msra.mxu0 %v17559_v4  ;;  %v17625_v4 = vld [vmem:[%s24677_s1 + $0x930] ss:$72 sps:$4 sm:$0xff]  }
 0x32c   : > { %8365 = vmatpush1.bf16.msra.mxu1 %v17562_v6  ;;  %8202 = vmatprep.subr.bf16.mxu0 %v17567_v7  ;;  %v17628_v6 = vld [vmem:[%s24677_s1 + $0x938] ss:$72 sps:$4 sm:$0xff]   ;;  %v17633_v7 = vld [vmem:[%s24677_s1 + $0x9c4] ss:$72 sps:$4 sm:$0xff]  }
 0x32d   : > { %8366 = vmatprep.subr.bf16.mxu1 %v17570_v8  ;;  %v17636_v8 = vld [vmem:[%s24677_s1 + $0x9cc] ss:$72 sps:$4 sm:$0xff]  }
 0x32f   : > { %8203 = vmatpush1.bf16.msra.mxu0 %v17565_v9  ;;  %v17631_v9 = vld [vmem:[%s24677_s1 + $0x9c0] ss:$72 sps:$4 sm:$0xff]  }
 0x330   : > { %8367 = vmatpush1.bf16.msra.mxu1 %v17568_v10  ;;  %8204 = vmatprep.subr.bf16.mxu0 %v17573_v11  ;;  %v17634_v10 = vld [vmem:[%s24677_s1 + $0x9c8] ss:$72 sps:$4 sm:$0xff]   ;;  %v17639_v11 = vld [vmem:[%s24677_s1 + $0xa54] ss:$72 sps:$4 sm:$0xff]  }
 0x331   : > { %8368 = vmatprep.subr.bf16.mxu1 %v17576_v12  ;;  %v17642_v12 = vld [vmem:[%s24677_s1 + $0xa5c] ss:$72 sps:$4 sm:$0xff]  }
 0x333   : > { %8205 = vmatpush1.bf16.msra.mxu0 %v17571_v14  ;;  %v17637_v14 = vld [vmem:[%s24677_s1 + $0xa50] ss:$72 sps:$4 sm:$0xff]  }
 0x334   : > { %8369 = vmatpush1.bf16.msra.mxu1 %v17574_v15  ;;  %8206 = vmatprep.subr.bf16.mxu0 %v17579_v16  ;;  %v17640_v15 = vld [vmem:[%s24677_s1 + $0xa58] ss:$72 sps:$4 sm:$0xff]   ;;  %v17645_v16 = vld [vmem:[%s24677_s1 + $0xae4] ss:$72 sps:$4 sm:$0xff]  }
 0x335   : > { %8370 = vmatprep.subr.bf16.mxu1 %v17582_v18  ;;  %v17648_v18 = vld [vmem:[%s24677_s1 + $0xaec] ss:$72 sps:$4 sm:$0xff]  }
 0x337   : > { %8207 = vmatpush1.bf16.msra.mxu0 %v17577_v19  ;;  %v17643_v19 = vld [vmem:[%s24677_s1 + $0xae0] ss:$72 sps:$4 sm:$0xff]  }
 0x338   : > { %8371 = vmatpush1.bf16.msra.mxu1 %v17580_v20  ;;  %8208 = vmatprep.subr.bf16.mxu0 %v17585_v29  ;;  %v17646_v20 = vld [vmem:[%s24677_s1 + $0xae8] ss:$72 sps:$4 sm:$0xff]   ;;  %v17651_v29 = vld [vmem:[%s24677_s1 + $0xb74] ss:$72 sps:$4 sm:$0xff]  }
 0x339   : > { %8372 = vmatprep.subr.bf16.mxu1 %v17588_v30  ;;  %v17654_v30 = vld [vmem:[%s24677_s1 + $0xb7c] ss:$72 sps:$4 sm:$0xff]  }
 0x33b   : > { %8209 = vmatpush1.bf16.msra.mxu0 %v17583_v33  ;;  %v17649_v33 = vld [vmem:[%s24677_s1 + $0xb70] ss:$72 sps:$4 sm:$0xff]  }
 0x33c   : > { %8373 = vmatpush1.bf16.msra.mxu1 %v17586_v34  ;;  %8210 = vmatprep.subr.bf16.mxu0 %v17591_v35  ;;  %v17652_v34 = vld [vmem:[%s24677_s1 + $0xb78] ss:$72 sps:$4 sm:$0xff]   ;;  %v17657_v35 = vld [vmem:[%s24677_s1 + $0xc04] ss:$72 sps:$4 sm:$0xff]  }
 0x33d   : > { %8374 = vmatprep.subr.bf16.mxu1 %v17594_v36  ;;  %v17660_v36 = vld [vmem:[%s24677_s1 + $0xc0c] ss:$72 sps:$4 sm:$0xff]  }
 0x33f   : > { %8211 = vmatpush1.bf16.msra.mxu0 %v17589_v37  ;;  %v17655_v37 = vld [vmem:[%s24677_s1 + $0xc00] ss:$72 sps:$4 sm:$0xff]  }
 0x340   : > { %8375 = vmatpush1.bf16.msra.mxu1 %v17592_v38  ;;  %8212 = vmatprep.subr.bf16.mxu0 %v17597_v39  ;;  %v17658_v38 = vld [vmem:[%s24677_s1 + $0xc08] ss:$72 sps:$4 sm:$0xff]   ;;  %v17663_v39 = vld [vmem:[%s24677_s1 + $0xc94] ss:$72 sps:$4 sm:$0xff]  }
 0x341   : > { %8376 = vmatprep.subr.bf16.mxu1 %v17600_v40  ;;  %v17666_v40 = vld [vmem:[%s24677_s1 + $0xc9c] ss:$72 sps:$4 sm:$0xff]  }
 0x343   : > { %8213 = vmatpush1.bf16.msra.mxu0 %v17595_v47  ;;  %v17661_v47 = vld [vmem:[%s24677_s1 + $0xc90] ss:$72 sps:$4 sm:$0xff]  }
 0x344   : > { %8377 = vmatpush1.bf16.msra.mxu1 %v17598_v49  ;;  %8214 = vmatprep.subr.bf16.mxu0 %v17603_v50  ;;  %v17664_v49 = vld [vmem:[%s24677_s1 + $0xc98] ss:$72 sps:$4 sm:$0xff]   ;;  %v17669_v50 = vld [vmem:[%s24677_s1 + $0xd24] ss:$72 sps:$4 sm:$0xff]  }
 0x345   : > { %8378 = vmatprep.subr.bf16.mxu1 %v17606_v51  ;;  %v17672_v51 = vld [vmem:[%s24677_s1 + $0xd2c] ss:$72 sps:$4 sm:$0xff]  }
 0x347   : > { %8215 = vmatpush1.bf16.msra.mxu0 %v17601_v52  ;;  %v17667_v52 = vld [vmem:[%s24677_s1 + $0xd20] ss:$72 sps:$4 sm:$0xff]  }
 0x348   : > { %8379 = vmatpush1.bf16.msra.mxu1 %v17604_v53  ;;  %8216 = vmatprep.subr.bf16.mxu0 %v17609_v54  ;;  %v17670_v53 = vld [vmem:[%s24677_s1 + $0xd28] ss:$72 sps:$4 sm:$0xff]   ;;  %v17675_v54 = vld [vmem:[%s24677_s1 + $0xdb4] ss:$72 sps:$4 sm:$0xff]  }
 0x349   : > { %8380 = vmatprep.subr.bf16.mxu1 %v17612_v55  ;;  %v17678_v55 = vld [vmem:[%s24677_s1 + $0xdbc] ss:$72 sps:$4 sm:$0xff]  }
 0x34b   : > { %8217 = vmatpush1.bf16.msra.mxu0 %v17607_v56  ;;  %v17673_v56 = vld [vmem:[%s24677_s1 + $0xdb0] ss:$72 sps:$4 sm:$0xff]  }
 0x34c   : > { %8381 = vmatpush1.bf16.msra.mxu1 %v17610_v57  ;;  %8218 = vmatprep.subr.bf16.mxu0 %v17615_v58  ;;  %v17676_v57 = vld [vmem:[%s24677_s1 + $0xdb8] ss:$72 sps:$4 sm:$0xff]   ;;  %v17681_v58 = vld [vmem:[%s24677_s1 + $0xe44] ss:$72 sps:$4 sm:$0xff]  }
 0x34d   : > { %8382 = vmatprep.subr.bf16.mxu1 %v17618_v59  ;;  %v17684_v59 = vld [vmem:[%s24677_s1 + $0xe4c] ss:$72 sps:$4 sm:$0xff]  }
 0x34f   : > { %8219 = vmatpush1.bf16.msra.mxu0 %v17613_v60  ;;  %v17679_v60 = vld [vmem:[%s24677_s1 + $0xe40] ss:$72 sps:$4 sm:$0xff]  }
 0x350   : > { %8383 = vmatpush1.bf16.msra.mxu1 %v17616_v61  ;;  %8220 = vmatprep.subr.bf16.mxu0 %v17621_v62  ;;  %v17682_v61 = vld [vmem:[%s24677_s1 + $0xe48] ss:$72 sps:$4 sm:$0xff]   ;;  %v17687_v62 = vld [vmem:[%s24677_s1 + $0xed4] ss:$72 sps:$4 sm:$0xff]  }
 0x351   : > { %8384 = vmatprep.subr.bf16.mxu1 %v17624_v63  ;;  %v17690_v63 = vld [vmem:[%s24677_s1 + $0xedc] ss:$72 sps:$4 sm:$0xff]  }
 0x353   : > { %8221 = vmatpush1.bf16.msra.mxu0 %v17619_v0  ;;  %v17685_v0 = vld [vmem:[%s24677_s1 + $0xed0] ss:$72 sps:$4 sm:$0xff]  }
 0x354   : > { %8385 = vmatpush1.bf16.msra.mxu1 %v17622_v1  ;;  %8231 = vmatprep.subr.bf16.mxu0 %v17627_v2  ;;  %v17688_v1 = vld [vmem:[%s24677_s1 + $0xed8] ss:$72 sps:$4 sm:$0xff]   ;;  %v17693_v2 = vld [vmem:[%s24677_s1 + $0xf64] ss:$72 sps:$4 sm:$0xff]  }
 0x355   : > { %8395 = vmatprep.subr.bf16.mxu1 %v17630_v3  ;;  %v17696_v3 = vld [vmem:[%s24677_s1 + $0xf6c] ss:$72 sps:$4 sm:$0xff]  }
 0x356   : > { %8223 = vmatmul.mubr.bf16.vlgmr.msra.gmra.mrb[12].mxu0 %v18979_v5 }
 0x357   : > { %8387 = vmatmul.mubr.bf16.vlgmr.msra.gmra.mrb[12].mxu1 %v18979_v5  ;;  %8232 = vmatpush1.bf16.msra.mxu0 %v17625_v4  ;;  %v17691_v4 = vld [vmem:[%s24677_s1 + $0xf60] ss:$72 sps:$4 sm:$0xff]  }
 0x358   : > { %8396 = vmatpush1.bf16.msra.mxu1 %v17628_v6  ;;  %8233 = vmatprep.subr.bf16.mxu0 %v17633_v7  ;;  %v17694_v6 = vld [vmem:[%s24677_s1 + $0xf68] ss:$72 sps:$4 sm:$0xff]   ;;  %v17699_v7 = vld [vmem:[%s24677_s1 + $0xff4] ss:$72 sps:$4 sm:$0xff]  }
 0x359   : > { %8397 = vmatprep.subr.bf16.mxu1 %v17636_v8  ;;  %8263 = vmatprep.mubr.bf16.mxu0 %v19059_v32  ;;  %v17702_v8 = vld [vmem:[%s24677_s1 + $0xffc] ss:$72 sps:$4 sm:$0xff]  }
 0x35a   : > { %8427 = vmatprep.mubr.bf16.mxu1 %v19059_v32 }
 0x35b   : > { %8234 = vmatpush1.bf16.msra.mxu0 %v17631_v9  ;;  %v17697_v9 = vld [vmem:[%s24677_s1 + $0xff0] ss:$72 sps:$4 sm:$0xff]  }
 0x35c   : > { %8398 = vmatpush1.bf16.msra.mxu1 %v17634_v10  ;;  %8235 = vmatprep.subr.bf16.mxu0 %v17639_v11  ;;  %v17700_v10 = vld [vmem:[%s24677_s1 + $0xff8] ss:$72 sps:$4 sm:$0xff]   ;;  %v17705_v11 = vld [vmem:[%s24677_s1 + $0x1084] ss:$72 sps:$4 sm:$0xff]  }
 0x35d   : > { %8399 = vmatprep.subr.bf16.mxu1 %v17642_v12  ;;  %v17708_v12 = vld [vmem:[%s24677_s1 + $0x108c] ss:$72 sps:$4 sm:$0xff]  }
 0x35f   : > { %8236 = vmatpush1.bf16.msra.mxu0 %v17637_v14  ;;  %v17703_v14 = vld [vmem:[%s24677_s1 + $0x1080] ss:$72 sps:$4 sm:$0xff]  }
 0x360   : > { %8400 = vmatpush1.bf16.msra.mxu1 %v17640_v15  ;;  %8237 = vmatprep.subr.bf16.mxu0 %v17645_v16  ;;  %v17706_v15 = vld [vmem:[%s24677_s1 + $0x1088] ss:$72 sps:$4 sm:$0xff]   ;;  %v17711_v16 = vld [vmem:[%s24677_s1 + $0x1114] ss:$72 sps:$4 sm:$0xff]  }
 0x361   : > { %8401 = vmatprep.subr.bf16.mxu1 %v17648_v18  ;;  %v17714_v18 = vld [vmem:[%s24677_s1 + $0x111c] ss:$72 sps:$4 sm:$0xff]  }
 0x363   : > { %8238 = vmatpush1.bf16.msra.mxu0 %v17643_v19  ;;  %v17709_v19 = vld [vmem:[%s24677_s1 + $0x1110] ss:$72 sps:$4 sm:$0xff]  }
 0x364   : > { %8402 = vmatpush1.bf16.msra.mxu1 %v17646_v20  ;;  %8239 = vmatprep.subr.bf16.mxu0 %v17651_v29  ;;  %v17712_v20 = vld [vmem:[%s24677_s1 + $0x1118] ss:$72 sps:$4 sm:$0xff]   ;;  %v17717_v29 = vld [vmem:[%s24677_s1 + $0x11a4] ss:$72 sps:$4 sm:$0xff]  }
 0x365   : > { %8403 = vmatprep.subr.bf16.mxu1 %v17654_v30  ;;  %v17720_v30 = vld [vmem:[%s24677_s1 + $0x11ac] ss:$72 sps:$4 sm:$0xff]  }
 0x367   : > { %8240 = vmatpush1.bf16.msra.mxu0 %v17649_v33  ;;  %v17715_v33 = vld [vmem:[%s24677_s1 + $0x11a0] ss:$72 sps:$4 sm:$0xff]  }
 0x368   : > { %8404 = vmatpush1.bf16.msra.mxu1 %v17652_v34  ;;  %8241 = vmatprep.subr.bf16.mxu0 %v17657_v35  ;;  %v17718_v34 = vld [vmem:[%s24677_s1 + $0x11a8] ss:$72 sps:$4 sm:$0xff]   ;;  %v17723_v35 = vld [vmem:[%s24677_s1 + $0x1234] ss:$72 sps:$4 sm:$0xff]  }
 0x369   : > { %8405 = vmatprep.subr.bf16.mxu1 %v17660_v36  ;;  %v17726_v36 = vld [vmem:[%s24677_s1 + $0x123c] ss:$72 sps:$4 sm:$0xff]  }
 0x36b   : > { %8242 = vmatpush1.bf16.msra.mxu0 %v17655_v37  ;;  %v17721_v37 = vld [vmem:[%s24677_s1 + $0x1230] ss:$72 sps:$4 sm:$0xff]  }
 0x36c   : > { %8406 = vmatpush1.bf16.msra.mxu1 %v17658_v38  ;;  %8243 = vmatprep.subr.bf16.mxu0 %v17663_v39  ;;  %v17724_v38 = vld [vmem:[%s24677_s1 + $0x1238] ss:$72 sps:$4 sm:$0xff]   ;;  %v17729_v39 = vld [vmem:[%s24677_s1 + $0x12c4] ss:$72 sps:$4 sm:$0xff]  }
 0x36d   : > { %8407 = vmatprep.subr.bf16.mxu1 %v17666_v40  ;;  %v17732_v40 = vld [vmem:[%s24677_s1 + $0x12cc] ss:$72 sps:$4 sm:$0xff]  }
 0x36f   : > { %8244 = vmatpush1.bf16.msra.mxu0 %v17661_v47  ;;  %v17727_v47 = vld [vmem:[%s24677_s1 + $0x12c0] ss:$72 sps:$4 sm:$0xff]  }
 0x370   : > { %8408 = vmatpush1.bf16.msra.mxu1 %v17664_v49  ;;  %8245 = vmatprep.subr.bf16.mxu0 %v17669_v50  ;;  %v17730_v49 = vld [vmem:[%s24677_s1 + $0x12c8] ss:$72 sps:$4 sm:$0xff]   ;;  %v17735_v50 = vld [vmem:[%s24677_s1 + $0x1354] ss:$72 sps:$4 sm:$0xff]  }
 0x371   : > { %8409 = vmatprep.subr.bf16.mxu1 %v17672_v51  ;;  %v17738_v51 = vld [vmem:[%s24677_s1 + $0x135c] ss:$72 sps:$4 sm:$0xff]  }
 0x373   : > { %8246 = vmatpush1.bf16.msra.mxu0 %v17667_v52  ;;  %v17733_v52 = vld [vmem:[%s24677_s1 + $0x1350] ss:$72 sps:$4 sm:$0xff]  }
 0x374   : > { %8410 = vmatpush1.bf16.msra.mxu1 %v17670_v53  ;;  %8247 = vmatprep.subr.bf16.mxu0 %v17675_v54  ;;  %v17736_v53 = vld [vmem:[%s24677_s1 + $0x1358] ss:$72 sps:$4 sm:$0xff]   ;;  %v17741_v54 = vld [vmem:[%s24677_s1 + $0x13e4] ss:$72 sps:$4 sm:$0xff]  }
 0x375   : > { %8411 = vmatprep.subr.bf16.mxu1 %v17678_v55  ;;  %v17744_v55 = vld [vmem:[%s24677_s1 + $0x13ec] ss:$72 sps:$4 sm:$0xff]  }
 0x377   : > { %8248 = vmatpush1.bf16.msra.mxu0 %v17673_v56  ;;  %v17739_v56 = vld [vmem:[%s24677_s1 + $0x13e0] ss:$72 sps:$4 sm:$0xff]  }
 0x378   : > { %8412 = vmatpush1.bf16.msra.mxu1 %v17676_v57  ;;  %8249 = vmatprep.subr.bf16.mxu0 %v17681_v58  ;;  %v17742_v57 = vld [vmem:[%s24677_s1 + $0x13e8] ss:$72 sps:$4 sm:$0xff]   ;;  %v17747_v58 = vld [vmem:[%s24677_s1 + $0x1474] ss:$72 sps:$4 sm:$0xff]  }
 0x379   : > { %8413 = vmatprep.subr.bf16.mxu1 %v17684_v59  ;;  %v17750_v59 = vld [vmem:[%s24677_s1 + $0x147c] ss:$72 sps:$4 sm:$0xff]  }
 0x37b   : > { %8250 = vmatpush1.bf16.msra.mxu0 %v17679_v60  ;;  %v17745_v60 = vld [vmem:[%s24677_s1 + $0x1470] ss:$72 sps:$4 sm:$0xff]  }
 0x37c   : > { %8414 = vmatpush1.bf16.msra.mxu1 %v17682_v61  ;;  %8251 = vmatprep.subr.bf16.mxu0 %v17687_v62  ;;  %v17748_v61 = vld [vmem:[%s24677_s1 + $0x1478] ss:$72 sps:$4 sm:$0xff]   ;;  %v17753_v62 = vld [vmem:[%s24677_s1 + $0x1504] ss:$72 sps:$4 sm:$0xff]  }
 0x37d   : > { %8415 = vmatprep.subr.bf16.mxu1 %v17690_v63  ;;  %v17756_v63 = vld [vmem:[%s24677_s1 + $0x150c] ss:$72 sps:$4 sm:$0xff]  }
 0x37f   : > { %8252 = vmatpush1.bf16.msra.mxu0 %v17685_v0  ;;  %v17751_v0 = vld [vmem:[%s24677_s1 + $0x1500] ss:$72 sps:$4 sm:$0xff]  }
 0x380   : > { %8416 = vmatpush1.bf16.msra.mxu1 %v17688_v1  ;;  %8253 = vmatprep.subr.bf16.mxu0 %v17693_v2  ;;  %v17754_v1 = vld [vmem:[%s24677_s1 + $0x1508] ss:$72 sps:$4 sm:$0xff]   ;;  %v17759_v2 = vld [vmem:[%s24677_s1 + $0x1594] ss:$72 sps:$4 sm:$0xff]  }
 0x381   : > { %8417 = vmatprep.subr.bf16.mxu1 %v17696_v3  ;;  %v17762_v3 = vld [vmem:[%s24677_s1 + $0x159c] ss:$72 sps:$4 sm:$0xff]  }
 0x383   : > { %8254 = vmatpush1.bf16.msra.mxu0 %v17691_v4  ;;  %v17757_v4 = vld [vmem:[%s24677_s1 + $0x1590] ss:$72 sps:$4 sm:$0xff]  }
 0x384   : > { %8418 = vmatpush1.bf16.msra.mxu1 %v17694_v6  ;;  %8255 = vmatprep.subr.bf16.mxu0 %v17699_v7  ;;  %v17760_v6 = vld [vmem:[%s24677_s1 + $0x1598] ss:$72 sps:$4 sm:$0xff]   ;;  %v17765_v7 = vld [vmem:[%s24677_s1 + $0x1624] ss:$72 sps:$4 sm:$0xff]  }
 0x385   : > { %8419 = vmatprep.subr.bf16.mxu1 %v17702_v8  ;;  %v17768_v8 = vld [vmem:[%s24677_s1 + $0x162c] ss:$72 sps:$4 sm:$0xff]  }
 0x387   : > { %8256 = vmatpush1.bf16.msra.mxu0 %v17697_v9  ;;  %v17763_v9 = vld [vmem:[%s24677_s1 + $0x1620] ss:$72 sps:$4 sm:$0xff]  }
 0x388   : > { %8420 = vmatpush1.bf16.msra.mxu1 %v17700_v10  ;;  %8257 = vmatprep.subr.bf16.mxu0 %v17705_v11  ;;  %v17766_v10 = vld [vmem:[%s24677_s1 + $0x1628] ss:$72 sps:$4 sm:$0xff]   ;;  %v17771_v11 = vld [vmem:[%s24677_s1 + $0x16b4] ss:$72 sps:$4 sm:$0xff]  }
 0x389   : > { %8421 = vmatprep.subr.bf16.mxu1 %v17708_v12  ;;  %v17774_v12 = vld [vmem:[%s24677_s1 + $0x16bc] ss:$72 sps:$4 sm:$0xff]  }
 0x38b   : > { %8258 = vmatpush1.bf16.msra.mxu0 %v17703_v14  ;;  %v17769_v14 = vld [vmem:[%s24677_s1 + $0x16b0] ss:$72 sps:$4 sm:$0xff]  }
 0x38c   : > { %8422 = vmatpush1.bf16.msra.mxu1 %v17706_v15  ;;  %8259 = vmatprep.subr.bf16.mxu0 %v17711_v16  ;;  %v17772_v15 = vld [vmem:[%s24677_s1 + $0x16b8] ss:$72 sps:$4 sm:$0xff]   ;;  %v17777_v16 = vld [vmem:[%s24677_s1 + $0x1744] ss:$72 sps:$4 sm:$0xff]  }
 0x38d   : > { %8423 = vmatprep.subr.bf16.mxu1 %v17714_v18  ;;  %v17780_v18 = vld [vmem:[%s24677_s1 + $0x174c] ss:$72 sps:$4 sm:$0xff]  }
 0x38f   : > { %8260 = vmatpush1.bf16.msra.mxu0 %v17709_v19  ;;  %v17775_v19 = vld [vmem:[%s24677_s1 + $0x1740] ss:$72 sps:$4 sm:$0xff]  }
 0x390   : > { %8424 = vmatpush1.bf16.msra.mxu1 %v17712_v20  ;;  %8261 = vmatprep.subr.bf16.mxu0 %v17717_v29  ;;  %v17778_v20 = vld [vmem:[%s24677_s1 + $0x1748] ss:$72 sps:$4 sm:$0xff]   ;;  %v17783_v29 = vld [vmem:[%s24677_s1 + $0x17d4] ss:$72 sps:$4 sm:$0xff]  }
 0x391   : > { %8425 = vmatprep.subr.bf16.mxu1 %v17720_v30  ;;  %v17786_v30 = vld [vmem:[%s24677_s1 + $0x17dc] ss:$72 sps:$4 sm:$0xff]  }
 0x393   : > { %8262 = vmatpush1.bf16.msra.mxu0 %v17715_v33  ;;  %v17781_v33 = vld [vmem:[%s24677_s1 + $0x17d0] ss:$72 sps:$4 sm:$0xff]  }
 0x394   : > { %8426 = vmatpush1.bf16.msra.mxu1 %v17718_v34  ;;  %8272 = vmatprep.subr.bf16.mxu0 %v17723_v35  ;;  %v17784_v34 = vld [vmem:[%s24677_s1 + $0x17d8] ss:$72 sps:$4 sm:$0xff]   ;;  %v17789_v35 = vld [vmem:[%s24677_s1 + $0x1864] ss:$72 sps:$4 sm:$0xff]  }
 0x395   : > { %8436 = vmatprep.subr.bf16.mxu1 %v17726_v36  ;;  %v17792_v36 = vld [vmem:[%s24677_s1 + $0x186c] ss:$72 sps:$4 sm:$0xff]  }
 0x396   : > { %8264 = vmatmul.mubr.bf16.vlgmr.msra.gmra.mrb[12].mxu0 %v19187_v13 }
 0x397   : > { %8428 = vmatmul.mubr.bf16.vlgmr.msra.gmra.mrb[12].mxu1 %v19187_v13  ;;  %8273 = vmatpush1.bf16.msra.mxu0 %v17721_v37  ;;  %v17787_v37 = vld [vmem:[%s24677_s1 + $0x1860] ss:$72 sps:$4 sm:$0xff]  }
 0x398   : > { %8437 = vmatpush1.bf16.msra.mxu1 %v17724_v38  ;;  %8274 = vmatprep.subr.bf16.mxu0 %v17729_v39  ;;  %v17790_v38 = vld [vmem:[%s24677_s1 + $0x1868] ss:$72 sps:$4 sm:$0xff]   ;;  %v17795_v39 = vld [vmem:[%s24677_s1 + $0x18f4] ss:$72 sps:$4 sm:$0xff]  }
 0x399   : > { %8438 = vmatprep.subr.bf16.mxu1 %v17732_v40  ;;  %8304 = vmatprep.mubr.bf16.mxu0 %v19196_v17  ;;  %v17798_v40 = vld [vmem:[%s24677_s1 + $0x18fc] ss:$72 sps:$4 sm:$0xff]  }
 0x39a   : > { %8468 = vmatprep.mubr.bf16.mxu1 %v19196_v17 }
 0x39b   : > { %8275 = vmatpush1.bf16.msra.mxu0 %v17727_v47  ;;  %v17793_v47 = vld [vmem:[%s24677_s1 + $0x18f0] ss:$72 sps:$4 sm:$0xff]  }
 0x39c   : > { %8439 = vmatpush1.bf16.msra.mxu1 %v17730_v49  ;;  %8276 = vmatprep.subr.bf16.mxu0 %v17735_v50  ;;  %v17796_v49 = vld [vmem:[%s24677_s1 + $0x18f8] ss:$72 sps:$4 sm:$0xff]   ;;  %v17801_v50 = vld [vmem:[%s24677_s1 + $0x1984] ss:$72 sps:$4 sm:$0xff]  }
 0x39d   : > { %8440 = vmatprep.subr.bf16.mxu1 %v17738_v51  ;;  %v17804_v51 = vld [vmem:[%s24677_s1 + $0x198c] ss:$72 sps:$4 sm:$0xff]  }
 0x39f   : > { %8277 = vmatpush1.bf16.msra.mxu0 %v17733_v52  ;;  %v17799_v52 = vld [vmem:[%s24677_s1 + $0x1980] ss:$72 sps:$4 sm:$0xff]  }
 0x3a0   : > { %8441 = vmatpush1.bf16.msra.mxu1 %v17736_v53  ;;  %8278 = vmatprep.subr.bf16.mxu0 %v17741_v54  ;;  %v17802_v53 = vld [vmem:[%s24677_s1 + $0x1988] ss:$72 sps:$4 sm:$0xff]   ;;  %v17807_v54 = vld [vmem:[%s24677_s1 + $0x1a14] ss:$72 sps:$4 sm:$0xff]  }
 0x3a1   : > { %8442 = vmatprep.subr.bf16.mxu1 %v17744_v55  ;;  %v17810_v55 = vld [vmem:[%s24677_s1 + $0x1a1c] ss:$72 sps:$4 sm:$0xff]  }
 0x3a3   : > { %8279 = vmatpush1.bf16.msra.mxu0 %v17739_v56  ;;  %v17805_v56 = vld [vmem:[%s24677_s1 + $0x1a10] ss:$72 sps:$4 sm:$0xff]  }
 0x3a4   : > { %8443 = vmatpush1.bf16.msra.mxu1 %v17742_v57  ;;  %8280 = vmatprep.subr.bf16.mxu0 %v17747_v58  ;;  %v17808_v57 = vld [vmem:[%s24677_s1 + $0x1a18] ss:$72 sps:$4 sm:$0xff]   ;;  %v17813_v58 = vld [vmem:[%s24677_s1 + $0x1aa4] ss:$72 sps:$4 sm:$0xff]  }
 0x3a5   : > { %8444 = vmatprep.subr.bf16.mxu1 %v17750_v59  ;;  %v17816_v59 = vld [vmem:[%s24677_s1 + $0x1aac] ss:$72 sps:$4 sm:$0xff]  }
 0x3a7   : > { %8281 = vmatpush1.bf16.msra.mxu0 %v17745_v60  ;;  %v17811_v60 = vld [vmem:[%s24677_s1 + $0x1aa0] ss:$72 sps:$4 sm:$0xff]  }
 0x3a8   : > { %8445 = vmatpush1.bf16.msra.mxu1 %v17748_v61  ;;  %8282 = vmatprep.subr.bf16.mxu0 %v17753_v62  ;;  %v17814_v61 = vld [vmem:[%s24677_s1 + $0x1aa8] ss:$72 sps:$4 sm:$0xff]   ;;  %v17819_v62 = vld [vmem:[%s24677_s1 + $0x1b34] ss:$72 sps:$4 sm:$0xff]  }
 0x3a9   : > { %8446 = vmatprep.subr.bf16.mxu1 %v17756_v63  ;;  %v17822_v63 = vld [vmem:[%s24677_s1 + $0x1b3c] ss:$72 sps:$4 sm:$0xff]  }
 0x3ab   : > { %8283 = vmatpush1.bf16.msra.mxu0 %v17751_v0  ;;  %v17817_v0 = vld [vmem:[%s24677_s1 + $0x1b30] ss:$72 sps:$4 sm:$0xff]  }
 0x3ac   : > { %8447 = vmatpush1.bf16.msra.mxu1 %v17754_v1  ;;  %8284 = vmatprep.subr.bf16.mxu0 %v17759_v2  ;;  %v17820_v1 = vld [vmem:[%s24677_s1 + $0x1b38] ss:$72 sps:$4 sm:$0xff]   ;;  %v17825_v2 = vld [vmem:[%s24677_s1 + $0x1bc4] ss:$72 sps:$4 sm:$0xff]  }
 0x3ad   : > { %8448 = vmatprep.subr.bf16.mxu1 %v17762_v3  ;;  %v17828_v3 = vld [vmem:[%s24677_s1 + $0x1bcc] ss:$72 sps:$4 sm:$0xff]  }
 0x3af   : > { %8285 = vmatpush1.bf16.msra.mxu0 %v17757_v4  ;;  %v17823_v4 = vld [vmem:[%s24677_s1 + $0x1bc0] ss:$72 sps:$4 sm:$0xff]  }
 0x3b0   : > { %8449 = vmatpush1.bf16.msra.mxu1 %v17760_v6  ;;  %8286 = vmatprep.subr.bf16.mxu0 %v17765_v7  ;;  %v17826_v6 = vld [vmem:[%s24677_s1 + $0x1bc8] ss:$72 sps:$4 sm:$0xff]   ;;  %v17831_v7 = vld [vmem:[%s24677_s1 + $0x1c54] ss:$72 sps:$4 sm:$0xff]  }
 0x3b1   : > { %8450 = vmatprep.subr.bf16.mxu1 %v17768_v8  ;;  %v17834_v8 = vld [vmem:[%s24677_s1 + $0x1c5c] ss:$72 sps:$4 sm:$0xff]  }
 0x3b3   : > { %8287 = vmatpush1.bf16.msra.mxu0 %v17763_v9  ;;  %v17829_v9 = vld [vmem:[%s24677_s1 + $0x1c50] ss:$72 sps:$4 sm:$0xff]  }
 0x3b4   : > { %8451 = vmatpush1.bf16.msra.mxu1 %v17766_v10  ;;  %8288 = vmatprep.subr.bf16.mxu0 %v17771_v11  ;;  %v17832_v10 = vld [vmem:[%s24677_s1 + $0x1c58] ss:$72 sps:$4 sm:$0xff]   ;;  %v17837_v11 = vld [vmem:[%s24677_s1 + $0x1ce4] ss:$72 sps:$4 sm:$0xff]  }
 0x3b5   : > { %8452 = vmatprep.subr.bf16.mxu1 %v17774_v12  ;;  %v17840_v12 = vld [vmem:[%s24677_s1 + $0x1cec] ss:$72 sps:$4 sm:$0xff]  }
 0x3b7   : > { %8289 = vmatpush1.bf16.msra.mxu0 %v17769_v14  ;;  %v17835_v14 = vld [vmem:[%s24677_s1 + $0x1ce0] ss:$72 sps:$4 sm:$0xff]  }
 0x3b8   : > { %8453 = vmatpush1.bf16.msra.mxu1 %v17772_v15  ;;  %8290 = vmatprep.subr.bf16.mxu0 %v17777_v16  ;;  %v17838_v15 = vld [vmem:[%s24677_s1 + $0x1ce8] ss:$72 sps:$4 sm:$0xff]   ;;  %v17843_v16 = vld [vmem:[%s24677_s1 + $0x1d74] ss:$72 sps:$4 sm:$0xff]  }
 0x3b9   : > { %8454 = vmatprep.subr.bf16.mxu1 %v17780_v18  ;;  %v17846_v18 = vld [vmem:[%s24677_s1 + $0x1d7c] ss:$72 sps:$4 sm:$0xff]  }
 0x3bb   : > { %8291 = vmatpush1.bf16.msra.mxu0 %v17775_v19  ;;  %v17841_v19 = vld [vmem:[%s24677_s1 + $0x1d70] ss:$72 sps:$4 sm:$0xff]  }
 0x3bc   : > { %8455 = vmatpush1.bf16.msra.mxu1 %v17778_v20  ;;  %8292 = vmatprep.subr.bf16.mxu0 %v17783_v29  ;;  %v17844_v20 = vld [vmem:[%s24677_s1 + $0x1d78] ss:$72 sps:$4 sm:$0xff]   ;;  %v17849_v29 = vld [vmem:[%s24677_s1 + $0x1e04] ss:$72 sps:$4 sm:$0xff]  }
 0x3bd   : > { %8456 = vmatprep.subr.bf16.mxu1 %v17786_v30  ;;  %v17852_v30 = vld [vmem:[%s24677_s1 + $0x1e0c] ss:$72 sps:$4 sm:$0xff]  }
 0x3bf   : > { %8293 = vmatpush1.bf16.msra.mxu0 %v17781_v33  ;;  %v17847_v33 = vld [vmem:[%s24677_s1 + $0x1e00] ss:$72 sps:$4 sm:$0xff]  }
 0x3c0   : > { %8457 = vmatpush1.bf16.msra.mxu1 %v17784_v34  ;;  %8294 = vmatprep.subr.bf16.mxu0 %v17789_v35  ;;  %v17850_v34 = vld [vmem:[%s24677_s1 + $0x1e08] ss:$72 sps:$4 sm:$0xff]   ;;  %v17855_v35 = vld [vmem:[%s24677_s1 + $0x1e94] ss:$72 sps:$4 sm:$0xff]  }
 0x3c1   : > { %8458 = vmatprep.subr.bf16.mxu1 %v17792_v36  ;;  %v17858_v36 = vld [vmem:[%s24677_s1 + $0x1e9c] ss:$72 sps:$4 sm:$0xff]  }
 0x3c3   : > { %8295 = vmatpush1.bf16.msra.mxu0 %v17787_v37 }
 0x3c4   : > { %8459 = vmatpush1.bf16.msra.mxu1 %v17790_v38  ;;  %8296 = vmatprep.subr.bf16.mxu0 %v17795_v39 }
 0x3c5   : > { %8460 = vmatprep.subr.bf16.mxu1 %v17798_v40 }
 0x3c7   : > { %8297 = vmatpush1.bf16.msra.mxu0 %v17793_v47 }
 0x3c8   : > { %8461 = vmatpush1.bf16.msra.mxu1 %v17796_v49  ;;  %8298 = vmatprep.subr.bf16.mxu0 %v17801_v50 }
 0x3c9   : > { %8462 = vmatprep.subr.bf16.mxu1 %v17804_v51  ;;  %v17853_v51 = vld [vmem:[%s24677_s1 + $0x1e90] ss:$72 sps:$4 sm:$0xff]  }
 0x3cb   : > { %8299 = vmatpush1.bf16.msra.mxu0 %v17799_v52  ;;  %v17856_v52 = vld [vmem:[%s24677_s1 + $0x1e98] ss:$72 sps:$4 sm:$0xff]  }
 0x3cc   : > { %8463 = vmatpush1.bf16.msra.mxu1 %v17802_v53  ;;  %8300 = vmatprep.subr.bf16.mxu0 %v17807_v54 }
 0x3cd   : > { %8464 = vmatprep.subr.bf16.mxu1 %v17810_v55  ;;  %v17861_v55 = vld [vmem:[%s24677_s1 + $0x1f24] ss:$72 sps:$4 sm:$0xff]  }
 0x3cf   : > { %8301 = vmatpush1.bf16.msra.mxu0 %v17805_v56  ;;  %v17864_v56 = vld [vmem:[%s24677_s1 + $0x1f2c] ss:$72 sps:$4 sm:$0xff]  }
 0x3d0   : > { %8465 = vmatpush1.bf16.msra.mxu1 %v17808_v57  ;;  %8302 = vmatprep.subr.bf16.mxu0 %v17813_v58  ;;  %v17859_v58 = vld [vmem:[%s24677_s1 + $0x1f20] ss:$72 sps:$4 sm:$0xff]  }
 0x3d1   : > { %8466 = vmatprep.subr.bf16.mxu1 %v17816_v59  ;;  %v17862_v59 = vld [vmem:[%s24677_s1 + $0x1f28] ss:$72 sps:$4 sm:$0xff]  }
 0x3d3   : > { %8303 = vmatpush1.bf16.msra.mxu0 %v17811_v60  ;;  %v17867_v60 = vld [vmem:[%s24677_s1 + $0x1fb4] ss:$72 sps:$4 sm:$0xff]  }
 0x3d4   : > { %8467 = vmatpush1.bf16.msra.mxu1 %v17814_v61  ;;  %8313 = vmatprep.subr.bf16.mxu0 %v17819_v62  ;;  %v17870_v61 = vld [vmem:[%s24677_s1 + $0x1fbc] ss:$72 sps:$4 sm:$0xff]   ;;  %v17865_v62 = vld [vmem:[%s24677_s1 + $0x1fb0] ss:$72 sps:$4 sm:$0xff]  }
 0x3d5   : > { %8477 = vmatprep.subr.bf16.mxu1 %v17822_v63  ;;  %v17868_v63 = vld [vmem:[%s24677_s1 + $0x1fb8] ss:$72 sps:$4 sm:$0xff]  }
 0x3d6   : > { %8305 = vmatmul.mubr.bf16.vlgmr.msra.gmra.mrb[12].mxu0 %v19389_v22 }
 0x3d7   : > { %8469 = vmatmul.mubr.bf16.vlgmr.msra.gmra.mrb[12].mxu1 %v19389_v22  ;;  %8314 = vmatpush1.bf16.msra.mxu0 %v17817_v0  ;;  %v17873_v0 = vld [vmem:[%s24677_s1 + $0x2044] ss:$72 sps:$4 sm:$0xff]  }
 0x3d8   : > { %8478 = vmatpush1.bf16.msra.mxu1 %v17820_v1  ;;  %8315 = vmatprep.subr.bf16.mxu0 %v17825_v2  ;;  %v17876_v1 = vld [vmem:[%s24677_s1 + $0x204c] ss:$72 sps:$4 sm:$0xff]   ;;  %v17871_v2 = vld [vmem:[%s24677_s1 + $0x2040] ss:$72 sps:$4 sm:$0xff]  }
 0x3d9   : > { %8479 = vmatprep.subr.bf16.mxu1 %v17828_v3  ;;  %8345 = vmatprep.mubr.bf16.mxu0 %v19398_v26  ;;  %v17874_v3 = vld [vmem:[%s24677_s1 + $0x2048] ss:$72 sps:$4 sm:$0xff]  }
 0x3da   : > { %8509 = vmatprep.mubr.bf16.mxu1 %v19398_v26 }
 0x3db   : > { %8316 = vmatpush1.bf16.msra.mxu0 %v17823_v4  ;;  %v17879_v4 = vld [vmem:[%s24677_s1 + $0x20d4] ss:$72 sps:$4 sm:$0xff]  }
 0x3dc   : > { %8480 = vmatpush1.bf16.msra.mxu1 %v17826_v6  ;;  %8317 = vmatprep.subr.bf16.mxu0 %v17831_v7  ;;  %v17882_v6 = vld [vmem:[%s24677_s1 + $0x20dc] ss:$72 sps:$4 sm:$0xff]   ;;  %v17877_v7 = vld [vmem:[%s24677_s1 + $0x20d0] ss:$72 sps:$4 sm:$0xff]  }
 0x3dd   : > { %8481 = vmatprep.subr.bf16.mxu1 %v17834_v8  ;;  %v17880_v8 = vld [vmem:[%s24677_s1 + $0x20d8] ss:$72 sps:$4 sm:$0xff]  }
 0x3df   : > { %8318 = vmatpush1.bf16.msra.mxu0 %v17829_v9  ;;  %v17885_v9 = vld [vmem:[%s24677_s1 + $0x2164] ss:$72 sps:$4 sm:$0xff]  }
 0x3e0   : > { %8482 = vmatpush1.bf16.msra.mxu1 %v17832_v10  ;;  %8319 = vmatprep.subr.bf16.mxu0 %v17837_v11  ;;  %v17888_v10 = vld [vmem:[%s24677_s1 + $0x216c] ss:$72 sps:$4 sm:$0xff]   ;;  %v17883_v11 = vld [vmem:[%s24677_s1 + $0x2160] ss:$72 sps:$4 sm:$0xff]  }
 0x3e1   : > { %8483 = vmatprep.subr.bf16.mxu1 %v17840_v12  ;;  %v17886_v12 = vld [vmem:[%s24677_s1 + $0x2168] ss:$72 sps:$4 sm:$0xff]  }
 0x3e3   : > { %8320 = vmatpush1.bf16.msra.mxu0 %v17835_v14  ;;  %v17891_v14 = vld [vmem:[%s24677_s1 + $0x21f4] ss:$72 sps:$4 sm:$0xff]  }
 0x3e4   : > { %8484 = vmatpush1.bf16.msra.mxu1 %v17838_v15  ;;  %8321 = vmatprep.subr.bf16.mxu0 %v17843_v16  ;;  %v17894_v15 = vld [vmem:[%s24677_s1 + $0x21fc] ss:$72 sps:$4 sm:$0xff]   ;;  %v17889_v16 = vld [vmem:[%s24677_s1 + $0x21f0] ss:$72 sps:$4 sm:$0xff]  }
 0x3e5   : > { %8485 = vmatprep.subr.bf16.mxu1 %v17846_v18  ;;  %v17892_v18 = vld [vmem:[%s24677_s1 + $0x21f8] ss:$72 sps:$4 sm:$0xff]  }
 0x3e7   : > { %8322 = vmatpush1.bf16.msra.mxu0 %v17841_v19  ;;  %v17897_v19 = vld [vmem:[%s24677_s1 + $0x2284] ss:$72 sps:$4 sm:$0xff]  }
 0x3e8   : > { %8486 = vmatpush1.bf16.msra.mxu1 %v17844_v20  ;;  %8323 = vmatprep.subr.bf16.mxu0 %v17849_v29  ;;  %v17900_v20 = vld [vmem:[%s24677_s1 + $0x228c] ss:$72 sps:$4 sm:$0xff]   ;;  %v17895_v29 = vld [vmem:[%s24677_s1 + $0x2280] ss:$72 sps:$4 sm:$0xff]  }
 0x3e9   : > { %8487 = vmatprep.subr.bf16.mxu1 %v17852_v30  ;;  %v21843_v37 = vpop.f32.mrb[8].mxu0  ;;  %v17898_v30 = vld [vmem:[%s24677_s1 + $0x2288] ss:$72 sps:$4 sm:$0xff]  }
 0x3ea   : > { %v21845_v38 = vpop.f32.mrb[8].mxu1  ;;  %v21849_v40 = vpop.f32.mrb[9].mxu0 }
 0x3eb   : > { %v8686_v39 = vpack.c.bf16 %v21845_v38, %v21843_v37  ;;  %v21851_v47 = vpop.f32.mrb[9].mxu1  ;;  %v8023_v50 = vpop.f32.mrb[10].mxu0  ;;  %8324 = vmatpush1.bf16.msra.mxu0 %v17847_v33  ;;  %v17903_v33 = vld [vmem:[%s24677_s1 + $0x2314] ss:$72 sps:$4 sm:$0xff]   ;;  %v17937_v37 = vld [vmem:[%s24677_s1 + $0x4c0] ss:$72 sps:$4 sm:$0xff]  }
 0x3ec   : > { %v8687_v49 = vpack.c.bf16 %v21851_v47, %v21849_v40  ;;  %8488 = vmatpush1.bf16.msra.mxu1 %v17850_v34  ;;  %v8187_v53 = vpop.f32.mrb[10].mxu1  ;;  %v8024_v54 = vpop.f32.mrb[11].mxu0  ;;  %8325 = vmatprep.subr.bf16.mxu0 %v17855_v35  ;;  %v17906_v34 = vld [vmem:[%s24677_s1 + $0x231c] ss:$72 sps:$4 sm:$0xff]   ;;  %v17901_v35 = vld [vmem:[%s24677_s1 + $0x2310] ss:$72 sps:$4 sm:$0xff]  }
 0x3ed   : > { %8489 = vmatprep.subr.bf16.mxu1 %v17858_v36  ;;  %v8188_v57 = vpop.f32.mrb[11].mxu1  ;;  %v17904_v36 = vld [vmem:[%s24677_s1 + $0x2318] ss:$72 sps:$4 sm:$0xff]   ;;  %v17909_v50 = vld [vmem:[%s24677_s1 + $0x23a4] ss:$72 sps:$4 sm:$0xff]  }
 0x3ee   : > { %v17910_v53 = vld [vmem:[%s24677_s1 + $0x23a8] ss:$72 sps:$4 sm:$0xff]   ;;  %v17915_v54 = vld [vmem:[%s24677_s1 + $0x44] ss:$72 sps:$4 sm:$0xff]   ;;  %v17942_v38 = vld [vmem:[%s24677_s1 + $0x554] ss:$72 sps:$4 sm:$0xff]  }
 0x3ef   : > { %8326 = vmatpush1.bf16.msra.mxu0 %v17853_v51  ;;  %v17912_v51 = vld [vmem:[%s24677_s1 + $0x23ac] ss:$72 sps:$4 sm:$0xff]   ;;  %v17916_v57 = vld [vmem:[%s24677_s1 + $0xd0] ss:$72 sps:$4 sm:$0xff]   ;;  %v17943_v47 = vld [vmem:[%s24677_s1 + $0x5e0] ss:$72 sps:$4 sm:$0xff]  }
 0x3f0   : > { %8490 = vmatpush1.bf16.msra.mxu1 %v17856_v52  ;;  %8327 = vmatprep.subr.bf16.mxu0 %v17861_v55  ;;  %v17907_v52 = vld [vmem:[%s24677_s1 + $0x23a0] ss:$72 sps:$4 sm:$0xff]   ;;  %v17945_v40 = vld [vmem:[%s24677_s1 + $0x5e4] ss:$72 sps:$4 sm:$0xff]  }
 0x3f1   : > { %8491 = vmatprep.subr.bf16.mxu1 %v17864_v56  ;;  %v17913_v55 = vld [vmem:[%s24677_s1 + $0x40] ss:$72 sps:$4 sm:$0xff]   ;;  %v17918_v56 = vld [vmem:[%s24677_s1 + $0xd4] ss:$72 sps:$4 sm:$0xff]  }
 0x3f3   : > { %8328 = vmatpush1.bf16.msra.mxu0 %v17859_v58  ;;  %v17946_v58 = vld [vmem:[%s24677_s1 + $0x670] ss:$72 sps:$4 sm:$0xff]  }
 0x3f4   : > { %8492 = vmatpush1.bf16.msra.mxu1 %v17862_v59  ;;  %8329 = vmatprep.subr.bf16.mxu0 %v17867_v60  ;;  %v17951_v59 = vld [vmem:[%s24677_s1 + $0x704] ss:$72 sps:$4 sm:$0xff]   ;;  %v17949_v60 = vld [vmem:[%s24677_s1 + $0x700] ss:$72 sps:$4 sm:$0xff]  }
 0x3f5   : > { %8493 = vmatprep.subr.bf16.mxu1 %v17870_v61  ;;  %v17954_v61 = vld [vmem:[%s24677_s1 + $0x794] ss:$72 sps:$4 sm:$0xff]  }
 0x3f7   : > { %8330 = vmatpush1.bf16.msra.mxu0 %v17865_v62  ;;  %v17952_v62 = vld [vmem:[%s24677_s1 + $0x790] ss:$72 sps:$4 sm:$0xff]  }
 0x3f8   : > { %8494 = vmatpush1.bf16.msra.mxu1 %v17868_v63  ;;  %8331 = vmatprep.subr.bf16.mxu0 %v17873_v0  ;;  %v17957_v63 = vld [vmem:[%s24677_s1 + $0x824] ss:$72 sps:$4 sm:$0xff]   ;;  %v17955_v0 = vld [vmem:[%s24677_s1 + $0x820] ss:$72 sps:$4 sm:$0xff]  }
 0x3f9   : > { %8495 = vmatprep.subr.bf16.mxu1 %v17876_v1  ;;  %v17960_v1 = vld [vmem:[%s24677_s1 + $0x8b4] ss:$72 sps:$4 sm:$0xff]  }
 0x3fb   : > { %8332 = vmatpush1.bf16.msra.mxu0 %v17871_v2  ;;  %v17958_v2 = vld [vmem:[%s24677_s1 + $0x8b0] ss:$72 sps:$4 sm:$0xff]  }
 0x3fc   : > { %8496 = vmatpush1.bf16.msra.mxu1 %v17874_v3  ;;  %8333 = vmatprep.subr.bf16.mxu0 %v17879_v4  ;;  %v17963_v3 = vld [vmem:[%s24677_s1 + $0x944] ss:$72 sps:$4 sm:$0xff]   ;;  %v17961_v4 = vld [vmem:[%s24677_s1 + $0x940] ss:$72 sps:$4 sm:$0xff]  }
 0x3fd   : > { %8497 = vmatprep.subr.bf16.mxu1 %v17882_v6  ;;  %v17966_v6 = vld [vmem:[%s24677_s1 + $0x9d4] ss:$72 sps:$4 sm:$0xff]  }
 0x3ff   : > { %8334 = vmatpush1.bf16.msra.mxu0 %v17877_v7  ;;  %v17964_v7 = vld [vmem:[%s24677_s1 + $0x9d0] ss:$72 sps:$4 sm:$0xff]  }
 0x400   : > { %8498 = vmatpush1.bf16.msra.mxu1 %v17880_v8  ;;  %8335 = vmatprep.subr.bf16.mxu0 %v17885_v9  ;;  %v17969_v8 = vld [vmem:[%s24677_s1 + $0xa64] ss:$72 sps:$4 sm:$0xff]   ;;  %v17967_v9 = vld [vmem:[%s24677_s1 + $0xa60] ss:$72 sps:$4 sm:$0xff]  }
 0x401   : > { %8499 = vmatprep.subr.bf16.mxu1 %v17888_v10  ;;  %v17975_v10 = vld [vmem:[%s24677_s1 + $0xb84] ss:$72 sps:$4 sm:$0xff]  }
 0x403   : > { %8336 = vmatpush1.bf16.msra.mxu0 %v17883_v11  ;;  %v17973_v11 = vld [vmem:[%s24677_s1 + $0xb80] ss:$72 sps:$4 sm:$0xff]  }
 0x404   : > { %8500 = vmatpush1.bf16.msra.mxu1 %v17886_v12  ;;  %8337 = vmatprep.subr.bf16.mxu0 %v17891_v14  ;;  %v17978_v12 = vld [vmem:[%s24677_s1 + $0xc14] ss:$72 sps:$4 sm:$0xff]   ;;  %v17976_v14 = vld [vmem:[%s24677_s1 + $0xc10] ss:$72 sps:$4 sm:$0xff]  }
 0x405   : > { %8501 = vmatprep.subr.bf16.mxu1 %v17894_v15  ;;  %v17981_v15 = vld [vmem:[%s24677_s1 + $0xca4] ss:$72 sps:$4 sm:$0xff]  }
 0x407   : > { %8338 = vmatpush1.bf16.msra.mxu0 %v17889_v16  ;;  %v17979_v16 = vld [vmem:[%s24677_s1 + $0xca0] ss:$72 sps:$4 sm:$0xff]  }
 0x408   : > { %8502 = vmatpush1.bf16.msra.mxu1 %v17892_v18  ;;  %8339 = vmatprep.subr.bf16.mxu0 %v17897_v19  ;;  %v17984_v18 = vld [vmem:[%s24677_s1 + $0xd34] ss:$72 sps:$4 sm:$0xff]   ;;  %v17982_v19 = vld [vmem:[%s24677_s1 + $0xd30] ss:$72 sps:$4 sm:$0xff]  }
 0x409   : > { %8503 = vmatprep.subr.bf16.mxu1 %v17900_v20  ;;  %v17987_v20 = vld [vmem:[%s24677_s1 + $0xdc4] ss:$72 sps:$4 sm:$0xff]  }
 0x40b   : > { %8340 = vmatpush1.bf16.msra.mxu0 %v17895_v29  ;;  %v17985_v29 = vld [vmem:[%s24677_s1 + $0xdc0] ss:$72 sps:$4 sm:$0xff]  }
 0x40c   : > { %8504 = vmatpush1.bf16.msra.mxu1 %v17898_v30  ;;  %8341 = vmatprep.subr.bf16.mxu0 %v17903_v33  ;;  %v17990_v30 = vld [vmem:[%s24677_s1 + $0xe54] ss:$72 sps:$4 sm:$0xff]   ;;  %v17988_v33 = vld [vmem:[%s24677_s1 + $0xe50] ss:$72 sps:$4 sm:$0xff]  }
 0x40d   : > { %8505 = vmatprep.subr.bf16.mxu1 %v17906_v34  ;;  %v17993_v34 = vld [vmem:[%s24677_s1 + $0xee4] ss:$72 sps:$4 sm:$0xff]  }
 0x40f   : > { %8342 = vmatpush1.bf16.msra.mxu0 %v17901_v35  ;;  %v17991_v35 = vld [vmem:[%s24677_s1 + $0xee0] ss:$72 sps:$4 sm:$0xff]  }
 0x410   : > { %8506 = vmatpush1.bf16.msra.mxu1 %v17904_v36  ;;  %8343 = vmatprep.subr.bf16.mxu0 %v17909_v50  ;;  %v17996_v36 = vld [vmem:[%s24677_s1 + $0xf74] ss:$72 sps:$4 sm:$0xff]   ;;  %v17994_v50 = vld [vmem:[%s24677_s1 + $0xf70] ss:$72 sps:$4 sm:$0xff]  }
 0x411   : > { %8507 = vmatprep.subr.bf16.mxu1 %v17912_v51  ;;  %v17999_v51 = vld [vmem:[%s24677_s1 + $0x1004] ss:$72 sps:$4 sm:$0xff]  }
 0x413   : > { %8344 = vmatpush1.bf16.msra.mxu0 %v17907_v52  ;;  %v17997_v52 = vld [vmem:[%s24677_s1 + $0x1000] ss:$72 sps:$4 sm:$0xff]  }
 0x414   : > { %8508 = vmatpush1.bf16.msra.mxu1 %v17910_v53  ;;  %8518 = vmatprep.subr.bf16.mxu0 %v17915_v54  ;;  %v18002_v53 = vld [vmem:[%s24677_s1 + $0x1094] ss:$72 sps:$4 sm:$0xff]   ;;  %v18000_v54 = vld [vmem:[%s24677_s1 + $0x1090] ss:$72 sps:$4 sm:$0xff]  }
 0x415   : > { %8783 = vmatprep.subr.bf16.mxu1 %v8683_v28  ;;  %v17930_v28 = vld [vmem:[%s24677_s1 + $0x314] ss:$72 sps:$4 sm:$0xff]  }
 0x416   : > { %8346 = vmatmul.mubr.bf16.vlgmr.msra.gmra.mrb[12].mxu0 %v19585_v31 }
 0x417   : > { %8510 = vmatmul.mubr.bf16.vlgmr.msra.gmra.mrb[12].mxu1 %v19585_v31  ;;  %8519 = vmatpush1.bf16.msra.mxu0 %v17913_v55  ;;  %v18005_v55 = vld [vmem:[%s24677_s1 + $0x1124] ss:$72 sps:$4 sm:$0xff]  }
 0x418   : > { %8784 = vmatpush1.bf16.msra.mxu1 %v8682_v24  ;;  %8520 = vmatprep.subr.bf16.mxu0 %v17918_v56  ;;  %v17927_v24 = vld [vmem:[%s24677_s1 + $0x284] ss:$72 sps:$4 sm:$0xff]   ;;  %v18003_v56 = vld [vmem:[%s24677_s1 + $0x1120] ss:$72 sps:$4 sm:$0xff]  }
 0x419   : > { %8785 = vmatprep.subr.bf16.mxu1 %v8685_v46  ;;  %8550 = vmatprep.mubr.bf16.mxu0 %v18917_v48  ;;  %v17922_v48 = vld [vmem:[%s24677_s1 + $0x1f0] ss:$72 sps:$4 sm:$0xff]   ;;  %v17939_v46 = vld [vmem:[%s24677_s1 + $0x4c4] ss:$72 sps:$4 sm:$0xff]  }
 0x41b   : > { %8521 = vmatpush1.bf16.msra.mxu0 %v17916_v57  ;;  %v18008_v57 = vld [vmem:[%s24677_s1 + $0x11b4] ss:$72 sps:$4 sm:$0xff]  }
 0x41c   : > { %8786 = vmatpush1.bf16.msra.mxu1 %v8684_v43  ;;  %8522 = vmatprep.subr.bf16.mxu0 %v17921_v25  ;;  %v17931_v43 = vld [vmem:[%s24677_s1 + $0x3a0] ss:$72 sps:$4 sm:$0xff]   ;;  %v18006_v25 = vld [vmem:[%s24677_s1 + $0x11b0] ss:$72 sps:$4 sm:$0xff]  }
 0x41d   : > { %8787 = vmatprep.subr.bf16.mxu1 %v8687_v49  ;;  %v17948_v49 = vld [vmem:[%s24677_s1 + $0x674] ss:$72 sps:$4 sm:$0xff]  }
 0x41f   : > { %8523 = vmatpush1.bf16.msra.mxu0 %v17919_v21  ;;  %v18011_v21 = vld [vmem:[%s24677_s1 + $0x1244] ss:$72 sps:$4 sm:$0xff]  }
 0x420   : > { %8788 = vmatpush1.bf16.msra.mxu1 %v8686_v39  ;;  %8524 = vmatprep.subr.bf16.mxu0 %v17924_v23  ;;  %v17940_v39 = vld [vmem:[%s24677_s1 + $0x550] ss:$72 sps:$4 sm:$0xff]   ;;  %v18009_v23 = vld [vmem:[%s24677_s1 + $0x1240] ss:$72 sps:$4 sm:$0xff]  }
 0x423   : > { %8525 = vmatpush1.bf16.msra.mxu0 %v17922_v48  ;;  %v18014_v48 = vld [vmem:[%s24677_s1 + $0x12d4] ss:$72 sps:$4 sm:$0xff]  }
 0x424   : > { %8526 = vmatprep.subr.bf16.mxu0 %v17927_v24  ;;  %v18012_v24 = vld [vmem:[%s24677_s1 + $0x12d0] ss:$72 sps:$4 sm:$0xff]  }
 0x427   : > { %8527 = vmatpush1.bf16.msra.mxu0 %v17925_v27  ;;  %v18017_v27 = vld [vmem:[%s24677_s1 + $0x1364] ss:$72 sps:$4 sm:$0xff]  }
 0x428   : > { %8528 = vmatprep.subr.bf16.mxu0 %v17930_v28  ;;  %v18015_v28 = vld [vmem:[%s24677_s1 + $0x1360] ss:$72 sps:$4 sm:$0xff]  }
 0x42b   : > { %8529 = vmatpush1.bf16.msra.mxu0 %v17928_v41  ;;  %v18023_v41 = vld [vmem:[%s24677_s1 + $0x1484] ss:$72 sps:$4 sm:$0xff]  }
 0x42c   : > { %8530 = vmatprep.subr.bf16.mxu0 %v17933_v42  ;;  %v18021_v42 = vld [vmem:[%s24677_s1 + $0x1480] ss:$72 sps:$4 sm:$0xff]  }
 0x42f   : > { %8531 = vmatpush1.bf16.msra.mxu0 %v17931_v43  ;;  %v18026_v43 = vld [vmem:[%s24677_s1 + $0x1514] ss:$72 sps:$4 sm:$0xff]  }
 0x430   : > { %8532 = vmatprep.subr.bf16.mxu0 %v17936_v44  ;;  %v18024_v44 = vld [vmem:[%s24677_s1 + $0x1510] ss:$72 sps:$4 sm:$0xff]  }
 0x433   : > { %8533 = vmatpush1.bf16.msra.mxu0 %v17934_v45  ;;  %v18029_v45 = vld [vmem:[%s24677_s1 + $0x15a4] ss:$72 sps:$4 sm:$0xff]  }
 0x434   : > { %8534 = vmatprep.subr.bf16.mxu0 %v17939_v46  ;;  %v18027_v46 = vld [vmem:[%s24677_s1 + $0x15a0] ss:$72 sps:$4 sm:$0xff]  }
 0x437   : > { %8535 = vmatpush1.bf16.msra.mxu0 %v17937_v37  ;;  %v18032_v37 = vld [vmem:[%s24677_s1 + $0x1634] ss:$72 sps:$4 sm:$0xff]  }
 0x438   : > { %8536 = vmatprep.subr.bf16.mxu0 %v17942_v38  ;;  %v18030_v38 = vld [vmem:[%s24677_s1 + $0x1630] ss:$72 sps:$4 sm:$0xff]  }
 0x43b   : > { %8537 = vmatpush1.bf16.msra.mxu0 %v17940_v39  ;;  %v18035_v39 = vld [vmem:[%s24677_s1 + $0x16c4] ss:$72 sps:$4 sm:$0xff]  }
 0x43c   : > { %8538 = vmatprep.subr.bf16.mxu0 %v17945_v40  ;;  %v18033_v40 = vld [vmem:[%s24677_s1 + $0x16c0] ss:$72 sps:$4 sm:$0xff]  }
 0x43f   : > { %8539 = vmatpush1.bf16.msra.mxu0 %v17943_v47  ;;  %v18038_v47 = vld [vmem:[%s24677_s1 + $0x1754] ss:$72 sps:$4 sm:$0xff]  }
 0x440   : > { %8540 = vmatprep.subr.bf16.mxu0 %v17948_v49  ;;  %v18036_v49 = vld [vmem:[%s24677_s1 + $0x1750] ss:$72 sps:$4 sm:$0xff]  }
 0x443   : > { %8541 = vmatpush1.bf16.msra.mxu0 %v17946_v58  ;;  %v18041_v58 = vld [vmem:[%s24677_s1 + $0x17e4] ss:$72 sps:$4 sm:$0xff]  }
 0x444   : > { %8542 = vmatprep.subr.bf16.mxu0 %v17951_v59  ;;  %v18039_v59 = vld [vmem:[%s24677_s1 + $0x17e0] ss:$72 sps:$4 sm:$0xff]  }
 0x447   : > { %8543 = vmatpush1.bf16.msra.mxu0 %v17949_v60  ;;  %v18044_v60 = vld [vmem:[%s24677_s1 + $0x1874] ss:$72 sps:$4 sm:$0xff]  }
 0x448   : > { %8544 = vmatprep.subr.bf16.mxu0 %v17954_v61  ;;  %v18042_v61 = vld [vmem:[%s24677_s1 + $0x1870] ss:$72 sps:$4 sm:$0xff]  }
 0x44b   : > { %8545 = vmatpush1.bf16.msra.mxu0 %v17952_v62  ;;  %v18047_v62 = vld [vmem:[%s24677_s1 + $0x1904] ss:$72 sps:$4 sm:$0xff]  }
 0x44c   : > { %8546 = vmatprep.subr.bf16.mxu0 %v17957_v63  ;;  %v18045_v63 = vld [vmem:[%s24677_s1 + $0x1900] ss:$72 sps:$4 sm:$0xff]  }
 0x44f   : > { %8547 = vmatpush1.bf16.msra.mxu0 %v17955_v0  ;;  %v18050_v0 = vld [vmem:[%s24677_s1 + $0x1994] ss:$72 sps:$4 sm:$0xff]  }
 0x450   : > { %8548 = vmatprep.subr.bf16.mxu0 %v17960_v1  ;;  %v18048_v1 = vld [vmem:[%s24677_s1 + $0x1990] ss:$72 sps:$4 sm:$0xff]  }
 0x453   : > { %8549 = vmatpush1.bf16.msra.mxu0 %v17958_v2  ;;  %v18053_v2 = vld [vmem:[%s24677_s1 + $0x1a24] ss:$72 sps:$4 sm:$0xff]  }
 0x454   : > { %8559 = vmatprep.subr.bf16.mxu0 %v17963_v3  ;;  %v18051_v3 = vld [vmem:[%s24677_s1 + $0x1a20] ss:$72 sps:$4 sm:$0xff]  }
 0x456   : > { %8551 = vmatmul.mubr.bf16.vlgmr.msra.gmra.mrb[16].mxu0 %v18979_v5  ;;  %v17972_v5 = vld [vmem:[%s24677_s1 + $0xaf4] ss:$72 sps:$4 sm:$0xff]  }
 0x457   : > { %8560 = vmatpush1.bf16.msra.mxu0 %v17961_v4  ;;  %8591 = vmatprep.mubr.bf16.mxu0 %v19059_v32  ;;  %v17970_v32 = vld [vmem:[%s24677_s1 + $0xaf0] ss:$72 sps:$4 sm:$0xff]   ;;  %v18056_v4 = vld [vmem:[%s24677_s1 + $0x1ab4] ss:$72 sps:$4 sm:$0xff]  }
 0x458   : > { %8561 = vmatprep.subr.bf16.mxu0 %v17966_v6  ;;  %v18054_v6 = vld [vmem:[%s24677_s1 + $0x1ab0] ss:$72 sps:$4 sm:$0xff]  }
 0x45b   : > { %8562 = vmatpush1.bf16.msra.mxu0 %v17964_v7  ;;  %v18059_v7 = vld [vmem:[%s24677_s1 + $0x1b44] ss:$72 sps:$4 sm:$0xff]  }
 0x45c   : > { %8563 = vmatprep.subr.bf16.mxu0 %v17969_v8  ;;  %v18057_v8 = vld [vmem:[%s24677_s1 + $0x1b40] ss:$72 sps:$4 sm:$0xff]  }
 0x45f   : > { %8564 = vmatpush1.bf16.msra.mxu0 %v17967_v9  ;;  %v18062_v9 = vld [vmem:[%s24677_s1 + $0x1bd4] ss:$72 sps:$4 sm:$0xff]  }
 0x460   : > { %8565 = vmatprep.subr.bf16.mxu0 %v17972_v5  ;;  %v18060_v5 = vld [vmem:[%s24677_s1 + $0x1bd0] ss:$72 sps:$4 sm:$0xff]  }
 0x463   : > { %8566 = vmatpush1.bf16.msra.mxu0 %v17970_v32  ;;  %v18065_v32 = vld [vmem:[%s24677_s1 + $0x1c64] ss:$72 sps:$4 sm:$0xff]  }
 0x464   : > { %8567 = vmatprep.subr.bf16.mxu0 %v17975_v10  ;;  %v18063_v10 = vld [vmem:[%s24677_s1 + $0x1c60] ss:$72 sps:$4 sm:$0xff]  }
 0x467   : > { %8568 = vmatpush1.bf16.msra.mxu0 %v17973_v11  ;;  %v18071_v11 = vld [vmem:[%s24677_s1 + $0x1d84] ss:$72 sps:$4 sm:$0xff]  }
 0x468   : > { %8569 = vmatprep.subr.bf16.mxu0 %v17978_v12  ;;  %v18069_v12 = vld [vmem:[%s24677_s1 + $0x1d80] ss:$72 sps:$4 sm:$0xff]  }
 0x46b   : > { %8570 = vmatpush1.bf16.msra.mxu0 %v17976_v14  ;;  %v18074_v14 = vld [vmem:[%s24677_s1 + $0x1e14] ss:$72 sps:$4 sm:$0xff]  }
 0x46c   : > { %8571 = vmatprep.subr.bf16.mxu0 %v17981_v15  ;;  %v18072_v15 = vld [vmem:[%s24677_s1 + $0x1e10] ss:$72 sps:$4 sm:$0xff]  }
 0x46f   : > { %8572 = vmatpush1.bf16.msra.mxu0 %v17979_v16  ;;  %v18077_v16 = vld [vmem:[%s24677_s1 + $0x1ea4] ss:$72 sps:$4 sm:$0xff]  }
 0x470   : > { %8573 = vmatprep.subr.bf16.mxu0 %v17984_v18 }
 0x473   : > { %8574 = vmatpush1.bf16.msra.mxu0 %v17982_v19 }
 0x474   : > { %8575 = vmatprep.subr.bf16.mxu0 %v17987_v20 }
 0x477   : > { %8576 = vmatpush1.bf16.msra.mxu0 %v17985_v29 }
 0x478   : > { %8577 = vmatprep.subr.bf16.mxu0 %v17990_v30 }
 0x47b   : > { %8578 = vmatpush1.bf16.msra.mxu0 %v17988_v33 }
 0x47c   : > { %8579 = vmatprep.subr.bf16.mxu0 %v17993_v34 }
 0x47f   : > { %8580 = vmatpush1.bf16.msra.mxu0 %v17991_v35  ;;  %v18075_v35 = vld [vmem:[%s24677_s1 + $0x1ea0] ss:$72 sps:$4 sm:$0xff]  }
 0x480   : > { %8581 = vmatprep.subr.bf16.mxu0 %v17996_v36 }
 0x483   : > { %8582 = vmatpush1.bf16.msra.mxu0 %v17994_v50 }
 0x484   : > { %8583 = vmatprep.subr.bf16.mxu0 %v17999_v51  ;;  %v18080_v51 = vld [vmem:[%s24677_s1 + $0x1f34] ss:$72 sps:$4 sm:$0xff]  }
 0x487   : > { %8584 = vmatpush1.bf16.msra.mxu0 %v17997_v52 }
 0x488   : > { %8585 = vmatprep.subr.bf16.mxu0 %v18002_v53  ;;  %v18078_v53 = vld [vmem:[%s24677_s1 + $0x1f30] ss:$72 sps:$4 sm:$0xff]  }
 0x48b   : > { %8586 = vmatpush1.bf16.msra.mxu0 %v18000_v54  ;;  %v18083_v54 = vld [vmem:[%s24677_s1 + $0x1fc4] ss:$72 sps:$4 sm:$0xff]  }
 0x48c   : > { %8587 = vmatprep.subr.bf16.mxu0 %v18005_v55  ;;  %v18081_v55 = vld [vmem:[%s24677_s1 + $0x1fc0] ss:$72 sps:$4 sm:$0xff]  }
 0x48f   : > { %8588 = vmatpush1.bf16.msra.mxu0 %v18003_v56  ;;  %v18086_v56 = vld [vmem:[%s24677_s1 + $0x2054] ss:$72 sps:$4 sm:$0xff]  }
 0x490   : > { %8589 = vmatprep.subr.bf16.mxu0 %v18008_v57  ;;  %v18084_v57 = vld [vmem:[%s24677_s1 + $0x2050] ss:$72 sps:$4 sm:$0xff]  }
 0x493   : > { %8590 = vmatpush1.bf16.msra.mxu0 %v18006_v25  ;;  %v18089_v25 = vld [vmem:[%s24677_s1 + $0x20e4] ss:$72 sps:$4 sm:$0xff]  }
 0x494   : > { %8600 = vmatprep.subr.bf16.mxu0 %v18011_v21  ;;  %v18087_v21 = vld [vmem:[%s24677_s1 + $0x20e0] ss:$72 sps:$4 sm:$0xff]  }
 0x496   : > { %8592 = vmatmul.mubr.bf16.vlgmr.msra.gmra.mrb[16].mxu0 %v19187_v13  ;;  %v18020_v13 = vld [vmem:[%s24677_s1 + $0x13f4] ss:$72 sps:$4 sm:$0xff]  }
 0x497   : > { %8601 = vmatpush1.bf16.msra.mxu0 %v18009_v23  ;;  %8632 = vmatprep.mubr.bf16.mxu0 %v19196_v17  ;;  %v18018_v17 = vld [vmem:[%s24677_s1 + $0x13f0] ss:$72 sps:$4 sm:$0xff]   ;;  %v18092_v23 = vld [vmem:[%s24677_s1 + $0x2174] ss:$72 sps:$4 sm:$0xff]  }
 0x498   : > { %8602 = vmatprep.subr.bf16.mxu0 %v18014_v48  ;;  %v18090_v48 = vld [vmem:[%s24677_s1 + $0x2170] ss:$72 sps:$4 sm:$0xff]  }
 0x49b   : > { %8603 = vmatpush1.bf16.msra.mxu0 %v18012_v24  ;;  %v18095_v24 = vld [vmem:[%s24677_s1 + $0x2204] ss:$72 sps:$4 sm:$0xff]  }
 0x49c   : > { %8604 = vmatprep.subr.bf16.mxu0 %v18017_v27  ;;  %v18093_v27 = vld [vmem:[%s24677_s1 + $0x2200] ss:$72 sps:$4 sm:$0xff]  }
 0x49f   : > { %8605 = vmatpush1.bf16.msra.mxu0 %v18015_v28  ;;  %v18098_v28 = vld [vmem:[%s24677_s1 + $0x2294] ss:$72 sps:$4 sm:$0xff]  }
 0x4a0   : > { %8606 = vmatprep.subr.bf16.mxu0 %v18020_v13  ;;  %v18096_v13 = vld [vmem:[%s24677_s1 + $0x2290] ss:$72 sps:$4 sm:$0xff]  }
 0x4a3   : > { %8607 = vmatpush1.bf16.msra.mxu0 %v18018_v17  ;;  %v18101_v17 = vld [vmem:[%s24677_s1 + $0x2324] ss:$72 sps:$4 sm:$0xff]  }
 0x4a4   : > { %8608 = vmatprep.subr.bf16.mxu0 %v18023_v41  ;;  %v18099_v41 = vld [vmem:[%s24677_s1 + $0x2320] ss:$72 sps:$4 sm:$0xff]  }
 0x4a7   : > { %8609 = vmatpush1.bf16.msra.mxu0 %v18021_v42  ;;  %v18104_v42 = vld [vmem:[%s24677_s1 + $0x23b4] ss:$72 sps:$4 sm:$0xff]  }
 0x4a8   : > { %8610 = vmatprep.subr.bf16.mxu0 %v18026_v43  ;;  %v18102_v43 = vld [vmem:[%s24677_s1 + $0x23b0] ss:$72 sps:$4 sm:$0xff]  }
 0x4ab   : > { %8611 = vmatpush1.bf16.msra.mxu0 %v18024_v44  ;;  %v24684_v44 = vmov 0  }
 0x4ac   : > { %8612 = vmatprep.subr.bf16.mxu0 %v18029_v45  ;;  %8815 = vmatprep.mubr.bf16.mxu1 %v24684_v44  ;;  %v18673_v45 = vmov 65535  }
 0x4af   : > { %8613 = vmatpush1.bf16.msra.mxu0 %v18027_v46  ;;  %v8775_v46 = vsel %vm8773_vm0, 4294967295, %v18673_v45 }
 0x4b0   : > { %8614 = vmatprep.subr.bf16.mxu0 %v18032_v37 }
 0x4b3   : > { %8615 = vmatpush1.bf16.msra.mxu0 %v18030_v38  ;;  %v18674_v38 = vmov 1.0  }
 0x4b4   : > { %8616 = vmatprep.subr.bf16.mxu0 %v18035_v39 }
 0x4b7   : > { %8617 = vmatpush1.bf16.msra.mxu0 %v18033_v40  ;;  %v8776_v40 = vsel %vm8774_vm1, %v8775_v46, 0 }
 0x4b8   : > { %8618 = vmatprep.subr.bf16.mxu0 %v18038_v47 }
 0x4bb   : > { %8619 = vmatpush1.bf16.msra.mxu0 %v18036_v49 }
 0x4bc   : > { %8620 = vmatprep.subr.bf16.mxu0 %v18041_v58 }
 0x4bf   : > { %8621 = vmatpush1.bf16.msra.mxu0 %v18039_v59 }
 0x4c0   : > { %8622 = vmatprep.subr.bf16.mxu0 %v18044_v60 }
 0x4c3   : > { %8623 = vmatpush1.bf16.msra.mxu0 %v18042_v61 }
 0x4c4   : > { %8624 = vmatprep.subr.bf16.mxu0 %v18047_v62  ;;  %v18105_v62 = vld [vmem:[%s24678_s2] sm:$0xff]  }
 0x4c7   : > { %8625 = vmatpush1.bf16.msra.mxu0 %v18045_v63  ;;  %v18113_v63 = vld [vmem:[%s24679_s3] ss:$20 sps:$4 sm:$0xff]  }
 0x4c8   : > { %8626 = vmatprep.subr.bf16.mxu0 %v18050_v0  ;;  %v18118_v0 = vld [vmem:[%s24679_s3 + $0x2c] ss:$20 sps:$4 sm:$0xff]  }
 0x4cb   : > { %8627 = vmatpush1.bf16.msra.mxu0 %v18048_v1  ;;  %v18116_v1 = vld [vmem:[%s24679_s3 + $0x28] ss:$20 sps:$4 sm:$0xff]  }
 0x4cc   : > { %8628 = vmatprep.subr.bf16.mxu0 %v18053_v2  ;;  %v18121_v2 = vld [vmem:[%s24679_s3 + $0x54] ss:$20 sps:$4 sm:$0xff]  }
 0x4cf   : > { %8629 = vmatpush1.bf16.msra.mxu0 %v18051_v3  ;;  %v18106_v3 = vld [vmem:[%s24678_s2 + $0x8] sm:$0xff]  }
 0x4d0   : > { %8630 = vmatprep.subr.bf16.mxu0 %v18056_v4  ;;  %v18119_v4 = vld [vmem:[%s24679_s3 + $0x50] ss:$20 sps:$4 sm:$0xff]  }
 0x4d3   : > { %8631 = vmatpush1.bf16.msra.mxu0 %v18054_v6  ;;  %v18124_v6 = vld [vmem:[%s24679_s3 + $0x7c] ss:$20 sps:$4 sm:$0xff]  }
 0x4d4   : > { %8641 = vmatprep.subr.bf16.mxu0 %v18059_v7  ;;  %v18122_v7 = vld [vmem:[%s24679_s3 + $0x78] ss:$20 sps:$4 sm:$0xff]  }
 0x4d6   : > { %8633 = vmatmul.mubr.bf16.vlgmr.msra.gmra.mrb[16].mxu0 %v19389_v22  ;;  %v18068_v22 = vld [vmem:[%s24677_s1 + $0x1cf4] ss:$72 sps:$4 sm:$0xff]  }
 0x4d7   : > { %8642 = vmatpush1.bf16.msra.mxu0 %v18057_v8  ;;  %8673 = vmatprep.mubr.bf16.mxu0 %v19398_v26  ;;  %v18066_v26 = vld [vmem:[%s24677_s1 + $0x1cf0] ss:$72 sps:$4 sm:$0xff]  }
 0x4d8   : > { %8643 = vmatprep.subr.bf16.mxu0 %v18062_v9  ;;  %v18127_v8 = vld [vmem:[%s24679_s3 + $0xa4] ss:$20 sps:$4 sm:$0xff]   ;;  %v18107_v9 = vld [vmem:[%s24678_s2 + $0x10] sm:$0xff]  }
 0x4db   : > { %8644 = vmatpush1.bf16.msra.mxu0 %v18060_v5  ;;  %v18125_v5 = vld [vmem:[%s24679_s3 + $0xa0] ss:$20 sps:$4 sm:$0xff]  }
 0x4dc   : > { %8645 = vmatprep.subr.bf16.mxu0 %v18065_v32  ;;  %v18130_v32 = vld [vmem:[%s24679_s3 + $0xcc] ss:$20 sps:$4 sm:$0xff]  }
 0x4df   : > { %8646 = vmatpush1.bf16.msra.mxu0 %v18063_v10  ;;  %v18128_v10 = vld [vmem:[%s24679_s3 + $0xc8] ss:$20 sps:$4 sm:$0xff]  }
 0x4e0   : > { %8647 = vmatprep.subr.bf16.mxu0 %v18068_v22  ;;  %v18133_v22 = vld [vmem:[%s24679_s3 + $0xf4] ss:$20 sps:$4 sm:$0xff]  }
 0x4e3   : > { %8648 = vmatpush1.bf16.msra.mxu0 %v18066_v26  ;;  %v18108_v26 = vld [vmem:[%s24678_s2 + $0x18] sm:$0xff]  }
 0x4e4   : > { %8649 = vmatprep.subr.bf16.mxu0 %v18071_v11  ;;  %v18131_v11 = vld [vmem:[%s24679_s3 + $0xf0] ss:$20 sps:$4 sm:$0xff]  }
 0x4e7   : > { %8650 = vmatpush1.bf16.msra.mxu0 %v18069_v12  ;;  %v18136_v12 = vld [vmem:[%s24679_s3 + $0x11c] ss:$20 sps:$4 sm:$0xff]  }
 0x4e8   : > { %8651 = vmatprep.subr.bf16.mxu0 %v18074_v14  ;;  %v18134_v14 = vld [vmem:[%s24679_s3 + $0x118] ss:$20 sps:$4 sm:$0xff]  }
 0x4e9   : > { %v8347_v18 = vpop.f32.mrb[12].mxu0 }
 0x4ea   : > { %v8511_v19 = vpop.f32.mrb[12].mxu1  ;;  %v8349_v29 = vpop.f32.mrb[13].mxu0 }
 0x4eb   : > { %v8688_v20 = vpack.c.bf16 %v8511_v19, %v8347_v18  ;;  %v8513_v30 = vpop.f32.mrb[13].mxu1  ;;  %v8351_v34 = vpop.f32.mrb[14].mxu0  ;;  %8652 = vmatpush1.bf16.msra.mxu0 %v18072_v15  ;;  %v18139_v15 = vld [vmem:[%s24679_s3 + $0x144] ss:$20 sps:$4 sm:$0xff]   ;;  %v18137_v18 = vld [vmem:[%s24679_s3 + $0x140] ss:$20 sps:$4 sm:$0xff]  }
 0x4ec   : > { %v8689_v33 = vpack.c.bf16 %v8513_v30, %v8349_v29  ;;  %v8515_v36 = vpop.f32.mrb[14].mxu1  ;;  %v8352_v50 = vpop.f32.mrb[15].mxu0  ;;  %8653 = vmatprep.subr.bf16.mxu0 %v18077_v16  ;;  %v18109_v16 = vld [vmem:[%s24678_s2 + $0x20] sm:$0xff]   ;;  %v18145_v29 = vld [vmem:[%s24679_s3 + $0x194] ss:$20 sps:$4 sm:$0xff]  }
 0x4ed   : > { %v8516_v52 = vpop.f32.mrb[15].mxu1  ;;  %v18142_v19 = vld [vmem:[%s24679_s3 + $0x16c] ss:$20 sps:$4 sm:$0xff]   ;;  %v18148_v34 = vld [vmem:[%s24679_s3 + $0x1bc] ss:$20 sps:$4 sm:$0xff]  }
 0x4ee   : > { %8789 = vmatprep.subr.bf16.mxu1 %v8689_v33  ;;  %v18110_v30 = vld [vmem:[%s24678_s2 + $0x28] sm:$0xff]   ;;  %v18143_v33 = vld [vmem:[%s24679_s3 + $0x190] ss:$20 sps:$4 sm:$0xff]  }
 0x4ef   : > { %8790 = vmatpush1.bf16.msra.mxu1 %v8688_v20  ;;  %8654 = vmatpush1.bf16.msra.mxu0 %v18075_v35  ;;  %v18140_v20 = vld [vmem:[%s24679_s3 + $0x168] ss:$20 sps:$4 sm:$0xff]   ;;  %v18146_v35 = vld [vmem:[%s24679_s3 + $0x1b8] ss:$20 sps:$4 sm:$0xff]   ;;  %v18111_v50 = vld [vmem:[%s24678_s2 + $0x30] sm:$0xff]  }
 0x4f0   : > { %8655 = vmatprep.subr.bf16.mxu0 %v18080_v51  ;;  %v18151_v36 = vld [vmem:[%s24679_s3 + $0x1e4] ss:$20 sps:$4 sm:$0xff]   ;;  %v18149_v51 = vld [vmem:[%s24679_s3 + $0x1e0] ss:$20 sps:$4 sm:$0xff]  }
 0x4f1   : > { %v18154_v52 = vld [vmem:[%s24679_s3 + $0x20c] ss:$20 sps:$4 sm:$0xff]  }
 0x4f3   : > { %8656 = vmatpush1.bf16.msra.mxu0 %v18078_v53  ;;  %v18152_v53 = vld [vmem:[%s24679_s3 + $0x208] ss:$20 sps:$4 sm:$0xff]  }
 0x4f4   : > { %8657 = vmatprep.subr.bf16.mxu0 %v18083_v54  ;;  %v18112_v54 = vld [vmem:[%s24678_s2 + $0x38] sm:$0xff]  }
 0x4f7   : > { %8658 = vmatpush1.bf16.msra.mxu0 %v18081_v55  ;;  %v18157_v55 = vld [vmem:[%s24679_s3 + $0x234] ss:$20 sps:$4 sm:$0xff]  }
 0x4f8   : > { %8659 = vmatprep.subr.bf16.mxu0 %v18086_v56  ;;  %v18155_v56 = vld [vmem:[%s24679_s3 + $0x230] ss:$20 sps:$4 sm:$0xff]  }
 0x4fb   : > { %8660 = vmatpush1.bf16.msra.mxu0 %v18084_v57  ;;  %v18160_v57 = vld [vmem:[%s24679_s3 + $0x25c] ss:$20 sps:$4 sm:$0xff]  }
 0x4fc   : > { %8661 = vmatprep.subr.bf16.mxu0 %v18089_v25  ;;  %v18158_v25 = vld [vmem:[%s24679_s3 + $0x258] ss:$20 sps:$4 sm:$0xff]  }
 0x4ff   : > { %8662 = vmatpush1.bf16.msra.mxu0 %v18087_v21  ;;  %v18163_v21 = vld [vmem:[%s24679_s3 + $0xc] ss:$20 sps:$4 sm:$0xff]  }
 0x500   : > { %8663 = vmatprep.subr.bf16.mxu0 %v18092_v23 }
 0x503   : > { %8664 = vmatpush1.bf16.msra.mxu0 %v18090_v48 }
 0x504   : > { %8665 = vmatprep.subr.bf16.mxu0 %v18095_v24 }
 0x507   : > { %8666 = vmatpush1.bf16.msra.mxu0 %v18093_v27 }
 0x508   : > { %8667 = vmatprep.subr.bf16.mxu0 %v18098_v28 }
 0x50b   : > { %8668 = vmatpush1.bf16.msra.mxu0 %v18096_v13 }
 0x50c   : > { %8669 = vmatprep.subr.bf16.mxu0 %v18101_v17 }
 0x50f   : > { %8670 = vmatpush1.bf16.msra.mxu0 %v18099_v41 }
 0x510   : > { %8671 = vmatprep.subr.bf16.mxu0 %v18104_v42 }
 0x513   : > { %8672 = vmatpush1.bf16.msra.mxu0 %v18102_v43 }
 0x516   : > { %8674 = vmatmul.mubr.bf16.vlgmr.msra.gmra.mrb[16].mxu0 %v19585_v31  ;;  %v18115_v31 = vld [vmem:[%s24679_s3 + $0x4] ss:$20 sps:$4 sm:$0xff]  }
 0x5e9   : > { %v8675_v37 = vpop.f32.mrb[16].mxu0 }
 0x5ea   : > { %v8690_v39 = vpack.c.bf16 %v18674_v38, %v8675_v37  ;;  %v8677_v47 = vpop.f32.mrb[17].mxu0 }
 0x5eb   : > { %v8691_v49 = vpack.c.bf16 %v18674_v38, %v8677_v47  ;;  %v8679_v58 = vpop.f32.mrb[18].mxu0  ;;  %v18166_v47 = vld [vmem:[%s24679_s3 + $0x34] ss:$20 sps:$4 sm:$0xff]  }
 0x5ec   : > { %v8680_v59 = vpop.f32.mrb[19].mxu0  ;;  %v8778_v61 = vand.u32 %v8776_v40, %v8690_v39  ;;  %v18161_v39 = vld [vmem:[%s24679_s3 + $0x8] ss:$20 sps:$4 sm:$0xff]  }
 0x5ed   : > { %v8781_v60 = vand.u32 %v8776_v40, %v8691_v49 }
 0x5ef   : > { %8791 = vmatprep.subr.bf16.mxu1 %v8781_v60 }
 0x5f0   : > { %8792 = vmatpush1.bf16.msra.mxu1 %v8778_v61 }
 0x5f1   : > { %9520 = vmatprep.subr.bf16.mxu1 %v18115_v31  ;;  %v18164_v31 = vld [vmem:[%s24679_s3 + $0x30] ss:$20 sps:$4 sm:$0xff]  }
 0x5f3   : > { %14915 = vmatmul.mubr.msk.bf16.vlgmr.msra.gmra.mrb[16].mxu1 %vm8748_vm2, %v18105_v62 }
 0x5f4   : > { %8825 = vmatprep.mubr.bf16.mxu1 %v24684_v44  ;;  %9521 = vmatpush1.bf16.msra.mxu1 %v18113_v63 }
 0x5f5   : > { %9522 = vmatprep.subr.bf16.mxu1 %v18118_v0  ;;  %v18169_v0 = vld [vmem:[%s24679_s3 + $0x5c] ss:$20 sps:$4 sm:$0xff]  }
 0x5f8   : > { %9523 = vmatpush1.bf16.msra.mxu1 %v18116_v1 }
 0x5f9   : > { %9524 = vmatprep.subr.bf16.mxu1 %v18121_v2 }
 0x5fb   : > { %14916 = vmatmul.mubr.msk.bf16.gmra.mrb[20].mxu1 %vm8748_vm2, %v18106_v3 }
 0x5fc   : > { %8835 = vmatprep.mubr.bf16.mxu1 %v24684_v44  ;;  %9525 = vmatpush1.bf16.msra.mxu1 %v18119_v4 }
 0x5fd   : > { %9526 = vmatprep.subr.bf16.mxu1 %v18124_v6 }
 0x600   : > { %9527 = vmatpush1.bf16.msra.mxu1 %v18122_v7 }
 0x601   : > { %9528 = vmatprep.subr.bf16.mxu1 %v18127_v8  ;;  %v18167_v8 = vld [vmem:[%s24679_s3 + $0x58] ss:$20 sps:$4 sm:$0xff]  }
 0x603   : > { %14917 = vmatmul.mubr.msk.bf16.gmra.mrb[24].mxu1 %vm8748_vm2, %v18107_v9 }
 0x604   : > { %8845 = vmatprep.mubr.bf16.mxu1 %v24684_v44  ;;  %9529 = vmatpush1.bf16.msra.mxu1 %v18125_v5  ;;  %v18172_v5 = vld [vmem:[%s24679_s3 + $0x84] ss:$20 sps:$4 sm:$0xff]  }
 0x605   : > { %9530 = vmatprep.subr.bf16.mxu1 %v18130_v32 }
 0x608   : > { %9531 = vmatpush1.bf16.msra.mxu1 %v18128_v10 }
 0x609   : > { %9532 = vmatprep.subr.bf16.mxu1 %v18133_v22 }
 0x60b   : > { %14918 = vmatmul.mubr.msk.bf16.gmra.mrb[28].mxu1 %vm8748_vm2, %v18108_v26 }
 0x60c   : > { %8855 = vmatprep.mubr.bf16.mxu1 %v24684_v44  ;;  %9533 = vmatpush1.bf16.msra.mxu1 %v18131_v11  ;;  %v18170_v11 = vld [vmem:[%s24679_s3 + $0x80] ss:$20 sps:$4 sm:$0xff]  }
 0x60d   : > { %9534 = vmatprep.subr.bf16.mxu1 %v18136_v12 }
 0x610   : > { %9535 = vmatpush1.bf16.msra.mxu1 %v18134_v14 }
 0x611   : > { %9536 = vmatprep.subr.bf16.mxu1 %v18139_v15 }
 0x613   : > { %14919 = vmatmul.mubr.msk.bf16.gmra.mrb[32].mxu1 %vm8748_vm2, %v18109_v16  ;;  %v18175_v16 = vld [vmem:[%s24679_s3 + $0xac] ss:$20 sps:$4 sm:$0xff]  }
 0x614   : > { %8865 = vmatprep.mubr.bf16.mxu1 %v24684_v44  ;;  %9537 = vmatpush1.bf16.msra.mxu1 %v18137_v18 }
 0x615   : > { %9538 = vmatprep.subr.bf16.mxu1 %v18142_v19 }
 0x618   : > { %9539 = vmatpush1.bf16.msra.mxu1 %v18140_v20 }
 0x619   : > { %9540 = vmatprep.subr.bf16.mxu1 %v18145_v29 }
 0x61b   : > { %14920 = vmatmul.mubr.msk.bf16.gmra.mrb[36].mxu1 %vm8748_vm2, %v18110_v30 }
 0x61c   : > { %8875 = vmatprep.mubr.bf16.mxu1 %v24684_v44  ;;  %9541 = vmatpush1.bf16.msra.mxu1 %v18143_v33 }
 0x61d   : > { %9542 = vmatprep.subr.bf16.mxu1 %v18148_v34  ;;  %v18173_v34 = vld [vmem:[%s24679_s3 + $0xa8] ss:$20 sps:$4 sm:$0xff]  }
 0x620   : > { %9543 = vmatpush1.bf16.msra.mxu1 %v18146_v35 }
 0x621   : > { %9544 = vmatprep.subr.bf16.mxu1 %v18151_v36  ;;  %v18178_v36 = vld [vmem:[%s24679_s3 + $0xd4] ss:$20 sps:$4 sm:$0xff]  }
 0x623   : > { %14921 = vmatmul.mubr.msk.bf16.gmra.mrb[40].mxu1 %vm8748_vm2, %v18111_v50 }
 0x624   : > { %8885 = vmatprep.mubr.bf16.mxu1 %v24684_v44  ;;  %9545 = vmatpush1.bf16.msra.mxu1 %v18149_v51 }
 0x625   : > { %9546 = vmatprep.subr.bf16.mxu1 %v18154_v52 }
 0x628   : > { %9547 = vmatpush1.bf16.msra.mxu1 %v18152_v53 }
 0x629   : > { %9548 = vmatprep.subr.bf16.mxu1 %v18157_v55 }
 0x62b   : > { %14922 = vmatmul.mubr.msk.bf16.gmra.mrb[44].mxu1 %vm8748_vm2, %v18112_v54  ;;  %v18176_v54 = vld [vmem:[%s24679_s3 + $0xd0] ss:$20 sps:$4 sm:$0xff]  }
 0x62c   : > { %9549 = vmatpush1.bf16.msra.mxu1 %v18155_v56 }
 0x62d   : > { %9550 = vmatprep.subr.bf16.mxu1 %v18160_v57 }
 0x630   : > { %9551 = vmatpush1.bf16.msra.mxu1 %v18158_v25  ;;  %v18181_v25 = vld [vmem:[%s24679_s3 + $0xfc] ss:$20 sps:$4 sm:$0xff]  }
 0x631   : > { %9633 = vmatprep.subr.bf16.mxu1 %v18163_v21 }
 0x6c6   : > { %v8817_v23 = vpop.f32.mrb[16].mxu1 }
 0x6c7   : > { %v8928_v48 = vmul.f32 0.2, %v8817_v23  ;;  %v8819_v24 = vpop.f32.mrb[17].mxu1  ;;  %vm8896_vm3 = vcmp.ge.f32.partialorder %v8817_v23, 0.0 }
 0x6c8   : > { %v8929_v27 = vmul.f32 0.2, %v8819_v24  ;;  %v8821_v28 = vpop.f32.mrb[18].mxu1  ;;  %vm8897_vm5 = vcmp.ge.f32.partialorder %v8819_v24, 0.0 }
 0x6c9   : > { %vm8898_vm4 = vcmp.ge.f32.partialorder %v8821_v28, 0.0  ;;  %v8930_v13 = vmul.f32 0.2, %v8821_v28  ;;  %v8823_v17 = vpop.f32.mrb[19].mxu1  ;;  %v8960_v42 = vsel %vm8896_vm3, %v8817_v23, %v8928_v48 }
 0x6ca   : > { %v8931_v41 = vmul.f32 0.2, %v8823_v17  ;;  %vm8899_vm6 = vcmp.ge.f32.partialorder %v8823_v17, 0.0  ;;  %v8961_v46 = vsel %vm8897_vm5, %v8819_v24, %v8929_v27 }
 0x6cb   : > { %v8962_v43 = vsel %vm8898_vm4, %v8821_v28, %v8930_v13  ;;  %v18179_v13 = vld [vmem:[%s24679_s3 + $0xf8] ss:$20 sps:$4 sm:$0xff]  }
 0x6cc   : > { %v22520_v45 = vpack.c.bf16 %v8962_v43, %v8960_v42  ;;  %v8963_v37 = vsel %vm8899_vm6, %v8823_v17, %v8931_v41  ;;  %v18184_v41 = vld [vmem:[%s24679_s3 + $0x124] ss:$20 sps:$4 sm:$0xff]  }
 0x6cd   : > { %v22522_v38 = vpack.c.bf16 %v8963_v37, %v8961_v46 }
 0x6ce   : > { %v8827_v40 = vpop.f32.mrb[20].mxu1 }
 0x6cf   : > { %v8932_v49 = vmul.f32 0.2, %v8827_v40  ;;  %v8829_v58 = vpop.f32.mrb[21].mxu1  ;;  %9552 = vmatprep.mubr.bf16.mxu1 %v22522_v38  ;;  %vm8900_vm7 = vcmp.ge.f32.partialorder %v8827_v40, 0.0 }
 0x6d0   : > { %v8933_v59 = vmul.f32 0.2, %v8829_v58  ;;  %v8831_v60 = vpop.f32.mrb[22].mxu1  ;;  %9553 = vmatmul.mubr.bf16.vlgmr.msra.gmra.mrb[48].mxu1 %v22520_v45  ;;  %vm8901_vm8 = vcmp.ge.f32.partialorder %v8829_v58, 0.0 }
 0x6d1   : > { %v8934_v61 = vmul.f32 0.2, %v8831_v60  ;;  %v8833_v62 = vpop.f32.mrb[23].mxu1  ;;  %9634 = vmatpush1.bf16.msra.mxu1 %v18161_v39  ;;  %vm8902_vm9 = vcmp.ge.f32.partialorder %v8831_v60, 0.0  ;;  %v8964_v1 = vsel %vm8900_vm7, %v8827_v40, %v8932_v49  ;;  %v18182_v39 = vld [vmem:[%s24679_s3 + $0x120] ss:$20 sps:$4 sm:$0xff]  }
 0x6d2   : > { %v8935_v63 = vmul.f32 0.2, %v8833_v62  ;;  %9635 = vmatprep.subr.bf16.mxu1 %v18166_v47  ;;  %vm8903_vm10 = vcmp.ge.f32.partialorder %v8833_v62, 0.0  ;;  %v8965_v3 = vsel %vm8901_vm8, %v8829_v58, %v8933_v59  ;;  %v18187_v58 = vld [vmem:[%s24679_s3 + $0x14c] ss:$20 sps:$4 sm:$0xff]  }
 0x6d3   : > { %v8966_v2 = vsel %vm8902_vm9, %v8831_v60, %v8934_v61 }
 0x6d4   : > { %v8967_v4 = vsel %vm8903_vm10, %v8833_v62, %v8935_v63  ;;  %v22538_v6 = vpack.c.bf16 %v8966_v2, %v8964_v1  ;;  %v18190_v2 = vld [vmem:[%s24679_s3 + $0x174] ss:$20 sps:$4 sm:$0xff]  }
 0x6d5   : > { %9636 = vmatpush1.bf16.msra.mxu1 %v18164_v31  ;;  %v22540_v7 = vpack.c.bf16 %v8967_v4, %v8965_v3 }
 0x6d6   : > { %v8837_v9 = vpop.f32.mrb[24].mxu1  ;;  %9637 = vmatprep.subr.bf16.mxu1 %v18169_v0  ;;  %v18185_v0 = vld [vmem:[%s24679_s3 + $0x148] ss:$20 sps:$4 sm:$0xff]  }
 0x6d7   : > { %v8936_v32 = vmul.f32 0.2, %v8837_v9  ;;  %v8839_v10 = vpop.f32.mrb[25].mxu1  ;;  %9562 = vmatprep.mubr.bf16.mxu1 %v22540_v7  ;;  %vm8904_vm11 = vcmp.ge.f32.partialorder %v8837_v9, 0.0 }
 0x6d8   : > { %v8937_v22 = vmul.f32 0.2, %v8839_v10  ;;  %v8841_v26 = vpop.f32.mrb[26].mxu1  ;;  %9563 = vmatmul.mubr.bf16.gmra.mrb[52].mxu1 %v22538_v6  ;;  %vm8905_vm12 = vcmp.ge.f32.partialorder %v8839_v10, 0.0 }
 0x6d9   : > { %v8938_v12 = vmul.f32 0.2, %v8841_v26  ;;  %v8843_v14 = vpop.f32.mrb[27].mxu1  ;;  %9638 = vmatpush1.bf16.msra.mxu1 %v18167_v8  ;;  %vm8906_vm13 = vcmp.ge.f32.partialorder %v8841_v26, 0.0  ;;  %v8968_v18 = vsel %vm8904_vm11, %v8837_v9, %v8936_v32 }
 0x6da   : > { %v8939_v15 = vmul.f32 0.2, %v8843_v14  ;;  %9639 = vmatprep.subr.bf16.mxu1 %v18172_v5  ;;  %vm8907_vm14 = vcmp.ge.f32.partialorder %v8843_v14, 0.0  ;;  %v8969_v20 = vsel %vm8905_vm12, %v8839_v10, %v8937_v22  ;;  %v18188_v5 = vld [vmem:[%s24679_s3 + $0x170] ss:$20 sps:$4 sm:$0xff]  }
 0x6db   : > { %v8970_v19 = vsel %vm8906_vm13, %v8841_v26, %v8938_v12  ;;  %v18193_v26 = vld [vmem:[%s24679_s3 + $0x19c] ss:$20 sps:$4 sm:$0xff]  }
 0x6dc   : > { %v8971_v29 = vsel %vm8907_vm14, %v8843_v14, %v8939_v15  ;;  %v22556_v30 = vpack.c.bf16 %v8970_v19, %v8968_v18  ;;  %v18191_v19 = vld [vmem:[%s24679_s3 + $0x198] ss:$20 sps:$4 sm:$0xff]  }
 0x6dd   : > { %9640 = vmatpush1.bf16.msra.mxu1 %v18170_v11  ;;  %v22558_v33 = vpack.c.bf16 %v8971_v29, %v8969_v20  ;;  %v18196_v29 = vld [vmem:[%s24679_s3 + $0x1c4] ss:$20 sps:$4 sm:$0xff]  }
 0x6de   : > { %v8847_v35 = vpop.f32.mrb[28].mxu1  ;;  %9641 = vmatprep.subr.bf16.mxu1 %v18175_v16 }
 0x6df   : > { %v8940_v50 = vmul.f32 0.2, %v8847_v35  ;;  %v8849_v51 = vpop.f32.mrb[29].mxu1  ;;  %9572 = vmatprep.mubr.bf16.mxu1 %v22558_v33  ;;  %vm8908_vm15 = vcmp.ge.f32.partialorder %v8847_v35, 0.0 }
 0x6e0   : > { %v8941_v52 = vmul.f32 0.2, %v8849_v51  ;;  %v8851_v53 = vpop.f32.mrb[30].mxu1  ;;  %9573 = vmatmul.mubr.bf16.gmra.mrb[56].mxu1 %v22556_v30  ;;  %vm8909_vm0 = vcmp.ge.f32.partialorder %v8849_v51, 0.0 }
 0x6e1   : > { %v8942_v55 = vmul.f32 0.2, %v8851_v53  ;;  %v8853_v56 = vpop.f32.mrb[31].mxu1  ;;  %9642 = vmatpush1.bf16.msra.mxu1 %v18173_v34  ;;  %vm8910_vm1 = vcmp.ge.f32.partialorder %v8851_v53, 0.0  ;;  %v8972_v21 = vsel %vm8908_vm15, %v8847_v35, %v8940_v50 }
 0x6e2   : > { %v8943_v57 = vmul.f32 0.2, %v8853_v56  ;;  %9643 = vmatprep.subr.bf16.mxu1 %v18178_v36  ;;  %vm8911_vm2 = vcmp.ge.f32.partialorder %v8853_v56, 0.0  ;;  %v8973_v48 = vsel %vm8909_vm0, %v8849_v51, %v8941_v52  ;;  %v18194_v51 = vld [vmem:[%s24679_s3 + $0x1c0] ss:$20 sps:$4 sm:$0xff]  }
 0x6e3   : > { %v8974_v23 = vsel %vm8910_vm1, %v8851_v53, %v8942_v55  ;;  %v18199_v55 = vld [vmem:[%s24679_s3 + $0x1ec] ss:$20 sps:$4 sm:$0xff]  }
 0x6e4   : > { %v8975_v24 = vsel %vm8911_vm2, %v8853_v56, %v8943_v57  ;;  %v22574_v27 = vpack.c.bf16 %v8974_v23, %v8972_v21 }
 0x6e5   : > { %9644 = vmatpush1.bf16.msra.mxu1 %v18176_v54  ;;  %v22576_v28 = vpack.c.bf16 %v8975_v24, %v8973_v48  ;;  %v18197_v24 = vld [vmem:[%s24679_s3 + $0x1e8] ss:$20 sps:$4 sm:$0xff]  }
 0x6e6   : > { %v8857_v17 = vpop.f32.mrb[32].mxu1  ;;  %9645 = vmatprep.subr.bf16.mxu1 %v18181_v25 }
 0x6e7   : > { %v8944_v42 = vmul.f32 0.2, %v8857_v17  ;;  %v8859_v43 = vpop.f32.mrb[33].mxu1  ;;  %9582 = vmatprep.mubr.bf16.mxu1 %v22576_v28  ;;  %vm8912_vm3 = vcmp.ge.f32.partialorder %v8857_v17, 0.0 }
 0x6e8   : > { %v8945_v46 = vmul.f32 0.2, %v8859_v43  ;;  %v8861_v37 = vpop.f32.mrb[34].mxu1  ;;  %9583 = vmatmul.mubr.bf16.gmra.mrb[60].mxu1 %v22574_v27  ;;  %vm8913_vm4 = vcmp.ge.f32.partialorder %v8859_v43, 0.0 }
 0x6e9   : > { %v8946_v40 = vmul.f32 0.2, %v8861_v37  ;;  %v8863_v47 = vpop.f32.mrb[35].mxu1  ;;  %9646 = vmatpush1.bf16.msra.mxu1 %v18179_v13  ;;  %vm8914_vm5 = vcmp.ge.f32.partialorder %v8861_v37, 0.0  ;;  %v8976_v59 = vsel %vm8912_vm3, %v8857_v17, %v8944_v42  ;;  %v18202_v17 = vld [vmem:[%s24679_s3 + $0x214] ss:$20 sps:$4 sm:$0xff]  }
 0x6ea   : > { %v8947_v49 = vmul.f32 0.2, %v8863_v47  ;;  %9647 = vmatprep.subr.bf16.mxu1 %v18184_v41  ;;  %vm8915_vm6 = vcmp.ge.f32.partialorder %v8863_v47, 0.0  ;;  %v8977_v31 = vsel %vm8913_vm4, %v8859_v43, %v8945_v46  ;;  %vm11165_vm3 = vcmask 1040384  }
 0x6eb   : > { %v8978_v60 = vsel %vm8914_vm5, %v8861_v37, %v8946_v40  ;;  %v18200_v37 = vld [vmem:[%s24679_s3 + $0x210] ss:$20 sps:$4 sm:$0xff]   ;;  %vm11116_vm4 = vcmask 7168  }
 0x6ec   : > { %v8979_v61 = vsel %vm8915_vm6, %v8863_v47, %v8947_v49  ;;  %v22592_v62 = vpack.c.bf16 %v8978_v60, %v8976_v59  ;;  %v18205_v49 = vld [vmem:[%s24679_s3 + $0x23c] ss:$20 sps:$4 sm:$0xff]  }
 0x6ed   : > { %9648 = vmatpush1.bf16.msra.mxu1 %v18182_v39  ;;  %v22594_v63 = vpack.c.bf16 %v8979_v61, %v8977_v31 }
 0x6ee   : > { %v8867_v1 = vpop.f32.mrb[36].mxu1  ;;  %9649 = vmatprep.subr.bf16.mxu1 %v18187_v58 }
 0x6ef   : > { %v8948_v3 = vmul.f32 0.2, %v8867_v1  ;;  %v8869_v4 = vpop.f32.mrb[37].mxu1  ;;  %9592 = vmatprep.mubr.bf16.mxu1 %v22594_v63  ;;  %vm8916_vm7 = vcmp.ge.f32.partialorder %v8867_v1, 0.0 }
 0x6f0   : > { %v8949_v8 = vmul.f32 0.2, %v8869_v4  ;;  %v8871_v9 = vpop.f32.mrb[38].mxu1  ;;  %9593 = vmatmul.mubr.bf16.gmra.mrb[64].mxu1 %v22592_v62  ;;  %vm8917_vm8 = vcmp.ge.f32.partialorder %v8869_v4, 0.0 }
 0x6f1   : > { %v8950_v32 = vmul.f32 0.2, %v8871_v9  ;;  %v8873_v10 = vpop.f32.mrb[39].mxu1  ;;  %9650 = vmatpush1.bf16.msra.mxu1 %v18185_v0  ;;  %vm8918_vm9 = vcmp.ge.f32.partialorder %v8871_v9, 0.0  ;;  %v8980_v11 = vsel %vm8916_vm7, %v8867_v1, %v8948_v3  ;;  %v18203_v1 = vld [vmem:[%s24679_s3 + $0x238] ss:$20 sps:$4 sm:$0xff]  }
 0x6f2   : > { %v8951_v22 = vmul.f32 0.2, %v8873_v10  ;;  %9651 = vmatprep.subr.bf16.mxu1 %v18190_v2  ;;  %vm8919_vm10 = vcmp.ge.f32.partialorder %v8873_v10, 0.0  ;;  %v8981_v14 = vsel %vm8917_vm8, %v8869_v4, %v8949_v8  ;;  %v18208_v2 = vld [vmem:[%s24679_s3 + $0x264] ss:$20 sps:$4 sm:$0xff]  }
 0x6f3   : > { %v8982_v12 = vsel %vm8918_vm9, %v8871_v9, %v8950_v32  ;;  %v18206_v3 = vld [vmem:[%s24679_s3 + $0x260] ss:$20 sps:$4 sm:$0xff]   ;;  %v18209_v4 = vld [vmem:[%s24679_s3 + $0x150] ss:$20 sps:$4 sm:$0xff]   ;;  %v18211_v9 = vld [vmem:[%s24679_s3 + $0x178] ss:$20 sps:$4 sm:$0xff]  }
 0x6f4   : > { %v8983_v15 = vsel %vm8919_vm10, %v8873_v10, %v8951_v22  ;;  %v22610_v16 = vpack.c.bf16 %v8982_v12, %v8980_v11  ;;  %v18210_v8 = vld [vmem:[%s24679_s3 + $0x10] ss:$20 sps:$4 sm:$0xff]   ;;  %v18213_v32 = vld [vmem:[%s24679_s3 + $0x1a0] ss:$20 sps:$4 sm:$0xff]   ;;  %v18215_v22 = vld [vmem:[%s24679_s3 + $0x1c8] ss:$20 sps:$4 sm:$0xff]  }
 0x6f5   : > { %9652 = vmatpush1.bf16.msra.mxu1 %v18188_v5  ;;  %v22612_v18 = vpack.c.bf16 %v8983_v15, %v8981_v14  ;;  %v18212_v5 = vld [vmem:[%s24679_s3 + $0x38] ss:$20 sps:$4 sm:$0xff]   ;;  %v18214_v10 = vld [vmem:[%s24679_s3 + $0x60] ss:$20 sps:$4 sm:$0xff]   ;;  %v18217_v11 = vld [vmem:[%s24679_s3 + $0x1f0] ss:$20 sps:$4 sm:$0xff]  }
 0x6f6   : > { %v8877_v20 = vpop.f32.mrb[40].mxu1  ;;  %9653 = vmatprep.subr.bf16.mxu1 %v18193_v26  ;;  %v18216_v26 = vld [vmem:[%s24679_s3 + $0x88] ss:$20 sps:$4 sm:$0xff]   ;;  %v18218_v12 = vld [vmem:[%s24679_s3 + $0xb0] ss:$20 sps:$4 sm:$0xff]  }
 0x6f7   : > { %v8952_v34 = vmul.f32 0.2, %v8877_v20  ;;  %v8879_v35 = vpop.f32.mrb[41].mxu1  ;;  %9602 = vmatprep.mubr.bf16.mxu1 %v22612_v18  ;;  %vm8920_vm11 = vcmp.ge.f32.partialorder %v8877_v20, 0.0  ;;  %v18219_v14 = vld [vmem:[%s24679_s3 + $0x218] ss:$20 sps:$4 sm:$0xff]  }
 0x6f8   : > { %v8953_v36 = vmul.f32 0.2, %v8879_v35  ;;  %v8881_v50 = vpop.f32.mrb[42].mxu1  ;;  %9603 = vmatmul.mubr.bf16.gmra.mrb[68].mxu1 %v22610_v16  ;;  %vm8921_vm12 = vcmp.ge.f32.partialorder %v8879_v35, 0.0  ;;  %v18220_v15 = vld [vmem:[%s24679_s3 + $0xd8] ss:$20 sps:$4 sm:$0xff]  }
 0x6f9   : > { %v8954_v52 = vmul.f32 0.2, %v8881_v50  ;;  %v8883_v53 = vpop.f32.mrb[43].mxu1  ;;  %9654 = vmatpush1.bf16.msra.mxu1 %v18191_v19  ;;  %vm8922_vm13 = vcmp.ge.f32.partialorder %v8881_v50, 0.0  ;;  %v8984_v56 = vsel %vm8920_vm11, %v8877_v20, %v8952_v34  ;;  %v18221_v19 = vld [vmem:[%s24679_s3 + $0x240] ss:$20 sps:$4 sm:$0xff]  }
 0x6fa   : > { %v8955_v54 = vmul.f32 0.2, %v8883_v53  ;;  %9655 = vmatprep.subr.bf16.mxu1 %v18196_v29  ;;  %vm8923_vm14 = vcmp.ge.f32.partialorder %v8883_v53, 0.0  ;;  %v8985_v25 = vsel %vm8921_vm12, %v8879_v35, %v8953_v36  ;;  %v18222_v20 = vld [vmem:[%s24679_s3 + $0x100] ss:$20 sps:$4 sm:$0xff]  }
 0x6fb   : > { %v8986_v57 = vsel %vm8922_vm13, %v8881_v50, %v8954_v52  ;;  %v18223_v29 = vld [vmem:[%s24679_s3 + $0x268] ss:$20 sps:$4 sm:$0xff]  }
 0x6fc   : > { %v8987_v21 = vsel %vm8923_vm14, %v8883_v53, %v8955_v54  ;;  %v22628_v23 = vpack.c.bf16 %v8986_v57, %v8984_v56  ;;  %v18224_v34 = vld [vmem:[%s24679_s3 + $0x128] ss:$20 sps:$4 sm:$0xff]  }
 0x6fd   : > { %9656 = vmatpush1.bf16.msra.mxu1 %v18194_v51  ;;  %v22630_v48 = vpack.c.bf16 %v8987_v21, %v8985_v25 }
 0x6fe   : > { %v8887_v13 = vpop.f32.mrb[44].mxu1  ;;  %9657 = vmatprep.subr.bf16.mxu1 %v18199_v55 }
 0x6ff   : > { %v8956_v41 = vmul.f32 0.2, %v8887_v13  ;;  %v8889_v42 = vpop.f32.mrb[45].mxu1  ;;  %9612 = vmatprep.mubr.bf16.mxu1 %v22630_v48  ;;  %vm8924_vm15 = vcmp.ge.f32.partialorder %v8887_v13, 0.0 }
 0x700   : > { %v8957_v43 = vmul.f32 0.2, %v8889_v42  ;;  %v8891_v46 = vpop.f32.mrb[46].mxu1  ;;  %9613 = vmatmul.mubr.bf16.gmra.mrb[72].mxu1 %v22628_v23  ;;  %vm8925_vm0 = vcmp.ge.f32.partialorder %v8889_v42, 0.0 }
 0x701   : > { %v8958_v39 = vmul.f32 0.2, %v8891_v46  ;;  %v8893_v40 = vpop.f32.mrb[47].mxu1  ;;  %9658 = vmatpush1.bf16.msra.mxu1 %v18197_v24  ;;  %vm8926_vm1 = vcmp.ge.f32.partialorder %v8891_v46, 0.0  ;;  %v8988_v58 = vsel %vm8924_vm15, %v8887_v13, %v8956_v41 }
 0x702   : > { %v8959_v47 = vmul.f32 0.2, %v8893_v40  ;;  %9659 = vmatprep.subr.bf16.mxu1 %v18202_v17  ;;  %vm8927_vm2 = vcmp.ge.f32.partialorder %v8893_v40, 0.0  ;;  %v8989_v60 = vsel %vm8925_vm0, %v8889_v42, %v8957_v43  ;;  %v18239_v42 = vld [vmem:[%s24680_s4 + $0xc] ss:$40 sps:$4 sm:$0xff]  }
 0x703   : > { %v8990_v59 = vsel %vm8926_vm1, %v8891_v46, %v8958_v39  ;;  %11364 = vmatprep.mubr.bf16.mxu0 %v18239_v42 }
 0x704   : > { %v8991_v31 = vsel %vm8927_vm2, %v8893_v40, %v8959_v47  ;;  %v22646_v61 = vpack.c.bf16 %v8990_v59, %v8988_v58 }
 0x705   : > { %9660 = vmatpush1.bf16.msra.mxu1 %v18200_v37  ;;  %v22648_v0 = vpack.c.bf16 %v8991_v31, %v8989_v60 }
 0x706   : > { %9661 = vmatprep.subr.bf16.mxu1 %v18205_v49 }
 0x707   : > { %9622 = vmatprep.mubr.bf16.mxu1 %v22648_v0 }
 0x708   : > { %9623 = vmatmul.mubr.bf16.gmra.mrb[76].mxu1 %v22646_v61 }
 0x709   : > { %9662 = vmatpush1.bf16.msra.mxu1 %v18203_v1  ;;  %9665 = vmatprep.mubr.bf16.mxu1 %v22522_v38 }
 0x70a   : > { %9663 = vmatprep.subr.bf16.mxu1 %v18208_v2 }
 0x70d   : > { %9664 = vmatpush1.bf16.msra.mxu1 %v18206_v3 }
 0x70e   : > { %15327 = vmatprep.subr.bf16.mxu1 %v18209_v4 }
 0x710   : > { %9666 = vmatmul.mubr.bf16.vlgmr.msra.gmra.mrb[80].mxu1 %v22520_v45 }
 0x711   : > { %9675 = vmatprep.mubr.bf16.mxu1 %v22540_v7  ;;  %15328 = vmatpush3.bf16.msra.mxu1 %v18210_v8 }
 0x712   : > { %15329 = vmatprep.subr.bf16.mxu1 %v18211_v9 }
 0x715   : > { %15330 = vmatpush3.bf16.msra.mxu1 %v18212_v5 }
 0x716   : > { %15331 = vmatprep.subr.bf16.mxu1 %v18213_v32 }
 0x718   : > { %9676 = vmatmul.mubr.bf16.gmra.mrb[84].mxu1 %v22538_v6 }
 0x719   : > { %9685 = vmatprep.mubr.bf16.mxu1 %v22558_v33  ;;  %15332 = vmatpush3.bf16.msra.mxu1 %v18214_v10 }
 0x71a   : > { %15333 = vmatprep.subr.bf16.mxu1 %v18215_v22 }
 0x71d   : > { %15334 = vmatpush3.bf16.msra.mxu1 %v18216_v26 }
 0x71e   : > { %15335 = vmatprep.subr.bf16.mxu1 %v18217_v11 }
 0x720   : > { %9686 = vmatmul.mubr.bf16.gmra.mrb[88].mxu1 %v22556_v30 }
 0x721   : > { %9695 = vmatprep.mubr.bf16.mxu1 %v22576_v28  ;;  %15336 = vmatpush3.bf16.msra.mxu1 %v18218_v12  ;;  %v18227_v12 = vld [vmem:[%s24680_s4 + $0x4] ss:$40 sps:$4 sm:$0xff]  }
 0x722   : > { %15337 = vmatprep.subr.bf16.mxu1 %v18219_v14 }
 0x725   : > { %15338 = vmatpush3.bf16.msra.mxu1 %v18220_v15 }
 0x726   : > { %15339 = vmatprep.subr.bf16.mxu1 %v18221_v19 }
 0x728   : > { %9696 = vmatmul.mubr.bf16.gmra.mrb[92].mxu1 %v22574_v27 }
 0x729   : > { %9705 = vmatprep.mubr.bf16.mxu1 %v22594_v63  ;;  %15340 = vmatpush3.bf16.msra.mxu1 %v18222_v20 }
 0x72a   : > { %15341 = vmatprep.subr.bf16.mxu1 %v18223_v29 }
 0x72d   : > { %15342 = vmatpush3.bf16.msra.mxu1 %v18224_v34 }
 0x730   : > { %9706 = vmatmul.mubr.bf16.gmra.mrb[96].mxu1 %v22592_v62 }
 0x731   : > { %9715 = vmatprep.mubr.bf16.mxu1 %v22612_v18 }
 0x738   : > { %9716 = vmatmul.mubr.bf16.gmra.mrb[100].mxu1 %v22610_v16 }
 0x739   : > { %9725 = vmatprep.mubr.bf16.mxu1 %v22630_v48 }
 0x740   : > { %9726 = vmatmul.mubr.bf16.gmra.mrb[104].mxu1 %v22628_v23 }
 0x741   : > { %9735 = vmatprep.mubr.bf16.mxu1 %v22648_v0 }
 0x748   : > { %9736 = vmatmul.mubr.bf16.gmra.mrb[108].mxu1 %v22646_v61 }
 0x749   : > { %9778 = vmatprep.mubr.bf16.mxu1 %v22522_v38 }
 0x750   : > { %9779 = vmatmul.mubr.bf16.vlgmr.msra.gmra.mrb[112].mxu1 %v22520_v45 }
 0x751   : > { %9786 = vmatprep.mubr.bf16.mxu1 %v22540_v7 }
 0x758   : > { %9787 = vmatmul.mubr.bf16.gmra.mrb[116].mxu1 %v22538_v6 }
 0x759   : > { %9794 = vmatprep.mubr.bf16.mxu1 %v22558_v33 }
 0x760   : > { %9795 = vmatmul.mubr.bf16.gmra.mrb[120].mxu1 %v22556_v30 }
 0x761   : > { %9802 = vmatprep.mubr.bf16.mxu1 %v22576_v28 }
 0x768   : > { %9803 = vmatmul.mubr.bf16.gmra.mrb[124].mxu1 %v22574_v27 }
 0x769   : > { %9810 = vmatprep.mubr.bf16.mxu1 %v22594_v63 }
 0x770   : > { %9811 = vmatmul.mubr.bf16.gmra.mrb[128].mxu1 %v22592_v62 }
 0x771   : > { %9818 = vmatprep.mubr.bf16.mxu1 %v22612_v18 }
 0x778   : > { %9819 = vmatmul.mubr.bf16.gmra.mrb[132].mxu1 %v22610_v16 }
 0x779   : > { %9826 = vmatprep.mubr.bf16.mxu1 %v22630_v48 }
 0x780   : > { %9827 = vmatmul.mubr.bf16.gmra.mrb[136].mxu1 %v22628_v23 }
 0x781   : > { %9834 = vmatprep.mubr.bf16.mxu1 %v22648_v0 }
 0x788   : > { %9835 = vmatmul.mubr.bf16.gmra.mrb[140].mxu1 %v22646_v61 }
 0x789   : > { %11203 = vmatprep.mubr.bf16.mxu1 %v18227_v12 }
 0x7a3   : > { %v22741_v45 = vpop.f32.mrb[48].mxu1 }
 0x7a4   : > { %v22743_v38 = vpop.f32.mrb[49].mxu1 }
 0x7a5   : > { %v22745_v6 = vpop.f32.mrb[50].mxu1 }
 0x7a6   : > { %v22749_v30 = vpop.f32.mrb[51].mxu1  ;;  %v16177_v33 = vpack.i.bf16 %v22745_v6, %v22741_v45 }
 0x7a7   : > { %v16217_v28 = vpack.i.bf16 %v22749_v30, %v22743_v38 }
 0x7a8   : > { %16178 = vrot.lane.b32.xlu0 %v16177_v33, %s18675_s29 }
 0x7ab   : > { %v22758_v62 = vpop.f32.mrb[52].mxu1 }
 0x7ac   : > { %v22760_v63 = vpop.f32.mrb[53].mxu1 }
 0x7ad   : > { %v22762_v16 = vpop.f32.mrb[54].mxu1 }
 0x7ae   : > { %v22766_v35 = vpop.f32.mrb[55].mxu1  ;;  %v16182_v36 = vpack.i.bf16 %v22762_v16, %v22758_v62 }
 0x7af   : > { %v16222_v51 = vpack.i.bf16 %v22766_v35, %v22760_v63 }
 0x7b0   : > { %16183 = vrot.lane.b32.xlu0 %v16182_v36, %s18675_s29 }
 0x7b3   : > { %v22775_v52 = vpop.f32.mrb[56].mxu1 }
 0x7b4   : > { %v22777_v53 = vpop.f32.mrb[57].mxu1 }
 0x7b5   : > { %v22779_v54 = vpop.f32.mrb[58].mxu1 }
 0x7b6   : > { %v22783_v56 = vpop.f32.mrb[59].mxu1  ;;  %v16187_v57 = vpack.i.bf16 %v22779_v54, %v22775_v52 }
 0x7b7   : > { %v16227_v21 = vpack.i.bf16 %v22783_v56, %v22777_v53 }
 0x7b8   : > { %16188 = vrot.lane.b32.xlu1 %v16187_v57, %s18675_s29 }
 0x7bb   : > { %v22792_v23 = vpop.f32.mrb[60].mxu1 }
 0x7bc   : > { %v22794_v48 = vpop.f32.mrb[61].mxu1 }
 0x7bd   : > { %v22796_v24 = vpop.f32.mrb[62].mxu1 }
 0x7be   : > { %v22800_v17 = vpop.f32.mrb[63].mxu1  ;;  %v16192_v41 = vpack.i.bf16 %v22796_v24, %v22792_v23 }
 0x7bf   : > { %v16232_v43 = vpack.i.bf16 %v22800_v17, %v22794_v48 }
 0x7c0   : > { %16193 = vrot.lane.b32.xlu1 %v16192_v41, %s18675_s29 }
 0x7c3   : > { %v22809_v46 = vpop.f32.mrb[64].mxu1 }
 0x7c4   : > { %v22811_v37 = vpop.f32.mrb[65].mxu1 }
 0x7c5   : > { %v22813_v39 = vpop.f32.mrb[66].mxu1 }
 0x7c6   : > { %v22817_v47 = vpop.f32.mrb[67].mxu1  ;;  %v16197_v49 = vpack.i.bf16 %v22813_v39, %v22809_v46 }
 0x7c7   : > { %v16237_v59 = vpack.i.bf16 %v22817_v47, %v22811_v37 }
 0x7c8   : > { %16198 = vrot.lane.b32.xlu0 %v16197_v49, %s18675_s29 }
 0x7cb   : > { %v22826_v60 = vpop.f32.mrb[68].mxu1 }
 0x7cc   : > { %v22828_v31 = vpop.f32.mrb[69].mxu1 }
 0x7cd   : > { %v22830_v61 = vpop.f32.mrb[70].mxu1 }
 0x7ce   : > { %v22834_v1 = vpop.f32.mrb[71].mxu1  ;;  %v16202_v2 = vpack.i.bf16 %v22830_v61, %v22826_v60 }
 0x7cf   : > { %v16242_v4 = vpack.i.bf16 %v22834_v1, %v22828_v31 }
 0x7d0   : > { %16203 = vrot.lane.b32.xlu1 %v16202_v2, %s18675_s29 }
 0x7d3   : > { %v22843_v8 = vpop.f32.mrb[72].mxu1 }
 0x7d4   : > { %v22845_v9 = vpop.f32.mrb[73].mxu1 }
 0x7d5   : > { %v22847_v5 = vpop.f32.mrb[74].mxu1 }
 0x7d6   : > { %v22851_v10 = vpop.f32.mrb[75].mxu1  ;;  %v16207_v22 = vpack.i.bf16 %v22847_v5, %v22843_v8 }
 0x7d7   : > { %v16247_v11 = vpack.i.bf16 %v22851_v10, %v22845_v9 }
 0x7d8   : > { %16208 = vrot.lane.b32.xlu0 %v16207_v22, %s18675_s29 }
 0x7db   : > { %v22863_v14 = vpop.f32.mrb[76].mxu1 }
 0x7dc   : > { %16218 = vrot.lane.b32.xlu0 %v16217_v28, %s18675_s29  ;;  %v22866_v15 = vpop.f32.mrb[77].mxu1 }
 0x7dd   : > { %v22868_v19 = vpop.f32.mrb[78].mxu1 }
 0x7de   : > { %v22872_v29 = vpop.f32.mrb[79].mxu1  ;;  %v16212_v34 = vpack.i.bf16 %v22868_v19, %v22863_v14 }
 0x7df   : > { %v16252_v36 = vpack.i.bf16 %v22872_v29, %v22866_v15 }
 0x7e0   : > { %16213 = vrot.lane.b32.xlu1 %v16212_v34, %s18675_s29 }
 0x7e3   : > { %v22881_v28 = vpop.f32.mrb[80].mxu1 }
 0x7e4   : > { %16223 = vrot.lane.b32.xlu1 %v16222_v51, %s18675_s29  ;;  %v22884_v57 = vpop.f32.mrb[81].mxu1 }
 0x7e5   : > { %24704 = vst [vmem:[#allocation5_spill] sm:$0xff] %v22884_v57  ;;  %v22886_v41 = vpop.f32.mrb[82].mxu1 }
 0x7e6   : > { %v22890_v2 = vpop.f32.mrb[83].mxu1  ;;  %v16257_v22 = vpack.i.bf16 %v22886_v41, %v22881_v28 }
 0x7e8   : > { %16228 = vrot.lane.b32.xlu1 %v16227_v21, %s18675_s29  ;;  %16258 = vrot.lane.b32.xlu0 %v16257_v22, %s18675_s29 }
 0x7eb   : > { %v22900_v51 = vpop.f32.mrb[84].mxu1 }
 0x7ec   : > { %16233 = vrot.lane.b32.xlu1 %v16232_v43, %s18675_s29  ;;  %v22903_v44 = vpop.f32.mrb[85].mxu1 }
 0x7ed   : > { %v22905_v33 = vpop.f32.mrb[86].mxu1 }
 0x7ee   : > { %v22909_v3 = vpop.f32.mrb[87].mxu1  ;;  %v16262_v12 = vpack.i.bf16 %v22905_v33, %v22900_v51 }
 0x7f0   : > { %16238 = vrot.lane.b32.xlu1 %v16237_v59, %s18675_s29  ;;  %16263 = vrot.lane.b32.xlu0 %v16262_v12, %s18675_s29 }
 0x7f3   : > { %v22919_v43 = vpop.f32.mrb[88].mxu1 }
 0x7f4   : > { %16243 = vrot.lane.b32.xlu1 %v16242_v4, %s18675_s29  ;;  %v22922_v26 = vpop.f32.mrb[89].mxu1 }
 0x7f5   : > { %24705 = vst [vmem:[#allocation6_spill] sm:$0xff] %v22922_v26  ;;  %v22924_v58 = vpop.f32.mrb[90].mxu1 }
 0x7f6   : > { %v22931_v49 = vpop.f32.mrb[91].mxu1  ;;  %v16267_v59 = vpack.i.bf16 %v22924_v58, %v22919_v43 }
 0x7f7   : > { %24706 = vst [vmem:[#allocation7_spill] sm:$0xff] %v22931_v49  ;;  %v16307_v4 = vpack.i.bf16 %v22931_v49, %v22922_v26 }
 0x7f8   : > { %16248 = vrot.lane.b32.xlu1 %v16247_v11, %s18675_s29  ;;  %16268 = vrot.lane.b32.xlu0 %v16267_v59, %s18675_s29 }
 0x7fb   : > { %v22941_v25 = vpop.f32.mrb[92].mxu1 }
 0x7fc   : > { %16253 = vrot.lane.b32.xlu1 %v16252_v36, %s18675_s29  ;;  %v22944_v21 = vpop.f32.mrb[93].mxu1 }
 0x7fd   : > { %v22946_v50 = vpop.f32.mrb[94].mxu1 }
 0x7fe   : > { %v16272_v20 = vpack.i.bf16 %v22946_v50, %v22941_v25  ;;  %v22952_v27 = vpop.f32.mrb[95].mxu1 }
 0x800   : > { %16273 = vrot.lane.b32.xlu0 %v16272_v20, %s18675_s29 }
 0x803   : > { %v22959_v36 = vpop.f32.mrb[96].mxu1 }
 0x804   : > { %v22961_v59 = vpop.f32.mrb[97].mxu1 }
 0x805   : > { %24707 = vst [vmem:[#allocation8_spill] sm:$0xff] %v22961_v59  ;;  %v22963_v32 = vpop.f32.mrb[98].mxu1 }
 0x806   : > { %v16277_v0 = vpack.i.bf16 %v22963_v32, %v22959_v36  ;;  %v22969_v40 = vpop.f32.mrb[99].mxu1 }
 0x807   : > { %24708 = vst [vmem:[#allocation9_spill] sm:$0xff] %v22969_v40  ;;  %v16317_v13 = vpack.i.bf16 %v22969_v40, %v22961_v59 }
 0x808   : > { %16278 = vrot.lane.b32.xlu0 %v16277_v0, %s18675_s29 }
 0x80b   : > { %v22976_v11 = vpop.f32.mrb[100].mxu1 }
 0x80c   : > { %24709 = vst [vmem:[#allocation10_spill] sm:$0xff] %v22976_v11  ;;  %v22978_v55 = vpop.f32.mrb[101].mxu1 }
 0x80d   : > { %24710 = vst [vmem:[#allocation11_spill] sm:$0xff] %v22978_v55  ;;  %v22980_v42 = vpop.f32.mrb[102].mxu1 }
 0x80e   : > { %24711 = vst [vmem:[#allocation12_spill] sm:$0xff] %v22980_v42  ;;  %v16282_v18 = vpack.i.bf16 %v22980_v42, %v22976_v11  ;;  %v22986_v22 = vpop.f32.mrb[103].mxu1  ;;  %v24718_v42 = vpack.i.bf16 %v22890_v2, %v22884_v57 }
 0x80f   : > { %24712 = vst [vmem:[#allocation13_spill] sm:$0xff] %v22986_v22  ;;  %v16322_v7 = vpack.i.bf16 %v22986_v22, %v22978_v55 }
 0x810   : > { %16283 = vrot.lane.b32.xlu0 %v16282_v18, %s18675_s29 }
 0x813   : > { %v22993_v20 = vpop.f32.mrb[104].mxu1 }
 0x814   : > { %24713 = vst [vmem:[#allocation14_spill] sm:$0xff] %v22993_v20  ;;  %v22995_v34 = vpop.f32.mrb[105].mxu1 }
 0x815   : > { %24714 = vst [vmem:[#allocation15_spill] sm:$0xff] %v22995_v34  ;;  %v22997_v59 = vpop.f32.mrb[106].mxu1 }
 0x816   : > { %24715 = vst [vmem:[#allocation16_spill] sm:$0xff] %v22997_v59  ;;  %v16287_v40 = vpack.i.bf16 %v22997_v59, %v22993_v20  ;;  %v23003_v26 = vpop.f32.mrb[107].mxu1 }
 0x817   : > { %24716 = vst [vmem:[#allocation17_spill] sm:$0xff] %v23003_v26  ;;  %v16327_v49 = vpack.i.bf16 %v23003_v26, %v22995_v34 }
 0x818   : > { %16288 = vrot.lane.b32.xlu0 %v16287_v40, %s18675_s29 }
 0x81a   : > { %v16179_v0 = vpop.permute.xlu0 %16178 }
 0x81b   : > { %v16181_v55 = vunpack.i.h.bf16 %v16179_v0  ;;  %v16180_v22 = vunpack.i.l.bf16 %v16179_v0  ;;  %v23010_v11 = vpop.f32.mrb[108].mxu1 }
 0x81c   : > { %24717 = vst [vmem:[#allocation18_spill] sm:$0xff] %v23010_v11  ;;  %16298 = vrot.lane.b32.xlu0 %v24718_v42, %s18675_s29  ;;  %v23016_v12 = vpop.f32.mrb[109].mxu1 }
 0x81d   : > { %v10107_v20 = vpack.c.bf16 %v16181_v55, %v16180_v22  ;;  %v23018_v59 = vpop.f32.mrb[110].mxu1  ;;  %v24720_v55 = vpack.c.bf16 %v22745_v6, %v22741_v45 }
 0x81e   : > { %24719 = vst [vmem:[#allocation19_spill] sm:$0xff] %v23018_v59  ;;  %v16292_v18 = vpack.i.bf16 %v23018_v59, %v23010_v11  ;;  %v23024_v34 = vpop.f32.mrb[111].mxu1 }
 0x81f   : > { %v16332_v0 = vpack.i.bf16 %v23024_v34, %v23016_v12  ;;  %15391 = vmatprep.subr.bf16.mxu1 %v10107_v20  ;;  %v24721_v20 = vpack.i.bf16 %v22909_v3, %v22903_v44 }
 0x820   : > { %15392 = vmatpush3.bf16.msra.mxu1 %v24720_v55  ;;  %16308 = vrot.lane.b32.xlu0 %v16307_v4, %s18675_s29 }
 0x821   : > { %16293 = vrot.lane.b32.xlu1 %v16292_v18, %s18675_s29  ;;  %v24722_v18 = vpack.c.bf16 %v22762_v16, %v22758_v62 }
 0x822   : > { %v16184_v22 = vpop.permute.xlu0 %16183 }
 0x823   : > { %v16186_v42 = vunpack.i.h.bf16 %v16184_v22  ;;  %v16185_v40 = vunpack.i.l.bf16 %v16184_v22  ;;  %v15343_v11 = vpop.f32.mrb[112].mxu1 }
 0x824   : > { %16318 = vrot.lane.b32.xlu0 %v16317_v13, %s18675_s29  ;;  %v15344_v59 = vpop.f32.mrb[113].mxu1 }
 0x825   : > { %v10108_v57 = vpack.c.bf16 %v16186_v42, %v16185_v40  ;;  %16303 = vrot.lane.b32.xlu1 %v24721_v20, %s18675_s29  ;;  %v23040_v26 = vadd.f32 %v15344_v59, %v15343_v11  ;;  %v15346_v45 = vpop.f32.mrb[114].mxu1  ;;  %v24723_v40 = vpack.i.bf16 %v22952_v27, %v22944_v21 }
 0x826   : > { %v15347_v6 = vpop.f32.mrb[115].mxu1 }
 0x827   : > { %v23042_v4 = vadd.f32 %v15347_v6, %v15346_v45  ;;  %15393 = vmatprep.subr.bf16.mxu1 %v10108_v57  ;;  %v24724_v45 = vpack.c.bf16 %v22779_v54, %v22775_v52  ;;  %v24725_v52 = vpack.c.bf16 %v22796_v24, %v22792_v23  ;;  %v24726_v23 = vpack.c.bf16 %v22813_v39, %v22809_v46 }
 0x828   : > { %15394 = vmatpush3.bf16.msra.mxu1 %v24722_v18  ;;  %16328 = vrot.lane.b32.xlu0 %v16327_v49, %s18675_s29  ;;  %v24727_v46 = vpack.c.bf16 %v22830_v61, %v22826_v60  ;;  %v24728_v60 = vpack.c.bf16 %v22847_v5, %v22843_v8 }
 0x829   : > { %16313 = vrot.lane.b32.xlu1 %v24723_v40, %s18675_s29 }
 0x82a   : > { %v16189_v11 = vpop.permute.xlu1 %16188 }
 0x82b   : > { %v16191_v59 = vunpack.i.h.bf16 %v16189_v11  ;;  %v16190_v55 = vunpack.i.l.bf16 %v16189_v11  ;;  %v15349_v22 = vpop.f32.mrb[116].mxu1 }
 0x82c   : > { %v15350_v42 = vpop.f32.mrb[117].mxu1 }
 0x82d   : > { %v10109_v57 = vpack.c.bf16 %v16191_v59, %v16190_v55  ;;  %16323 = vrot.lane.b32.xlu1 %v16322_v7, %s18675_s29  ;;  %v23055_v62 = vadd.f32 %v15350_v42, %v15349_v22  ;;  %v15352_v16 = vpop.f32.mrb[118].mxu1 }
 0x82e   : > { %v15353_v49 = vpop.f32.mrb[119].mxu1 }
 0x82f   : > { %v23057_v20 = vadd.f32 %v15353_v49, %v15352_v16  ;;  %15395 = vmatprep.subr.bf16.mxu1 %v10109_v57 }
 0x830   : > { %15396 = vmatpush3.bf16.msra.mxu1 %v24724_v45 }
 0x831   : > { %16333 = vrot.lane.b32.xlu1 %v16332_v0, %s18675_s29 }
 0x832   : > { %v16194_v18 = vpop.permute.xlu1 %16193 }
 0x833   : > { %v16196_v40 = vunpack.i.h.bf16 %v16194_v18  ;;  %v16195_v11 = vunpack.i.l.bf16 %v16194_v18  ;;  %v15355_v7 = vpop.f32.mrb[120].mxu1 }
 0x834   : > { %v15356_v59 = vpop.f32.mrb[121].mxu1 }
 0x835   : > { %v10110_v55 = vpack.c.bf16 %v16196_v40, %v16195_v11  ;;  %v23065_v22 = vadd.f32 %v15356_v59, %v15355_v7  ;;  %v15358_v42 = vpop.f32.mrb[122].mxu1 }
 0x836   : > { %v15359_v16 = vpop.f32.mrb[123].mxu1 }
 0x837   : > { %v23067_v57 = vadd.f32 %v15359_v16, %v15358_v42  ;;  %15397 = vmatprep.subr.bf16.mxu1 %v10110_v55 }
 0x838   : > { %15398 = vmatpush3.bf16.msra.mxu1 %v24725_v52 }
 0x83a   : > { %v16199_v0 = vpop.permute.xlu0 %16198 }
 0x83b   : > { %v16201_v49 = vunpack.i.h.bf16 %v16199_v0  ;;  %v16200_v45 = vunpack.i.l.bf16 %v16199_v0  ;;  %v15361_v18 = vpop.f32.mrb[124].mxu1 }
 0x83c   : > { %v15362_v6 = vpop.f32.mrb[125].mxu1 }
 0x83d   : > { %v10111_v40 = vpack.c.bf16 %v16201_v49, %v16200_v45  ;;  %v23074_v11 = vadd.f32 %v15362_v6, %v15361_v18  ;;  %v15364_v7 = vpop.f32.mrb[126].mxu1 }
 0x83e   : > { %v15365_v59 = vpop.f32.mrb[127].mxu1 }
 0x83f   : > { %v23076_v42 = vadd.f32 %v15365_v59, %v15364_v7  ;;  %15399 = vmatprep.subr.bf16.mxu1 %v10111_v40 }
 0x840   : > { %15400 = vmatpush3.bf16.msra.mxu1 %v24726_v23 }
 0x842   : > { %v16204_v55 = vpop.permute.xlu1 %16203 }
 0x843   : > { %v16206_v16 = vunpack.i.h.bf16 %v16204_v55  ;;  %v16205_v52 = vunpack.i.l.bf16 %v16204_v55  ;;  %v15367_v0 = vpop.f32.mrb[128].mxu1 }
 0x844   : > { %v15368_v54 = vpop.f32.mrb[129].mxu1 }
 0x845   : > { %v10112_v49 = vpack.c.bf16 %v16206_v16, %v16205_v52  ;;  %v23083_v6 = vadd.f32 %v15368_v54, %v15367_v0  ;;  %v15370_v45 = vpop.f32.mrb[130].mxu1 }
 0x846   : > { %v15371_v18 = vpop.f32.mrb[131].mxu1 }
 0x847   : > { %v23085_v7 = vadd.f32 %v15371_v18, %v15370_v45  ;;  %15401 = vmatprep.subr.bf16.mxu1 %v10112_v49 }
 0x848   : > { %15402 = vmatpush3.bf16.msra.mxu1 %v24727_v46 }
 0x84a   : > { %v16209_v40 = vpop.permute.xlu0 %16208 }
 0x84b   : > { %v16211_v59 = vunpack.i.h.bf16 %v16209_v40  ;;  %v16210_v23 = vunpack.i.l.bf16 %v16209_v40  ;;  %v15373_v55 = vpop.f32.mrb[132].mxu1 }
 0x84c   : > { %v15374_v24 = vpop.f32.mrb[133].mxu1 }
 0x84d   : > { %v10113_v16 = vpack.c.bf16 %v16211_v59, %v16210_v23  ;;  %v23092_v54 = vadd.f32 %v15374_v24, %v15373_v55  ;;  %v15376_v52 = vpop.f32.mrb[134].mxu1 }
 0x84e   : > { %v16219_v0 = vpop.permute.xlu0 %16218  ;;  %v15377_v45 = vpop.f32.mrb[135].mxu1 }
 0x84f   : > { %v16221_v18 = vunpack.i.h.bf16 %v16219_v0  ;;  %v16220_v49 = vunpack.i.l.bf16 %v16219_v0  ;;  %v23094_v13 = vadd.f32 %v15377_v45, %v15376_v52  ;;  %15403 = vmatprep.subr.bf16.mxu1 %v10113_v16  ;;  %v24729_v0 = vpack.c.bf16 %v22749_v30, %v22743_v38  ;;  %v18228_v38 = vld [vmem:[%s24680_s4 + $0x54] ss:$40 sps:$4 sm:$0xff]  }
 0x850   : > { %15404 = vmatpush3.bf16.msra.mxu1 %v24728_v60 }
 0x851   : > { %v10123_v61 = vpack.c.bf16 %v16221_v18, %v16220_v49 }
 0x852   : > { %v16214_v40 = vpop.permute.xlu1 %16213 }
 0x853   : > { %v16216_v59 = vunpack.i.h.bf16 %v16214_v40  ;;  %v16215_v24 = vunpack.i.l.bf16 %v16214_v40  ;;  %v15379_v23 = vpop.f32.mrb[136].mxu1  ;;  %15503 = vmatprep.subr.bf16.mxu0 %v10123_v61  ;;  %v18225_v61 = vld [vmem:[%s24680_s4] ss:$40 sps:$4 sm:$0xff]   ;;  %v24731_v40 = vpack.c.bf16 %v22868_v19, %v22863_v14  ;;  %v24732_v14 = vpack.c.bf16 %v22766_v35, %v22760_v63 }
 0x854   : > { %v15380_v55 = vpop.f32.mrb[137].mxu1  ;;  %15504 = vmatpush3.bf16.msra.mxu0 %v24729_v0  ;;  %v24733_v63 = vpack.c.bf16 %v22783_v56, %v22777_v53  ;;  %v24734_v35 = vpack.c.bf16 %v22886_v41, %v22881_v28  ;;  %v24735_v53 = vpack.c.bf16 %v22800_v17, %v22794_v48  ;;  %v24737_v48 = vpack.c.bf16 %v22905_v33, %v22900_v51  ;;  %v18234_v17 = vld [vmem:[%s24680_s4 + $0xf4] ss:$40 sps:$4 sm:$0xff]  }
 0x855   : > { %v10114_v52 = vpack.c.bf16 %v16216_v59, %v16215_v24  ;;  %v23104_v16 = vadd.f32 %v15380_v55, %v15379_v23  ;;  %v15382_v45 = vpop.f32.mrb[138].mxu1 }
 0x856   : > { %v16224_v8 = vpop.permute.xlu1 %16223  ;;  %v15383_v5 = vpop.f32.mrb[139].mxu1 }
 0x857   : > { %24730 = vst [vmem:[#allocation20_spill] sm:$0xff] %v23104_v16  ;;  %v16226_v18 = vunpack.i.h.bf16 %v16224_v8  ;;  %v16225_v49 = vunpack.i.l.bf16 %v16224_v8  ;;  %v23106_v60 = vadd.f32 %v15383_v5, %v15382_v45  ;;  %15405 = vmatprep.subr.bf16.mxu1 %v10114_v52 }
 0x858   : > { %15406 = vmatpush3.bf16.msra.mxu1 %v24731_v40 }
 0x859   : > { %v10124_v30 = vpack.c.bf16 %v16226_v18, %v16225_v49 }
 0x85a   : > { %v16229_v24 = vpop.permute.xlu1 %16228  ;;  %v16259_v23 = vpop.permute.xlu0 %16258 }
 0x85b   : > { %v16231_v55 = vunpack.i.h.bf16 %v16229_v24  ;;  %v16230_v0 = vunpack.i.l.bf16 %v16229_v24  ;;  %v16261_v52 = vunpack.i.h.bf16 %v16259_v23  ;;  %v16260_v45 = vunpack.i.l.bf16 %v16259_v23  ;;  %v15385_v8 = vpop.f32.mrb[140].mxu1  ;;  %11204 = vmatmul.mubr.bf16.vlgmr.msra.gmra.mrb[144].mxu1 %v18225_v61  ;;  %15505 = vmatprep.subr.bf16.mxu0 %v10124_v30  ;;  %v18230_v61 = vld [vmem:[%s24680_s4 + $0x50] ss:$40 sps:$4 sm:$0xff]  }
 0x85c   : > { %v15386_v5 = vpop.f32.mrb[141].mxu1  ;;  %15506 = vmatpush3.bf16.msra.mxu0 %v24732_v14  ;;  %11211 = vmatprep.mubr.bf16.mxu1 %v18228_v38  ;;  %v18231_v38 = vld [vmem:[%s24680_s4 + $0xa4] ss:$40 sps:$4 sm:$0xff]   ;;  %v24736_v14 = vpack.c.bf16 %v22817_v47, %v22811_v37  ;;  %v24738_v37 = vpack.c.bf16 %v22834_v1, %v22828_v31  ;;  %v24740_v31 = vpack.c.bf16 %v22924_v58, %v22919_v43  ;;  %v18242_v43 = vld [vmem:[%s24680_s4 + $0x140] ss:$40 sps:$4 sm:$0xff]  }
 0x85d   : > { %v10125_v19 = vpack.c.bf16 %v16231_v55, %v16230_v0  ;;  %v10139_v18 = vpack.c.bf16 %v16261_v52, %v16260_v45  ;;  %v23122_v49 = vadd.f32 %v15386_v5, %v15385_v8  ;;  %v15388_v40 = vpop.f32.mrb[142].mxu1  ;;  %v18233_v5 = vld [vmem:[%s24680_s4 + $0xa0] ss:$40 sps:$4 sm:$0xff]   ;;  %v18240_v1 = vld [vmem:[%s24680_s4 + $0x144] ss:$40 sps:$4 sm:$0xff]  }
 0x85e   : > { %v16234_v59 = vpop.permute.xlu1 %16233  ;;  %v15389_v46 = vpop.f32.mrb[143].mxu1  ;;  %v18243_v58 = vld [vmem:[%s24680_s4 + $0x5c] ss:$40 sps:$4 sm:$0xff]  }
 0x85f   : > { %v16236_v39 = vunpack.i.h.bf16 %v16234_v59  ;;  %v16235_v24 = vunpack.i.l.bf16 %v16234_v59  ;;  %v23124_v16 = vadd.f32 %v15389_v46, %v15388_v40  ;;  %15507 = vmatprep.subr.bf16.mxu0 %v10125_v19  ;;  %15615 = vmatprep.subr.bf16.mxu1 %v10139_v18 }
 0x860   : > { %15508 = vmatpush3.bf16.msra.mxu0 %v24733_v63  ;;  %15616 = vmatpush3.bf16.msra.mxu1 %v24734_v35 }
 0x861   : > { %v10126_v46 = vpack.c.bf16 %v16236_v39, %v16235_v24  ;;  %v10170_v30 = vpack.c.bf16 %v23124_v16, %v23122_v49  ;;  %v18345_v16 = vld [vmem:[%s24680_s4 + $0xbc] ss:$40 sps:$4 sm:$0xff]   ;;  %v18344_v49 = vld [vmem:[%s24680_s4 + $0x1a0] ss:$40 sps:$4 sm:$0xff]  }
 0x862   : > { %v16239_v59 = vpop.permute.xlu1 %16238  ;;  %v16264_v23 = vpop.permute.xlu0 %16263 }
 0x863   : > { %v16241_v55 = vunpack.i.h.bf16 %v16239_v59  ;;  %v16240_v0 = vunpack.i.l.bf16 %v16239_v59  ;;  %v16266_v52 = vunpack.i.h.bf16 %v16264_v23  ;;  %v16265_v45 = vunpack.i.l.bf16 %v16264_v23  ;;  %11212 = vmatmul.mubr.bf16.gmra.mrb[148].mxu1 %v18230_v61  ;;  %15509 = vmatprep.subr.bf16.mxu0 %v10126_v46  ;;  %v18236_v59 = vld [vmem:[%s24680_s4 + $0xf0] ss:$40 sps:$4 sm:$0xff]  }
 0x864   : > { %15510 = vmatpush3.bf16.msra.mxu0 %v24735_v53  ;;  %11219 = vmatprep.mubr.bf16.mxu1 %v18231_v38  ;;  %v24739_v23 = vpack.c.bf16 %v22851_v10, %v22845_v9  ;;  %v18237_v53 = vld [vmem:[%s24680_s4 + $0x8] ss:$40 sps:$4 sm:$0xff]   ;;  %v24741_v9 = vpack.c.bf16 %v22872_v29, %v22866_v15  ;;  %v18246_v15 = vld [vmem:[%s24680_s4 + $0x194] ss:$40 sps:$4 sm:$0xff]  }
 0x865   : > { %v10127_v56 = vpack.c.bf16 %v16241_v55, %v16240_v0  ;;  %v10140_v28 = vpack.c.bf16 %v16266_v52, %v16265_v45 }
 0x866   : > { %v16244_v41 = vpop.permute.xlu1 %16243 }
 0x867   : > { %v16246_v39 = vunpack.i.h.bf16 %v16244_v41  ;;  %v16245_v8 = vunpack.i.l.bf16 %v16244_v41  ;;  %15511 = vmatprep.subr.bf16.mxu0 %v10127_v56  ;;  %15617 = vmatprep.subr.bf16.mxu1 %v10140_v28  ;;  %v24742_v56 = vpack.c.bf16 %v22946_v50, %v22941_v25  ;;  %v18248_v25 = vld [vmem:[%s24680_s4 + $0x190] ss:$40 sps:$4 sm:$0xff]  }
 0x868   : > { %15512 = vmatpush3.bf16.msra.mxu0 %v24736_v14  ;;  %15618 = vmatpush3.bf16.msra.mxu1 %v24737_v48  ;;  %v18252_v14 = vld [vmem:[%s24680_s4 + $0x1e4] ss:$40 sps:$4 sm:$0xff]  }
 0x869   : > { %v10128_v19 = vpack.c.bf16 %v16246_v39, %v16245_v8  ;;  %v18245_v39 = vld [vmem:[%s24680_s4 + $0x58] ss:$40 sps:$4 sm:$0xff]   ;;  %v18249_v8 = vld [vmem:[%s24680_s4 + $0xac] ss:$40 sps:$4 sm:$0xff]  }
 0x86a   : > { %v16249_v18 = vpop.permute.xlu1 %16248  ;;  %v16269_v40 = vpop.permute.xlu0 %16268 }
 0x86b   : > { %v16251_v24 = vunpack.i.h.bf16 %v16249_v18  ;;  %v16250_v61 = vunpack.i.l.bf16 %v16249_v18  ;;  %v16271_v63 = vunpack.i.h.bf16 %v16269_v40  ;;  %v16270_v35 = vunpack.i.l.bf16 %v16269_v40  ;;  %11220 = vmatmul.mubr.bf16.gmra.mrb[152].mxu1 %v18233_v5  ;;  %15513 = vmatprep.subr.bf16.mxu0 %v10128_v19  ;;  %v18251_v18 = vld [vmem:[%s24680_s4 + $0xa8] ss:$40 sps:$4 sm:$0xff]   ;;  %v18255_v40 = vld [vmem:[%s24680_s4 + $0xfc] ss:$40 sps:$4 sm:$0xff]  }
 0x86c   : > { %15514 = vmatpush3.bf16.msra.mxu0 %v24738_v37  ;;  %11227 = vmatprep.mubr.bf16.mxu1 %v18234_v17  ;;  %v24743_v5 = vpack.c.bf16 %v22963_v32, %v22959_v36  ;;  %v18254_v36 = vld [vmem:[%s24680_s4 + $0x1e0] ss:$40 sps:$4 sm:$0xff]  }
 0x86d   : > { %v10129_v47 = vpack.c.bf16 %v16251_v24, %v16250_v61  ;;  %v10141_v33 = vpack.c.bf16 %v16271_v63, %v16270_v35  ;;  %v24744_v24 = vld [vmem:[#allocation12_spill] sm:$0xff]  ;;  %v24745_v61 = vld [vmem:[#allocation10_spill] sm:$0xff] }
 0x86e   : > { %v16254_v51 = vpop.permute.xlu1 %16253  ;;  %v24746_v63 = vpack.c.bf16 %v24744_v24, %v24745_v61  ;;  %v18258_v35 = vld [vmem:[%s24680_s4 + $0x234] ss:$40 sps:$4 sm:$0xff]  }
 0x86f   : > { %v16256_v38 = vunpack.i.h.bf16 %v16254_v51  ;;  %v16255_v46 = vunpack.i.l.bf16 %v16254_v51  ;;  %15515 = vmatprep.subr.bf16.mxu0 %v10129_v47  ;;  %15619 = vmatprep.subr.bf16.mxu1 %v10141_v33  ;;  %v18257_v51 = vld [vmem:[%s24680_s4 + $0xf8] ss:$40 sps:$4 sm:$0xff]  }
 0x870   : > { %15516 = vmatpush3.bf16.msra.mxu0 %v24739_v23  ;;  %15620 = vmatpush3.bf16.msra.mxu1 %v24740_v31 }
 0x871   : > { %v10130_v55 = vpack.c.bf16 %v16256_v38, %v16255_v46  ;;  %v18261_v38 = vld [vmem:[%s24680_s4 + $0x14c] ss:$40 sps:$4 sm:$0xff]  }
 0x872   : > { %v16274_v0 = vpop.permute.xlu0 %16273 }
 0x873   : > { %v16276_v52 = vunpack.i.h.bf16 %v16274_v0  ;;  %v16275_v45 = vunpack.i.l.bf16 %v16274_v0  ;;  %11228 = vmatmul.mubr.bf16.gmra.mrb[156].mxu1 %v18236_v59  ;;  %15517 = vmatprep.subr.bf16.mxu0 %v10130_v55  ;;  %v24747_v55 = vld [vmem:[#allocation16_spill] sm:$0xff]  ;;  %v24748_v0 = vld [vmem:[#allocation14_spill] sm:$0xff] }
 0x874   : > { %15518 = vmatpush3.bf16.msra.mxu0 %v24741_v9  ;;  %11235 = vmatprep.mubr.bf16.mxu1 %v18240_v1  ;;  %v18260_v1 = vld [vmem:[%s24680_s4 + $0x230] ss:$40 sps:$4 sm:$0xff]  }
 0x875   : > { %v10142_v10 = vpack.c.bf16 %v16276_v52, %v16275_v45  ;;  %v24749_v52 = vpack.c.bf16 %v24747_v55, %v24748_v0  ;;  %v18264_v45 = vld [vmem:[%s24680_s4 + $0x284] ss:$40 sps:$4 sm:$0xff]  }
 0x877   : > { %11365 = vmatmul.mubr.bf16.vlgmr.msra.gmra.mrb[20].mxu0 %v18237_v53  ;;  %15621 = vmatprep.subr.bf16.mxu1 %v10142_v10 }
 0x878   : > { %15622 = vmatpush3.bf16.msra.mxu1 %v24742_v56  ;;  %11372 = vmatprep.mubr.bf16.mxu0 %v18243_v58  ;;  %v18263_v58 = vld [vmem:[%s24680_s4 + $0x148] ss:$40 sps:$4 sm:$0xff]   ;;  %v24750_v56 = vld [vmem:[#allocation5_spill] sm:$0xff] }
 0x87a   : > { %v16279_v29 = vpop.permute.xlu0 %16278 }
 0x87b   : > { %v16281_v28 = vunpack.i.h.bf16 %v16279_v29  ;;  %v16280_v41 = vunpack.i.l.bf16 %v16279_v29  ;;  %11236 = vmatmul.mubr.bf16.gmra.mrb[160].mxu1 %v18242_v43  ;;  %v18267_v29 = vld [vmem:[%s24680_s4 + $0x19c] ss:$40 sps:$4 sm:$0xff]  }
 0x87c   : > { %11243 = vmatprep.mubr.bf16.mxu1 %v18246_v15  ;;  %v24751_v15 = vpack.c.bf16 %v22890_v2, %v24750_v56  ;;  %v18270_v2 = vld [vmem:[%s24680_s4 + $0x2d4] ss:$40 sps:$4 sm:$0xff]  }
 0x87d   : > { %v10143_v50 = vpack.c.bf16 %v16281_v28, %v16280_v41 }
 0x87f   : > { %11373 = vmatmul.mubr.bf16.gmra.mrb[24].mxu0 %v18245_v39  ;;  %15623 = vmatprep.subr.bf16.mxu1 %v10143_v50 }
 0x880   : > { %15624 = vmatpush3.bf16.msra.mxu1 %v24743_v5  ;;  %11380 = vmatprep.mubr.bf16.mxu0 %v18249_v8  ;;  %v18266_v8 = vld [vmem:[%s24680_s4 + $0x280] ss:$40 sps:$4 sm:$0xff]  }
 0x882   : > { %v16284_v48 = vpop.permute.xlu0 %16283 }
 0x883   : > { %v16286_v17 = vunpack.i.h.bf16 %v16284_v48  ;;  %v16285_v19 = vunpack.i.l.bf16 %v16284_v48  ;;  %11244 = vmatmul.mubr.bf16.gmra.mrb[164].mxu1 %v18248_v25  ;;  %v24752_v48 = vld [vmem:[#allocation19_spill] sm:$0xff] }
 0x884   : > { %11251 = vmatprep.mubr.bf16.mxu1 %v18252_v14 }
 0x885   : > { %v10144_v32 = vpack.c.bf16 %v16286_v17, %v16285_v19  ;;  %v24753_v17 = vld [vmem:[#allocation18_spill] sm:$0xff] }
 0x886   : > { %v24754_v19 = vpack.c.bf16 %v24752_v48, %v24753_v17  ;;  %v18284_v48 = vld [vmem:[%s24680_s4 + $0x370] ss:$40 sps:$4 sm:$0xff]  }
 0x887   : > { %11381 = vmatmul.mubr.bf16.gmra.mrb[28].mxu0 %v18251_v18  ;;  %15625 = vmatprep.subr.bf16.mxu1 %v10144_v32 }
 0x888   : > { %15626 = vmatpush3.bf16.msra.mxu1 %v24746_v63  ;;  %11388 = vmatprep.mubr.bf16.mxu0 %v18255_v40  ;;  %v24755_v40 = vmov 0  }
 0x88a   : > { %v16289_v37 = vpop.permute.xlu0 %16288 }
 0x88b   : > { %v16291_v47 = vunpack.i.h.bf16 %v16289_v37  ;;  %v16290_v33 = vunpack.i.l.bf16 %v16289_v37  ;;  %11252 = vmatmul.mubr.bf16.gmra.mrb[168].mxu1 %v18254_v36  ;;  %v18269_v36 = vld [vmem:[%s24680_s4 + $0x198] ss:$40 sps:$4 sm:$0xff]  }
 0x88c   : > { %11259 = vmatprep.mubr.bf16.mxu1 %v18258_v35  ;;  %v18273_v35 = vld [vmem:[%s24680_s4 + $0x1ec] ss:$40 sps:$4 sm:$0xff]  }
 0x88d   : > { %v10145_v46 = vpack.c.bf16 %v16291_v47, %v16290_v33  ;;  %v24756_v47 = vpack.c.bf16 %v22909_v3, %v22903_v44  ;;  %v18272_v33 = vld [vmem:[%s24680_s4 + $0x2d0] ss:$40 sps:$4 sm:$0xff]  }
 0x88e   : > { %v16299_v59 = vpop.permute.xlu0 %16298  ;;  %v18275_v44 = vld [vmem:[%s24680_s4 + $0x1e8] ss:$40 sps:$4 sm:$0xff]  }
 0x88f   : > { %v16301_v23 = vunpack.i.h.bf16 %v16299_v59  ;;  %v16300_v31 = vunpack.i.l.bf16 %v16299_v59  ;;  %11389 = vmatmul.mubr.bf16.gmra.mrb[32].mxu0 %v18257_v51  ;;  %15627 = vmatprep.subr.bf16.mxu1 %v10145_v46  ;;  %v18276_v59 = vld [vmem:[%s24680_s4 + $0x324] ss:$40 sps:$4 sm:$0xff]  }
 0x890   : > { %15628 = vmatpush3.bf16.msra.mxu1 %v24749_v52  ;;  %11396 = vmatprep.mubr.bf16.mxu0 %v18261_v38 }
 0x891   : > { %v10155_v53 = vpack.c.bf16 %v16301_v23, %v16300_v31  ;;  %v24757_v31 = vld [vmem:[#allocation7_spill] sm:$0xff] }
 0x892   : > { %v16309_v28 = vpop.permute.xlu0 %16308 }
 0x893   : > { %v16294_v9 = vpop.permute.xlu1 %16293  ;;  %11260 = vmatmul.mubr.bf16.gmra.mrb[172].mxu1 %v18260_v1  ;;  %15727 = vmatprep.subr.bf16.mxu0 %v10155_v53  ;;  %v16311_v50 = vunpack.i.h.bf16 %v16309_v28  ;;  %v16310_v25 = vunpack.i.l.bf16 %v16309_v28  ;;  %v24758_v1 = vld [vmem:[#allocation6_spill] sm:$0xff]  ;;  %v24761_v28 = vld [vmem:[#allocation9_spill] sm:$0xff] }
 0x894   : > { %v16296_v10 = vunpack.i.h.bf16 %v16294_v9  ;;  %v16295_v43 = vunpack.i.l.bf16 %v16294_v9  ;;  %15728 = vmatpush3.bf16.msra.mxu0 %v24751_v15  ;;  %11267 = vmatprep.mubr.bf16.mxu1 %v18264_v45  ;;  %v24759_v55 = vpack.c.bf16 %v24757_v31, %v24758_v1  ;;  %v18279_v45 = vld [vmem:[%s24680_s4 + $0x23c] ss:$40 sps:$4 sm:$0xff]   ;;  %v24760_v9 = vpack.c.bf16 %v22952_v27, %v22944_v21  ;;  %v18281_v27 = vld [vmem:[%s24680_s4 + $0x238] ss:$40 sps:$4 sm:$0xff]   ;;  %v18309_v31 = vld [vmem:[%s24680_s4 + $0x3cc] ss:$40 sps:$4 sm:$0xff]  }
 0x895   : > { %v10157_v24 = vpack.c.bf16 %v16311_v50, %v16310_v25  ;;  %v18282_v15 = vld [vmem:[%s24680_s4 + $0x374] ss:$40 sps:$4 sm:$0xff]   ;;  %v18308_v1 = vld [vmem:[%s24680_s4 + $0x4b0] ss:$40 sps:$4 sm:$0xff]  }
 0x896   : > { %v10146_v41 = vpack.c.bf16 %v16296_v10, %v16295_v43  ;;  %v16319_v37 = vpop.permute.xlu0 %16318  ;;  %v18285_v25 = vld [vmem:[%s24680_s4 + $0x28c] ss:$40 sps:$4 sm:$0xff]  }
 0x897   : > { %v16304_v39 = vpop.permute.xlu1 %16303  ;;  %11397 = vmatmul.mubr.bf16.gmra.mrb[36].mxu0 %v18263_v58  ;;  %v16321_v51 = vunpack.i.h.bf16 %v16319_v37  ;;  %v16320_v38 = vunpack.i.l.bf16 %v16319_v37  ;;  %v18278_v58 = vld [vmem:[%s24680_s4 + $0x320] ss:$40 sps:$4 sm:$0xff]   ;;  %v18294_v37 = vld [vmem:[%s24680_s4 + $0x414] ss:$40 sps:$4 sm:$0xff]  }
 0x898   : > { %v16306_v5 = vunpack.i.h.bf16 %v16304_v39  ;;  %v16305_v14 = vunpack.i.l.bf16 %v16304_v39  ;;  %15629 = vmatprep.subr.bf16.mxu1 %v10146_v41  ;;  %11404 = vmatprep.mubr.bf16.mxu0 %v18267_v29  ;;  %v24762_v41 = vld [vmem:[#allocation8_spill] sm:$0xff] }
 0x899   : > { %15630 = vmatpush3.bf16.msra.mxu1 %v24754_v19  ;;  %v10159_v3 = vpack.c.bf16 %v16321_v51, %v16320_v38  ;;  %v24763_v39 = vpack.c.bf16 %v24761_v28, %v24762_v41  ;;  %v18288_v19 = vld [vmem:[%s24680_s4 + $0x3c4] ss:$40 sps:$4 sm:$0xff]   ;;  %v18299_v51 = vld [vmem:[%s24680_s4 + $0x328] ss:$40 sps:$4 sm:$0xff]   ;;  %v24777_v28 = vld [vmem:[#allocation20_spill] sm:$0xff] }
 0x89a   : > { %v10156_v18 = vpack.c.bf16 %v16306_v5, %v16305_v14  ;;  %11815 = vmatprep.subr.bf16.mxu1 %v24755_v40  ;;  %v16329_v53 = vpop.permute.xlu0 %16328  ;;  %v24764_v5 = vld [vmem:[#allocation13_spill] sm:$0xff]  ;;  %v24765_v14 = vld [vmem:[#allocation11_spill] sm:$0xff]  ;;  %v24778_v41 = vpack.c.bf16 %v23106_v60, %v24777_v28 }
 0x89b   : > { %v16314_v32 = vpop.permute.xlu1 %16313  ;;  %11268 = vmatmul.mubr.bf16.gmra.mrb[176].mxu1 %v18266_v8  ;;  %v16331_v10 = vunpack.i.h.bf16 %v16329_v53  ;;  %v16330_v43 = vunpack.i.l.bf16 %v16329_v53  ;;  %v18303_v38 = vld [vmem:[%s24680_s4 + $0x37c] ss:$40 sps:$4 sm:$0xff]   ;;  %v24771_v53 = vpack.c.bf16 %v23042_v4, %v23040_v26  ;;  %v18323_v4 = vld [vmem:[%s24680_s4 + $0x468] ss:$40 sps:$4 sm:$0xff]  }
 0x89c   : > { %v16316_v61 = vunpack.i.h.bf16 %v16314_v32  ;;  %v16315_v63 = vunpack.i.l.bf16 %v16314_v32  ;;  %15729 = vmatprep.subr.bf16.mxu0 %v10156_v18  ;;  %11275 = vmatprep.mubr.bf16.mxu1 %v18270_v2  ;;  %v24766_v2 = vpack.c.bf16 %v24764_v5, %v24765_v14  ;;  %v24767_v18 = vld [vmem:[#allocation17_spill] sm:$0xff]  ;;  %v24768_v32 = vld [vmem:[#allocation15_spill] sm:$0xff] }
 0x89d   : > { %15730 = vmatpush3.bf16.msra.mxu0 %v24756_v47  ;;  %v10161_v21 = vpack.c.bf16 %v16331_v10, %v16330_v43  ;;  %v18293_v47 = vld [vmem:[%s24680_s4 + $0x2d8] ss:$40 sps:$4 sm:$0xff]   ;;  %v24772_v10 = vpack.c.bf16 %v23057_v20, %v23055_v62  ;;  %v18324_v26 = vld [vmem:[%s24680_s4 + $0xb4] ss:$40 sps:$4 sm:$0xff]   ;;  %v24773_v43 = vpack.c.bf16 %v23067_v57, %v23065_v22  ;;  %v18330_v22 = vld [vmem:[%s24680_s4 + $0x104] ss:$40 sps:$4 sm:$0xff]  }
 0x89e   : > { %15731 = vmatprep.subr.bf16.mxu0 %v10157_v24  ;;  %v10158_v46 = vpack.c.bf16 %v16316_v61, %v16315_v63  ;;  %v18287_v24 = vld [vmem:[%s24680_s4 + $0x288] ss:$40 sps:$4 sm:$0xff]   ;;  %v18291_v61 = vld [vmem:[%s24680_s4 + $0x2dc] ss:$40 sps:$4 sm:$0xff]   ;;  %v24770_v63 = vpack.c.bf16 %v23024_v34, %v23016_v12  ;;  %v18297_v34 = vld [vmem:[%s24680_s4 + $0x32c] ss:$40 sps:$4 sm:$0xff]  }
 0x89f   : > { %11405 = vmatmul.mubr.bf16.gmra.mrb[40].mxu0 %v18269_v36  ;;  %v16324_v23 = vpop.permute.xlu1 %16323  ;;  %v24769_v36 = vpack.c.bf16 %v24767_v18, %v24768_v32  ;;  %v18296_v12 = vld [vmem:[%s24680_s4 + $0x410] ss:$40 sps:$4 sm:$0xff]   ;;  %v18327_v62 = vld [vmem:[%s24680_s4 + $0x4bc] ss:$40 sps:$4 sm:$0xff]   ;;  %v18363_v18 = vld [vmem:[%s24680_s4 + $0x1ac] ss:$40 sps:$4 sm:$0xff]  }
 0x8a0   : > { %11412 = vmatprep.mubr.bf16.mxu0 %v18273_v35  ;;  %v16326_v0 = vunpack.i.h.bf16 %v16324_v23  ;;  %v16325_v52 = vunpack.i.l.bf16 %v16324_v23  ;;  %v18290_v35 = vld [vmem:[%s24680_s4 + $0x3c0] ss:$40 sps:$4 sm:$0xff]   ;;  %v18326_v20 = vld [vmem:[%s24680_s4 + $0xb0] ss:$40 sps:$4 sm:$0xff]   ;;  %v18342_v60 = vld [vmem:[%s24680_s4 + $0x1a4] ss:$40 sps:$4 sm:$0xff]  }
 0x8a1   : > { %15732 = vmatpush3.bf16.msra.mxu0 %v24759_v55  ;;  %v18305_v23 = vld [vmem:[%s24680_s4 + $0x378] ss:$40 sps:$4 sm:$0xff]   ;;  %v18314_v55 = vld [vmem:[%s24680_s4 + $0x14] ss:$40 sps:$4 sm:$0xff]   ;;  %v18354_v5 = vld [vmem:[%s24680_s4 + $0x244] ss:$40 sps:$4 sm:$0xff]  }
 0x8a2   : > { %15733 = vmatprep.subr.bf16.mxu0 %v10158_v46  ;;  %v10160_v56 = vpack.c.bf16 %v16326_v0, %v16325_v52  ;;  %v18302_v46 = vld [vmem:[%s24680_s4 + $0x460] ss:$40 sps:$4 sm:$0xff]   ;;  %v18312_v0 = vld [vmem:[%s24680_s4 + $0x10] ss:$40 sps:$4 sm:$0xff]   ;;  %v18318_v52 = vld [vmem:[%s24680_s4 + $0x64] ss:$40 sps:$4 sm:$0xff]  }
 0x8a3   : > { %11276 = vmatmul.mubr.bf16.gmra.mrb[180].mxu1 %v18272_v33  ;;  %v16334_v29 = vpop.permute.xlu1 %16333  ;;  %v18300_v33 = vld [vmem:[%s24680_s4 + $0x464] ss:$40 sps:$4 sm:$0xff]   ;;  %v18329_v57 = vld [vmem:[%s24680_s4 + $0x4b8] ss:$40 sps:$4 sm:$0xff]   ;;  %v18353_v14 = vld [vmem:[%s24680_s4 + $0x108] ss:$40 sps:$4 sm:$0xff]  }
 0x8a4   : > { %11283 = vmatprep.mubr.bf16.mxu1 %v18276_v59  ;;  %v16336_v8 = vunpack.i.h.bf16 %v16334_v29  ;;  %v16335_v50 = vunpack.i.l.bf16 %v16334_v29  ;;  %v18306_v59 = vld [vmem:[%s24680_s4 + $0x4b4] ss:$40 sps:$4 sm:$0xff]   ;;  %v24776_v29 = vpack.c.bf16 %v23094_v13, %v23092_v54  ;;  %v23440_v54 = vsel %vm11165_vm3, 65535, %v24755_v40  ;;  %v18362_v32 = vld [vmem:[%s24680_s4 + $0x290] ss:$40 sps:$4 sm:$0xff]  }
 0x8a5   : > { %15734 = vmatpush3.bf16.msra.mxu0 %v24760_v9  ;;  %v18321_v9 = vld [vmem:[%s24680_s4 + $0x46c] ss:$40 sps:$4 sm:$0xff]  }
 0x8a6   : > { %15735 = vmatprep.subr.bf16.mxu0 %v10159_v3  ;;  %v10162_v17 = vpack.c.bf16 %v16336_v8, %v16335_v50  ;;  %v18315_v3 = vld [vmem:[%s24680_s4 + $0x41c] ss:$40 sps:$4 sm:$0xff]   ;;  %v18339_v13 = vld [vmem:[%s24680_s4 + $0x6c] ss:$40 sps:$4 sm:$0xff]   ;;  %v18347_v8 = vld [vmem:[%s24680_s4 + $0xb8] ss:$40 sps:$4 sm:$0xff]  }
 0x8a7   : > { %11413 = vmatmul.mubr.bf16.gmra.mrb[44].mxu0 %v18275_v44  ;;  %v18311_v44 = vld [vmem:[%s24680_s4 + $0x3c8] ss:$40 sps:$4 sm:$0xff]   ;;  %v18351_v50 = vld [vmem:[%s24680_s4 + $0x10c] ss:$40 sps:$4 sm:$0xff]  }
 0x8a8   : > { %11420 = vmatprep.mubr.bf16.mxu0 %v18279_v45  ;;  %v18317_v45 = vld [vmem:[%s24680_s4 + $0x418] ss:$40 sps:$4 sm:$0xff]  }
 0x8a9   : > { %15736 = vmatpush3.bf16.msra.mxu0 %v24763_v39  ;;  %v18338_v39 = vld [vmem:[%s24680_s4 + $0x150] ss:$40 sps:$4 sm:$0xff]  }
 0x8aa   : > { %15737 = vmatprep.subr.bf16.mxu0 %v10160_v56  ;;  %v24774_v56 = vpack.c.bf16 %v23076_v42, %v23074_v11  ;;  %v18335_v11 = vld [vmem:[%s24680_s4 + $0x1c] ss:$40 sps:$4 sm:$0xff]   ;;  %v18332_v42 = vld [vmem:[%s24680_s4 + $0x100] ss:$40 sps:$4 sm:$0xff]  }
 0x8ab   : > { %11284 = vmatmul.mubr.bf16.gmra.mrb[184].mxu1 %v18278_v58  ;;  %v18320_v58 = vld [vmem:[%s24680_s4 + $0x60] ss:$40 sps:$4 sm:$0xff]  }
 0x8ac   : > { %11291 = vmatprep.mubr.bf16.mxu1 %v18282_v15  ;;  %v24775_v15 = vpack.c.bf16 %v23085_v7, %v23083_v6  ;;  %v18336_v6 = vld [vmem:[%s24680_s4 + $0x154] ss:$40 sps:$4 sm:$0xff]   ;;  %v18333_v7 = vld [vmem:[%s24680_s4 + $0x18] ss:$40 sps:$4 sm:$0xff]  }
 0x8ad   : > { %15738 = vmatpush3.bf16.msra.mxu0 %v24766_v2  ;;  %v18357_v2 = vld [vmem:[%s24680_s4 + $0x15c] ss:$40 sps:$4 sm:$0xff]  }
 0x8ae   : > { %15739 = vmatprep.subr.bf16.mxu0 %v10161_v21  ;;  %v18341_v21 = vld [vmem:[%s24680_s4 + $0x68] ss:$40 sps:$4 sm:$0xff]  }
 0x8af   : > { %11421 = vmatmul.mubr.bf16.gmra.mrb[48].mxu0 %v18281_v27  ;;  %v11169_v27 = vand.u32 1.0|1.0, %v23440_v54 }
 0x8b0   : > { %11428 = vmatprep.mubr.bf16.mxu0 %v18285_v25  ;;  %v18350_v25 = vld [vmem:[%s24680_s4 + $0x1f0] ss:$40 sps:$4 sm:$0xff]  }
 0x8b1   : > { %15740 = vmatpush3.bf16.msra.mxu0 %v24769_v36  ;;  %v18366_v36 = vld [vmem:[%s24680_s4 + $0x2e4] ss:$40 sps:$4 sm:$0xff]  }
 0x8b2   : > { %15741 = vmatprep.subr.bf16.mxu0 %v10162_v17  ;;  %v18360_v17 = vld [vmem:[%s24680_s4 + $0x294] ss:$40 sps:$4 sm:$0xff]  }
 0x8b3   : > { %11292 = vmatmul.mubr.bf16.gmra.mrb[188].mxu1 %v18284_v48  ;;  %v18356_v48 = vld [vmem:[%s24680_s4 + $0x240] ss:$40 sps:$4 sm:$0xff]  }
 0x8b4   : > { %11299 = vmatprep.mubr.bf16.mxu1 %v18288_v19  ;;  %v18359_v19 = vld [vmem:[%s24680_s4 + $0x158] ss:$40 sps:$4 sm:$0xff]  }
 0x8b5   : > { %15742 = vmatpush3.bf16.msra.mxu0 %v24770_v63  ;;  %v18368_v63 = vld [vmem:[%s24680_s4 + $0x2e0] ss:$40 sps:$4 sm:$0xff]  }
 0x8b7   : > { %11429 = vmatmul.mubr.bf16.gmra.mrb[52].mxu0 %v18287_v24  ;;  %v18365_v24 = vld [vmem:[%s24680_s4 + $0x1a8] ss:$40 sps:$4 sm:$0xff]  }
 0x8b8   : > { %11436 = vmatprep.mubr.bf16.mxu0 %v18291_v61  ;;  %v18369_v61 = vld [vmem:[%s24680_s4 + $0x1fc] ss:$40 sps:$4 sm:$0xff]  }
 0x8bb   : > { %11300 = vmatmul.mubr.bf16.gmra.mrb[192].mxu1 %v18290_v35  ;;  %v18372_v35 = vld [vmem:[%s24680_s4 + $0x334] ss:$40 sps:$4 sm:$0xff]  }
 0x8bc   : > { %11307 = vmatprep.mubr.bf16.mxu1 %v18294_v37  ;;  %v18371_v37 = vld [vmem:[%s24680_s4 + $0x1f8] ss:$40 sps:$4 sm:$0xff]  }
 0x8bf   : > { %11437 = vmatmul.mubr.bf16.gmra.mrb[56].mxu0 %v18293_v47  ;;  %v18375_v47 = vld [vmem:[%s24680_s4 + $0x24c] ss:$40 sps:$4 sm:$0xff]  }
 0x8c0   : > { %11444 = vmatprep.mubr.bf16.mxu0 %v18297_v34  ;;  %v18374_v34 = vld [vmem:[%s24680_s4 + $0x330] ss:$40 sps:$4 sm:$0xff]  }
 0x8c3   : > { %11308 = vmatmul.mubr.bf16.gmra.mrb[196].mxu1 %v18296_v12  ;;  %v18378_v12 = vld [vmem:[%s24680_s4 + $0x384] ss:$40 sps:$4 sm:$0xff]  }
 0x8c4   : > { %11315 = vmatprep.mubr.bf16.mxu1 %v18300_v33  ;;  %v18377_v33 = vld [vmem:[%s24680_s4 + $0x248] ss:$40 sps:$4 sm:$0xff]  }
 0x8c7   : > { %11445 = vmatmul.mubr.bf16.gmra.mrb[60].mxu0 %v18299_v51  ;;  %v18381_v51 = vld [vmem:[%s24680_s4 + $0x29c] ss:$40 sps:$4 sm:$0xff]  }
 0x8c8   : > { %11452 = vmatprep.mubr.bf16.mxu0 %v18303_v38 }
 0x8cb   : > { %11316 = vmatmul.mubr.bf16.gmra.mrb[200].mxu1 %v18302_v46 }
 0x8cc   : > { %11323 = vmatprep.mubr.bf16.mxu1 %v18306_v59  ;;  %v18380_v59 = vld [vmem:[%s24680_s4 + $0x380] ss:$40 sps:$4 sm:$0xff]  }
 0x8cf   : > { %11453 = vmatmul.mubr.bf16.gmra.mrb[64].mxu0 %v18305_v23 }
 0x8d0   : > { %11460 = vmatprep.mubr.bf16.mxu0 %v18309_v31 }
 0x8d3   : > { %11324 = vmatmul.mubr.bf16.gmra.mrb[204].mxu1 %v18308_v1  ;;  %v18386_v1 = vld [vmem:[%s24680_s4 + $0x3d4] ss:$40 sps:$4 sm:$0xff]  }
 0x8d4   : > { %11525 = vmatprep.mubr.bf16.mxu1 %v18314_v55 }
 0x8d7   : > { %11461 = vmatmul.mubr.bf16.gmra.mrb[68].mxu0 %v18311_v44 }
 0x8d8   : > { %11468 = vmatprep.mubr.bf16.mxu0 %v18315_v3  ;;  %v18383_v3 = vld [vmem:[%s24680_s4 + $0x298] ss:$40 sps:$4 sm:$0xff]  }
 0x8db   : > { %11526 = vmatmul.mubr.bf16.vlgmr.msra.gmra.mrb[208].mxu1 %v18312_v0  ;;  %v18387_v0 = vld [vmem:[%s24680_s4 + $0x2ec] ss:$40 sps:$4 sm:$0xff]  }
 0x8dc   : > { %11816 = vmatpush1.bf16.msra.mxu1 %v24771_v53  ;;  %11533 = vmatprep.mubr.bf16.mxu1 %v18318_v52  ;;  %v18384_v53 = vld [vmem:[%s24680_s4 + $0x3d0] ss:$40 sps:$4 sm:$0xff]  }
 0x8dd   : > { %11817 = vmatprep.subr.bf16.mxu1 %v24755_v40 }
 0x8df   : > { %11469 = vmatmul.mubr.bf16.gmra.mrb[72].mxu0 %v18317_v45 }
 0x8e0   : > { %11818 = vmatpush1.bf16.msra.mxu1 %v24772_v10  ;;  %11476 = vmatprep.mubr.bf16.mxu0 %v18321_v9  ;;  %v18392_v10 = vld [vmem:[%s24680_s4 + $0x424] ss:$40 sps:$4 sm:$0xff]  }
 0x8e1   : > { %11819 = vmatprep.subr.bf16.mxu1 %v24755_v40 }
 0x8e3   : > { %11534 = vmatmul.mubr.bf16.gmra.mrb[212].mxu1 %v18320_v58 }
 0x8e4   : > { %11820 = vmatpush1.bf16.msra.mxu1 %v24773_v43  ;;  %11541 = vmatprep.mubr.bf16.mxu1 %v18324_v26  ;;  %v18389_v43 = vld [vmem:[%s24680_s4 + $0x2e8] ss:$40 sps:$4 sm:$0xff]  }
 0x8e5   : > { %11821 = vmatprep.subr.bf16.mxu1 %v24755_v40 }
 0x8e7   : > { %11477 = vmatmul.mubr.bf16.gmra.mrb[76].mxu0 %v18323_v4 }
 0x8e8   : > { %11822 = vmatpush1.bf16.msra.mxu1 %v24774_v56  ;;  %11484 = vmatprep.mubr.bf16.mxu0 %v18327_v62  ;;  %v18393_v62 = vld [vmem:[%s24680_s4 + $0x33c] ss:$40 sps:$4 sm:$0xff]  }
 0x8e9   : > { %11823 = vmatprep.subr.bf16.mxu1 %v24755_v40 }
 0x8eb   : > { %11542 = vmatmul.mubr.bf16.gmra.mrb[216].mxu1 %v18326_v20 }
 0x8ec   : > { %11824 = vmatpush1.bf16.msra.mxu1 %v24775_v15  ;;  %11549 = vmatprep.mubr.bf16.mxu1 %v18330_v22  ;;  %v18390_v22 = vld [vmem:[%s24680_s4 + $0x420] ss:$40 sps:$4 sm:$0xff]  }
 0x8ed   : > { %11825 = vmatprep.subr.bf16.mxu1 %v24755_v40 }
 0x8ef   : > { %11485 = vmatmul.mubr.bf16.gmra.mrb[80].mxu0 %v18329_v57 }
 0x8f0   : > { %11826 = vmatpush1.bf16.msra.mxu1 %v24776_v29  ;;  %11686 = vmatprep.mubr.bf16.mxu0 %v18335_v11  ;;  %v18398_v11 = vld [vmem:[%s24680_s4 + $0x474] ss:$40 sps:$4 sm:$0xff]  }
 0x8f1   : > { %11827 = vmatprep.subr.bf16.mxu1 %v24755_v40 }
 0x8f3   : > { %11550 = vmatmul.mubr.bf16.gmra.mrb[220].mxu1 %v18332_v42 }
 0x8f4   : > { %11828 = vmatpush1.bf16.msra.mxu1 %v24778_v41  ;;  %11557 = vmatprep.mubr.bf16.mxu1 %v18336_v6  ;;  %v18395_v6 = vld [vmem:[%s24680_s4 + $0x338] ss:$40 sps:$4 sm:$0xff]  }
 0x8f5   : > { %11829 = vmatprep.subr.bf16.mxu1 %v24755_v40 }
 0x8f7   : > { %11687 = vmatmul.mubr.bf16.vlgmr.msra.gmra.mrb[84].mxu0 %v18333_v7  ;;  %v18399_v7 = vld [vmem:[%s24680_s4 + $0x38c] ss:$40 sps:$4 sm:$0xff]  }
 0x8f8   : > { %11830 = vmatpush1.bf16.msra.mxu1 %v10170_v30  ;;  %11694 = vmatprep.mubr.bf16.mxu0 %v18339_v13  ;;  %v18348_v30 = vld [vmem:[%s24680_s4 + $0x1f4] ss:$40 sps:$4 sm:$0xff]   ;;  %v18396_v13 = vld [vmem:[%s24680_s4 + $0x470] ss:$40 sps:$4 sm:$0xff]  }
 0x8f9   : > { %11831 = vmatprep.subr.bf16.mxu1 %v24755_v40 }
 0x8fb   : > { %11558 = vmatmul.mubr.bf16.gmra.mrb[224].mxu1 %v18338_v39 }
 0x8fc   : > { %11565 = vmatprep.mubr.bf16.mxu1 %v18342_v60  ;;  %11832 = vmatpush1.bf16.msra.mxu1 %v11169_v27  ;;  %v18404_v27 = vld [vmem:[%s24680_s4 + $0x4c4] ss:$40 sps:$4 sm:$0xff]  }
 0x8ff   : > { %11695 = vmatmul.mubr.bf16.gmra.mrb[88].mxu0 %v18341_v21 }
 0x900   : > { %11702 = vmatprep.mubr.bf16.mxu0 %v18345_v16 }
 0x903   : > { %11566 = vmatmul.mubr.bf16.gmra.mrb[228].mxu1 %v18344_v49 }
 0x904   : > { %11573 = vmatprep.mubr.bf16.mxu1 %v18348_v30 }
 0x907   : > { %11703 = vmatmul.mubr.bf16.gmra.mrb[92].mxu0 %v18347_v8  ;;  %v18401_v8 = vld [vmem:[%s24680_s4 + $0x388] ss:$40 sps:$4 sm:$0xff]  }
 0x908   : > { %11710 = vmatprep.mubr.bf16.mxu0 %v18351_v50 }
 0x90b   : > { %11574 = vmatmul.mubr.bf16.gmra.mrb[232].mxu1 %v18350_v25 }
 0x90c   : > { %11581 = vmatprep.mubr.bf16.mxu1 %v18354_v5  ;;  %v18405_v5 = vld [vmem:[%s24680_s4 + $0x3dc] ss:$40 sps:$4 sm:$0xff]  }
 0x90f   : > { %11711 = vmatmul.mubr.bf16.gmra.mrb[96].mxu0 %v18353_v14 }
 0x910   : > { %11718 = vmatprep.mubr.bf16.mxu0 %v18357_v2 }
 0x913   : > { %11582 = vmatmul.mubr.bf16.gmra.mrb[236].mxu1 %v18356_v48 }
 0x914   : > { %11589 = vmatprep.mubr.bf16.mxu1 %v18360_v17 }
 0x917   : > { %11719 = vmatmul.mubr.bf16.gmra.mrb[100].mxu0 %v18359_v19 }
 0x918   : > { %11726 = vmatprep.mubr.bf16.mxu0 %v18363_v18  ;;  %v18402_v18 = vld [vmem:[%s24680_s4 + $0x4c0] ss:$40 sps:$4 sm:$0xff]  }
 0x91b   : > { %11590 = vmatmul.mubr.bf16.gmra.mrb[240].mxu1 %v18362_v32 }
 0x91c   : > { %11597 = vmatprep.mubr.bf16.mxu1 %v18366_v36 }
 0x91f   : > { %11727 = vmatmul.mubr.bf16.gmra.mrb[104].mxu0 %v18365_v24 }
 0x920   : > { %11734 = vmatprep.mubr.bf16.mxu0 %v18369_v61  ;;  %v18410_v61 = vld [vmem:[%s24680_s4 + $0x24] ss:$40 sps:$4 sm:$0xff]  }
 0x923   : > { %11598 = vmatmul.mubr.bf16.gmra.mrb[244].mxu1 %v18368_v63 }
 0x924   : > { %11605 = vmatprep.mubr.bf16.mxu1 %v18372_v35 }
 0x927   : > { %11735 = vmatmul.mubr.bf16.gmra.mrb[108].mxu0 %v18371_v37 }
 0x928   : > { %11742 = vmatprep.mubr.bf16.mxu0 %v18375_v47 }
 0x92b   : > { %11606 = vmatmul.mubr.bf16.gmra.mrb[248].mxu1 %v18374_v34  ;;  %v18407_v34 = vld [vmem:[%s24680_s4 + $0x3d8] ss:$40 sps:$4 sm:$0xff]  }
 0x92c   : > { %11613 = vmatprep.mubr.bf16.mxu1 %v18378_v12 }
 0x92e   : > { %v15407_v38 = vpop.f32.mrb[144].mxu1 }
 0x92f   : > { %11743 = vmatmul.mubr.bf16.gmra.mrb[112].mxu0 %v18377_v33  ;;  %v15408_v46 = vpop.f32.mrb[145].mxu1 }
 0x930   : > { %v15409_v23 = vadd.f32 %v15408_v46, %v15407_v38  ;;  %v15410_v31 = vpop.f32.mrb[146].mxu1  ;;  %11750 = vmatprep.mubr.bf16.mxu0 %v18381_v51  ;;  %v18411_v51 = vld [vmem:[%s24680_s4 + $0x42c] ss:$40 sps:$4 sm:$0xff]  }
 0x931   : > { %v15411_v55 = vpop.f32.mrb[147].mxu1 }
 0x932   : > { %v15412_v44 = vadd.f32 %v15411_v55, %v15410_v31 }
 0x933   : > { %11614 = vmatmul.mubr.bf16.gmra.mrb[252].mxu1 %v18380_v59 }
 0x934   : > { %11621 = vmatprep.mubr.bf16.mxu1 %v18386_v1  ;;  %v18408_v1 = vld [vmem:[%s24680_s4 + $0x20] ss:$40 sps:$4 sm:$0xff]  }
 0x936   : > { %v15413_v52 = vpop.f32.mrb[148].mxu1 }
 0x937   : > { %11751 = vmatmul.mubr.bf16.gmra.mrb[116].mxu0 %v18383_v3  ;;  %v15414_v45 = vpop.f32.mrb[149].mxu1 }
 0x938   : > { %v23546_v9 = vadd.f32 %v15414_v45, %v15413_v52  ;;  %v15416_v58 = vpop.f32.mrb[150].mxu1  ;;  %11758 = vmatprep.mubr.bf16.mxu0 %v18387_v0  ;;  %v18416_v0 = vld [vmem:[%s24680_s4 + $0x74] ss:$40 sps:$4 sm:$0xff]  }
 0x939   : > { %v15417_v26 = vpop.f32.mrb[151].mxu1 }
 0x93a   : > { %v23551_v4 = vadd.f32 %v15417_v26, %v15416_v58  ;;  %v18413_v58 = vld [vmem:[%s24680_s4 + $0x428] ss:$40 sps:$4 sm:$0xff]  }
 0x93b   : > { %11622 = vmatmul.mubr.bf16.gmra.mrb[0].mxu1 %v18384_v53 }
 0x93c   : > { %11629 = vmatprep.mubr.bf16.mxu1 %v18392_v10 }
 0x93e   : > { %v15419_v20 = vpop.f32.mrb[152].mxu1 }
 0x93f   : > { %11759 = vmatmul.mubr.bf16.gmra.mrb[120].mxu0 %v18389_v43  ;;  %v15420_v56 = vpop.f32.mrb[153].mxu1 }
 0x940   : > { %v23562_v57 = vadd.f32 %v15420_v56, %v15419_v20  ;;  %v15422_v15 = vpop.f32.mrb[154].mxu1  ;;  %11766 = vmatprep.mubr.bf16.mxu0 %v18393_v62 }
 0x941   : > { %v15423_v42 = vpop.f32.mrb[155].mxu1 }
 0x942   : > { %v23567_v29 = vadd.f32 %v15423_v42, %v15422_v15  ;;  %v18414_v15 = vld [vmem:[%s24680_s4 + $0x70] ss:$40 sps:$4 sm:$0xff]  }
 0x943   : > { %11630 = vmatmul.mubr.bf16.gmra.mrb[4].mxu1 %v18390_v22 }
 0x944   : > { %11637 = vmatprep.mubr.bf16.mxu1 %v18398_v11 }
 0x946   : > { %v15425_v28 = vpop.f32.mrb[156].mxu1 }
 0x947   : > { %11767 = vmatmul.mubr.bf16.gmra.mrb[124].mxu0 %v18395_v6  ;;  %v15426_v41 = vpop.f32.mrb[157].mxu1 }
 0x948   : > { %v23578_v39 = vadd.f32 %v15426_v41, %v15425_v28  ;;  %v15428_v60 = vpop.f32.mrb[158].mxu1  ;;  %11774 = vmatprep.mubr.bf16.mxu0 %v18399_v7 }
 0x949   : > { %v15429_v21 = vpop.f32.mrb[159].mxu1 }
 0x94a   : > { %v23583_v16 = vadd.f32 %v15429_v21, %v15428_v60  ;;  %v15519_v49 = vpop.f32.mrb[20].mxu0  ;;  %v18419_v60 = vld [vmem:[%s24680_s4 + $0x478] ss:$40 sps:$4 sm:$0xff]   ;;  %v18423_v21 = vld [vmem:[%s24680_s4 + $0x4cc] ss:$40 sps:$4 sm:$0xff]  }
 0x94b   : > { %v15520_v30 = vpop.f32.mrb[21].mxu0  ;;  %11638 = vmatmul.mubr.bf16.gmra.mrb[8].mxu1 %v18396_v13 }
 0x94c   : > { %v15521_v50 = vadd.f32 %v15520_v30, %v15519_v49  ;;  %v15522_v25 = vpop.f32.mrb[22].mxu0  ;;  %11645 = vmatprep.mubr.bf16.mxu1 %v18404_v27 }
 0x94d   : > { %v15523_v14 = vpop.f32.mrb[23].mxu0 }
 0x94e   : > { %v23591_v2 = vadd.f32 %v15521_v50, %v15409_v23  ;;  %v15524_v48 = vadd.f32 %v15523_v14, %v15522_v25  ;;  %v15431_v17 = vpop.f32.mrb[160].mxu1 }
 0x94f   : > { %11775 = vmatmul.mubr.bf16.gmra.mrb[128].mxu0 %v18401_v8  ;;  %v15432_v19 = vpop.f32.mrb[161].mxu1 }
 0x950   : > { %v23596_v32 = vadd.f32 %v15524_v48, %v15412_v44  ;;  %v23598_v36 = vadd.f32 %v15432_v19, %v15431_v17  ;;  %v15434_v24 = vpop.f32.mrb[162].mxu1  ;;  %11782 = vmatprep.mubr.bf16.mxu0 %v18405_v5  ;;  %v18420_v5 = vld [vmem:[%s24680_s4 + $0xc0] ss:$40 sps:$4 sm:$0xff]  }
 0x951   : > { %v15435_v63 = vpop.f32.mrb[163].mxu1 }
 0x952   : > { %v23603_v35 = vadd.f32 %v15435_v63, %v15434_v24  ;;  %v15525_v37 = vpop.f32.mrb[24].mxu0  ;;  %v18425_v63 = vld [vmem:[%s24680_s4 + $0x4c8] ss:$40 sps:$4 sm:$0xff]  }
 0x953   : > { %v15526_v47 = vpop.f32.mrb[25].mxu0  ;;  %11646 = vmatmul.mubr.bf16.gmra.mrb[12].mxu1 %v18402_v18 }
 0x954   : > { %v15527_v12 = vadd.f32 %v15526_v47, %v15525_v37  ;;  %v15528_v33 = vpop.f32.mrb[26].mxu0  ;;  %15163 = vmatprep.mubr.msk.bf16.mxu1 %vm11116_vm4, %v18410_v61 }
 0x955   : > { %v15529_v38 = vpop.f32.mrb[27].mxu0 }
 0x956   : > { %v23613_v46 = vadd.f32 %v15527_v12, %v23546_v9  ;;  %v15530_v59 = vadd.f32 %v15529_v38, %v15528_v33  ;;  %v15437_v23 = vpop.f32.mrb[164].mxu1  ;;  %v18426_v38 = vld [vmem:[%s24680_s4 + $0x110] ss:$40 sps:$4 sm:$0xff]  }
 0x957   : > { %11783 = vmatmul.mubr.bf16.gmra.mrb[132].mxu0 %v18407_v34  ;;  %v15438_v31 = vpop.f32.mrb[165].mxu1 }
 0x958   : > { %v23619_v55 = vadd.f32 %v15530_v59, %v23551_v4  ;;  %v23621_v44 = vadd.f32 %v15438_v31, %v15437_v23  ;;  %v15440_v3 = vpop.f32.mrb[166].mxu1  ;;  %11790 = vmatprep.mubr.bf16.mxu0 %v18411_v51  ;;  %v18417_v4 = vld [vmem:[%s24680_s4 + $0x47c] ss:$40 sps:$4 sm:$0xff]  }
 0x959   : > { %v15441_v52 = vpop.f32.mrb[167].mxu1 }
 0x95a   : > { %v23626_v45 = vadd.f32 %v15441_v52, %v15440_v3  ;;  %v15531_v53 = vpop.f32.mrb[28].mxu0 }
 0x95b   : > { %v15532_v9 = vpop.f32.mrb[29].mxu0  ;;  %11848 = vmatmul.mubr.bf16.vlgmr.msra.gmra.mrb[16].mxu1 %v18408_v1  ;;  %v18431_v1 = vld [vmem:[%s24680_s4 + $0x164] ss:$40 sps:$4 sm:$0xff]  }
 0x95c   : > { %v15533_v10 = vadd.f32 %v15532_v9, %v15531_v53  ;;  %v15534_v26 = vpop.f32.mrb[30].mxu0  ;;  %15164 = vmatprep.mubr.msk.bf16.mxu1 %vm11116_vm4, %v18416_v0 }
 0x95d   : > { %v15535_v43 = vpop.f32.mrb[31].mxu0 }
 0x95e   : > { %v23636_v62 = vadd.f32 %v15533_v10, %v23562_v57  ;;  %v15536_v20 = vadd.f32 %v15535_v43, %v15534_v26  ;;  %v15443_v56 = vpop.f32.mrb[168].mxu1  ;;  %v18422_v57 = vld [vmem:[%s24680_s4 + $0xc4] ss:$40 sps:$4 sm:$0xff]   ;;  %v18429_v43 = vld [vmem:[%s24680_s4 + $0x160] ss:$40 sps:$4 sm:$0xff]  }
 0x95f   : > { %11791 = vmatmul.mubr.bf16.gmra.mrb[136].mxu0 %v18413_v58  ;;  %v15444_v22 = vpop.f32.mrb[169].mxu1 }
 0x960   : > { %v23642_v11 = vadd.f32 %v15536_v20, %v23567_v29  ;;  %v23644_v42 = vadd.f32 %v15444_v22, %v15443_v56  ;;  %v15446_v6 = vpop.f32.mrb[170].mxu1  ;;  %11798 = vmatprep.mubr.bf16.mxu0 %v18417_v4 }
 0x961   : > { %v15447_v7 = vpop.f32.mrb[171].mxu1 }
 0x962   : > { %v23649_v28 = vadd.f32 %v15447_v7, %v15446_v6  ;;  %v15537_v41 = vpop.f32.mrb[32].mxu0 }
 0x963   : > { %v15538_v13 = vpop.f32.mrb[33].mxu0  ;;  %11856 = vmatmul.mubr.bf16.gmra.mrb[20].mxu1 %v18414_v15  ;;  %v18434_v15 = vld [vmem:[%s24680_s4 + $0x1b4] ss:$40 sps:$4 sm:$0xff]  }
 0x964   : > { %v15539_v29 = vadd.f32 %v15538_v13, %v15537_v41  ;;  %v15540_v27 = vpop.f32.mrb[34].mxu0  ;;  %15165 = vmatprep.mubr.msk.bf16.mxu1 %vm11116_vm4, %v18422_v57 }
 0x965   : > { %v15541_v49 = vpop.f32.mrb[35].mxu0 }
 0x966   : > { %v23659_v30 = vadd.f32 %v15539_v29, %v23578_v39  ;;  %v15542_v8 = vadd.f32 %v15541_v49, %v15540_v27  ;;  %v15449_v50 = vpop.f32.mrb[172].mxu1  ;;  %v18428_v39 = vld [vmem:[%s24680_s4 + $0x114] ss:$40 sps:$4 sm:$0xff]   ;;  %v18432_v49 = vld [vmem:[%s24680_s4 + $0x1b0] ss:$40 sps:$4 sm:$0xff]  }
 0x967   : > { %11799 = vmatmul.mubr.bf16.gmra.mrb[140].mxu0 %v18419_v60  ;;  %v15450_v25 = vpop.f32.mrb[173].mxu1 }
 0x968   : > { %v23665_v14 = vadd.f32 %v15542_v8, %v23583_v16  ;;  %v23667_v48 = vadd.f32 %v15450_v25, %v15449_v50  ;;  %v15452_v17 = vpop.f32.mrb[174].mxu1  ;;  %11806 = vmatprep.mubr.bf16.mxu0 %v18423_v21 }
 0x969   : > { %v15453_v19 = vpop.f32.mrb[175].mxu1 }
 0x96a   : > { %v23672_v18 = vadd.f32 %v15453_v19, %v15452_v17  ;;  %v15543_v24 = vpop.f32.mrb[36].mxu0 }
 0x96b   : > { %v15544_v61 = vpop.f32.mrb[37].mxu0  ;;  %11864 = vmatmul.mubr.bf16.gmra.mrb[24].mxu1 %v18420_v5  ;;  %v18437_v5 = vld [vmem:[%s24680_s4 + $0x204] ss:$40 sps:$4 sm:$0xff]  }
 0x96c   : > { %v15545_v16 = vadd.f32 %v15544_v61, %v15543_v24  ;;  %v15546_v37 = vpop.f32.mrb[38].mxu0  ;;  %15166 = vmatprep.mubr.msk.bf16.mxu1 %vm11116_vm4, %v18428_v39 }
 0x96d   : > { %v15547_v47 = vpop.f32.mrb[39].mxu0 }
 0x96e   : > { %v23679_v34 = vadd.f32 %v15545_v16, %v23598_v36  ;;  %v15548_v12 = vadd.f32 %v15547_v47, %v15546_v37  ;;  %v15455_v33 = vpop.f32.mrb[176].mxu1 }
 0x96f   : > { %11807 = vmatmul.mubr.bf16.gmra.mrb[144].mxu0 %v18425_v63  ;;  %v15456_v51 = vpop.f32.mrb[177].mxu1 }
 0x970   : > { %v23685_v59 = vadd.f32 %v15548_v12, %v23603_v35  ;;  %v23687_v23 = vadd.f32 %v15456_v51, %v15455_v33  ;;  %v15458_v31 = vpop.f32.mrb[178].mxu1  ;;  %v18435_v12 = vld [vmem:[%s24680_s4 + $0x200] ss:$40 sps:$4 sm:$0xff]  }
 0x971   : > { %v15459_v36 = vpop.f32.mrb[179].mxu1 }
 0x972   : > { %v23692_v3 = vadd.f32 %v15459_v36, %v15458_v31  ;;  %v15549_v0 = vpop.f32.mrb[40].mxu0  ;;  %v18440_v31 = vld [vmem:[%s24680_s4 + $0x254] ss:$40 sps:$4 sm:$0xff]  }
 0x973   : > { %v15550_v52 = vpop.f32.mrb[41].mxu0  ;;  %11872 = vmatmul.mubr.bf16.gmra.mrb[28].mxu1 %v18426_v38 }
 0x974   : > { %v15551_v53 = vadd.f32 %v15550_v52, %v15549_v0  ;;  %v15552_v9 = vpop.f32.mrb[42].mxu0  ;;  %15167 = vmatprep.mubr.msk.bf16.mxu1 %vm11116_vm4, %v18431_v1 }
 0x975   : > { %v15553_v58 = vpop.f32.mrb[43].mxu0 }
 0x976   : > { %v23696_v35 = vadd.f32 %v15551_v53, %v23621_v44  ;;  %v15554_v10 = vadd.f32 %v15553_v58, %v15552_v9  ;;  %v15461_v26 = vpop.f32.mrb[180].mxu1 }
 0x977   : > { %v15462_v4 = vpop.f32.mrb[181].mxu1 }
 0x978   : > { %v23702_v20 = vadd.f32 %v15554_v10, %v23626_v45  ;;  %v23704_v56 = vadd.f32 %v15462_v4, %v15461_v26  ;;  %v15464_v22 = vpop.f32.mrb[182].mxu1  ;;  %v18438_v4 = vld [vmem:[%s24680_s4 + $0x250] ss:$40 sps:$4 sm:$0xff]  }
 0x979   : > { %v15465_v6 = vpop.f32.mrb[183].mxu1 }
 0x97a   : > { %v23709_v44 = vadd.f32 %v15465_v6, %v15464_v22  ;;  %v15555_v57 = vpop.f32.mrb[44].mxu0  ;;  %v18443_v6 = vld [vmem:[%s24680_s4 + $0x2a4] ss:$40 sps:$4 sm:$0xff]  }
 0x97b   : > { %v15556_v7 = vpop.f32.mrb[45].mxu0  ;;  %11880 = vmatmul.mubr.bf16.gmra.mrb[32].mxu1 %v18429_v43 }
 0x97c   : > { %v15557_v41 = vadd.f32 %v15556_v7, %v15555_v57  ;;  %v15558_v13 = vpop.f32.mrb[46].mxu0  ;;  %15168 = vmatprep.mubr.msk.bf16.mxu1 %vm11116_vm4, %v18434_v15 }
 0x97d   : > { %v15559_v60 = vpop.f32.mrb[47].mxu0 }
 0x97e   : > { %v23713_v45 = vadd.f32 %v15557_v41, %v23644_v42  ;;  %v15560_v29 = vadd.f32 %v15559_v60, %v15558_v13  ;;  %v15467_v27 = vpop.f32.mrb[184].mxu1 }
 0x97f   : > { %v15468_v21 = vpop.f32.mrb[185].mxu1 }
 0x980   : > { %v23719_v8 = vadd.f32 %v15560_v29, %v23649_v28  ;;  %v23721_v50 = vadd.f32 %v15468_v21, %v15467_v27  ;;  %v15470_v25 = vpop.f32.mrb[186].mxu1 }
 0x981   : > { %v15471_v17 = vpop.f32.mrb[187].mxu1 }
 0x982   : > { %v23726_v42 = vadd.f32 %v15471_v17, %v15470_v25  ;;  %v15561_v39 = vpop.f32.mrb[48].mxu0  ;;  %v18441_v25 = vld [vmem:[%s24680_s4 + $0x2a0] ss:$40 sps:$4 sm:$0xff]  }
 0x983   : > { %v15562_v19 = vpop.f32.mrb[49].mxu0  ;;  %11888 = vmatmul.mubr.bf16.gmra.mrb[36].mxu1 %v18432_v49 }
 0x984   : > { %v15563_v24 = vadd.f32 %v15562_v19, %v15561_v39  ;;  %v15564_v61 = vpop.f32.mrb[50].mxu0  ;;  %15169 = vmatprep.mubr.msk.bf16.mxu1 %vm11116_vm4, %v18437_v5  ;;  %v18446_v19 = vld [vmem:[%s24680_s4 + $0x2f4] ss:$40 sps:$4 sm:$0xff]  }
 0x985   : > { %v15565_v63 = vpop.f32.mrb[51].mxu0 }
 0x986   : > { %v23730_v28 = vadd.f32 %v15563_v24, %v23667_v48  ;;  %v15566_v16 = vadd.f32 %v15565_v63, %v15564_v61  ;;  %v15473_v37 = vpop.f32.mrb[188].mxu1 }
 0x987   : > { %v15474_v47 = vpop.f32.mrb[189].mxu1 }
 0x988   : > { %v23736_v33 = vadd.f32 %v15566_v16, %v23672_v18  ;;  %v23738_v51 = vadd.f32 %v15474_v47, %v15473_v37  ;;  %v15476_v38 = vpop.f32.mrb[190].mxu1 }
 0x989   : > { %v15477_v1 = vpop.f32.mrb[191].mxu1 }
 0x98a   : > { %v23743_v48 = vadd.f32 %v15477_v1, %v15476_v38  ;;  %v15567_v36 = vpop.f32.mrb[52].mxu0  ;;  %v18444_v1 = vld [vmem:[%s24680_s4 + $0x2f0] ss:$40 sps:$4 sm:$0xff]  }
 0x98b   : > { %v15568_v0 = vpop.f32.mrb[53].mxu0  ;;  %11896 = vmatmul.mubr.bf16.gmra.mrb[40].mxu1 %v18435_v12 }
 0x98c   : > { %v15569_v52 = vadd.f32 %v15568_v0, %v15567_v36  ;;  %v15570_v53 = vpop.f32.mrb[54].mxu0  ;;  %15170 = vmatprep.mubr.msk.bf16.mxu1 %vm11116_vm4, %v18440_v31 }
 0x98d   : > { %v15571_v9 = vpop.f32.mrb[55].mxu0 }
 0x98e   : > { %v23747_v18 = vadd.f32 %v15569_v52, %v23687_v23  ;;  %v15572_v58 = vadd.f32 %v15571_v9, %v15570_v53  ;;  %v15479_v10 = vpop.f32.mrb[192].mxu1  ;;  %v18449_v53 = vld [vmem:[%s24680_s4 + $0x344] ss:$40 sps:$4 sm:$0xff]  }
 0x98f   : > { %v15480_v26 = vpop.f32.mrb[193].mxu1 }
 0x990   : > { %v23753_v43 = vadd.f32 %v15572_v58, %v23692_v3  ;;  %v23755_v22 = vadd.f32 %v15480_v26, %v15479_v10  ;;  %v15482_v15 = vpop.f32.mrb[194].mxu1 }
 0x991   : > { %v15483_v57 = vpop.f32.mrb[195].mxu1 }
 0x992   : > { %v23760_v23 = vadd.f32 %v15483_v57, %v15482_v15  ;;  %v15573_v7 = vpop.f32.mrb[56].mxu0 }
 0x993   : > { %v15574_v41 = vpop.f32.mrb[57].mxu0  ;;  %11904 = vmatmul.mubr.bf16.gmra.mrb[44].mxu1 %v18438_v4 }
 0x994   : > { %v15575_v13 = vadd.f32 %v15574_v41, %v15573_v7  ;;  %v15576_v60 = vpop.f32.mrb[58].mxu0  ;;  %15171 = vmatprep.mubr.msk.bf16.mxu1 %vm11116_vm4, %v18443_v6  ;;  %v18447_v41 = vld [vmem:[%s24680_s4 + $0x340] ss:$40 sps:$4 sm:$0xff]  }
 0x995   : > { %v15577_v29 = vpop.f32.mrb[59].mxu0 }
 0x996   : > { %v23764_v3 = vadd.f32 %v15575_v13, %v23704_v56  ;;  %v15578_v27 = vadd.f32 %v15577_v29, %v15576_v60  ;;  %v15485_v21 = vpop.f32.mrb[196].mxu1 }
 0x997   : > { %v15486_v49 = vpop.f32.mrb[197].mxu1 }
 0x998   : > { %v23770_v5 = vadd.f32 %v15578_v27, %v23709_v44  ;;  %v23772_v17 = vadd.f32 %v15486_v49, %v15485_v21  ;;  %v15488_v39 = vpop.f32.mrb[198].mxu1  ;;  %v18452_v27 = vld [vmem:[%s24680_s4 + $0x394] ss:$40 sps:$4 sm:$0xff]  }
 0x999   : > { %v15489_v24 = vpop.f32.mrb[199].mxu1 }
 0x99a   : > { %v23777_v56 = vadd.f32 %v15489_v24, %v15488_v39  ;;  %v15579_v61 = vpop.f32.mrb[60].mxu0 }
 0x99b   : > { %v15580_v63 = vpop.f32.mrb[61].mxu0  ;;  %11912 = vmatmul.mubr.bf16.gmra.mrb[48].mxu1 %v18441_v25 }
 0x99c   : > { %v15581_v16 = vadd.f32 %v15580_v63, %v15579_v61  ;;  %v15582_v37 = vpop.f32.mrb[62].mxu0  ;;  %15172 = vmatprep.mubr.msk.bf16.mxu1 %vm11116_vm4, %v18446_v19 }
 0x99d   : > { %v15583_v47 = vpop.f32.mrb[63].mxu0 }
 0x99e   : > { %v23781_v44 = vadd.f32 %v15581_v16, %v23721_v50  ;;  %v15584_v12 = vadd.f32 %v15583_v47, %v15582_v37  ;;  %v15491_v38 = vpop.f32.mrb[200].mxu1  ;;  %v18450_v37 = vld [vmem:[%s24680_s4 + $0x390] ss:$40 sps:$4 sm:$0xff]  }
 0x99f   : > { %v15492_v31 = vpop.f32.mrb[201].mxu1 }
 0x9a0   : > { %v23787_v36 = vadd.f32 %v15584_v12, %v23726_v42  ;;  %v23789_v0 = vadd.f32 %v15492_v31, %v15491_v38  ;;  %v15494_v52 = vpop.f32.mrb[202].mxu1  ;;  %v18455_v31 = vld [vmem:[%s24680_s4 + $0x3e4] ss:$40 sps:$4 sm:$0xff]  }
 0x9a1   : > { %v15495_v9 = vpop.f32.mrb[203].mxu1 }
 0x9a2   : > { %v23794_v50 = vadd.f32 %v15495_v9, %v15494_v52  ;;  %v15585_v58 = vpop.f32.mrb[64].mxu0 }
 0x9a3   : > { %v15586_v10 = vpop.f32.mrb[65].mxu0  ;;  %11920 = vmatmul.mubr.bf16.gmra.mrb[52].mxu1 %v18444_v1 }
 0x9a4   : > { %v15587_v26 = vadd.f32 %v15586_v10, %v15585_v58  ;;  %v15588_v4 = vpop.f32.mrb[66].mxu0  ;;  %15173 = vmatprep.mubr.msk.bf16.mxu1 %vm11116_vm4, %v18449_v53 }
 0x9a5   : > { %v15589_v15 = vpop.f32.mrb[67].mxu0 }
 0x9a6   : > { %v23798_v42 = vadd.f32 %v15587_v26, %v23738_v51  ;;  %v15590_v6 = vadd.f32 %v15589_v15, %v15588_v4  ;;  %v15497_v57 = vpop.f32.mrb[204].mxu1 }
 0x9a7   : > { %v15498_v7 = vpop.f32.mrb[205].mxu1 }
 0x9a8   : > { %v23804_v13 = vadd.f32 %v15590_v6, %v23743_v48  ;;  %v23806_v60 = vadd.f32 %v15498_v7, %v15497_v57  ;;  %v15500_v29 = vpop.f32.mrb[206].mxu1 }
 0x9a9   : > { %v15501_v21 = vpop.f32.mrb[207].mxu1 }
 0x9aa   : > { %v23811_v51 = vadd.f32 %v15501_v21, %v15500_v29  ;;  %v15591_v49 = vpop.f32.mrb[68].mxu0  ;;  %v18458_v29 = vld [vmem:[%s24680_s4 + $0x434] ss:$40 sps:$4 sm:$0xff]  }
 0x9ab   : > { %v15592_v25 = vpop.f32.mrb[69].mxu0  ;;  %11928 = vmatmul.mubr.bf16.gmra.mrb[56].mxu1 %v18447_v41 }
 0x9ac   : > { %v15593_v39 = vadd.f32 %v15592_v25, %v15591_v49  ;;  %v15594_v19 = vpop.f32.mrb[70].mxu0  ;;  %15174 = vmatprep.mubr.msk.bf16.mxu1 %vm11116_vm4, %v18452_v27 }
 0x9ad   : > { %v15595_v24 = vpop.f32.mrb[71].mxu0 }
 0x9ae   : > { %v23815_v48 = vadd.f32 %v15593_v39, %v23755_v22  ;;  %v15596_v61 = vadd.f32 %v15595_v24, %v15594_v19  ;;  %v15631_v63 = vpop.f32.mrb[208].mxu1 }
 0x9af   : > { %v15632_v16 = vpop.f32.mrb[209].mxu1 }
 0x9b0   : > { %v23821_v47 = vadd.f32 %v15596_v61, %v23760_v23  ;;  %v15633_v12 = vadd.f32 %v15632_v16, %v15631_v63  ;;  %v15634_v38 = vpop.f32.mrb[210].mxu1 }
 0x9b1   : > { %v15635_v1 = vpop.f32.mrb[211].mxu1 }
 0x9b2   : > { %v23827_v22 = vadd.f32 %v15633_v12, %v23591_v2  ;;  %v15636_v52 = vadd.f32 %v15635_v1, %v15634_v38  ;;  %v15597_v53 = vpop.f32.mrb[72].mxu0  ;;  %v18453_v2 = vld [vmem:[%s24680_s4 + $0x3e0] ss:$40 sps:$4 sm:$0xff]  }
 0x9b3   : > { %v15598_v9 = vpop.f32.mrb[73].mxu0  ;;  %11936 = vmatmul.mubr.bf16.gmra.mrb[60].mxu1 %v18450_v37 }
 0x9b4   : > { %v23830_v58 = vadd.f32 %v15636_v52, %v23596_v32  ;;  %v15599_v10 = vadd.f32 %v15598_v9, %v15597_v53  ;;  %v15600_v23 = vpop.f32.mrb[74].mxu0  ;;  %15175 = vmatprep.mubr.msk.bf16.mxu1 %vm11116_vm4, %v18455_v31 }
 0x9b5   : > { %v15601_v26 = vpop.f32.mrb[75].mxu0 }
 0x9b6   : > { %v23834_v4 = vadd.f32 %v15599_v10, %v23772_v17  ;;  %v15602_v15 = vadd.f32 %v15601_v26, %v15600_v23  ;;  %v15637_v6 = vpop.f32.mrb[212].mxu1 }
 0x9b7   : > { %v15638_v57 = vpop.f32.mrb[213].mxu1 }
 0x9b8   : > { %v23840_v7 = vadd.f32 %v15602_v15, %v23777_v56  ;;  %v15639_v32 = vadd.f32 %v15638_v57, %v15637_v6  ;;  %v15640_v41 = vpop.f32.mrb[214].mxu1 }
 0x9b9   : > { %v15641_v27 = vpop.f32.mrb[215].mxu1 }
 0x9ba   : > { %v23846_v17 = vadd.f32 %v15639_v32, %v23613_v46  ;;  %v15642_v21 = vadd.f32 %v15641_v27, %v15640_v41  ;;  %v15603_v49 = vpop.f32.mrb[76].mxu0  ;;  %v18465_v46 = vld [vmem:[%s24681_s5 + $0x40] sm:$0xff]  }
 0x9bb   : > { %v15604_v25 = vpop.f32.mrb[77].mxu0  ;;  %11944 = vmatmul.mubr.bf16.gmra.mrb[64].mxu1 %v18453_v2  ;;  %15839 = vmatprep.subr.bf16.mxu0 %v18465_v46  ;;  %v18459_v41 = vld [vmem:[%s24680_s4 + $0x480] ss:$40 sps:$4 sm:$0xff]  }
 0x9bc   : > { %v23849_v39 = vadd.f32 %v15642_v21, %v23619_v55  ;;  %v15605_v19 = vadd.f32 %v15604_v25, %v15603_v49  ;;  %v15606_v56 = vpop.f32.mrb[78].mxu0  ;;  %15176 = vmatprep.mubr.msk.bf16.mxu1 %vm11116_vm4, %v18458_v29  ;;  %v18456_v55 = vld [vmem:[%s24680_s4 + $0x430] ss:$40 sps:$4 sm:$0xff]   ;;  %v18464_v21 = vld [vmem:[%s24680_s4 + $0x4d4] ss:$40 sps:$4 sm:$0xff]  }
 0x9bd   : > { %v15607_v24 = vpop.f32.mrb[79].mxu0 }
 0x9be   : > { %v23853_v61 = vadd.f32 %v15605_v19, %v23789_v0  ;;  %v15608_v63 = vadd.f32 %v15607_v24, %v15606_v56  ;;  %v15643_v16 = vpop.f32.mrb[216].mxu1  ;;  %v18461_v0 = vld [vmem:[%s24680_s4 + $0x484] ss:$40 sps:$4 sm:$0xff]  }
 0x9bf   : > { %v15644_v37 = vpop.f32.mrb[217].mxu1  ;;  %v18467_v24 = vld [vmem:[%s24681_s5 + $0x48] sm:$0xff]  }
 0x9c0   : > { %v23862_v12 = vadd.f32 %v15608_v63, %v23794_v50  ;;  %v15645_v38 = vadd.f32 %v15644_v37, %v15643_v16  ;;  %v15646_v31 = vpop.f32.mrb[218].mxu1  ;;  %v18466_v50 = vld [vmem:[%s24681_s5] sm:$0xff]  }
 0x9c1   : > { %v15647_v1 = vpop.f32.mrb[219].mxu1  ;;  %15840 = vmatpush3.bf16.msra.mxu0 %v18466_v50 }
 0x9c2   : > { %v23868_v52 = vadd.f32 %v15645_v38, %v23636_v62  ;;  %v15648_v53 = vadd.f32 %v15647_v1, %v15646_v31  ;;  %v15609_v9 = vpop.f32.mrb[80].mxu0  ;;  %15841 = vmatprep.subr.bf16.mxu0 %v18467_v24  ;;  %v18462_v31 = vld [vmem:[%s24680_s4 + $0x4d0] ss:$40 sps:$4 sm:$0xff]  }
 0x9c3   : > { %v15610_v10 = vpop.f32.mrb[81].mxu0  ;;  %11952 = vmatmul.mubr.bf16.gmra.mrb[68].mxu1 %v18456_v55  ;;  %v18469_v24 = vld [vmem:[%s24681_s5 + $0x50] sm:$0xff]  }
 0x9c4   : > { %v23874_v23 = vadd.f32 %v15648_v53, %v23642_v11  ;;  %v15611_v26 = vadd.f32 %v15610_v10, %v15609_v9  ;;  %v15612_v15 = vpop.f32.mrb[82].mxu0  ;;  %15177 = vmatprep.mubr.msk.bf16.mxu1 %vm11116_vm4, %v18461_v0 }
 0x9c5   : > { %v15613_v6 = vpop.f32.mrb[83].mxu0 }
 0x9c6   : > { %v23878_v62 = vadd.f32 %v15611_v26, %v23806_v60  ;;  %v15614_v57 = vadd.f32 %v15613_v6, %v15612_v15  ;;  %v15649_v2 = vpop.f32.mrb[220].mxu1 }
 0x9c7   : > { %v15650_v32 = vpop.f32.mrb[221].mxu1 }
 0x9c8   : > { %v23884_v29 = vadd.f32 %v15614_v57, %v23811_v51  ;;  %v15651_v11 = vadd.f32 %v15650_v32, %v15649_v2  ;;  %v15652_v27 = vpop.f32.mrb[222].mxu1 }
 0x9c9   : > { %v15653_v49 = vpop.f32.mrb[223].mxu1 }
 0x9ca   : > { %v23890_v60 = vadd.f32 %v15651_v11, %v23659_v30  ;;  %v15654_v25 = vadd.f32 %v15653_v49, %v15652_v27  ;;  %v15743_v19 = vpop.f32.mrb[84].mxu0 }
 0x9cb   : > { %v15744_v56 = vpop.f32.mrb[85].mxu0  ;;  %11960 = vmatmul.mubr.bf16.gmra.mrb[72].mxu1 %v18459_v41 }
 0x9cc   : > { %v23896_v51 = vadd.f32 %v15654_v25, %v23665_v14  ;;  %v15745_v63 = vadd.f32 %v15744_v56, %v15743_v19  ;;  %v15746_v16 = vpop.f32.mrb[86].mxu0  ;;  %15178 = vmatprep.mubr.msk.bf16.mxu1 %vm11116_vm4, %v18464_v21 }
 0x9cd   : > { %v15747_v46 = vpop.f32.mrb[87].mxu0 }
 0x9ce   : > { %v15748_v37 = vadd.f32 %v15747_v46, %v15746_v16  ;;  %v15655_v30 = vpop.f32.mrb[224].mxu1  ;;  %v23900_v55 = vadd.f32 %v15745_v63, %v23827_v22  ;;  %v18468_v22 = vld [vmem:[%s24681_s5 + $0x8] sm:$0xff]  }
 0x9cf   : > { %v15656_v38 = vpop.f32.mrb[225].mxu1  ;;  %15842 = vmatpush3.bf16.msra.mxu0 %v18468_v22 }
 0x9d0   : > { %v15657_v0 = vadd.f32 %v15656_v38, %v15655_v30  ;;  %v15658_v1 = vpop.f32.mrb[226].mxu1  ;;  %v23906_v14 = vadd.f32 %v15748_v37, %v23830_v58  ;;  %15843 = vmatprep.subr.bf16.mxu0 %v18469_v24 }
 0x9d1   : > { %v15659_v53 = vpop.f32.mrb[227].mxu1 }
 0x9d2   : > { %v23909_v9 = vadd.f32 %v15657_v0, %v23679_v34  ;;  %v15660_v10 = vadd.f32 %v15659_v53, %v15658_v1  ;;  %v15749_v50 = vpop.f32.mrb[88].mxu0 }
 0x9d3   : > { %v15750_v26 = vpop.f32.mrb[89].mxu0  ;;  %11968 = vmatmul.mubr.bf16.gmra.mrb[76].mxu1 %v18462_v31 }
 0x9d4   : > { %v23915_v15 = vadd.f32 %v15660_v10, %v23685_v59  ;;  %v15751_v6 = vadd.f32 %v15750_v26, %v15749_v50  ;;  %v15752_v57 = vpop.f32.mrb[90].mxu0  ;;  %v18470_v26 = vld [vmem:[%s24681_s5 + $0x10] sm:$0xff]  }
 0x9d5   : > { %v15753_v2 = vpop.f32.mrb[91].mxu0  ;;  %15844 = vmatpush3.bf16.msra.mxu0 %v18470_v26 }
 0x9d6   : > { %v15754_v58 = vadd.f32 %v15753_v2, %v15752_v57  ;;  %v15661_v32 = vpop.f32.mrb[228].mxu1  ;;  %v23918_v34 = vadd.f32 %v15751_v6, %v23846_v17 }
 0x9d7   : > { %v15662_v41 = vpop.f32.mrb[229].mxu1 }
 0x9d8   : > { %v15663_v11 = vadd.f32 %v15662_v41, %v15661_v32  ;;  %v15664_v27 = vpop.f32.mrb[230].mxu1  ;;  %v23921_v21 = vadd.f32 %v15754_v58, %v23849_v39 }
 0x9d9   : > { %v15665_v49 = vpop.f32.mrb[231].mxu1 }
 0x9da   : > { %v23924_v25 = vadd.f32 %v15663_v11, %v23696_v35  ;;  %v15666_v59 = vadd.f32 %v15665_v49, %v15664_v27  ;;  %v15755_v19 = vpop.f32.mrb[92].mxu0 }
 0x9db   : > { %v15756_v56 = vpop.f32.mrb[93].mxu0 }
 0x9dc   : > { %v23930_v17 = vadd.f32 %v15666_v59, %v23702_v20  ;;  %v15757_v63 = vadd.f32 %v15756_v56, %v15755_v19  ;;  %v15758_v16 = vpop.f32.mrb[94].mxu0  ;;  %v18471_v56 = vld [vmem:[%s24681_s5 + $0x58] sm:$0xff]  }
 0x9dd   : > { %v15759_v46 = vpop.f32.mrb[95].mxu0  ;;  %15845 = vmatprep.subr.bf16.mxu0 %v18471_v56 }
 0x9de   : > { %v15760_v39 = vadd.f32 %v15759_v46, %v15758_v16  ;;  %v15667_v37 = vpop.f32.mrb[232].mxu1  ;;  %v23933_v30 = vadd.f32 %v15757_v63, %v23868_v52 }
 0x9df   : > { %v15668_v35 = vpop.f32.mrb[233].mxu1 }
 0x9e0   : > { %v15669_v38 = vadd.f32 %v15668_v35, %v15667_v37  ;;  %v15670_v31 = vpop.f32.mrb[234].mxu1  ;;  %v23936_v0 = vadd.f32 %v15760_v39, %v23874_v23 }
 0x9e1   : > { %v15671_v1 = vpop.f32.mrb[235].mxu1 }
 0x9e2   : > { %v23939_v53 = vadd.f32 %v15669_v38, %v23713_v45  ;;  %v15672_v20 = vadd.f32 %v15671_v1, %v15670_v31  ;;  %v15761_v10 = vpop.f32.mrb[96].mxu0 }
 0x9e3   : > { %v15762_v50 = vpop.f32.mrb[97].mxu0 }
 0x9e4   : > { %v23945_v52 = vadd.f32 %v15672_v20, %v23719_v8  ;;  %v15763_v22 = vadd.f32 %v15762_v50, %v15761_v10  ;;  %v15764_v6 = vpop.f32.mrb[98].mxu0  ;;  %v18472_v50 = vld [vmem:[%s24681_s5 + $0x18] sm:$0xff]  }
 0x9e5   : > { %v15765_v57 = vpop.f32.mrb[99].mxu0  ;;  %15846 = vmatpush3.bf16.msra.mxu0 %v18472_v50 }
 0x9e6   : > { %v15766_v23 = vadd.f32 %v15765_v57, %v15764_v6  ;;  %v15673_v2 = vpop.f32.mrb[236].mxu1  ;;  %v23948_v58 = vadd.f32 %v15763_v22, %v23890_v60 }
 0x9e7   : > { %v15674_v45 = vpop.f32.mrb[237].mxu1 }
 0x9e8   : > { %v15675_v32 = vadd.f32 %v15674_v45, %v15673_v2  ;;  %v15676_v41 = vpop.f32.mrb[238].mxu1  ;;  %v23951_v11 = vadd.f32 %v15766_v23, %v23896_v51 }
 0x9e9   : > { %v15677_v27 = vpop.f32.mrb[239].mxu1 }
 0x9ea   : > { %v23954_v49 = vadd.f32 %v15675_v32, %v23730_v28  ;;  %v15678_v8 = vadd.f32 %v15677_v27, %v15676_v41  ;;  %v15767_v59 = vpop.f32.mrb[100].mxu0 }
 0x9eb   : > { %v15768_v19 = vpop.f32.mrb[101].mxu0 }
 0x9ec   : > { %v23960_v60 = vadd.f32 %v15678_v8, %v23736_v33  ;;  %v15769_v24 = vadd.f32 %v15768_v19, %v15767_v59  ;;  %v15770_v63 = vpop.f32.mrb[102].mxu0  ;;  %v18473_v19 = vld [vmem:[%s24681_s5 + $0x60] sm:$0xff]  }
 0x9ed   : > { %v15771_v16 = vpop.f32.mrb[103].mxu0  ;;  %15847 = vmatprep.subr.bf16.mxu0 %v18473_v19 }
 0x9ee   : > { %v15772_v51 = vadd.f32 %v15771_v16, %v15770_v63  ;;  %v15679_v46 = vpop.f32.mrb[240].mxu1  ;;  %v23963_v39 = vadd.f32 %v15769_v24, %v23909_v9 }
 0x9ef   : > { %v15680_v28 = vpop.f32.mrb[241].mxu1 }
 0x9f0   : > { %v15681_v37 = vadd.f32 %v15680_v28, %v15679_v46  ;;  %v15682_v35 = vpop.f32.mrb[242].mxu1  ;;  %v23966_v38 = vadd.f32 %v15772_v51, %v23915_v15 }
 0x9f1   : > { %v15683_v31 = vpop.f32.mrb[243].mxu1 }
 0x9f2   : > { %v23969_v1 = vadd.f32 %v15681_v37, %v23747_v18  ;;  %v15684_v33 = vadd.f32 %v15683_v31, %v15682_v35  ;;  %v15773_v20 = vpop.f32.mrb[104].mxu0 }
 0x9f3   : > { %v15774_v10 = vpop.f32.mrb[105].mxu0 }
 0x9f4   : > { %v23975_v9 = vadd.f32 %v15684_v33, %v23753_v43  ;;  %v15775_v26 = vadd.f32 %v15774_v10, %v15773_v20  ;;  %v15776_v22 = vpop.f32.mrb[106].mxu0  ;;  %v18474_v10 = vld [vmem:[%s24681_s5 + $0x20] sm:$0xff]  }
 0x9f5   : > { %v15777_v6 = vpop.f32.mrb[107].mxu0  ;;  %15848 = vmatpush3.bf16.msra.mxu0 %v18474_v10 }
 0x9f6   : > { %v15778_v15 = vadd.f32 %v15777_v6, %v15776_v22  ;;  %v15685_v57 = vpop.f32.mrb[244].mxu1  ;;  %v23978_v23 = vadd.f32 %v15775_v26, %v23924_v25 }
 0x9f7   : > { %v15686_v18 = vpop.f32.mrb[245].mxu1 }
 0x9f8   : > { %v15687_v2 = vadd.f32 %v15686_v18, %v15685_v57  ;;  %v15688_v45 = vpop.f32.mrb[246].mxu1  ;;  %v23981_v32 = vadd.f32 %v15778_v15, %v23930_v17 }
 0x9f9   : > { %v15689_v41 = vpop.f32.mrb[247].mxu1 }
 0x9fa   : > { %v23984_v27 = vadd.f32 %v15687_v2, %v23764_v3  ;;  %v15690_v43 = vadd.f32 %v15689_v41, %v15688_v45  ;;  %v15779_v8 = vpop.f32.mrb[108].mxu0 }
 0x9fb   : > { %v15780_v59 = vpop.f32.mrb[109].mxu0 }
 0x9fc   : > { %v23990_v25 = vadd.f32 %v15690_v43, %v23770_v5  ;;  %v15781_v56 = vadd.f32 %v15780_v59, %v15779_v8  ;;  %v15782_v24 = vpop.f32.mrb[110].mxu0  ;;  %v18475_v59 = vld [vmem:[%s24681_s5 + $0x68] sm:$0xff]  }
 0x9fd   : > { %v15783_v63 = vpop.f32.mrb[111].mxu0  ;;  %15849 = vmatprep.subr.bf16.mxu0 %v18475_v59 }
 0x9fe   : > { %v15784_v17 = vadd.f32 %v15783_v63, %v15782_v24  ;;  %v15691_v16 = vpop.f32.mrb[248].mxu1  ;;  %v23993_v51 = vadd.f32 %v15781_v56, %v23939_v53 }
 0x9ff   : > { %v15692_v3 = vpop.f32.mrb[249].mxu1 }
 0xa00   : > { %v15693_v46 = vadd.f32 %v15692_v3, %v15691_v16  ;;  %v15694_v28 = vpop.f32.mrb[250].mxu1  ;;  %v23996_v37 = vadd.f32 %v15784_v17, %v23945_v52 }
 0xa01   : > { %v15695_v35 = vpop.f32.mrb[251].mxu1 }
 0xa02   : > { %v23999_v31 = vadd.f32 %v15693_v46, %v23781_v44  ;;  %v15696_v5 = vadd.f32 %v15695_v35, %v15694_v28  ;;  %v15785_v33 = vpop.f32.mrb[112].mxu0 }
 0xa03   : > { %v15786_v20 = vpop.f32.mrb[113].mxu0 }
 0xa04   : > { %v24005_v53 = vadd.f32 %v15696_v5, %v23787_v36  ;;  %v15787_v50 = vadd.f32 %v15786_v20, %v15785_v33  ;;  %v15788_v26 = vpop.f32.mrb[114].mxu0  ;;  %v18476_v20 = vld [vmem:[%s24681_s5 + $0x28] sm:$0xff]  }
 0xa05   : > { %v15789_v22 = vpop.f32.mrb[115].mxu0  ;;  %15850 = vmatpush3.bf16.msra.mxu0 %v18476_v20 }
 0xa06   : > { %v15790_v52 = vadd.f32 %v15789_v22, %v15788_v26  ;;  %v15697_v6 = vpop.f32.mrb[252].mxu1  ;;  %v24008_v15 = vadd.f32 %v15787_v50, %v23954_v49 }
 0xa07   : > { %v15698_v44 = vpop.f32.mrb[253].mxu1 }
 0xa08   : > { %v15699_v57 = vadd.f32 %v15698_v44, %v15697_v6  ;;  %v15700_v18 = vpop.f32.mrb[254].mxu1  ;;  %v24011_v2 = vadd.f32 %v15790_v52, %v23960_v60 }
 0xa09   : > { %v15701_v45 = vpop.f32.mrb[255].mxu1 }
 0xa0a   : > { %v24014_v41 = vadd.f32 %v15699_v57, %v23798_v42  ;;  %v15702_v36 = vadd.f32 %v15701_v45, %v15700_v18  ;;  %v15791_v43 = vpop.f32.mrb[116].mxu0 }
 0xa0b   : > { %v15792_v8 = vpop.f32.mrb[117].mxu0 }
 0xa0c   : > { %v24020_v49 = vadd.f32 %v15702_v36, %v23804_v13  ;;  %v15793_v19 = vadd.f32 %v15792_v8, %v15791_v43  ;;  %v15794_v56 = vpop.f32.mrb[118].mxu0  ;;  %v18477_v8 = vld [vmem:[%s24681_s5 + $0x70] sm:$0xff]  }
 0xa0d   : > { %v15795_v24 = vpop.f32.mrb[119].mxu0  ;;  %15851 = vmatprep.subr.bf16.mxu0 %v18477_v8 }
 0xa0e   : > { %v15796_v60 = vadd.f32 %v15795_v24, %v15794_v56  ;;  %v15703_v63 = vpop.f32.mrb[0].mxu1  ;;  %v24023_v17 = vadd.f32 %v15793_v19, %v23969_v1 }
 0xa0f   : > { %v15704_v42 = vpop.f32.mrb[1].mxu1 }
 0xa10   : > { %v15705_v16 = vadd.f32 %v15704_v42, %v15703_v63  ;;  %v15706_v3 = vpop.f32.mrb[2].mxu1  ;;  %v24026_v46 = vadd.f32 %v15796_v60, %v23975_v9 }
 0xa11   : > { %v15707_v28 = vpop.f32.mrb[3].mxu1 }
 0xa12   : > { %v24029_v35 = vadd.f32 %v15705_v16, %v23815_v48  ;;  %v15708_v13 = vadd.f32 %v15707_v28, %v15706_v3  ;;  %v15797_v5 = vpop.f32.mrb[120].mxu0 }
 0xa13   : > { %v15798_v33 = vpop.f32.mrb[121].mxu0 }
 0xa14   : > { %v24035_v1 = vadd.f32 %v15708_v13, %v23821_v47  ;;  %v15799_v10 = vadd.f32 %v15798_v33, %v15797_v5  ;;  %v15800_v50 = vpop.f32.mrb[122].mxu0  ;;  %v18478_v33 = vld [vmem:[%s24681_s5 + $0x30] sm:$0xff]  }
 0xa15   : > { %v15801_v26 = vpop.f32.mrb[123].mxu0  ;;  %15852 = vmatpush3.bf16.msra.mxu0 %v18478_v33 }
 0xa16   : > { %v15802_v9 = vadd.f32 %v15801_v26, %v15800_v50  ;;  %v15709_v22 = vpop.f32.mrb[4].mxu1  ;;  %v24038_v52 = vadd.f32 %v15799_v10, %v23984_v27 }
 0xa17   : > { %v15710_v48 = vpop.f32.mrb[5].mxu1 }
 0xa18   : > { %v15711_v6 = vadd.f32 %v15710_v48, %v15709_v22  ;;  %v15712_v44 = vpop.f32.mrb[6].mxu1  ;;  %v24041_v57 = vadd.f32 %v15802_v9, %v23990_v25 }
 0xa19   : > { %v15713_v18 = vpop.f32.mrb[7].mxu1 }
 0xa1a   : > { %v24044_v45 = vadd.f32 %v15711_v6, %v23834_v4  ;;  %v15714_v47 = vadd.f32 %v15713_v18, %v15712_v44  ;;  %v15803_v36 = vpop.f32.mrb[124].mxu0 }
 0xa1b   : > { %v15804_v43 = vpop.f32.mrb[125].mxu0 }
 0xa1c   : > { %v24050_v27 = vadd.f32 %v15714_v47, %v23840_v7  ;;  %v15805_v59 = vadd.f32 %v15804_v43, %v15803_v36  ;;  %v15806_v19 = vpop.f32.mrb[126].mxu0  ;;  %v18479_v43 = vld [vmem:[%s24681_s5 + $0x78] sm:$0xff]  }
 0xa1d   : > { %v15807_v56 = vpop.f32.mrb[127].mxu0  ;;  %15853 = vmatprep.subr.bf16.mxu0 %v18479_v43 }
 0xa1e   : > { %v15808_v25 = vadd.f32 %v15807_v56, %v15806_v19  ;;  %v15715_v24 = vpop.f32.mrb[8].mxu1  ;;  %v24053_v60 = vadd.f32 %v15805_v59, %v23999_v31 }
 0xa1f   : > { %v15716_v4 = vpop.f32.mrb[9].mxu1 }
 0xa20   : > { %v15717_v63 = vadd.f32 %v15716_v4, %v15715_v24  ;;  %v15718_v42 = vpop.f32.mrb[10].mxu1  ;;  %v24056_v16 = vadd.f32 %v15808_v25, %v24005_v53 }
 0xa21   : > { %v15719_v3 = vpop.f32.mrb[11].mxu1 }
 0xa22   : > { %v24059_v28 = vadd.f32 %v15717_v63, %v23853_v61  ;;  %v15720_v7 = vadd.f32 %v15719_v3, %v15718_v42  ;;  %v15809_v13 = vpop.f32.mrb[128].mxu0 }
 0xa23   : > { %v15810_v5 = vpop.f32.mrb[129].mxu0 }
 0xa24   : > { %v24065_v31 = vadd.f32 %v15720_v7, %v23862_v12  ;;  %v15811_v20 = vadd.f32 %v15810_v5, %v15809_v13  ;;  %v15812_v10 = vpop.f32.mrb[130].mxu0 }
 0xa25   : > { %v15813_v50 = vpop.f32.mrb[131].mxu0 }
 0xa26   : > { %v15814_v53 = vadd.f32 %v15813_v50, %v15812_v10  ;;  %v15721_v26 = vpop.f32.mrb[12].mxu1  ;;  %v24068_v9 = vadd.f32 %v15811_v20, %v24014_v41  ;;  %v18480_v41 = vld [vmem:[%s24681_s5 + $0x38] sm:$0xff]  }
 0xa27   : > { %v15722_v61 = vpop.f32.mrb[13].mxu1  ;;  %15854 = vmatpush3.bf16.msra.mxu0 %v18480_v41 }
 0xa28   : > { %v15723_v22 = vadd.f32 %v15722_v61, %v15721_v26  ;;  %v15724_v48 = vpop.f32.mrb[14].mxu1  ;;  %v24071_v6 = vadd.f32 %v15814_v53, %v24020_v49 }
 0xa29   : > { %v15725_v44 = vpop.f32.mrb[15].mxu1 }
 0xa2a   : > { %v24074_v18 = vadd.f32 %v15723_v22, %v23878_v62  ;;  %v15726_v12 = vadd.f32 %v15725_v44, %v15724_v48  ;;  %v15815_v47 = vpop.f32.mrb[132].mxu0 }
 0xa2b   : > { %v15816_v36 = vpop.f32.mrb[133].mxu0 }
 0xa2c   : > { %v24083_v8 = vadd.f32 %v15726_v12, %v23884_v29  ;;  %v15817_v49 = vadd.f32 %v15816_v36, %v15815_v47  ;;  %v15818_v59 = vpop.f32.mrb[134].mxu0 }
 0xa2d   : > { %v15819_v19 = vpop.f32.mrb[135].mxu0 }
 0xa2e   : > { %v15820_v62 = vadd.f32 %v15819_v19, %v15818_v59  ;;  %v11849_v56 = vpop.f32.mrb[16].mxu1  ;;  %v24086_v25 = vadd.f32 %v15817_v49, %v24029_v35 }
 0xa2f   : > { %v24089_v24 = vadd.f32 %v11849_v56, %v23900_v55  ;;  %v11851_v4 = vpop.f32.mrb[17].mxu1 }
 0xa30   : > { %v11852_v63 = vpop.f32.mrb[18].mxu1  ;;  %v24092_v42 = vadd.f32 %v15820_v62, %v24035_v1  ;;  %v18481_v1 = vld [vmem:[%s24681_s5 + $0xc0] sm:$0xff]  }
 0xa31   : > { %v11853_v29 = vadd.f32 %v11852_v63, %v23906_v14  ;;  %v11854_v3 = vpop.f32.mrb[19].mxu1  ;;  %15861 = vmatprep.subr.bf16.mxu0 %v18481_v1  ;;  %v18486_v62 = vld [vmem:[%s24681_s5 + $0x200] sm:$0xff]  }
 0xa32   : > { %v15821_v7 = vpop.f32.mrb[136].mxu0 }
 0xa33   : > { %v15822_v13 = vpop.f32.mrb[137].mxu0  ;;  %v12009_v61 = vmul.f32 0.2, %v11853_v29  ;;  %vm11977_vm5 = vcmp.ge.f32.partialorder %v11853_v29, 0.0 }
 0xa34   : > { %v15823_v5 = vadd.f32 %v15822_v13, %v15821_v7  ;;  %v15824_v33 = vpop.f32.mrb[138].mxu0 }
 0xa35   : > { %v15825_v20 = vpop.f32.mrb[139].mxu0  ;;  %v12041_v43 = vsel %vm11977_vm5, %v11853_v29, %v12009_v61 }
 0xa36   : > { %v15826_v10 = vadd.f32 %v15825_v20, %v15824_v33  ;;  %v11857_v35 = vpop.f32.mrb[20].mxu1  ;;  %v24096_v50 = vadd.f32 %v15823_v5, %v24044_v45 }
 0xa37   : > { %v24099_v55 = vadd.f32 %v11857_v35, %v23918_v34  ;;  %v11859_v53 = vpop.f32.mrb[21].mxu1 }
 0xa38   : > { %v11860_v14 = vpop.f32.mrb[22].mxu1  ;;  %v24105_v26 = vadd.f32 %v15826_v10, %v24050_v27 }
 0xa39   : > { %v11861_v22 = vadd.f32 %v11860_v14, %v23921_v21  ;;  %v11862_v48 = vpop.f32.mrb[23].mxu1  ;;  %v18485_v21 = vld [vmem:[%s24681_s5 + $0x240] sm:$0xff]  }
 0xa3a   : > { %v15827_v45 = vpop.f32.mrb[140].mxu0  ;;  %15927 = vmatprep.subr.bf16.mxu1 %v18485_v21 }
 0xa3b   : > { %vm11979_vm6 = vcmp.ge.f32.partialorder %v11861_v22, 0.0  ;;  %v12011_v44 = vmul.f32 0.2, %v11861_v22  ;;  %v15828_v34 = vpop.f32.mrb[141].mxu0  ;;  %15928 = vmatpush3.bf16.msra.mxu1 %v18486_v62 }
 0xa3c   : > { %v15829_v12 = vadd.f32 %v15828_v34, %v15827_v45  ;;  %v15830_v47 = vpop.f32.mrb[142].mxu0 }
 0xa3d   : > { %v15831_v36 = vpop.f32.mrb[143].mxu0  ;;  %v12043_v41 = vsel %vm11979_vm6, %v11861_v22, %v12011_v44  ;;  %vm11976_vm6 = vcmp.ge.f32.partialorder %v24089_v24, 0.0 }
 0xa3e   : > { %v15832_v49 = vadd.f32 %v15831_v36, %v15830_v47  ;;  %v11865_v59 = vpop.f32.mrb[24].mxu1  ;;  %v16337_v19 = vpack.i.bf16 %v12041_v43, %v12043_v41  ;;  %v24109_v27 = vadd.f32 %v15829_v12, %v24059_v28 }
 0xa3f   : > { %v24118_v56 = vadd.f32 %v11865_v59, %v23933_v30  ;;  %v11867_v4 = vpop.f32.mrb[25].mxu1 }
 0xa40   : > { %v11868_v63 = vpop.f32.mrb[26].mxu1  ;;  %16338 = vrot.lane.b32.xlu0 %v16337_v19, %s18675_s29  ;;  %v24122_v29 = vadd.f32 %v15832_v49, %v24065_v31 }
 0xa41   : > { %v11869_v28 = vadd.f32 %v11868_v63, %v23936_v0  ;;  %v11870_v3 = vpop.f32.mrb[27].mxu1 }
 0xa42   : > { %v15833_v7 = vpop.f32.mrb[144].mxu0 }
 0xa43   : > { %v15834_v13 = vpop.f32.mrb[145].mxu0  ;;  %v12013_v0 = vmul.f32 0.2, %v11869_v28  ;;  %vm11981_vm7 = vcmp.ge.f32.partialorder %v11869_v28, 0.0 }
 0xa44   : > { %v15835_v5 = vadd.f32 %v15834_v13, %v15833_v7  ;;  %v15836_v33 = vpop.f32.mrb[146].mxu0 }
 0xa45   : > { %v15837_v20 = vpop.f32.mrb[147].mxu0  ;;  %v12045_v45 = vsel %vm11981_vm7, %v11869_v28, %v12013_v0  ;;  %vm11978_vm7 = vcmp.ge.f32.partialorder %v24099_v55, 0.0 }
 0xa46   : > { %v15838_v10 = vadd.f32 %v15837_v20, %v15836_v33  ;;  %v11873_v30 = vpop.f32.mrb[28].mxu1  ;;  %v24126_v35 = vadd.f32 %v15835_v5, %v24074_v18 }
 0xa47   : > { %v24129_v53 = vadd.f32 %v11873_v30, %v23948_v58  ;;  %v11875_v31 = vpop.f32.mrb[29].mxu1  ;;  %v18495_v58 = vld [vmem:[%s24681_s5 + $0x248] sm:$0xff]  }
 0xa48   : > { %v11876_v1 = vpop.f32.mrb[30].mxu1  ;;  %v24132_v14 = vadd.f32 %v15838_v10, %v24083_v8  ;;  %v18496_v8 = vld [vmem:[%s24681_s5 + $0x208] sm:$0xff]   ;;  %15929 = vmatprep.subr.bf16.mxu1 %v18495_v58 }
 0xa49   : > { %v11877_v61 = vadd.f32 %v11876_v1, %v23951_v11  ;;  %v11878_v22 = vpop.f32.mrb[31].mxu1  ;;  %15930 = vmatpush3.bf16.msra.mxu1 %v18496_v8 }
 0xa4b   : > { %vm11983_vm8 = vcmp.ge.f32.partialorder %v11877_v61, 0.0  ;;  %v12015_v48 = vmul.f32 0.2, %v11877_v61 }
 0xa4d   : > { %v12047_v44 = vsel %vm11983_vm8, %v11877_v61, %v12015_v48  ;;  %vm12104_vm8 = vcmask 523264  }
 0xa4e   : > { %v11881_v34 = vpop.f32.mrb[32].mxu1  ;;  %v16342_v18 = vpack.i.bf16 %v12045_v45, %v12047_v44 }
 0xa4f   : > { %v24142_v12 = vadd.f32 %v11881_v34, %v23963_v39  ;;  %v11883_v11 = vpop.f32.mrb[33].mxu1 }
 0xa50   : > { %v11884_v47 = vpop.f32.mrb[34].mxu1  ;;  %16343 = vrot.lane.b32.xlu1 %v16342_v18, %s18675_s29 }
 0xa51   : > { %v11885_v36 = vadd.f32 %v11884_v47, %v23966_v38  ;;  %v11886_v43 = vpop.f32.mrb[35].mxu1  ;;  %v18505_v38 = vld [vmem:[%s24681_s5 + $0x250] sm:$0xff]  }
 0xa52   : > { %15931 = vmatprep.subr.bf16.mxu1 %v18505_v38  ;;  %v18532_v38 = vld [vmem:[%s24681_s5 + $0x230] sm:$0xff]  }
 0xa53   : > { %v12017_v21 = vmul.f32 0.2, %v11885_v36  ;;  %vm11985_vm9 = vcmp.ge.f32.partialorder %v11885_v36, 0.0 }
 0xa55   : > { %v12049_v63 = vsel %vm11985_vm9, %v11885_v36, %v12017_v21  ;;  %v18524_v21 = vld [vmem:[%s24681_s5 + $0x220] sm:$0xff]   ;;  %vm11982_vm9 = vcmp.ge.f32.partialorder %v24129_v53, 0.0 }
 0xa56   : > { %v11889_v41 = vpop.f32.mrb[36].mxu1 }
 0xa57   : > { %v24147_v49 = vadd.f32 %v11889_v41, %v23978_v23  ;;  %v11891_v59 = vpop.f32.mrb[37].mxu1  ;;  %v18506_v23 = vld [vmem:[%s24681_s5 + $0x210] sm:$0xff]  }
 0xa58   : > { %v11892_v19 = vpop.f32.mrb[38].mxu1  ;;  %15932 = vmatpush3.bf16.msra.mxu1 %v18506_v23  ;;  %v18535_v23 = vld [vmem:[%s24681_s5 + $0x278] sm:$0xff]  }
 0xa59   : > { %v11893_v62 = vadd.f32 %v11892_v19, %v23981_v32  ;;  %v11894_v39 = vpop.f32.mrb[39].mxu1 }
 0xa5b   : > { %vm11987_vm10 = vcmp.ge.f32.partialorder %v11893_v62, 0.0  ;;  %v12019_v4 = vmul.f32 0.2, %v11893_v62 }
 0xa5d   : > { %v12051_v28 = vsel %vm11987_vm10, %v11893_v62, %v12019_v4  ;;  %vm11980_vm10 = vcmp.ge.f32.partialorder %v24118_v56, 0.0 }
 0xa5e   : > { %v11897_v3 = vpop.f32.mrb[40].mxu1  ;;  %v16347_v7 = vpack.i.bf16 %v12049_v63, %v12051_v28  ;;  %v18531_v63 = vld [vmem:[%s24681_s5 + $0x270] sm:$0xff]  }
 0xa5f   : > { %v24157_v13 = vadd.f32 %v11897_v3, %v23993_v51  ;;  %v11899_v32 = vpop.f32.mrb[41].mxu1 }
 0xa60   : > { %v11900_v5 = vpop.f32.mrb[42].mxu1  ;;  %16348 = vrot.lane.b32.xlu0 %v16347_v7, %s18675_s29 }
 0xa61   : > { %v11901_v33 = vadd.f32 %v11900_v5, %v23996_v37  ;;  %v11902_v20 = vpop.f32.mrb[43].mxu1  ;;  %v18515_v37 = vld [vmem:[%s24681_s5 + $0x258] sm:$0xff]  }
 0xa62   : > { %15933 = vmatprep.subr.bf16.mxu1 %v18515_v37 }
 0xa63   : > { %v12021_v0 = vmul.f32 0.2, %v11901_v33  ;;  %vm11989_vm11 = vcmp.ge.f32.partialorder %v11901_v33, 0.0 }
 0xa65   : > { %v12053_v48 = vsel %vm11989_vm11, %v11901_v33, %v12021_v0  ;;  %v18539_v0 = vld [vmem:[%s24681_s5 + $0x340] sm:$0xff]   ;;  %vm11986_vm11 = vcmp.ge.f32.partialorder %v24147_v49, 0.0 }
 0xa66   : > { %v11905_v10 = vpop.f32.mrb[44].mxu1 }
 0xa67   : > { %v24162_v30 = vadd.f32 %v11905_v10, %v24008_v15  ;;  %v11907_v31 = vpop.f32.mrb[45].mxu1  ;;  %v18516_v15 = vld [vmem:[%s24681_s5 + $0x218] sm:$0xff]  }
 0xa68   : > { %v11908_v1 = vpop.f32.mrb[46].mxu1  ;;  %15934 = vmatpush3.bf16.msra.mxu1 %v18516_v15 }
 0xa69   : > { %v11909_v61 = vadd.f32 %v11908_v1, %v24011_v2  ;;  %v11910_v51 = vpop.f32.mrb[47].mxu1 }
 0xa6b   : > { %vm11991_vm12 = vcmp.ge.f32.partialorder %v11909_v61, 0.0  ;;  %v12023_v22 = vmul.f32 0.2, %v11909_v61 }
 0xa6d   : > { %v12055_v45 = vsel %vm11991_vm12, %v11909_v61, %v12023_v22  ;;  %vm11984_vm12 = vcmp.ge.f32.partialorder %v24142_v12, 0.0 }
 0xa6e   : > { %v11913_v44 = vpop.f32.mrb[48].mxu1  ;;  %v16352_v34 = vpack.i.bf16 %v12053_v48, %v12055_v45 }
 0xa6f   : > { %v24172_v18 = vadd.f32 %v11913_v44, %v24023_v17  ;;  %v11915_v2 = vpop.f32.mrb[49].mxu1  ;;  %v18523_v17 = vld [vmem:[%s24681_s5 + $0x260] sm:$0xff]  }
 0xa70   : > { %v11916_v58 = vpop.f32.mrb[50].mxu1  ;;  %16353 = vrot.lane.b32.xlu1 %v16352_v34, %s18675_s29  ;;  %15935 = vmatprep.subr.bf16.mxu1 %v18523_v17 }
 0xa71   : > { %v11917_v8 = vadd.f32 %v11916_v58, %v24026_v46  ;;  %v11918_v11 = vpop.f32.mrb[51].mxu1  ;;  %15936 = vmatpush3.bf16.msra.mxu1 %v18524_v21  ;;  %v18527_v46 = vld [vmem:[%s24681_s5 + $0x268] sm:$0xff]  }
 0xa72   : > { %15937 = vmatprep.subr.bf16.mxu1 %v18527_v46 }
 0xa73   : > { %v12025_v28 = vmul.f32 0.2, %v11917_v8  ;;  %vm11993_vm13 = vcmp.ge.f32.partialorder %v11917_v8, 0.0 }
 0xa75   : > { %v12057_v32 = vsel %vm11993_vm13, %v11917_v8, %v12025_v28  ;;  %vm11990_vm13 = vcmp.ge.f32.partialorder %v24162_v30, 0.0 }
 0xa76   : > { %v11921_v47 = vpop.f32.mrb[52].mxu1 }
 0xa77   : > { %v24177_v36 = vadd.f32 %v11921_v47, %v24038_v52  ;;  %v11923_v43 = vpop.f32.mrb[53].mxu1  ;;  %v18528_v52 = vld [vmem:[%s24681_s5 + $0x228] sm:$0xff]  }
 0xa78   : > { %v11924_v41 = vpop.f32.mrb[54].mxu1  ;;  %15938 = vmatpush3.bf16.msra.mxu1 %v18528_v52 }
 0xa79   : > { %v11925_v59 = vadd.f32 %v11924_v41, %v24041_v57  ;;  %v11926_v19 = vpop.f32.mrb[55].mxu1  ;;  %15939 = vmatprep.subr.bf16.mxu1 %v18531_v63 }
 0xa7b   : > { %v12027_v61 = vmul.f32 0.2, %v11925_v59  ;;  %vm11995_vm15 = vcmp.ge.f32.partialorder %v11925_v59, 0.0 }
 0xa7c   : > { %15940 = vmatpush3.bf16.msra.mxu1 %v18532_v38 }
 0xa7d   : > { %15941 = vmatprep.subr.bf16.mxu1 %v18535_v23  ;;  %v12059_v45 = vsel %vm11995_vm15, %v11925_v59, %v12027_v61  ;;  %vm11994_vm15 = vcmp.ge.f32.partialorder %v24177_v36, 0.0 }
 0xa7e   : > { %v11929_v62 = vpop.f32.mrb[56].mxu1 }
 0xa7f   : > { %v24193_v39 = vadd.f32 %v11929_v62, %v24053_v60  ;;  %v11931_v57 = vpop.f32.mrb[57].mxu1 }
 0xa80   : > { %v11932_v4 = vpop.f32.mrb[58].mxu1 }
 0xa81   : > { %v11933_v3 = vadd.f32 %v11932_v4, %v24056_v16  ;;  %v11934_v7 = vpop.f32.mrb[59].mxu1  ;;  %v18536_v16 = vld [vmem:[%s24681_s5 + $0x238] sm:$0xff]  }
 0xa82   : > { %15942 = vmatpush3.bf16.msra.mxu1 %v18536_v16  ;;  %v12010_v16 = vmul.f32 0.2, %v24099_v55 }
 0xa83   : > { %vm11997_vm14 = vcmp.ge.f32.partialorder %v11933_v3, 0.0  ;;  %v12029_v60 = vmul.f32 0.2, %v11933_v3  ;;  %15971 = vmatprep.subr.bf16.mxu1 %v18539_v0 }
 0xa85   : > { %v12061_v5 = vsel %vm11997_vm14, %v11933_v3, %v12029_v60  ;;  %vm11992_vm14 = vcmp.ge.f32.partialorder %v24172_v18, 0.0 }
 0xa86   : > { %v11937_v33 = vpop.f32.mrb[60].mxu1  ;;  %v16362_v20 = vpack.i.bf16 %v12057_v32, %v12061_v5  ;;  %v12008_v5 = vmul.f32 0.2, %v24089_v24 }
 0xa87   : > { %v24209_v10 = vadd.f32 %v11937_v33, %v24068_v9  ;;  %v11939_v31 = vpop.f32.mrb[61].mxu1 }
 0xa88   : > { %v11940_v1 = vpop.f32.mrb[62].mxu1  ;;  %16363 = vrot.lane.b32.xlu1 %v16362_v20, %s18675_s29  ;;  %v12040_v20 = vsel %vm11976_vm6, %v24089_v24, %v12008_v5  ;;  %v12042_v31 = vsel %vm11978_vm7, %v24099_v55, %v12010_v16  ;;  %v18484_v24 = vld [vmem:[%s24681_s5 + $0x88] sm:$0xff]   ;;  %v18487_v55 = vld [vmem:[%s24681_s5 + $0xd0] sm:$0xff]   ;;  %v18511_v5 = vld [vmem:[%s24681_s5 + $0x160] sm:$0xff]  }
 0xa89   : > { %v11941_v51 = vadd.f32 %v11940_v1, %v24071_v6  ;;  %v11942_v22 = vpop.f32.mrb[63].mxu1  ;;  %v18512_v16 = vld [vmem:[%s24681_s5 + $0x120] sm:$0xff]  }
 0xa8a   : > { %v18482_v22 = vld [vmem:[%s24681_s5 + $0x80] sm:$0xff]  }
 0xa8b   : > { %vm11999_vm0 = vcmp.ge.f32.partialorder %v11941_v51, 0.0  ;;  %v12031_v48 = vmul.f32 0.2, %v11941_v51 }
 0xa8d   : > { %v12063_v9 = vsel %vm11999_vm0, %v11941_v51, %v12031_v48  ;;  %v18483_v48 = vld [vmem:[%s24681_s5 + $0xc8] sm:$0xff]   ;;  %vm11988_vm0 = vcmp.ge.f32.partialorder %v24157_v13, 0.0 }
 0xa8e   : > { %v11945_v44 = vpop.f32.mrb[64].mxu1  ;;  %v16357_v34 = vpack.i.bf16 %v12059_v45, %v12063_v9  ;;  %v18488_v45 = vld [vmem:[%s24681_s5 + $0x90] sm:$0xff]   ;;  %v18489_v9 = vld [vmem:[%s24681_s5 + $0xd8] sm:$0xff]  }
 0xa8f   : > { %v24217_v37 = vadd.f32 %v11945_v44, %v24086_v25  ;;  %v11947_v15 = vpop.f32.mrb[65].mxu1  ;;  %v12014_v44 = vmul.f32 0.2, %v24129_v53 }
 0xa90   : > { %v11948_v2 = vpop.f32.mrb[66].mxu1  ;;  %16358 = vrot.lane.b32.xlu0 %v16357_v34, %s18675_s29  ;;  %v18490_v15 = vld [vmem:[%s24681_s5 + $0x98] sm:$0xff]  }
 0xa91   : > { %v11949_v58 = vadd.f32 %v11948_v2, %v24092_v42  ;;  %v11950_v8 = vpop.f32.mrb[67].mxu1 }
 0xa92   : > { %v12046_v8 = vsel %vm11982_vm9, %v24129_v53, %v12014_v44  ;;  %v18497_v53 = vld [vmem:[%s24681_s5 + $0xf0] sm:$0xff]   ;;  %vm18677_vm9 = vmmov 0  }
 0xa93   : > { %v12033_v46 = vmul.f32 0.2, %v11949_v58  ;;  %vm12001_vm1 = vcmp.ge.f32.partialorder %v11949_v58, 0.0 }
 0xa96   : > { %v11953_v6 = vpop.f32.mrb[68].mxu1 }
 0xa97   : > { %v24222_v11 = vadd.f32 %v11953_v6, %v24096_v50  ;;  %v11955_v47 = vpop.f32.mrb[69].mxu1  ;;  %v12065_v50 = vsel %vm12001_vm1, %v11949_v58, %v12033_v46  ;;  %v18491_v58 = vld [vmem:[%s24681_s5 + $0xe0] sm:$0xff]   ;;  %v12018_v46 = vmul.f32 0.2, %v24147_v49  ;;  %vm11998_vm1 = vcmp.ge.f32.partialorder %v24209_v10, 0.0 }
 0xa98   : > { %v11956_v43 = vpop.f32.mrb[70].mxu1 }
 0xa99   : > { %v11957_v41 = vadd.f32 %v11956_v43, %v24105_v26  ;;  %v11958_v17 = vpop.f32.mrb[71].mxu1  ;;  %v18492_v43 = vld [vmem:[%s24681_s5 + $0xa0] sm:$0xff]  }
 0xa9a   : > { %v18494_v17 = vld [vmem:[%s24681_s5 + $0xa8] sm:$0xff]  }
 0xa9b   : > { %vm12003_vm3 = vcmp.ge.f32.partialorder %v11957_v41, 0.0 }
 0xa9e   : > { %v11961_v59 = vpop.f32.mrb[72].mxu1 }
 0xa9f   : > { %v24226_v25 = vadd.f32 %v11961_v59, %v24109_v27  ;;  %v11963_v19 = vpop.f32.mrb[73].mxu1  ;;  %v12035_v27 = vmul.f32 0.2, %v11957_v41  ;;  %v18498_v59 = vld [vmem:[%s24681_s5 + $0xb0] sm:$0xff]  }
 0xaa0   : > { %v11964_v21 = vpop.f32.mrb[74].mxu1  ;;  %v12012_v19 = vmul.f32 0.2, %v24118_v56 }
 0xaa1   : > { %v11965_v52 = vadd.f32 %v11964_v21, %v24122_v29  ;;  %v11966_v42 = vpop.f32.mrb[75].mxu1  ;;  %v12067_v60 = vsel %vm12003_vm3, %v11957_v41, %v12035_v27  ;;  %v18493_v41 = vld [vmem:[%s24681_s5 + $0xe8] sm:$0xff]   ;;  %v18499_v21 = vld [vmem:[%s24681_s5 + $0xf8] sm:$0xff]   ;;  %v18502_v27 = vld [vmem:[%s24681_s5 + $0x100] sm:$0xff]   ;;  %vm12002_vm3 = vcmp.ge.f32.partialorder %v24222_v11, 0.0  ;;  %vm12004_vm7 = vcmp.ge.f32.partialorder %v24226_v25, 0.0 }
 0xaa3   : > { %vm12005_vm2 = vcmp.ge.f32.partialorder %v11965_v52, 0.0  ;;  %v12037_v62 = vmul.f32 0.2, %v11965_v52 }
 0xaa5   : > { %v12069_v57 = vsel %vm12005_vm2, %v11965_v52, %v12037_v62  ;;  %v18500_v62 = vld [vmem:[%s24681_s5 + $0xb8] sm:$0xff]   ;;  %vm12000_vm2 = vcmp.ge.f32.partialorder %v24217_v37, 0.0 }
 0xaa6   : > { %v11969_v4 = vpop.f32.mrb[76].mxu1  ;;  %v16372_v63 = vpack.i.bf16 %v12065_v50, %v12069_v57  ;;  %v12044_v50 = vsel %vm11980_vm10, %v24118_v56, %v12012_v19  ;;  %v18503_v56 = vld [vmem:[%s24681_s5 + $0x148] sm:$0xff]   ;;  %vm13621_vm10 = vcmask 531456  }
 0xaa7   : > { %v24230_v26 = vadd.f32 %v11969_v4, %v24126_v35  ;;  %v11971_v28 = vpop.f32.mrb[77].mxu1  ;;  %v18501_v4 = vld [vmem:[%s24681_s5 + $0x140] sm:$0xff]  }
 0xaa8   : > { %v11972_v3 = vpop.f32.mrb[78].mxu1  ;;  %16373 = vrot.lane.b32.xlu1 %v16372_v63, %s18675_s29  ;;  %v12050_v63 = vsel %vm11986_vm11, %v24147_v49, %v12018_v46  ;;  %v18504_v49 = vld [vmem:[%s24681_s5 + $0x108] sm:$0xff]   ;;  %v18537_v46 = vld [vmem:[%s24681_s5 + $0x1e0] sm:$0xff]  }
 0xaa9   : > { %v11973_v7 = vadd.f32 %v11972_v3, %v24132_v14  ;;  %v11974_v38 = vpop.f32.mrb[79].mxu1  ;;  %vm12006_vm6 = vcmp.ge.f32.partialorder %v24230_v26, 0.0 }
 0xaab   : > { %vm12007_vm5 = vcmp.ge.f32.partialorder %v11973_v7, 0.0  ;;  %v12039_v29 = vmul.f32 0.2, %v11973_v7 }
 0xaad   : > { %v12071_v23 = vsel %vm12007_vm5, %v11973_v7, %v12039_v29  ;;  %v18507_v29 = vld [vmem:[%s24681_s5 + $0x150] sm:$0xff]   ;;  %vm11996_vm5 = vcmp.ge.f32.partialorder %v24193_v39, 0.0 }
 0xaae   : > { %v16367_v32 = vpack.i.bf16 %v12067_v60, %v12071_v23  ;;  %v18508_v60 = vld [vmem:[%s24681_s5 + $0x110] sm:$0xff]   ;;  %v18509_v23 = vld [vmem:[%s24681_s5 + $0x158] sm:$0xff]  }
 0xab0   : > { %16368 = vrot.lane.b32.xlu0 %v16367_v32, %s18675_s29  ;;  %v18510_v32 = vld [vmem:[%s24681_s5 + $0x118] sm:$0xff]   ;;  %s13689_s29 = sshll.u32 %s271_s23, 4  ;;  %s24631_s29 = int_to_ptr.vmem [resolvable:$true] %s13689_s29 }
 0xab1   : > { %s18608_s15 = scalar_lea.vmem %s24631_s29, 256  ;;  %p18615_p0 = scmp.lt.s32.totalorder %s24631_s29, %s18613_s16 }
 0xab2   : > { %v16339_v35 = vpop.permute.xlu0 %16338  ;;  %p18609_p11 = scmp.ne.s32.totalorder %s24631_s29, %s18608_s15  ;;  %p18616_p1 = scmp.lt.s32.totalorder %s18614_s18, %s18608_s15 }
 0xab3   : > { %v16341_v14 = vunpack.i.h.bf16 %v16339_v35  ;;  %v16340_v33 = vunpack.i.l.bf16 %v16339_v35  ;;  %v18513_v35 = vld [vmem:[%s24681_s5 + $0x168] sm:$0xff]  }
 0xab4   : > { %p18610_p12 = pnand %p18609_p11, %p18758_p5  ;;  %p18617_p2 = por %p18616_p1, %p18615_p0 }
 0xab5   : > { %v12105_v1 = vsel %vm12104_vm8, %v12040_v20, %v16341_v14  ;;  %v12106_v0 = vsel %vm12104_vm8, %v12042_v31, %v16340_v33  ;;  %v18514_v14 = vld [vmem:[%s24681_s5 + $0x128] sm:$0xff]   ;;  %v18517_v33 = vld [vmem:[%s24681_s5 + $0x170] sm:$0xff]  }
 0xab6   : > { %v12153_v61 = vpack.c.bf16 %v12105_v1, %v12105_v1  ;;  %v12154_v51 = vpack.c.bf16 %v12106_v0, %v12106_v0  ;;  %v18518_v31 = vld [vmem:[%s24681_s5 + $0x130] sm:$0xff]   ;;  %v12016_v1 = vmul.f32 0.2, %v24142_v12  ;;  %v18519_v0 = vld [vmem:[%s24681_s5 + $0x178] sm:$0xff]   ;;  %p18611_p13 = pneg %p18610_p12 }
 0xab8   : > { %13234 = vmatprep.mubr.bf16.mxu0 %v12154_v51  ;;  %p18618_p3 = pnand %p18617_p2, %p18611_p13 }
 0xab9   : > { %13235 = vmatmul.mubr.bf16.vlgmr.msra.gmra.mrb[148].mxu0 %v12153_v61  ;;  %v12022_v61 = vmul.f32 0.2, %v24162_v30 }
 0xaba   : > { %15862 = vmatpush3.bf16.msra.mxu0 %v18482_v22 }
 0xabb   : > { %15863 = vmatprep.subr.bf16.mxu0 %v18483_v48  ;;  %v18520_v48 = vld [vmem:[%s24681_s5 + $0x138] sm:$0xff]  }
 0xabe   : > { %15864 = vmatpush3.bf16.msra.mxu0 %v18484_v24  ;;  %v12048_v24 = vsel %vm11984_vm12, %v24142_v12, %v12016_v1  ;;  %v18525_v12 = vld [vmem:[%s24681_s5 + $0x1c8] sm:$0xff]  }
 0xabf   : > { %15865 = vmatprep.subr.bf16.mxu0 %v18487_v55  ;;  %v18521_v55 = vld [vmem:[%s24681_s5 + $0x1c0] sm:$0xff]  }
 0xac2   : > { %15866 = vmatpush3.bf16.msra.mxu0 %v18488_v45  ;;  %v16344_v34 = vpop.permute.xlu1 %16343  ;;  %v12054_v45 = vsel %vm11990_vm13, %v24162_v30, %v12022_v61  ;;  %v18526_v30 = vld [vmem:[%s24681_s5 + $0x188] sm:$0xff]  }
 0xac3   : > { %v16345_v2 = vunpack.i.l.bf16 %v16344_v34  ;;  %15867 = vmatprep.subr.bf16.mxu0 %v18489_v9  ;;  %v16346_v52 = vunpack.i.h.bf16 %v16344_v34  ;;  %v18522_v34 = vld [vmem:[%s24681_s5 + $0x180] sm:$0xff]  }
 0xac5   : > { %v12108_v6 = vsel %vm12104_vm8, %v12046_v8, %v16345_v2  ;;  %v12107_v28 = vsel %vm12104_vm8, %v12044_v50, %v16346_v52 }
 0xac6   : > { %15868 = vmatpush3.bf16.msra.mxu0 %v18490_v15  ;;  %v12156_v47 = vpack.c.bf16 %v12108_v6, %v12108_v6  ;;  %v12155_v38 = vpack.c.bf16 %v12107_v28, %v12107_v28  ;;  %v18530_v6 = vld [vmem:[%s24681_s5 + $0x190] sm:$0xff]   ;;  %v18542_v28 = vld [vmem:[%s24681_s5 + $0x1a8] sm:$0xff]  }
 0xac7   : > { %15869 = vmatprep.subr.bf16.mxu0 %v18491_v58  ;;  %v18529_v58 = vld [vmem:[%s24681_s5 + $0x1d0] sm:$0xff]  }
 0xac8   : > { %13274 = vmatprep.mubr.bf16.mxu0 %v12156_v47  ;;  %v12024_v47 = vmul.f32 0.2, %v24172_v18 }
 0xaca   : > { %15870 = vmatpush3.bf16.msra.mxu0 %v18492_v43  ;;  %v18533_v43 = vld [vmem:[%s24681_s5 + $0x1d8] sm:$0xff]   ;;  %v12056_v19 = vsel %vm11992_vm14, %v24172_v18, %v12024_v47  ;;  %v18540_v18 = vld [vmem:[%s24681_s5 + $0x300] sm:$0xff]  }
 0xacb   : > { %15871 = vmatprep.subr.bf16.mxu0 %v18493_v41  ;;  %v12026_v41 = vmul.f32 0.2, %v24177_v36 }
 0xacd   : > { %v12058_v52 = vsel %vm11994_vm15, %v24177_v36, %v12026_v41  ;;  %v18541_v36 = vld [vmem:[%s24681_s5 + $0x1e8] sm:$0xff]  }
 0xace   : > { %15872 = vmatpush3.bf16.msra.mxu0 %v18494_v17 }
 0xacf   : > { %15873 = vmatprep.subr.bf16.mxu0 %v18497_v53 }
 0xad2   : > { %15874 = vmatpush3.bf16.msra.mxu0 %v18498_v59  ;;  %v16349_v42 = vpop.permute.xlu0 %16348  ;;  %v18534_v59 = vld [vmem:[%s24681_s5 + $0x198] sm:$0xff]  }
 0xad3   : > { %v16350_v57 = vunpack.i.l.bf16 %v16349_v42  ;;  %15875 = vmatprep.subr.bf16.mxu0 %v18499_v21  ;;  %v16351_v51 = vunpack.i.h.bf16 %v16349_v42 }
 0xad5   : > { %v12110_v3 = vsel %vm12104_vm8, %v12050_v63, %v16350_v57  ;;  %v12109_v9 = vsel %vm12104_vm8, %v12048_v24, %v16351_v51  ;;  %v18538_v57 = vld [vmem:[%s24681_s5 + $0x1a0] sm:$0xff]   ;;  %v18543_v63 = vld [vmem:[%s24681_s5 + $0x348] sm:$0xff]  }
 0xad6   : > { %15876 = vmatpush3.bf16.msra.mxu0 %v18500_v62  ;;  %v12158_v7 = vpack.c.bf16 %v12110_v3, %v12110_v3  ;;  %v12157_v15 = vpack.c.bf16 %v12109_v9, %v12109_v9  ;;  %v18544_v3 = vld [vmem:[%s24681_s5 + $0x308] sm:$0xff]   ;;  %v18556_v51 = vld [vmem:[%s24681_s5 + $0x320] sm:$0xff]   ;;  %v18563_v9 = vld [vmem:[%s24681_s5 + $0x370] sm:$0xff]  }
 0xad7   : > { %15883 = vmatprep.subr.bf16.mxu0 %v18501_v4  ;;  %v18558_v24 = vld [vmem:[%s24681_s5 + $0x288] sm:$0xff]  }
 0xad9   : > { %13275 = vmatmul.mubr.bf16.vlgmr.msra.gmra.mrb[152].mxu0 %v12155_v38  ;;  %v18546_v38 = vld [vmem:[%s24681_s5 + $0x1b0] sm:$0xff]  }
 0xada   : > { %15884 = vmatpush3.bf16.msra.mxu0 %v18502_v27  ;;  %13314 = vmatprep.mubr.bf16.mxu0 %v12158_v7  ;;  %v18545_v27 = vld [vmem:[%s24681_s5 + $0x1f0] sm:$0xff]  }
 0xadb   : > { %15885 = vmatprep.subr.bf16.mxu0 %v18503_v56  ;;  %v18547_v7 = vld [vmem:[%s24681_s5 + $0x350] sm:$0xff]  }
 0xadc   : > { %v18548_v56 = vld [vmem:[%s24681_s5 + $0x310] sm:$0xff]  }
 0xade   : > { %15886 = vmatpush3.bf16.msra.mxu0 %v18504_v49  ;;  %v12020_v49 = vmul.f32 0.2, %v24157_v13 }
 0xadf   : > { %15887 = vmatprep.subr.bf16.mxu0 %v18507_v29  ;;  %v18549_v29 = vld [vmem:[%s24681_s5 + $0x1f8] sm:$0xff]  }
 0xae2   : > { %15888 = vmatpush3.bf16.msra.mxu0 %v18508_v60  ;;  %v24339_v20 = vpop.permute.xlu1 %16353  ;;  %v18551_v60 = vld [vmem:[%s24681_s5 + $0x358] sm:$0xff]  }
 0xae3   : > { %15889 = vmatprep.subr.bf16.mxu0 %v18509_v23  ;;  %v16355_v22 = vunpack.i.l.bf16 %v24339_v20  ;;  %v12030_v23 = vmul.f32 0.2, %v24209_v10 }
 0xae5   : > { %v12112_v44 = vsel %vm12104_vm8, %v12054_v45, %v16355_v22  ;;  %v18561_v45 = vld [vmem:[%s24681_s5 + $0x2d0] sm:$0xff]  }
 0xae6   : > { %15890 = vmatpush3.bf16.msra.mxu0 %v18510_v32  ;;  %v12160_v2 = vpack.c.bf16 %v12112_v44, %v12112_v44  ;;  %v16356_v32 = vunpack.i.h.bf16 %v24339_v20  ;;  %v18555_v20 = vld [vmem:[%s24681_s5 + $0x360] sm:$0xff]  }
 0xae7   : > { %15891 = vmatprep.subr.bf16.mxu0 %v18511_v5 }
 0xaea   : > { %15892 = vmatpush3.bf16.msra.mxu0 %v18512_v16  ;;  %v18550_v16 = vld [vmem:[%s24681_s5 + $0x1b8] sm:$0xff]  }
 0xaeb   : > { %15893 = vmatprep.subr.bf16.mxu0 %v18513_v35  ;;  %v18552_v35 = vld [vmem:[%s24681_s5 + $0x318] sm:$0xff]  }
 0xaee   : > { %15894 = vmatpush3.bf16.msra.mxu0 %v18514_v14  ;;  %v12052_v14 = vsel %vm11988_vm0, %v24157_v13, %v12020_v49  ;;  %v18554_v13 = vld [vmem:[%s24681_s5 + $0x280] sm:$0xff]  }
 0xaef   : > { %15895 = vmatprep.subr.bf16.mxu0 %v18517_v33  ;;  %v18553_v33 = vld [vmem:[%s24681_s5 + $0x2c0] sm:$0xff]   ;;  %v12111_v1 = vsel %vm12104_vm8, %v12052_v14, %v16356_v32  ;;  %v18583_v32 = vld [vmem:[%s24681_s5 + $0x3d8] sm:$0xff]   ;;  %v18587_v14 = vld [vmem:[%s24681_s5 + $0x3e8] sm:$0xff]  }
 0xaf0   : > { %v12159_v61 = vpack.c.bf16 %v12111_v1, %v12111_v1  ;;  %v12036_v1 = vmul.f32 0.2, %v24226_v25 }
 0xaf2   : > { %15896 = vmatpush3.bf16.msra.mxu0 %v18518_v31  ;;  %v12062_v31 = vsel %vm11998_vm1, %v24209_v10, %v12030_v23  ;;  %v18557_v10 = vld [vmem:[%s24681_s5 + $0x2c8] sm:$0xff]   ;;  %v18582_v23 = vld [vmem:[%s24681_s5 + $0x390] sm:$0xff]  }
 0xaf3   : > { %15897 = vmatprep.subr.bf16.mxu0 %v18519_v0 }
 0xaf6   : > { %15898 = vmatpush3.bf16.msra.mxu0 %v18520_v48  ;;  %v18559_v48 = vld [vmem:[%s24681_s5 + $0x368] sm:$0xff]  }
 0xaf7   : > { %15905 = vmatprep.subr.bf16.mxu0 %v18521_v55  ;;  %v18560_v55 = vld [vmem:[%s24681_s5 + $0x328] sm:$0xff]  }
 0xaf9   : > { %13315 = vmatmul.mubr.bf16.vlgmr.msra.gmra.mrb[156].mxu0 %v12157_v15  ;;  %v18564_v15 = vld [vmem:[%s24681_s5 + $0x330] sm:$0xff]  }
 0xafa   : > { %15906 = vmatpush3.bf16.msra.mxu0 %v18522_v34  ;;  %13354 = vmatprep.mubr.bf16.mxu0 %v12160_v2  ;;  %v24374_v8 = vpop.permute.xlu1 %16363  ;;  %v18562_v34 = vld [vmem:[%s24681_s5 + $0x290] sm:$0xff]   ;;  %v12032_v2 = vmul.f32 0.2, %v24217_v37 }
 0xafb   : > { %15907 = vmatprep.subr.bf16.mxu0 %v18525_v12  ;;  %v16366_v17 = vunpack.i.h.bf16 %v24374_v8  ;;  %v18565_v12 = vld [vmem:[%s24681_s5 + $0x2d8] sm:$0xff]  }
 0xafd   : > { %v12145_v42 = vsel %vm12104_vm8, %v12056_v19, %v16366_v17  ;;  %v18568_v17 = vld [vmem:[%s24681_s5 + $0x338] sm:$0xff]  }
 0xafe   : > { %15908 = vmatpush3.bf16.msra.mxu0 %v18526_v30  ;;  %v12161_v4 = vpack.c.bf16 %v12145_v42, %v12145_v42  ;;  %v12034_v30 = vmul.f32 0.2, %v24222_v11  ;;  %v18570_v42 = vld [vmem:[%s24681_s5 + $0x2a0] sm:$0xff]  }
 0xaff   : > { %15909 = vmatprep.subr.bf16.mxu0 %v18529_v58  ;;  %v18567_v58 = vld [vmem:[%s24681_s5 + $0x378] sm:$0xff]  }
 0xb00   : > { %v12066_v19 = vsel %vm12002_vm3, %v24222_v11, %v12034_v30  ;;  %v18572_v11 = vld [vmem:[%s24681_s5 + $0x2a8] sm:$0xff]   ;;  %v18599_v30 = vld [vmem:[%s24682_s6 + $0x14] ss:$8 sps:$4 sm:$0xff]  }
 0xb02   : > { %15910 = vmatpush3.bf16.msra.mxu0 %v18530_v6  ;;  %v16359_v53 = vpop.permute.xlu0 %16358 }
 0xb03   : > { %v16361_v21 = vunpack.i.h.bf16 %v16359_v53  ;;  %15911 = vmatprep.subr.bf16.mxu0 %v18533_v43  ;;  %v16360_v5 = vunpack.i.l.bf16 %v16359_v53  ;;  %v18566_v43 = vld [vmem:[%s24681_s5 + $0x298] sm:$0xff]   ;;  %v18569_v53 = vld [vmem:[%s24681_s5 + $0x2e0] sm:$0xff]  }
 0xb05   : > { %v12146_v62 = vsel %vm12104_vm8, %v12058_v52, %v16361_v21  ;;  %v12148_v0 = vsel %vm12104_vm8, %v12062_v31, %v16360_v5  ;;  %v18584_v5 = vld [vmem:[%s24681_s5 + $0x398] sm:$0xff]   ;;  %v18590_v31 = vld [vmem:[%s24681_s5 + $0x3b0] sm:$0xff]  }
 0xb06   : > { %15912 = vmatpush3.bf16.msra.mxu0 %v18534_v59  ;;  %v12162_v50 = vpack.c.bf16 %v12146_v62, %v12146_v62  ;;  %v12164_v22 = vpack.c.bf16 %v12148_v0, %v12148_v0  ;;  %v12064_v59 = vsel %vm12000_vm2, %v24217_v37, %v12032_v2  ;;  %v18571_v62 = vld [vmem:[%s24681_s5 + $0x2e8] sm:$0xff]   ;;  %v18591_v0 = vld [vmem:[%s24681_s5 + $0x3f8] sm:$0xff]  }
 0xb07   : > { %15913 = vmatprep.subr.bf16.mxu0 %v18537_v46  ;;  %v18596_v2 = vld [vmem:[%s24682_s6 + $0x4] ss:$8 sps:$4 sm:$0xff]  }
 0xb08   : > { %13394 = vmatprep.mubr.bf16.mxu1 %v12162_v50  ;;  %v18573_v50 = vld [vmem:[%s24681_s5 + $0x2f0] sm:$0xff]  }
 0xb09   : > { %13395 = vmatmul.mubr.bf16.vlgmr.msra.gmra.mrb[80].mxu1 %v12161_v4  ;;  %v18575_v4 = vld [vmem:[%s24681_s5 + $0x2f8] sm:$0xff]  }
 0xb0a   : > { %15914 = vmatpush3.bf16.msra.mxu0 %v18538_v57  ;;  %15972 = vmatpush3.bf16.msra.mxu1 %v18540_v18  ;;  %v18574_v57 = vld [vmem:[%s24681_s5 + $0x2b0] sm:$0xff]   ;;  %v12028_v18 = vmul.f32 0.2, %v24193_v39 }
 0xb0b   : > { %15915 = vmatprep.subr.bf16.mxu0 %v18541_v36  ;;  %15973 = vmatprep.subr.bf16.mxu1 %v18543_v63  ;;  %v12038_v36 = vmul.f32 0.2, %v24230_v26  ;;  %v16365_v63 = vunpack.i.l.bf16 %v24374_v8 }
 0xb0e   : > { %15916 = vmatpush3.bf16.msra.mxu0 %v18542_v28  ;;  %15974 = vmatpush3.bf16.msra.mxu1 %v18544_v3  ;;  %v18576_v28 = vld [vmem:[%s24681_s5 + $0x2b8] sm:$0xff]   ;;  %v12060_v3 = vsel %vm11996_vm5, %v24193_v39, %v12028_v18  ;;  %v18579_v39 = vld [vmem:[%s24681_s5 + $0x3c8] sm:$0xff]  }
 0xb0f   : > { %15917 = vmatprep.subr.bf16.mxu0 %v18545_v27  ;;  %15975 = vmatprep.subr.bf16.mxu1 %v18547_v7  ;;  %v18577_v27 = vld [vmem:[%s24681_s5 + $0x3c0] sm:$0xff]   ;;  %v12070_v7 = vsel %vm12006_vm6, %v24230_v26, %v12038_v36  ;;  %v18580_v26 = vld [vmem:[%s24681_s5 + $0x388] sm:$0xff]  }
 0xb12   : > { %15918 = vmatpush3.bf16.msra.mxu0 %v18546_v38  ;;  %15976 = vmatpush3.bf16.msra.mxu1 %v18548_v56  ;;  %v12147_v38 = vsel %vm12104_vm8, %v12060_v3, %v16365_v63  ;;  %v18578_v56 = vld [vmem:[%s24681_s5 + $0x380] sm:$0xff]  }
 0xb13   : > { %15919 = vmatprep.subr.bf16.mxu0 %v18549_v29  ;;  %15977 = vmatprep.subr.bf16.mxu1 %v18551_v60  ;;  %v12163_v49 = vpack.c.bf16 %v12147_v38, %v12147_v38  ;;  %v18581_v60 = vld [vmem:[%s24681_s5 + $0x3d0] sm:$0xff]  }
 0xb16   : > { %15920 = vmatpush3.bf16.msra.mxu0 %v18550_v16  ;;  %15978 = vmatpush3.bf16.msra.mxu1 %v18552_v35  ;;  %v18585_v16 = vld [vmem:[%s24681_s5 + $0x3e0] sm:$0xff]  }
 0xb17   : > { %15949 = vmatprep.subr.bf16.mxu0 %v18553_v33  ;;  %15979 = vmatprep.subr.bf16.mxu1 %v18555_v20  ;;  %v18586_v35 = vld [vmem:[%s24681_s5 + $0x3a0] sm:$0xff]   ;;  %v18588_v33 = vld [vmem:[%s24681_s5 + $0x3a8] sm:$0xff]   ;;  %v18589_v20 = vld [vmem:[%s24681_s5 + $0x3f0] sm:$0xff]  }
 0xb19   : > { %13355 = vmatmul.mubr.bf16.vlgmr.msra.gmra.mrb[160].mxu0 %v12159_v61  ;;  %v18592_v61 = vld [vmem:[%s24681_s5 + $0x3b8] sm:$0xff]  }
 0xb1a   : > { %15950 = vmatpush3.bf16.msra.mxu0 %v18554_v13  ;;  %13434 = vmatprep.mubr.bf16.mxu0 %v12164_v22  ;;  %v24478_v44 = vpop.permute.xlu1 %16373 }
 0xb1b   : > { %15980 = vmatpush3.bf16.msra.mxu1 %v18556_v51  ;;  %15951 = vmatprep.subr.bf16.mxu0 %v18557_v10  ;;  %v16376_v6 = vunpack.i.h.bf16 %v24478_v44  ;;  %v16375_v13 = vunpack.i.l.bf16 %v24478_v44  ;;  %v18593_v51 = vld [vmem:[%s24681_s5 + $0x400] ss:$0 sps:$4 sm:$0x11]   ;;  %v12068_v10 = vsel %vm12004_vm7, %v24226_v25, %v12036_v1 }
 0xb1c   : > { %15981 = vmatprep.subr.bf16.mxu1 %v18559_v48  ;;  %v13200_v48 = vand.u32 %v18593_v51, %v23440_v54 }
 0xb1d   : > { %v12149_v21 = vsel %vm12104_vm8, %v12064_v59, %v16376_v6  ;;  %v12151_v22 = vsel %vm12104_vm8, %v12068_v10, %v16375_v13  ;;  %v18597_v6 = vld [vmem:[%s24682_s6 + $0x10] ss:$8 sps:$4 sm:$0xff]   ;;  %v18602_v59 = vld [vmem:[%s24682_s6 + $0x24] ss:$8 sps:$4 sm:$0xff]  }
 0xb1e   : > { %15952 = vmatpush3.bf16.msra.mxu0 %v18558_v24  ;;  %v12165_v37 = vpack.c.bf16 %v12149_v21, %v12149_v21  ;;  %v12167_v24 = vpack.c.bf16 %v12151_v22, %v12151_v22  ;;  %v18605_v21 = vld [vmem:[%s24682_s6 + $0x34] ss:$8 sps:$4 sm:$0xff]  }
 0xb1f   : > { %15982 = vmatpush3.bf16.msra.mxu1 %v18560_v55  ;;  %15953 = vmatprep.subr.bf16.mxu0 %v18561_v45  ;;  %v18676_v55 = vmov 0.0   ;;  %v18678_v45 = vmov 1.0|1.0  }
 0xb20   : > { %15983 = vmatprep.subr.bf16.mxu1 %v18563_v9 }
 0xb22   : > { %15954 = vmatpush3.bf16.msra.mxu0 %v18562_v34  ;;  %v16369_v47 = vpop.permute.xlu0 %16368 }
 0xb23   : > { %v16371_v41 = vunpack.i.h.bf16 %v16369_v47  ;;  %15984 = vmatpush3.bf16.msra.mxu1 %v18564_v15  ;;  %15955 = vmatprep.subr.bf16.mxu0 %v18565_v12  ;;  %v18594_v12 = vld [vmem:[%s24682_s6] ss:$8 sps:$4 sm:$0xff]  }
 0xb24   : > { %15985 = vmatprep.subr.bf16.mxu1 %v18567_v58 }
 0xb25   : > { %v12150_v46 = vsel %vm12104_vm8, %v12066_v19, %v16371_v41 }
 0xb26   : > { %15956 = vmatpush3.bf16.msra.mxu0 %v18566_v43  ;;  %v12166_v52 = vpack.c.bf16 %v12150_v46, %v12150_v46  ;;  %v18603_v46 = vld [vmem:[%s24682_s6 + $0x30] ss:$8 sps:$4 sm:$0xff]  }
 0xb27   : > { %15986 = vmatpush3.bf16.msra.mxu1 %v18568_v17  ;;  %15957 = vmatprep.subr.bf16.mxu0 %v18569_v53  ;;  %v18600_v53 = vld [vmem:[%s24682_s6 + $0x20] ss:$8 sps:$4 sm:$0xff]  }
 0xb28   : > { %13474 = vmatprep.mubr.bf16.mxu1 %v12166_v52  ;;  %13631 = vmatprep.subr.bf16.mxu1 %v18596_v2  ;;  %v13575_v52 = vld [vmem:[%s24682_s6 + $0x40] sm:$0x11] }
 0xb2a   : > { %15958 = vmatpush3.bf16.msra.mxu0 %v18570_v42  ;;  %13475 = vmatmul.mubr.bf16.vlgmr.msra.gmra.mrb[84].mxu1 %v12165_v37  ;;  %v15318_v42 = vcombine.high %v13575_v52, %v13575_v52 }
 0xb2b   : > { %15959 = vmatprep.subr.bf16.mxu0 %v18571_v62  ;;  %13663 = vmatprep.mubr.bf16.mxu1 %v24755_v40  ;;  %v16370_v40 = vunpack.i.l.bf16 %v16369_v47  ;;  %v15317_v62 = vcombine.low %v13575_v52, %v13575_v52 }
 0xb2c   : > { %13632 = vmatpush1.bf16.msra.mxu1 %v18594_v12  ;;  %v13629_v37 = vand.u32 %v15318_v42, %v23440_v54 }
 0xb2d   : > { %v12152_v8 = vsel %vm12104_vm8, %v12070_v7, %v16370_v40  ;;  %13633 = vmatprep.subr.bf16.mxu1 %v18599_v30 }
 0xb2e   : > { %15960 = vmatpush3.bf16.msra.mxu0 %v18572_v11  ;;  %v12168_v29 = vpack.c.bf16 %v12152_v8, %v12152_v8  ;;  %v13626_v11 = vand.u32 %v15317_v62, %v23440_v54 }
 0xb2f   : > { %15961 = vmatprep.subr.bf16.mxu0 %v18573_v50 }
 0xb30   : > { %13634 = vmatpush1.bf16.msra.mxu1 %v18597_v6 }
 0xb31   : > { %13635 = vmatprep.subr.bf16.mxu1 %v18602_v59 }
 0xb32   : > { %15962 = vmatpush3.bf16.msra.mxu0 %v18574_v57 }
 0xb33   : > { %15963 = vmatprep.subr.bf16.mxu0 %v18575_v4 }
 0xb34   : > { %13636 = vmatpush1.bf16.msra.mxu1 %v18600_v53 }
 0xb35   : > { %13637 = vmatprep.subr.bf16.mxu1 %v18605_v21 }
 0xb36   : > { %15964 = vmatpush3.bf16.msra.mxu0 %v18576_v28 }
 0xb37   : > { %15993 = vmatprep.subr.bf16.mxu0 %v18577_v27 }
 0xb38   : > { %13638 = vmatpush1.bf16.msra.mxu1 %v18603_v46 }
 0xb39   : > { %13435 = vmatmul.mubr.bf16.vlgmr.msra.gmra.mrb[164].mxu0 %v12163_v49  ;;  %13639 = vmatprep.subr.bf16.mxu1 %v13629_v37 }
 0xb3a   : > { %15994 = vmatpush3.bf16.msra.mxu0 %v18578_v56  ;;  %13514 = vmatprep.mubr.bf16.mxu0 %v12168_v29 }
 0xb3b   : > { %15995 = vmatprep.subr.bf16.mxu0 %v18579_v39 }
 0xb3c   : > { %13640 = vmatpush1.bf16.msra.mxu1 %v13626_v11 }
 0xb3e   : > { %15996 = vmatpush3.bf16.msra.mxu0 %v18580_v26 }
 0xb3f   : > { %15997 = vmatprep.subr.bf16.mxu0 %v18581_v60 }
 0xb42   : > { %15998 = vmatpush3.bf16.msra.mxu0 %v18582_v23 }
 0xb43   : > { %15999 = vmatprep.subr.bf16.mxu0 %v18583_v32 }
 0xb46   : > { %16000 = vmatpush3.bf16.msra.mxu0 %v18584_v5 }
 0xb47   : > { %16001 = vmatprep.subr.bf16.mxu0 %v18585_v16 }
 0xb4a   : > { %16002 = vmatpush3.bf16.msra.mxu0 %v18586_v35 }
 0xb4b   : > { %16003 = vmatprep.subr.bf16.mxu0 %v18587_v14 }
 0xb4e   : > { %16004 = vmatpush3.bf16.msra.mxu0 %v18588_v33 }
 0xb4f   : > { %16005 = vmatprep.subr.bf16.mxu0 %v18589_v20 }
 0xb52   : > { %16006 = vmatpush3.bf16.msra.mxu0 %v18590_v31 }
 0xb53   : > { %16007 = vmatprep.subr.bf16.mxu0 %v18591_v0 }
 0xb56   : > { %16008 = vmatpush3.bf16.msra.mxu0 %v18592_v61 }
 0xb57   : > { %16017 = vmatprep.subr.bf16.mxu0 %v18676_v55 }
 0xb59   : > { %13515 = vmatmul.mubr.bf16.vlgmr.msra.gmra.mrb[168].mxu0 %v12167_v24 }
 0xb5a   : > { %16018 = vmatpush3.bf16.msra.mxu0 %v13200_v48  ;;  %16019 = vmatprep.mubr.msk.bf16.mxu0 %vm18677_vm9, %v18676_v55 }
 0xb61   : > { %16020 = vmatmul.mubr.msk.bf16.vlgmr.msra.gmra.mrb[172].mxu0 %vm11116_vm4, %v18678_v45 }
 0xb8c   : > { %v15855_v9 = vpop.f32.mrb[148].mxu0 }
 0xb8d   : > { %v15856_v44 = vpop.f32.mrb[149].mxu0 }
 0xb8e   : > { %v15857_v34 = vadd.f32 %v15856_v44, %v15855_v9  ;;  %v15858_v25 = vpop.f32.mrb[150].mxu0 }
 0xb8f   : > { %v15859_v15 = vpop.f32.mrb[151].mxu0 }
 0xbac   : > { %v15877_v58 = vpop.f32.mrb[152].mxu0 }
 0xbad   : > { %v15878_v47 = vpop.f32.mrb[153].mxu0 }
 0xbae   : > { %v15879_v43 = vadd.f32 %v15878_v47, %v15877_v58  ;;  %v15880_v41 = vpop.f32.mrb[154].mxu0 }
 0xbaf   : > { %v15881_v17 = vpop.f32.mrb[155].mxu0 }
 0xbb0   : > { %v13277_v19 = vadd.f32 %v15879_v43, %v15857_v34 }
 0xbcc   : > { %v15899_v50 = vpop.f32.mrb[156].mxu0 }
 0xbcd   : > { %v15900_v57 = vpop.f32.mrb[157].mxu0 }
 0xbce   : > { %v15901_v18 = vadd.f32 %v15900_v57, %v15899_v50  ;;  %v15902_v4 = vpop.f32.mrb[158].mxu0 }
 0xbcf   : > { %v15903_v36 = vpop.f32.mrb[159].mxu0 }
 0xbd0   : > { %v13317_v63 = vadd.f32 %v15901_v18, %v13277_v19 }
 0xbdc   : > { %v15943_v40 = vpop.f32.mrb[80].mxu1 }
 0xbdd   : > { %v15944_v28 = vpop.f32.mrb[81].mxu1 }
 0xbde   : > { %v15945_v3 = vadd.f32 %v15944_v28, %v15943_v40  ;;  %v15946_v27 = vpop.f32.mrb[82].mxu1 }
 0xbdf   : > { %v15947_v7 = vpop.f32.mrb[83].mxu1 }
 0xbec   : > { %v15921_v38 = vpop.f32.mrb[160].mxu0 }
 0xbed   : > { %v15922_v8 = vpop.f32.mrb[161].mxu0 }
 0xbee   : > { %v15923_v56 = vadd.f32 %v15922_v8, %v15921_v38  ;;  %v15924_v49 = vpop.f32.mrb[162].mxu0 }
 0xbef   : > { %v15925_v39 = vpop.f32.mrb[163].mxu0 }
 0xbf0   : > { %v13357_v29 = vadd.f32 %v15923_v56, %v13317_v63 }
 0xbf2   : > { %v13397_v54 = vadd.f32 %v15945_v3, %v13357_v29 }
 0xbfd   : > { %v15987_v26 = vpop.f32.mrb[84].mxu1 }
 0xbfe   : > { %v15988_v60 = vpop.f32.mrb[85].mxu1 }
 0xbff   : > { %v15989_v23 = vadd.f32 %v15988_v60, %v15987_v26  ;;  %v15990_v32 = vpop.f32.mrb[86].mxu1 }
 0xc00   : > { %v15991_v5 = vpop.f32.mrb[87].mxu1 }
 0xc0c   : > { %v15965_v16 = vpop.f32.mrb[164].mxu0 }
 0xc0d   : > { %v15966_v35 = vpop.f32.mrb[165].mxu0 }
 0xc0e   : > { %v15967_v14 = vadd.f32 %v15966_v35, %v15965_v16  ;;  %v15968_v33 = vpop.f32.mrb[166].mxu0 }
 0xc0f   : > { %v15969_v20 = vpop.f32.mrb[167].mxu0 }
 0xc10   : > { %v13437_v31 = vadd.f32 %v15967_v14, %v13397_v54 }
 0xc12   : > { %v13477_v1 = vadd.f32 %v15989_v23, %v13437_v31 }
 0xc2c   : > { %v16009_v0 = vpop.f32.mrb[168].mxu0 }
 0xc2d   : > { %v16010_v13 = vpop.f32.mrb[169].mxu0 }
 0xc2e   : > { %v16011_v61 = vadd.f32 %v16010_v13, %v16009_v0  ;;  %v16012_v51 = vpop.f32.mrb[170].mxu0 }
 0xc2f   : > { %v16013_v10 = vpop.f32.mrb[171].mxu0 }
 0xc30   : > { %v13517_v22 = vadd.f32 %v16011_v61, %v13477_v1 }
 0xc34   : > { %v13556_v48 = vpop.f32.mrb[172].mxu0 }
 0xc35   : > { %v13557_v24 = vadd.f32 %v13556_v48, %v13517_v22  ;;  %v16021_v55 = vpop.f32.mrb[173].mxu0 }
 0xc36   : > { %v13559_v45 = vpop.f32.mrb[174].mxu0 }
 0xc37   : > { %vm13562_vm4 = vcmp.ge.f32.partialorder %v13557_v24, 0.0  ;;  %v13563_v9 = vmul.f32 0.2, %v13557_v24  ;;  %v16022_v44 = vpop.f32.mrb[175].mxu0 }
 0xc39   : > { %v13564_v34 = vsel %vm13562_vm4, %v13557_v24, %v13563_v9 }
 0xc3a   : > { %v13565_v25 = vsel %vm12104_vm8, %v13564_v34, 1.0 }
 0xc3b   : > { %v13566_v15 = vpack.c.bf16 %v13565_v25, %v13565_v25 }
 0xc3d   : > { %15319 = vmatmul.mubr.msk.bf16.vlgmr.msra.gmra.mrb[88].mxu1 %vm13621_vm10, %v13566_v15 }
 0xd10   : > { %v13665_v12 = vpop.f32.mrb[88].mxu1 }
 0xd11   : > { %13672 = vst [vmem:[%s271_s23] sm:$0xff] %v13665_v12  ;;  %v13667_v2 = vpop.f32.mrb[89].mxu1 }
 0xd12   : > { %13673 = vst [vmem:[%s271_s23 + $0x8] sm:$0xff] %v13667_v2  ;;  %v13669_v30 = vpop.f32.mrb[90].mxu1 }
 0xd13   : > { %v13670_v58 = vpop.f32.mrb[91].mxu1 }
 0xd14   : > { %18621 = shalt.err (!%p18618_p3)
}
 0xd15   : > { %s18622_s19 = scalar_lea.hbm %s24636_s14, 256  ;;  %s18626_s17 = scalar_lea.hbm %s24683_s7, 4096 }
 0xd16   : > { %p18623_p4 = scmp.ne.s32.totalorder %s24636_s14, %s18622_s19  ;;  %p18627_p9 = scmp.lt.u32.totalorder %s24636_s14, %s24683_s7 }
 0xd17   : > { %p18628_p10 = scmp.lt.u32.totalorder %s18626_s17, %s18622_s19  ;;  %p18630_p12 = scmp.lt.u32.totalorder %s18622_s19, %s24636_s14 }
 0xd18   : > { %p18624_p7 = pnand %p18623_p4, %p18758_p5 }
 0xd19   : > { %p18629_p11 = por %p18628_p10, %p18627_p9 }
 0xd1a   : > { %p18625_p8 = pneg %p18624_p7 }
 0xd1b   : > { %p18631_p13 = por %p18630_p12, %p18629_p11 }
 0xd1d   : > { %p18632_p0 = pnand %p18631_p13, %p18625_p8 }
 0xd1f   : > { %18635 = shalt.err (!%p18632_p0)
}
 0xd20   : > { %16131 = dma.vmem_to_hbm [thread:$0]  (%p18758_p5), %s24631_s29, 256, %s24636_s14, %s13675_s9  }
 0xd21 PF: > { %p16137_p1 = scmp.ge.s32.totalorder %s18670_s27, 2  ;;  %s13701_s8 = sand.u32 1, %s18658_s24  }
 0xd22   : > { %s13702_s13 = scalar_lea.sflag [#allocation3], %s13701_s8 }
 0xd23   : > { %p16134_p2 = pnand %p16137_p1, %p18762_p6 }
 0xd25   : > { %18653 = dma.done.wait (!%p16134_p2), %s13702_s13, 256  }
 0xd26   : > { %18655 = vsyncadd (!%p16134_p2), %s13702_s13, 4294967040  ;;  %p17_p3 = scmp.ge.s32.totalorder %s18745_s30, 18   ;;  %s24779_s24 = smov %s18662_s25 }
 0xd27   : > { %s24780_s25 = smov %s18666_s26  ;;  %s24781_s26 = smov %s18756_s10 }
 0xd28   : > { %s24782_s27 = smov %s18745_s30  ;;  %19 = sbr.rel (!%p17_p3) target bundleno = 3 (0x3), region = 83 }
 0xd2f   :  { %13707 = vsyncpa [#allocation3], 1 }
 0xd30   :  { %13709 = vsyncpa [#allocation3 + $0x1], 1 }

</bundles_post_ra>
